<compile_context>
chip_gen: v7x
topology: tpu7x:2x2x1
jax: 0.10.0
libtpu: 0.0.40
codegen_flags: <defaults>
</compile_context>

<pallas_src>
import numpy as np
import jax
import jax.numpy as jnp
from jax import lax
from jax.experimental import pallas as pl
from jax.experimental.pallas import tpu as pltpu

BN_EPS = 1e-3
ACT_DTYPE = jnp.bfloat16          # inter-layer / inter-block activation dtype


# ------------------------------ small helpers ------------------------------ #

def _nbytes(a):
    return int(np.prod(a.shape)) * jnp.dtype(a.dtype).itemsize


def _vmem_limit_bytes(need_bytes):
    """Generation-aware scoped-VMEM limit (v5e/v6e: 128 MiB phys, v7x: 64 MiB)."""
    try:
        cap = int(pltpu.get_tpu_info().vmem_capacity_bytes)
    except Exception:
        cap = 64 * 2**20
    return int(min(max(4 * need_bytes, 16 * 2**20), cap // 2))


def _const_spec(arr):
    nd = arr.ndim
    return pl.BlockSpec(tuple(arr.shape), lambda *_, _nd=nd: (0,) * _nd)


def _batch_spec(shape):
    nd = len(shape)
    return pl.BlockSpec((1,) + tuple(shape[1:]),
                        lambda n, _z=(0,) * (nd - 1): (n,) + _z)


def _phase_decompose(x, k, s, pad):
    """Pad + split an NHWC activation into s*s stride phases so a stride-s kxk
    conv only needs unit-stride tap slices in-kernel.
    Returns (N, s*s, Hq, Wq, C), Ho, Wo."""
    N, H, W, C = x.shape
    Ho = (H + 2 * pad - k) // s + 1
    Wo = (W + 2 * pad - k) // s + 1
    Hq = (k - 1) // s + Ho
    Wq = (k - 1) // s + Wo
    pb = s * Hq - H - pad
    pr = s * Wq - W - pad
    assert pb >= 0 and pr >= 0
    xp = jnp.pad(x, ((0, 0), (pad, pb), (pad, pr), (0, 0)))
    xph = xp.reshape(N, Hq, s, Wq, s, C).transpose(0, 2, 4, 1, 3, 5)
    return xph.reshape(N, s * s, Hq, Wq, C), Ho, Wo


# --------------------------- weight preprocessing --------------------------- #
# BN (eval mode) is folded: scale into the weights (f32 multiply, then bf16
# cast), bias kept separate in f32.

def _prep_conv(w_hwio, scale, bias):
    kh, kw, cin, cout = w_hwio.shape
    w = w_hwio.astype(jnp.float32) * scale.reshape(1, 1, 1, cout).astype(jnp.float32)
    w = w.reshape(kh * kw, cin, cout).astype(jnp.bfloat16)        # (T, Cin, Cout)
    return w, bias.reshape(1, cout).astype(jnp.float32)


def _prep_1x1(w_hwio, scale, bias):
    cin, cout = int(w_hwio.shape[2]), int(w_hwio.shape[3])
    w = w_hwio.astype(jnp.float32).reshape(cin, cout) * scale.reshape(1, cout).astype(jnp.float32)
    return w.astype(jnp.bfloat16), bias.reshape(1, cout).astype(jnp.float32)


def _prep_deconv(w_iokk, scale, bias):
    # torch ConvTranspose2d weight layout (Cin, Cout, K, K); column order (kx, co).
    cin, cout, K, _ = w_iokk.shape
    w = w_iokk.astype(jnp.float32) * scale.reshape(1, cout, 1, 1).astype(jnp.float32)
    w = jnp.transpose(w, (2, 0, 3, 1)).reshape(K, cin, K * cout).astype(jnp.bfloat16)
    b = jnp.tile(bias.astype(jnp.float32), K).reshape(1, K * cout)
    return w, b


# ------------------------------ fused block kernel -------------------------- #

def _make_block_kernel(conv_cfgs, first_stride, deblock_cfg, has_next):
    n_convs = len(conv_cfgs)
    s = int(first_stride)

    def kernel(*refs):
        pos = 0
        x_ref = refs[pos]; pos += 1
        cw, cb = [], []
        for _ in range(n_convs):
            cw.append(refs[pos]); cb.append(refs[pos + 1]); pos += 2
        de_w = de_b = None
        if deblock_cfg is not None:
            de_w, de_b = refs[pos], refs[pos + 1]; pos += 2
        n_outs = (1 if deblock_cfg is not None else 0) + (1 if has_next else 0)
        out_refs = list(refs[pos:pos + n_outs]); pos += n_outs
        pad_refs = list(refs[pos:])                   # n_convs - 1 VMEM scratch

        def conv(read_tap, cfg, w_ref, b_ref):
            kh, kw, ho, wo = cfg["kh"], cfg["kw"], cfg["Ho"], cfg["Wo"]
            m = ho * wo
            acc = None
            for ky in range(kh):
                for kx in range(kw):
                    t = ky * kw + kx
                    slab = read_tap(ky, kx, ho, wo)          # (ho, wo, cin) bf16
                    part = jnp.dot(slab.reshape(m, slab.shape[-1]), w_ref[t],
                                   preferred_element_type=jnp.float32)
                    acc = part if acc is None else acc + part
            return jnp.maximum(acc + b_ref[...], 0.0), ho, wo   # f32 (m, cout)

        # -- first (possibly strided) conv: taps from the phase-split input ---
        def read_first(ky, kx, ho, wo):
            ph = (ky % s) * s + (kx % s)
            return x_ref[0, ph, pl.ds(ky // s, ho), pl.ds(kx // s, wo), :]

        y, ho, wo = conv(read_first, conv_cfgs[0], cw[0], cb[0])

        # -- remaining stride-1 convs: write into padded VMEM scratch, re-tap --
        for li in range(1, n_convs):
            pad_ref = pad_refs[li - 1]
            cin = pad_ref.shape[-1]
            pad_ref[...] = jnp.zeros(pad_ref.shape, pad_ref.dtype)
            pad_ref[pl.ds(1, ho), pl.ds(1, wo), :] = (
                y.reshape(ho, wo, cin).astype(pad_ref.dtype))

            def read_mid(ky, kx, h2, w2, _r=pad_ref):
                return _r[pl.ds(ky, h2), pl.ds(kx, w2), :]

            y, ho, wo = conv(read_mid, conv_cfgs[li], cw[li], cb[li])

        oi = 0
        cur = y.astype(ACT_DTYPE)                  # deblock matmul lhs (m, cout)

        # -- deblock -----------------------------------------------------------
        if deblock_cfg is not None:
            up_ref = out_refs[oi]; oi += 1
            if deblock_cfg["type"] == "deconv":
                K, KC = deblock_cfg["K"], deblock_cfg["KC"]
                for ky in range(K):
                    r = jnp.dot(cur, de_w[ky], preferred_element_type=jnp.float32)
                    r = jnp.maximum(r + de_b[...], 0.0)
                    # (N, ho, K, wo, K*Cout) is bytes-identical to the NHWC
                    # (N, ho*K, wo*K, Cout) upsampled map -> no post-transpose.
                    up_ref[0, :, ky, :, :] = r.reshape(ho, wo, KC).astype(up_ref.dtype)
            else:                                   # 1x1 conv deblock
                r = jnp.dot(cur, de_w[...], preferred_element_type=jnp.float32)
                r = jnp.maximum(r + de_b[...], 0.0)
                up_ref[0] = r.reshape(ho, wo, r.shape[-1]).astype(up_ref.dtype)

        # -- activation handed to the next block (bf16) ------------------------
        if has_next:
            nxt_ref = out_refs[oi]
            nxt_ref[0] = y.reshape(ho, wo, nxt_ref.shape[-1]).astype(nxt_ref.dtype)

    return kernel


# ------------------------------ block wrapper ------------------------------ #

def _run_block(x, conv_layers, deblock, has_next):
    """Run one fused RPN block (conv stack + optional deblock) as one pallas_call.

    x: (N, H, W, Cin).  Returns (up, next_act): deblock output (f32 NHWC) or
    None, and the conv-stack output (bf16 NHWC) or None."""
    N = x.shape[0]
    x = x.astype(ACT_DTYPE)

    # Pad the input channel (contraction) dim to a multiple of 8.
    cin0 = conv_layers[0]["w"].shape[2]
    cpad = (-cin0) % 8
    if cpad:
        x = jnp.pad(x, ((0, 0), (0, 0), (0, 0), (0, cpad)))

    kh0 = int(conv_layers[0]["w"].shape[0])
    s0 = int(conv_layers[0]["stride"])
    xph, Ho, Wo = _phase_decompose(x, kh0, s0, (kh0 - 1) // 2)

    inputs = [xph]
    in_specs = [_batch_spec(xph.shape)]
    conv_cfgs, scratch_shapes = [], []
    scratch_bytes = 0
    flops = 0

    cur_h, cur_w = Ho, Wo
    for li, layer in enumerate(conv_layers):
        kh, kw, cin, cout = layer["w"].shape
        wq, bq = _prep_conv(layer["w"], layer["scale"], layer["bias"])
        if li == 0 and cpad:
            wq = jnp.pad(wq, ((0, 0), (0, cpad), (0, 0)))
        if li > 0:
            # padded VMEM buffer for this layer's input (previous layer output)
            scratch_shapes.append(pltpu.VMEM((cur_h + 2, cur_w + 2, int(cin)), ACT_DTYPE))
            scratch_bytes += (cur_h + 2) * (cur_w + 2) * int(cin) * 2
        conv_cfgs.append(dict(kh=int(kh), kw=int(kw), Ho=cur_h, Wo=cur_w))
        inputs += [wq, bq]
        in_specs += [_const_spec(wq), _const_spec(bq)]
        flops += 2 * N * cur_h * cur_w * int(kh) * int(kw) * int(wq.shape[1]) * int(cout)

    last_cout = int(conv_layers[-1]["w"].shape[3])

    deblock_cfg, cout_up = None, None
    out_shapes, out_specs = [], []
    if deblock is not None:
        if deblock["type"] == "deconv":
            cin_d, cout_up, K, _ = (int(d) for d in deblock["w"].shape)
            dw, dbias = _prep_deconv(deblock["w"], deblock["scale"], deblock["bias"])
            deblock_cfg = dict(type="deconv", K=K, KC=K * cout_up)
            up_shape = (N, cur_h, K, cur_w, K * cout_up)
            flops += 2 * N * cur_h * cur_w * cin_d * K * K * cout_up
        else:
            # TODO(synk): stride>1 (kernel==stride) conv deblock not implemented;
            # only the stride-1 (1x1 conv) case occurs in this configuration.
            if int(deblock["stride"]) != 1:
                raise NotImplementedError("conv deblock with stride > 1")
            dw, dbias = _prep_1x1(deblock["w"], deblock["scale"], deblock["bias"])
            cout_up = int(deblock["w"].shape[3])
            deblock_cfg = dict(type="conv1x1")
            up_shape = (N, cur_h, cur_w, cout_up)
            flops += 2 * N * cur_h * cur_w * int(dw.shape[0]) * cout_up
        inputs += [dw, dbias]
        in_specs += [_const_spec(dw), _const_spec(dbias)]
        out_shapes.append(jax.ShapeDtypeStruct(up_shape, jnp.float32))
        out_specs.append(_batch_spec(up_shape))

    if has_next:
        nxt_shape = (N, cur_h, cur_w, last_cout)
        out_shapes.append(jax.ShapeDtypeStruct(nxt_shape, ACT_DTYPE))
        out_specs.append(_batch_spec(nxt_shape))

    # VMEM working set: double-buffered per-batch in/out blocks + resident
    # weights + intermediate scratch.
    xph_blk = _nbytes(jax.ShapeDtypeStruct(xph.shape[1:], xph.dtype))
    w_bytes = sum(_nbytes(a) for a in inputs[1:])
    out_blk = sum(_nbytes(jax.ShapeDtypeStruct(s.shape[1:], s.dtype)) for s in out_shapes)
    need = 2 * (xph_blk + out_blk) + w_bytes + scratch_bytes
    bytes_accessed = sum(_nbytes(a) for a in inputs) + sum(_nbytes(s) for s in out_shapes)

    kernel = _make_block_kernel(conv_cfgs, s0, deblock_cfg, has_next)
    outs = pl.pallas_call(
        kernel,
        out_shape=tuple(out_shapes),
        grid=(N,),
        in_specs=in_specs,
        out_specs=tuple(out_specs),
        scratch_shapes=scratch_shapes,
        compiler_params=pltpu.CompilerParams(
            dimension_semantics=("parallel",),
            vmem_limit_bytes=_vmem_limit_bytes(need)),
        cost_estimate=pl.CostEstimate(flops=int(flops), transcendentals=0,
                                      bytes_accessed=int(bytes_accessed)),
    )(*inputs)

    idx = 0
    up = nxt = None
    if deblock is not None:
        up = outs[idx]; idx += 1
        if deblock_cfg["type"] == "deconv":
            K = deblock_cfg["K"]
            up = up.reshape(N, cur_h * K, cur_w * K, cout_up)  # bytes-identical
    if has_next:
        nxt = outs[idx]
    return up, nxt


# --------------------------------- forward ---------------------------------- #

def rpn_forward(x_nchw, params):
    x = jnp.transpose(x_nchw, (0, 2, 3, 1))              # NCHW -> NHWC
    nblocks = len(params["blocks"])
    ups = []
    for i, block in enumerate(params["blocks"]):
        di = i - params["up_start"]
        deblock = params["deblocks"][di] if di >= 0 else None
        has_next = (i + 1 < nblocks) or (deblock is None)
        up, nxt = _run_block(x, block, deblock, has_next)
        if up is not None:
            ups.append(up)
        if nxt is not None:
            x = nxt
    y = jnp.concatenate(ups, axis=-1) if ups else x.astype(jnp.float32)
    y = jnp.transpose(y, (0, 3, 1, 2))                   # NHWC -> NCHW
    return tuple(y[b] for b in range(y.shape[0]))        # torch `tuple(x)`


# ------------------------- parameter initialization ------------------------ #

def _xavier_uniform(key, shape, fan_in, fan_out):
    limit = float(np.sqrt(6.0 / (fan_in + fan_out)))
    return jax.random.uniform(key, shape, jnp.float32, -limit, limit)


def _make_bn(key, c):
    k1, k2, k3, k4 = jax.random.split(key, 4)
    gamma = 1.0 + 0.1 * jax.random.normal(k1, (c,), jnp.float32)
    beta = 0.1 * jax.random.normal(k2, (c,), jnp.float32)
    mean = 0.1 * jax.random.normal(k3, (c,), jnp.float32)
    var = 1.0 + 0.1 * jax.random.uniform(k4, (c,), jnp.float32)
    scale = gamma / jnp.sqrt(var + BN_EPS)
    bias = beta - mean * scale
    return scale, bias


def _make_conv(key, kh, kw, cin, cout):
    kw_, kbn = jax.random.split(key)
    w = _xavier_uniform(kw_, (kh, kw, cin, cout), cin * kh * kw, cout * kh * kw)
    scale, bias = _make_bn(kbn, cout)
    return {"w": w, "scale": scale, "bias": bias}


def _make_deconv(key, K, cin, cout):
    kw_, kbn = jax.random.split(key)
    w = _xavier_uniform(kw_, (cin, cout, K, K), cin * K * K, cout * K * K)
    scale, bias = _make_bn(kbn, cout)
    return {"w": w, "scale": scale, "bias": bias}


def build_rpn_params(key, layer_nums, ds_strides, ds_filters,
                     us_strides, us_filters, in_channels):
    assert len(ds_strides) == len(layer_nums) == len(ds_filters)
    assert len(us_filters) == len(us_strides)
    up_start = len(layer_nums) - len(us_strides)
    in_filters = [in_channels, *ds_filters[:-1]]

    blocks, deblocks = [], []
    for i, num in enumerate(layer_nums):
        key, kb = jax.random.split(key)
        layers = []
        kb, k0 = jax.random.split(kb)
        layers.append(dict(_make_conv(k0, 3, 3, in_filters[i], ds_filters[i]),
                           stride=ds_strides[i]))
        for _ in range(num):
            kb, kj = jax.random.split(kb)
            layers.append(dict(_make_conv(kj, 3, 3, ds_filters[i], ds_filters[i]),
                               stride=1))
        blocks.append(layers)

        if i - up_start >= 0:
            key, kd = jax.random.split(key)
            stride = us_strides[i - up_start]
            cout = us_filters[i - up_start]
            if stride > 1:
                deblocks.append(dict(_make_deconv(kd, int(stride), ds_filters[i], cout),
                                     type="deconv"))
            else:
                s = int(np.round(1.0 / stride))
                deblocks.append(dict(_make_conv(kd, s, s, ds_filters[i], cout),
                                     type="conv", stride=s))
    return {"blocks": blocks, "deblocks": deblocks, "up_start": up_start}


# ------------------------- pure-JAX reference (check) ----------------------- #

def _conv_ref(x, w_hwio, scale, bias, stride):
    kh = w_hwio.shape[0]
    pad = (kh - 1) // 2
    y = lax.conv_general_dilated(x, w_hwio, (stride, stride),
                                 [(pad, pad), (pad, pad)],
                                 dimension_numbers=("NHWC", "HWIO", "NHWC"))
    return jnp.maximum(y * scale + bias, 0.0)


def _deconv_ref(x, w_iokk, scale, bias):
    N, H, W, Cin = x.shape
    _, Cout, K, _ = w_iokk.shape
    y = jnp.einsum("nhwc,coyx->nhywxo", x, w_iokk).reshape(N, H * K, W * K, Cout)
    return jnp.maximum(y * scale + bias, 0.0)


def rpn_forward_ref(x_nchw, params):
    x = jnp.transpose(x_nchw, (0, 2, 3, 1))
    ups = []
    for i, block in enumerate(params["blocks"]):
        for layer in block:
            x = _conv_ref(x, layer["w"], layer["scale"], layer["bias"], layer["stride"])
        di = i - params["up_start"]
        if di >= 0:
            db = params["deblocks"][di]
            if db["type"] == "deconv":
                ups.append(_deconv_ref(x, db["w"], db["scale"], db["bias"]))
            else:
                ups.append(_conv_ref(x, db["w"], db["scale"], db["bias"], db["stride"]))
    y = jnp.transpose(jnp.concatenate(ups, axis=-1), (0, 3, 1, 2))
    return tuple(y[b] for b in range(y.shape[0]))


# ----------------------------------- main ----------------------------------- #

if __name__ == "__main__":
    layer_nums = [1, 1]
    ds_layer_strides = [1, 2]
    ds_num_filters = [8, 16]
    us_layer_strides = [1, 2]
    us_num_filters = [8, 8]
    in_channels = 4

    key = jax.random.PRNGKey(0)
    kx, kp = jax.random.split(key)
    x = jax.random.normal(kx, (2, in_channels, 16, 16), jnp.float32)   # NCHW

    params = build_rpn_params(kp, layer_nums, ds_layer_strides, ds_num_filters,
                              us_layer_strides, us_num_filters, in_channels)

    out = jax.block_until_ready(rpn_forward(x, params))
    ref = jax.block_until_ready(rpn_forward_ref(x, params))

    # bf16 matmul operands + bf16 intermediate activations (f32 accumulation)
    # across ~5 stacked layers -> loosened tolerance vs. the f32 reference.
    assert len(out) == x.shape[0]
    for o, r in zip(out, ref):
        assert o.shape == (sum(us_num_filters), 16, 16)
        np.testing.assert_allclose(np.asarray(o), np.asarray(r),
                                   rtol=5e-2, atol=5e-2)

    print("KERNEL_OK")
</pallas_src>

<mosaic_0001>
module attributes {stable_mosaic.version = 11 : i64} {
  func.func @kernel(%arg0: i32, %arg1: memref<1x1x18x18x8xbf16, #tpu.memory_space<vmem>>, %arg2: memref<9x8x8xbf16, #tpu.memory_space<vmem>>, %arg3: memref<1x8xf32, #tpu.memory_space<vmem>>, %arg4: memref<9x8x8xbf16, #tpu.memory_space<vmem>>, %arg5: memref<1x8xf32, #tpu.memory_space<vmem>>, %arg6: memref<8x8xbf16, #tpu.memory_space<vmem>>, %arg7: memref<1x8xf32, #tpu.memory_space<vmem>>, %arg8: memref<1x16x16x8xf32, #tpu.memory_space<vmem>>, %arg9: memref<1x16x16x8xbf16, #tpu.memory_space<vmem>>, %arg10: memref<18x18x8xbf16, #tpu.memory_space<vmem>>) attributes {dimension_semantics = [#tpu.dimension_semantics<parallel>], iteration_bounds = array<i64: 2>, scalar_prefetch = 0 : i64, scratch_operands = 1 : i64, tpu.core_type = #tpu.core_type<tc>, window_params = [{transform_indices = @transform_0, window_bounds = array<i64: 1, 1, 18, 18, 8>}, {pipeline_mode = #tpu.pipeline_mode<synchronous>, transform_indices = @transform_1, window_bounds = array<i64: 9, 8, 8>}, {pipeline_mode = #tpu.pipeline_mode<synchronous>, transform_indices = @transform_2, window_bounds = array<i64: 1, 8>}, {pipeline_mode = #tpu.pipeline_mode<synchronous>, transform_indices = @transform_3, window_bounds = array<i64: 9, 8, 8>}, {pipeline_mode = #tpu.pipeline_mode<synchronous>, transform_indices = @transform_4, window_bounds = array<i64: 1, 8>}, {pipeline_mode = #tpu.pipeline_mode<synchronous>, transform_indices = @transform_5, window_bounds = array<i64: 8, 8>}, {pipeline_mode = #tpu.pipeline_mode<synchronous>, transform_indices = @transform_6, window_bounds = array<i64: 1, 8>}, {transform_indices = @transform_7, window_bounds = array<i64: 1, 16, 16, 8>}, {transform_indices = @transform_8, window_bounds = array<i64: 1, 16, 16, 8>}]} {
    %c0 = arith.constant 0 : index
    %c0_0 = arith.constant 0 : index
    %c0_1 = arith.constant 0 : index
    %c0_2 = arith.constant 0 : index
    %c0_3 = arith.constant 0 : index
    %0 = vector.load %arg1[%c0, %c0_0, %c0_1, %c0_2, %c0_3] : memref<1x1x18x18x8xbf16, #tpu.memory_space<vmem>>, vector<1x1x16x16x8xbf16>
    %1 = vector.shape_cast %0 : vector<1x1x16x16x8xbf16> to vector<16x16x8xbf16>
    %2 = vector.shape_cast %1 : vector<16x16x8xbf16> to vector<256x8xbf16>
    %c0_4 = arith.constant 0 : index
    %c0_5 = arith.constant 0 : index
    %c0_6 = arith.constant 0 : index
    %3 = vector.load %arg2[%c0_4, %c0_5, %c0_6] : memref<9x8x8xbf16, #tpu.memory_space<vmem>>, vector<1x8x8xbf16>
    %4 = vector.shape_cast %3 : vector<1x8x8xbf16> to vector<8x8xbf16>
    %cst = arith.constant dense<0.000000e+00> : vector<256x8xf32>
    %5 = tpu.matmul %2, %4, %cst {dimension_numbers = #tpu.dot_dimension_numbers<[1], [0], [0], [1], [0, 0, 1, 1], [], []>} : vector<256x8xbf16>, vector<8x8xbf16>, vector<256x8xf32> -> vector<256x8xf32>
    %c0_7 = arith.constant 0 : index
    %c0_8 = arith.constant 0 : index
    %c0_9 = arith.constant 0 : index
    %c1 = arith.constant 1 : index
    %c0_10 = arith.constant 0 : index
    %6 = vector.load %arg1[%c0_7, %c0_8, %c0_9, %c1, %c0_10] : memref<1x1x18x18x8xbf16, #tpu.memory_space<vmem>>, vector<1x1x16x16x8xbf16>
    %7 = vector.shape_cast %6 : vector<1x1x16x16x8xbf16> to vector<16x16x8xbf16>
    %8 = vector.shape_cast %7 : vector<16x16x8xbf16> to vector<256x8xbf16>
    %c1_11 = arith.constant 1 : index
    %c0_12 = arith.constant 0 : index
    %c0_13 = arith.constant 0 : index
    %9 = vector.load %arg2[%c1_11, %c0_12, %c0_13] : memref<9x8x8xbf16, #tpu.memory_space<vmem>>, vector<1x8x8xbf16>
    %10 = vector.shape_cast %9 : vector<1x8x8xbf16> to vector<8x8xbf16>
    %cst_14 = arith.constant dense<0.000000e+00> : vector<256x8xf32>
    %11 = tpu.matmul %8, %10, %cst_14 {dimension_numbers = #tpu.dot_dimension_numbers<[1], [0], [0], [1], [0, 0, 1, 1], [], []>} : vector<256x8xbf16>, vector<8x8xbf16>, vector<256x8xf32> -> vector<256x8xf32>
    %12 = arith.addf %5, %11 : vector<256x8xf32>
    %c0_15 = arith.constant 0 : index
    %c0_16 = arith.constant 0 : index
    %c0_17 = arith.constant 0 : index
    %c2 = arith.constant 2 : index
    %c0_18 = arith.constant 0 : index
    %13 = vector.load %arg1[%c0_15, %c0_16, %c0_17, %c2, %c0_18] : memref<1x1x18x18x8xbf16, #tpu.memory_space<vmem>>, vector<1x1x16x16x8xbf16>
    %14 = vector.shape_cast %13 : vector<1x1x16x16x8xbf16> to vector<16x16x8xbf16>
    %15 = vector.shape_cast %14 : vector<16x16x8xbf16> to vector<256x8xbf16>
    %c2_19 = arith.constant 2 : index
    %c0_20 = arith.constant 0 : index
    %c0_21 = arith.constant 0 : index
    %16 = vector.load %arg2[%c2_19, %c0_20, %c0_21] : memref<9x8x8xbf16, #tpu.memory_space<vmem>>, vector<1x8x8xbf16>
    %17 = vector.shape_cast %16 : vector<1x8x8xbf16> to vector<8x8xbf16>
    %cst_22 = arith.constant dense<0.000000e+00> : vector<256x8xf32>
    %18 = tpu.matmul %15, %17, %cst_22 {dimension_numbers = #tpu.dot_dimension_numbers<[1], [0], [0], [1], [0, 0, 1, 1], [], []>} : vector<256x8xbf16>, vector<8x8xbf16>, vector<256x8xf32> -> vector<256x8xf32>
    %19 = arith.addf %12, %18 : vector<256x8xf32>
    %c0_23 = arith.constant 0 : index
    %c0_24 = arith.constant 0 : index
    %c1_25 = arith.constant 1 : index
    %c0_26 = arith.constant 0 : index
    %c0_27 = arith.constant 0 : index
    %20 = vector.load %arg1[%c0_23, %c0_24, %c1_25, %c0_26, %c0_27] : memref<1x1x18x18x8xbf16, #tpu.memory_space<vmem>>, vector<1x1x16x16x8xbf16>
    %21 = vector.shape_cast %20 : vector<1x1x16x16x8xbf16> to vector<16x16x8xbf16>
    %22 = vector.shape_cast %21 : vector<16x16x8xbf16> to vector<256x8xbf16>
    %c3 = arith.constant 3 : index
    %c0_28 = arith.constant 0 : index
    %c0_29 = arith.constant 0 : index
    %23 = vector.load %arg2[%c3, %c0_28, %c0_29] : memref<9x8x8xbf16, #tpu.memory_space<vmem>>, vector<1x8x8xbf16>
    %24 = vector.shape_cast %23 : vector<1x8x8xbf16> to vector<8x8xbf16>
    %cst_30 = arith.constant dense<0.000000e+00> : vector<256x8xf32>
    %25 = tpu.matmul %22, %24, %cst_30 {dimension_numbers = #tpu.dot_dimension_numbers<[1], [0], [0], [1], [0, 0, 1, 1], [], []>} : vector<256x8xbf16>, vector<8x8xbf16>, vector<256x8xf32> -> vector<256x8xf32>
    %26 = arith.addf %19, %25 : vector<256x8xf32>
    %c0_31 = arith.constant 0 : index
    %c0_32 = arith.constant 0 : index
    %c1_33 = arith.constant 1 : index
    %c1_34 = arith.constant 1 : index
    %c0_35 = arith.constant 0 : index
    %27 = vector.load %arg1[%c0_31, %c0_32, %c1_33, %c1_34, %c0_35] : memref<1x1x18x18x8xbf16, #tpu.memory_space<vmem>>, vector<1x1x16x16x8xbf16>
    %28 = vector.shape_cast %27 : vector<1x1x16x16x8xbf16> to vector<16x16x8xbf16>
    %29 = vector.shape_cast %28 : vector<16x16x8xbf16> to vector<256x8xbf16>
    %c4 = arith.constant 4 : index
    %c0_36 = arith.constant 0 : index
    %c0_37 = arith.constant 0 : index
    %30 = vector.load %arg2[%c4, %c0_36, %c0_37] : memref<9x8x8xbf16, #tpu.memory_space<vmem>>, vector<1x8x8xbf16>
    %31 = vector.shape_cast %30 : vector<1x8x8xbf16> to vector<8x8xbf16>
    %cst_38 = arith.constant dense<0.000000e+00> : vector<256x8xf32>
    %32 = tpu.matmul %29, %31, %cst_38 {dimension_numbers = #tpu.dot_dimension_numbers<[1], [0], [0], [1], [0, 0, 1, 1], [], []>} : vector<256x8xbf16>, vector<8x8xbf16>, vector<256x8xf32> -> vector<256x8xf32>
    %33 = arith.addf %26, %32 : vector<256x8xf32>
    %c0_39 = arith.constant 0 : index
    %c0_40 = arith.constant 0 : index
    %c1_41 = arith.constant 1 : index
    %c2_42 = arith.constant 2 : index
    %c0_43 = arith.constant 0 : index
    %34 = vector.load %arg1[%c0_39, %c0_40, %c1_41, %c2_42, %c0_43] : memref<1x1x18x18x8xbf16, #tpu.memory_space<vmem>>, vector<1x1x16x16x8xbf16>
    %35 = vector.shape_cast %34 : vector<1x1x16x16x8xbf16> to vector<16x16x8xbf16>
    %36 = vector.shape_cast %35 : vector<16x16x8xbf16> to vector<256x8xbf16>
    %c5 = arith.constant 5 : index
    %c0_44 = arith.constant 0 : index
    %c0_45 = arith.constant 0 : index
    %37 = vector.load %arg2[%c5, %c0_44, %c0_45] : memref<9x8x8xbf16, #tpu.memory_space<vmem>>, vector<1x8x8xbf16>
    %38 = vector.shape_cast %37 : vector<1x8x8xbf16> to vector<8x8xbf16>
    %cst_46 = arith.constant dense<0.000000e+00> : vector<256x8xf32>
    %39 = tpu.matmul %36, %38, %cst_46 {dimension_numbers = #tpu.dot_dimension_numbers<[1], [0], [0], [1], [0, 0, 1, 1], [], []>} : vector<256x8xbf16>, vector<8x8xbf16>, vector<256x8xf32> -> vector<256x8xf32>
    %40 = arith.addf %33, %39 : vector<256x8xf32>
    %c0_47 = arith.constant 0 : index
    %c0_48 = arith.constant 0 : index
    %c2_49 = arith.constant 2 : index
    %c0_50 = arith.constant 0 : index
    %c0_51 = arith.constant 0 : index
    %41 = vector.load %arg1[%c0_47, %c0_48, %c2_49, %c0_50, %c0_51] : memref<1x1x18x18x8xbf16, #tpu.memory_space<vmem>>, vector<1x1x16x16x8xbf16>
    %42 = vector.shape_cast %41 : vector<1x1x16x16x8xbf16> to vector<16x16x8xbf16>
    %43 = vector.shape_cast %42 : vector<16x16x8xbf16> to vector<256x8xbf16>
    %c6 = arith.constant 6 : index
    %c0_52 = arith.constant 0 : index
    %c0_53 = arith.constant 0 : index
    %44 = vector.load %arg2[%c6, %c0_52, %c0_53] : memref<9x8x8xbf16, #tpu.memory_space<vmem>>, vector<1x8x8xbf16>
    %45 = vector.shape_cast %44 : vector<1x8x8xbf16> to vector<8x8xbf16>
    %cst_54 = arith.constant dense<0.000000e+00> : vector<256x8xf32>
    %46 = tpu.matmul %43, %45, %cst_54 {dimension_numbers = #tpu.dot_dimension_numbers<[1], [0], [0], [1], [0, 0, 1, 1], [], []>} : vector<256x8xbf16>, vector<8x8xbf16>, vector<256x8xf32> -> vector<256x8xf32>
    %47 = arith.addf %40, %46 : vector<256x8xf32>
    %c0_55 = arith.constant 0 : index
    %c0_56 = arith.constant 0 : index
    %c2_57 = arith.constant 2 : index
    %c1_58 = arith.constant 1 : index
    %c0_59 = arith.constant 0 : index
    %48 = vector.load %arg1[%c0_55, %c0_56, %c2_57, %c1_58, %c0_59] : memref<1x1x18x18x8xbf16, #tpu.memory_space<vmem>>, vector<1x1x16x16x8xbf16>
    %49 = vector.shape_cast %48 : vector<1x1x16x16x8xbf16> to vector<16x16x8xbf16>
    %50 = vector.shape_cast %49 : vector<16x16x8xbf16> to vector<256x8xbf16>
    %c7 = arith.constant 7 : index
    %c0_60 = arith.constant 0 : index
    %c0_61 = arith.constant 0 : index
    %51 = vector.load %arg2[%c7, %c0_60, %c0_61] : memref<9x8x8xbf16, #tpu.memory_space<vmem>>, vector<1x8x8xbf16>
    %52 = vector.shape_cast %51 : vector<1x8x8xbf16> to vector<8x8xbf16>
    %cst_62 = arith.constant dense<0.000000e+00> : vector<256x8xf32>
    %53 = tpu.matmul %50, %52, %cst_62 {dimension_numbers = #tpu.dot_dimension_numbers<[1], [0], [0], [1], [0, 0, 1, 1], [], []>} : vector<256x8xbf16>, vector<8x8xbf16>, vector<256x8xf32> -> vector<256x8xf32>
    %54 = arith.addf %47, %53 : vector<256x8xf32>
    %c0_63 = arith.constant 0 : index
    %c0_64 = arith.constant 0 : index
    %c2_65 = arith.constant 2 : index
    %c2_66 = arith.constant 2 : index
    %c0_67 = arith.constant 0 : index
    %55 = vector.load %arg1[%c0_63, %c0_64, %c2_65, %c2_66, %c0_67] : memref<1x1x18x18x8xbf16, #tpu.memory_space<vmem>>, vector<1x1x16x16x8xbf16>
    %56 = vector.shape_cast %55 : vector<1x1x16x16x8xbf16> to vector<16x16x8xbf16>
    %57 = vector.shape_cast %56 : vector<16x16x8xbf16> to vector<256x8xbf16>
    %c8 = arith.constant 8 : index
    %c0_68 = arith.constant 0 : index
    %c0_69 = arith.constant 0 : index
    %58 = vector.load %arg2[%c8, %c0_68, %c0_69] : memref<9x8x8xbf16, #tpu.memory_space<vmem>>, vector<1x8x8xbf16>
    %59 = vector.shape_cast %58 : vector<1x8x8xbf16> to vector<8x8xbf16>
    %cst_70 = arith.constant dense<0.000000e+00> : vector<256x8xf32>
    %60 = tpu.matmul %57, %59, %cst_70 {dimension_numbers = #tpu.dot_dimension_numbers<[1], [0], [0], [1], [0, 0, 1, 1], [], []>} : vector<256x8xbf16>, vector<8x8xbf16>, vector<256x8xf32> -> vector<256x8xf32>
    %61 = arith.addf %54, %60 : vector<256x8xf32>
    %c0_71 = arith.constant 0 : index
    %c0_72 = arith.constant 0 : index
    %62 = vector.load %arg3[%c0_71, %c0_72] : memref<1x8xf32, #tpu.memory_space<vmem>>, vector<1x8xf32>
    %63 = vector.broadcast %62 : vector<1x8xf32> to vector<256x8xf32>
    %64 = arith.addf %61, %63 : vector<256x8xf32>
    %cst_73 = arith.constant 0.000000e+00 : f32
    %65 = vector.broadcast %cst_73 : f32 to vector<256x8xf32>
    %66 = arith.maximumf %64, %65 : vector<256x8xf32>
    %cst_74 = arith.constant 0.000000e+00 : bf16
    %67 = vector.broadcast %cst_74 : bf16 to vector<18x18x8xbf16>
    %c0_75 = arith.constant 0 : index
    %c0_76 = arith.constant 0 : index
    %c0_77 = arith.constant 0 : index
    %68 = vector.load %arg10[%c0_75, %c0_76, %c0_77] : memref<18x18x8xbf16, #tpu.memory_space<vmem>>, vector<18x18x8xbf16>
    tpu.vector_store %arg10[%c0_75, %c0_76, %c0_77], %67 {strides = array<i32>} : memref<18x18x8xbf16, #tpu.memory_space<vmem>>, vector<18x18x8xbf16>,
    %69 = vector.shape_cast %66 : vector<256x8xf32> to vector<16x16x8xf32>
    %70 = arith.truncf %69 : vector<16x16x8xf32> to vector<16x16x8xbf16>
    %c1_78 = arith.constant 1 : index
    %c1_79 = arith.constant 1 : index
    %c0_80 = arith.constant 0 : index
    %71 = vector.load %arg10[%c1_78, %c1_79, %c0_80] : memref<18x18x8xbf16, #tpu.memory_space<vmem>>, vector<16x16x8xbf16>
    tpu.vector_store %arg10[%c1_78, %c1_79, %c0_80], %70 {strides = array<i32>} : memref<18x18x8xbf16, #tpu.memory_space<vmem>>, vector<16x16x8xbf16>,
    %c0_81 = arith.constant 0 : index
    %c0_82 = arith.constant 0 : index
    %c0_83 = arith.constant 0 : index
    %72 = vector.load %arg10[%c0_81, %c0_82, %c0_83] : memref<18x18x8xbf16, #tpu.memory_space<vmem>>, vector<16x16x8xbf16>
    %73 = vector.shape_cast %72 : vector<16x16x8xbf16> to vector<256x8xbf16>
    %c0_84 = arith.constant 0 : index
    %c0_85 = arith.constant 0 : index
    %c0_86 = arith.constant 0 : index
    %74 = vector.load %arg4[%c0_84, %c0_85, %c0_86] : memref<9x8x8xbf16, #tpu.memory_space<vmem>>, vector<1x8x8xbf16>
    %75 = vector.shape_cast %74 : vector<1x8x8xbf16> to vector<8x8xbf16>
    %cst_87 = arith.constant dense<0.000000e+00> : vector<256x8xf32>
    %76 = tpu.matmul %73, %75, %cst_87 {dimension_numbers = #tpu.dot_dimension_numbers<[1], [0], [0], [1], [0, 0, 1, 1], [], []>} : vector<256x8xbf16>, vector<8x8xbf16>, vector<256x8xf32> -> vector<256x8xf32>
    %c0_88 = arith.constant 0 : index
    %c1_89 = arith.constant 1 : index
    %c0_90 = arith.constant 0 : index
    %77 = vector.load %arg10[%c0_88, %c1_89, %c0_90] : memref<18x18x8xbf16, #tpu.memory_space<vmem>>, vector<16x16x8xbf16>
    %78 = vector.shape_cast %77 : vector<16x16x8xbf16> to vector<256x8xbf16>
    %c1_91 = arith.constant 1 : index
    %c0_92 = arith.constant 0 : index
    %c0_93 = arith.constant 0 : index
    %79 = vector.load %arg4[%c1_91, %c0_92, %c0_93] : memref<9x8x8xbf16, #tpu.memory_space<vmem>>, vector<1x8x8xbf16>
    %80 = vector.shape_cast %79 : vector<1x8x8xbf16> to vector<8x8xbf16>
    %cst_94 = arith.constant dense<0.000000e+00> : vector<256x8xf32>
    %81 = tpu.matmul %78, %80, %cst_94 {dimension_numbers = #tpu.dot_dimension_numbers<[1], [0], [0], [1], [0, 0, 1, 1], [], []>} : vector<256x8xbf16>, vector<8x8xbf16>, vector<256x8xf32> -> vector<256x8xf32>
    %82 = arith.addf %76, %81 : vector<256x8xf32>
    %c0_95 = arith.constant 0 : index
    %c2_96 = arith.constant 2 : index
    %c0_97 = arith.constant 0 : index
    %83 = vector.load %arg10[%c0_95, %c2_96, %c0_97] : memref<18x18x8xbf16, #tpu.memory_space<vmem>>, vector<16x16x8xbf16>
    %84 = vector.shape_cast %83 : vector<16x16x8xbf16> to vector<256x8xbf16>
    %c2_98 = arith.constant 2 : index
    %c0_99 = arith.constant 0 : index
    %c0_100 = arith.constant 0 : index
    %85 = vector.load %arg4[%c2_98, %c0_99, %c0_100] : memref<9x8x8xbf16, #tpu.memory_space<vmem>>, vector<1x8x8xbf16>
    %86 = vector.shape_cast %85 : vector<1x8x8xbf16> to vector<8x8xbf16>
    %cst_101 = arith.constant dense<0.000000e+00> : vector<256x8xf32>
    %87 = tpu.matmul %84, %86, %cst_101 {dimension_numbers = #tpu.dot_dimension_numbers<[1], [0], [0], [1], [0, 0, 1, 1], [], []>} : vector<256x8xbf16>, vector<8x8xbf16>, vector<256x8xf32> -> vector<256x8xf32>
    %88 = arith.addf %82, %87 : vector<256x8xf32>
    %c1_102 = arith.constant 1 : index
    %c0_103 = arith.constant 0 : index
    %c0_104 = arith.constant 0 : index
    %89 = vector.load %arg10[%c1_102, %c0_103, %c0_104] : memref<18x18x8xbf16, #tpu.memory_space<vmem>>, vector<16x16x8xbf16>
    %90 = vector.shape_cast %89 : vector<16x16x8xbf16> to vector<256x8xbf16>
    %c3_105 = arith.constant 3 : index
    %c0_106 = arith.constant 0 : index
    %c0_107 = arith.constant 0 : index
    %91 = vector.load %arg4[%c3_105, %c0_106, %c0_107] : memref<9x8x8xbf16, #tpu.memory_space<vmem>>, vector<1x8x8xbf16>
    %92 = vector.shape_cast %91 : vector<1x8x8xbf16> to vector<8x8xbf16>
    %cst_108 = arith.constant dense<0.000000e+00> : vector<256x8xf32>
    %93 = tpu.matmul %90, %92, %cst_108 {dimension_numbers = #tpu.dot_dimension_numbers<[1], [0], [0], [1], [0, 0, 1, 1], [], []>} : vector<256x8xbf16>, vector<8x8xbf16>, vector<256x8xf32> -> vector<256x8xf32>
    %94 = arith.addf %88, %93 : vector<256x8xf32>
    %c1_109 = arith.constant 1 : index
    %c1_110 = arith.constant 1 : index
    %c0_111 = arith.constant 0 : index
    %95 = vector.load %arg10[%c1_109, %c1_110, %c0_111] : memref<18x18x8xbf16, #tpu.memory_space<vmem>>, vector<16x16x8xbf16>
    %96 = vector.shape_cast %95 : vector<16x16x8xbf16> to vector<256x8xbf16>
    %c4_112 = arith.constant 4 : index
    %c0_113 = arith.constant 0 : index
    %c0_114 = arith.constant 0 : index
    %97 = vector.load %arg4[%c4_112, %c0_113, %c0_114] : memref<9x8x8xbf16, #tpu.memory_space<vmem>>, vector<1x8x8xbf16>
    %98 = vector.shape_cast %97 : vector<1x8x8xbf16> to vector<8x8xbf16>
    %cst_115 = arith.constant dense<0.000000e+00> : vector<256x8xf32>
    %99 = tpu.matmul %96, %98, %cst_115 {dimension_numbers = #tpu.dot_dimension_numbers<[1], [0], [0], [1], [0, 0, 1, 1], [], []>} : vector<256x8xbf16>, vector<8x8xbf16>, vector<256x8xf32> -> vector<256x8xf32>
    %100 = arith.addf %94, %99 : vector<256x8xf32>
    %c1_116 = arith.constant 1 : index
    %c2_117 = arith.constant 2 : index
    %c0_118 = arith.constant 0 : index
    %101 = vector.load %arg10[%c1_116, %c2_117, %c0_118] : memref<18x18x8xbf16, #tpu.memory_space<vmem>>, vector<16x16x8xbf16>
    %102 = vector.shape_cast %101 : vector<16x16x8xbf16> to vector<256x8xbf16>
    %c5_119 = arith.constant 5 : index
    %c0_120 = arith.constant 0 : index
    %c0_121 = arith.constant 0 : index
    %103 = vector.load %arg4[%c5_119, %c0_120, %c0_121] : memref<9x8x8xbf16, #tpu.memory_space<vmem>>, vector<1x8x8xbf16>
    %104 = vector.shape_cast %103 : vector<1x8x8xbf16> to vector<8x8xbf16>
    %cst_122 = arith.constant dense<0.000000e+00> : vector<256x8xf32>
    %105 = tpu.matmul %102, %104, %cst_122 {dimension_numbers = #tpu.dot_dimension_numbers<[1], [0], [0], [1], [0, 0, 1, 1], [], []>} : vector<256x8xbf16>, vector<8x8xbf16>, vector<256x8xf32> -> vector<256x8xf32>
    %106 = arith.addf %100, %105 : vector<256x8xf32>
    %c2_123 = arith.constant 2 : index
    %c0_124 = arith.constant 0 : index
    %c0_125 = arith.constant 0 : index
    %107 = vector.load %arg10[%c2_123, %c0_124, %c0_125] : memref<18x18x8xbf16, #tpu.memory_space<vmem>>, vector<16x16x8xbf16>
    %108 = vector.shape_cast %107 : vector<16x16x8xbf16> to vector<256x8xbf16>
    %c6_126 = arith.constant 6 : index
    %c0_127 = arith.constant 0 : index
    %c0_128 = arith.constant 0 : index
    %109 = vector.load %arg4[%c6_126, %c0_127, %c0_128] : memref<9x8x8xbf16, #tpu.memory_space<vmem>>, vector<1x8x8xbf16>
    %110 = vector.shape_cast %109 : vector<1x8x8xbf16> to vector<8x8xbf16>
    %cst_129 = arith.constant dense<0.000000e+00> : vector<256x8xf32>
    %111 = tpu.matmul %108, %110, %cst_129 {dimension_numbers = #tpu.dot_dimension_numbers<[1], [0], [0], [1], [0, 0, 1, 1], [], []>} : vector<256x8xbf16>, vector<8x8xbf16>, vector<256x8xf32> -> vector<256x8xf32>
    %112 = arith.addf %106, %111 : vector<256x8xf32>
    %c2_130 = arith.constant 2 : index
    %c1_131 = arith.constant 1 : index
    %c0_132 = arith.constant 0 : index
    %113 = vector.load %arg10[%c2_130, %c1_131, %c0_132] : memref<18x18x8xbf16, #tpu.memory_space<vmem>>, vector<16x16x8xbf16>
    %114 = vector.shape_cast %113 : vector<16x16x8xbf16> to vector<256x8xbf16>
    %c7_133 = arith.constant 7 : index
    %c0_134 = arith.constant 0 : index
    %c0_135 = arith.constant 0 : index
    %115 = vector.load %arg4[%c7_133, %c0_134, %c0_135] : memref<9x8x8xbf16, #tpu.memory_space<vmem>>, vector<1x8x8xbf16>
    %116 = vector.shape_cast %115 : vector<1x8x8xbf16> to vector<8x8xbf16>
    %cst_136 = arith.constant dense<0.000000e+00> : vector<256x8xf32>
    %117 = tpu.matmul %114, %116, %cst_136 {dimension_numbers = #tpu.dot_dimension_numbers<[1], [0], [0], [1], [0, 0, 1, 1], [], []>} : vector<256x8xbf16>, vector<8x8xbf16>, vector<256x8xf32> -> vector<256x8xf32>
    %118 = arith.addf %112, %117 : vector<256x8xf32>
    %c2_137 = arith.constant 2 : index
    %c2_138 = arith.constant 2 : index
    %c0_139 = arith.constant 0 : index
    %119 = vector.load %arg10[%c2_137, %c2_138, %c0_139] : memref<18x18x8xbf16, #tpu.memory_space<vmem>>, vector<16x16x8xbf16>
    %120 = vector.shape_cast %119 : vector<16x16x8xbf16> to vector<256x8xbf16>
    %c8_140 = arith.constant 8 : index
    %c0_141 = arith.constant 0 : index
    %c0_142 = arith.constant 0 : index
    %121 = vector.load %arg4[%c8_140, %c0_141, %c0_142] : memref<9x8x8xbf16, #tpu.memory_space<vmem>>, vector<1x8x8xbf16>
    %122 = vector.shape_cast %121 : vector<1x8x8xbf16> to vector<8x8xbf16>
    %cst_143 = arith.constant dense<0.000000e+00> : vector<256x8xf32>
    %123 = tpu.matmul %120, %122, %cst_143 {dimension_numbers = #tpu.dot_dimension_numbers<[1], [0], [0], [1], [0, 0, 1, 1], [], []>} : vector<256x8xbf16>, vector<8x8xbf16>, vector<256x8xf32> -> vector<256x8xf32>
    %124 = arith.addf %118, %123 : vector<256x8xf32>
    %c0_144 = arith.constant 0 : index
    %c0_145 = arith.constant 0 : index
    %125 = vector.load %arg5[%c0_144, %c0_145] : memref<1x8xf32, #tpu.memory_space<vmem>>, vector<1x8xf32>
    %126 = vector.broadcast %125 : vector<1x8xf32> to vector<256x8xf32>
    %127 = arith.addf %124, %126 : vector<256x8xf32>
    %cst_146 = arith.constant 0.000000e+00 : f32
    %128 = vector.broadcast %cst_146 : f32 to vector<256x8xf32>
    %129 = arith.maximumf %127, %128 : vector<256x8xf32>
    %130 = arith.truncf %129 : vector<256x8xf32> to vector<256x8xbf16>
    %c0_147 = arith.constant 0 : index
    %c0_148 = arith.constant 0 : index
    %131 = vector.load %arg6[%c0_147, %c0_148] : memref<8x8xbf16, #tpu.memory_space<vmem>>, vector<8x8xbf16>
    %cst_149 = arith.constant dense<0.000000e+00> : vector<256x8xf32>
    %132 = tpu.matmul %130, %131, %cst_149 {dimension_numbers = #tpu.dot_dimension_numbers<[1], [0], [0], [1], [0, 0, 1, 1], [], []>} : vector<256x8xbf16>, vector<8x8xbf16>, vector<256x8xf32> -> vector<256x8xf32>
    %c0_150 = arith.constant 0 : index
    %c0_151 = arith.constant 0 : index
    %133 = vector.load %arg7[%c0_150, %c0_151] : memref<1x8xf32, #tpu.memory_space<vmem>>, vector<1x8xf32>
    %134 = vector.broadcast %133 : vector<1x8xf32> to vector<256x8xf32>
    %135 = arith.addf %132, %134 : vector<256x8xf32>
    %cst_152 = arith.constant 0.000000e+00 : f32
    %136 = vector.broadcast %cst_152 : f32 to vector<256x8xf32>
    %137 = arith.maximumf %135, %136 : vector<256x8xf32>
    %138 = vector.shape_cast %137 : vector<256x8xf32> to vector<16x16x8xf32>
    %c0_153 = arith.constant 0 : index
    %c0_154 = arith.constant 0 : index
    %c0_155 = arith.constant 0 : index
    %c0_156 = arith.constant 0 : index
    %139 = vector.load %arg8[%c0_153, %c0_154, %c0_155, %c0_156] : memref<1x16x16x8xf32, #tpu.memory_space<vmem>>, vector<1x16x16x8xf32>
    %140 = vector.shape_cast %139 : vector<1x16x16x8xf32> to vector<16x16x8xf32>
    %141 = vector.shape_cast %138 : vector<16x16x8xf32> to vector<1x16x16x8xf32>
    tpu.vector_store %arg8[%c0_153, %c0_154, %c0_155, %c0_156], %141 {strides = array<i32>} : memref<1x16x16x8xf32, #tpu.memory_space<vmem>>, vector<1x16x16x8xf32>,
    %142 = vector.shape_cast %129 : vector<256x8xf32> to vector<16x16x8xf32>
    %143 = arith.truncf %142 : vector<16x16x8xf32> to vector<16x16x8xbf16>
    %c0_157 = arith.constant 0 : index
    %c0_158 = arith.constant 0 : index
    %c0_159 = arith.constant 0 : index
    %c0_160 = arith.constant 0 : index
    %144 = vector.load %arg9[%c0_157, %c0_158, %c0_159, %c0_160] : memref<1x16x16x8xbf16, #tpu.memory_space<vmem>>, vector<1x16x16x8xbf16>
    %145 = vector.shape_cast %144 : vector<1x16x16x8xbf16> to vector<16x16x8xbf16>
    %146 = vector.shape_cast %143 : vector<16x16x8xbf16> to vector<1x16x16x8xbf16>
    tpu.vector_store %arg9[%c0_157, %c0_158, %c0_159, %c0_160], %146 {strides = array<i32>} : memref<1x16x16x8xbf16, #tpu.memory_space<vmem>>, vector<1x16x16x8xbf16>,
    return
  }
  func.func @transform_0(%arg0: i32) -> (i32, i32, i32, i32, i32) {
    %c0_i32 = arith.constant 0 : i32
    %c0_i32_0 = arith.constant 0 : i32
    %c0_i32_1 = arith.constant 0 : i32
    %c0_i32_2 = arith.constant 0 : i32
    %c0_i32_3 = arith.constant 0 : i32
    return %arg0, %c0_i32, %c0_i32_0, %c0_i32_1, %c0_i32_2 : i32, i32, i32, i32, i32
  }
  func.func @transform_1(%arg0: i32) -> (i32, i32, i32) {
    %c0_i32 = arith.constant 0 : i32
    %c0_i32_0 = arith.constant 0 : i32
    %c0_i32_1 = arith.constant 0 : i32
    %c0_i32_2 = arith.constant 0 : i32
    return %c0_i32, %c0_i32_0, %c0_i32_1 : i32, i32, i32
  }
  func.func @transform_2(%arg0: i32) -> (i32, i32) {
    %c0_i32 = arith.constant 0 : i32
    %c0_i32_0 = arith.constant 0 : i32
    %c0_i32_1 = arith.constant 0 : i32
    return %c0_i32, %c0_i32_0 : i32, i32
  }
  func.func @transform_3(%arg0: i32) -> (i32, i32, i32) {
    %c0_i32 = arith.constant 0 : i32
    %c0_i32_0 = arith.constant 0 : i32
    %c0_i32_1 = arith.constant 0 : i32
    %c0_i32_2 = arith.constant 0 : i32
    return %c0_i32, %c0_i32_0, %c0_i32_1 : i32, i32, i32
  }
  func.func @transform_4(%arg0: i32) -> (i32, i32) {
    %c0_i32 = arith.constant 0 : i32
    %c0_i32_0 = arith.constant 0 : i32
    %c0_i32_1 = arith.constant 0 : i32
    return %c0_i32, %c0_i32_0 : i32, i32
  }
  func.func @transform_5(%arg0: i32) -> (i32, i32) {
    %c0_i32 = arith.constant 0 : i32
    %c0_i32_0 = arith.constant 0 : i32
    %c0_i32_1 = arith.constant 0 : i32
    return %c0_i32, %c0_i32_0 : i32, i32
  }
  func.func @transform_6(%arg0: i32) -> (i32, i32) {
    %c0_i32 = arith.constant 0 : i32
    %c0_i32_0 = arith.constant 0 : i32
    %c0_i32_1 = arith.constant 0 : i32
    return %c0_i32, %c0_i32_0 : i32, i32
  }
  func.func @transform_7(%arg0: i32) -> (i32, i32, i32, i32) {
    %c0_i32 = arith.constant 0 : i32
    %c0_i32_0 = arith.constant 0 : i32
    %c0_i32_1 = arith.constant 0 : i32
    %c0_i32_2 = arith.constant 0 : i32
    return %arg0, %c0_i32, %c0_i32_0, %c0_i32_1 : i32, i32, i32, i32
  }
  func.func @transform_8(%arg0: i32) -> (i32, i32, i32, i32) {
    %c0_i32 = arith.constant 0 : i32
    %c0_i32_0 = arith.constant 0 : i32
    %c0_i32_1 = arith.constant 0 : i32
    %c0_i32_2 = arith.constant 0 : i32
    return %arg0, %c0_i32, %c0_i32_0, %c0_i32_1 : i32, i32, i32, i32
  }
}

</mosaic_0001>

<bundles_post_ra>
// kernel: tpu_custom_call.1
= control target key start
LH: loop header
LB: loop body
LE: loop exit
PB: predicated region body
PF: predicated region fallthrough
CT: control target
= control target key end

     0   :  { %s13437_s27 = smov 0   ;;  %s17312_s0 = inlined_call_operand.vmem [shape: bf16[2,1,18,18,8], index: 0, kind: input, shape index: {}]   ;;  %s17313_s1 = inlined_call_operand.vmem [shape: bf16[9,8,8], index: 1, kind: input, shape index: {}]   ;;  %s17314_s2 = inlined_call_operand.vmem [shape: f32[1,8], index: 2, kind: input, shape index: {}]   ;;  %s17315_s3 = inlined_call_operand.vmem [shape: bf16[9,8,8], index: 3, kind: input, shape index: {}]   ;;  %s17316_s4 = inlined_call_operand.vmem [shape: f32[1,8], index: 4, kind: input, shape index: {}]   ;;  %s17317_s5 = inlined_call_operand.vmem [shape: bf16[8,8], index: 5, kind: input, shape index: {}]   ;;  %s17318_s6 = inlined_call_operand.vmem [shape: f32[1,8], index: 6, kind: input, shape index: {}]   ;;  %s17319_s7 = inlined_call_operand.vmem [shape: f32[2,16,16,8], index: 7, kind: output, shape index: {0}]   ;;  %s17320_s8 = inlined_call_operand.vmem [shape: bf16[2,16,16,8], index: 8, kind: output, shape index: {1}]  }
   0x1 LB: > { %s10696_s28 = sadd.s32 4294967295, %s13389_s27   ;;  %p10700_p0 = scmp.ge.s32.totalorder %s13389_s27, 1  ;;  %s13389_s27 = sphi %s13437_s27, %s19_s27  }
   0x2   : > { %p265_p1 = scmp.lt.s32.totalorder %s13389_s27, 3 }
   0x4   : > { %p266_p2 = pnand %p10700_p0, %p265_p1 }
   0x6   : > { %269 = sbr.rel (%p266_p2) target bundleno = 1838 (0x72e), region = 48 }
   0xd   : > { %v10706_v0 = vld [vmem:[%s17313_s1 + $0x4] sm:$0xf]  ;;  %vm855_vm0 = vcmask 1043456   ;;  %p304_p3 = scmp.lt.s32.totalorder %s10696_s28, 1  ;;  %v352_v2 = vld [vmem:[%s17313_s1] sm:$0xf] }
   0xe   : > { %13220 = vmatprep.subr.msk.bf16.mxu0 %vm855_vm0, %v10706_v0  ;;  %v857_v1 = vsel %vm855_vm0, %v10706_v0, 0  ;;  %13221 = vmatprep.subr.msk.bf16.mxu1 %vm855_vm0, %v10706_v0  ;;  %vm369_vm1 = vsmask.f32 3328  ;;  %vm370_vm2 = vsmask.f32 7440  ;;  %vm806_vm4 = vcmask 64512  }
   0xf   : > { %12061 = vmatpush3.bf16.msra.mxu0 %v857_v1  ;;  %s17662_s28 = smov (!%p304_p3, %s10696_s28), 1  ;;  %12707 = vmatpush3.bf16.msra.mxu1 %v857_v1  ;;  %vm13496_vm3 = vmor %vm369_vm1, %vm370_vm2  ;;  %v1149_v35 = vsel %vm855_vm0, %v352_v2, 0  ;;  %vm1360_vm5 = vcmask 1042432   ;;  %vm1361_vm6 = vcmask 1046532   ;;  %vm4950_vm8 = vcmask 60416  }
  0x10   : > { %13222 = vmatprep.subr.msk.bf16.mxu0 %vm855_vm0, %v352_v2  ;;  %s13240_s11 = smul.u32 216, %s17662_s28  ;;  %vm13644_vm7 = vmor %vm1360_vm5, %vm1361_vm6  ;;  %vm4953_vm9 = vcmask 57344   ;;  %vm5427_vm10 = vsmask.f32 7938  ;;  %vm5102_vm11 = vsmask.f32 256 }
  0x11   : > { %vm5103_vm12 = vsmask.f32 4368  ;;  %vm15253_vm13 = vmand %vm4950_vm8, %vm5427_vm10  ;;  %s11672_s15 = sshll.u32 %s17662_s28, 7  ;;  %s11671_s21 = sshll.u32 %s17662_s28, 8 }
  0x12   : > { %s13461_s14 = scalar_lea.vmem %s17312_s0, %s13240_s11  ;;  %vm15260_vm14 = vmor %vm5102_vm11, %vm5103_vm12  ;;  %s17091_s18 = scalar_lea.vmem %s17320_s8, %s11672_s15 }
  0x13   : > { %v13464_v3 = vld [vmem:[%s13461_s14] sm:$0xf]  ;;  %v13467_v4 = vld [vmem:[%s13461_s14 + $0x4] sm:$0xf]  ;;  %v13470_v5 = vld [vmem:[%s13461_s14 + $0x8] sm:$0x1]  ;;  %s17212_s24 = scalar_lea.vmem %s17319_s7, %s11671_s21 }
  0x14   : > { %v373_v6 = vshrl.u32 %v13464_v3, 16  ;;  %v376_v7 = vshll.u32 %v13464_v3, 16  ;;  %v382_v8 = vshll.u32 %v13467_v4, 16  ;;  %v386_v9 = vshrl.u32 %v13467_v4, 16  ;;  %v13477_v10 = vld [vmem:[%s13461_s14 + $0xc] sm:$0xf]  ;;  %vm15266_vm15 = vmand %vm4953_vm9, %vm5102_vm11 }
  0x15   : > { %v392_v11 = vshll.u32 %v13470_v5, 16  ;;  %v13481_v12 = vld [vmem:[%s13461_s14 + $0x10] sm:$0xf]  ;;  %v13484_v13 = vld [vmem:[%s13461_s14 + $0x14] sm:$0x1]  ;;  %v397_v19 = vshrl.u32 %v13477_v10, 16 }
  0x16   : > { %v375_v14 = vrot.slane %v373_v6, 4  ;;  %v378_v15 = vrot.slane %v376_v7, 5  ;;  %v384_v16 = vrot.slane %v382_v8, 5  ;;  %v388_v17 = vrot.slane %v386_v9, 4  ;;  %v13492_v26 = vld [vmem:[%s13461_s14 + $0x18] sm:$0xf] }
  0x17   : > { %v394_v18 = vrot.slane %v392_v11, 5  ;;  %v400_v20 = vshll.u32 %v13477_v10, 16  ;;  %v406_v21 = vshll.u32 %v13481_v12, 16  ;;  %v410_v24 = vshrl.u32 %v13481_v12, 16  ;;  %v13501_v31 = vld [vmem:[%s13461_s14 + $0x1c] sm:$0xf] }
  0x18   : > { %v379_v22 = vor.u32 %v378_v15, %v375_v14  ;;  %v389_v23 = vor.u32 %v388_v17, %v384_v16  ;;  %v416_v25 = vshll.u32 %v13484_v13, 16  ;;  %v399_v28 = vrot.slane %v397_v19, 4  ;;  %v13505_v38 = vld [vmem:[%s13461_s14 + $0x20] sm:$0x1]  ;;  %v13515_v45 = vld [vmem:[%s13461_s14 + $0x24] sm:$0xf] }
  0x19   : > { %v402_v29 = vrot.slane %v400_v20, 5  ;;  %v408_v30 = vrot.slane %v406_v21, 5  ;;  %v412_v34 = vrot.slane %v410_v24, 4  ;;  %v421_v39 = vshrl.u32 %v13492_v26, 16  ;;  %v13518_v50 = vld [vmem:[%s13461_s14 + $0x28] sm:$0xf] }
  0x1a   : > { %v380_v32 = vrot.slane %v379_v22, 4  ;;  %v390_v33 = vrot.slane %v389_v23, 4  ;;  %v418_v37 = vrot.slane %v416_v25, 5  ;;  %v424_v40 = vshll.u32 %v13492_v26, 16  ;;  %v13526_v57 = vld [vmem:[%s13461_s14 + $0x2c] sm:$0x1] }
  0x1b   : > { %v403_v36 = vor.u32 %v402_v29, %v399_v28  ;;  %v413_v43 = vor.u32 %v412_v34, %v408_v30  ;;  %v430_v44 = vshll.u32 %v13501_v31, 16  ;;  %v423_v48 = vrot.slane %v421_v39, 4  ;;  %v13534_v0 = vld [vmem:[%s13461_s14 + $0x30] sm:$0xf]  ;;  %v13537_v8 = vld [vmem:[%s13461_s14 + $0x34] sm:$0xf] }
  0x1c   : > { %v385_v41 = vsel %vm13496_vm3, %v380_v32, %v384_v16  ;;  %v395_v42 = vsel %vm13496_vm3, %v390_v33, %v394_v18  ;;  %v426_v49 = vrot.slane %v424_v40, 5  ;;  %v434_v53 = vshrl.u32 %v13501_v31, 16  ;;  %v13544_v16 = vld [vmem:[%s17313_s1 + $0x8] sm:$0xf]  ;;  %v13550_v19 = vld [vmem:[%s13461_s14 + $0x38] sm:$0x1] }
  0x1d   : > { %v10707_v46 = vcombine.low %v385_v41, %v395_v42  ;;  %v404_v47 = vrot.slane %v403_v36, 4  ;;  %v414_v51 = vrot.slane %v413_v43, 4  ;;  %v432_v52 = vrot.slane %v430_v44, 5  ;;  %v13557_v33 = vld [vmem:[%s13461_s14 + $0x3c] sm:$0xf] }
  0x1e   : > { %v440_v54 = vshll.u32 %v13505_v38, 16  ;;  %v427_v56 = vor.u32 %v426_v49, %v423_v48  ;;  %v445_v58 = vshrl.u32 %v13515_v45, 16  ;;  %v448_v59 = vshll.u32 %v13515_v45, 16  ;;  %v13565_v39 = vld [vmem:[%s13461_s14 + $0x40] sm:$0xf] }
  0x1f   : > { %12062 = vmatprep.mubr.msk.bf16.mxu0 %vm806_vm4, %v10707_v46  ;;  %v409_v55 = vsel %vm13496_vm3, %v404_v47, %v408_v30  ;;  %v419_v60 = vsel %vm13496_vm3, %v414_v51, %v418_v37  ;;  %v436_v61 = vrot.slane %v434_v53, 4  ;;  %v454_v63 = vshll.u32 %v13518_v50, 16  ;;  %v13570_v44 = vld [vmem:[%s13461_s14 + $0x44] sm:$0x1] }
  0x20   : > { %v442_v62 = vrot.slane %v440_v54, 5  ;;  %v10708_v1 = vcombine.low %v409_v55, %v419_v60  ;;  %v428_v2 = vrot.slane %v427_v56, 4  ;;  %v447_v6 = vrot.slane %v445_v58, 4  ;;  %v13578_v55 = vld [vmem:[%s13461_s14 + $0x48] sm:$0xf] }
  0x21   : > { %v450_v7 = vrot.slane %v448_v59, 5  ;;  %v437_v9 = vor.u32 %v436_v61, %v432_v52  ;;  %v456_v11 = vrot.slane %v454_v63, 5  ;;  %v458_v14 = vshrl.u32 %v13518_v50, 16  ;;  %v13584_v61 = vld [vmem:[%s13461_s14 + $0x4c] sm:$0xf] }
  0x22   : > { %v464_v15 = vshll.u32 %v13526_v57, 16  ;;  %12063 = vmatmul.mubr.msk.bf16.vlgmr.msra.gmra.mrb[0].mxu0 %vm806_vm4, %v10708_v1  ;;  %v433_v17 = vsel %vm13496_vm3, %v428_v2, %v432_v52  ;;  %v469_v20 = vshrl.u32 %v13534_v0, 16  ;;  %v472_v21 = vshll.u32 %v13534_v0, 16 }
  0x23   : > { %v451_v18 = vor.u32 %v450_v7, %v447_v6  ;;  %12095 = vmatpush3.bf16.msra.mxu0 %v1149_v35  ;;  %v438_v22 = vrot.slane %v437_v9, 4  ;;  %v460_v23 = vrot.slane %v458_v14, 4  ;;  %v478_v25 = vshll.u32 %v13537_v8, 16 }
  0x24   : > { %v466_v24 = vrot.slane %v464_v15, 5  ;;  %v471_v29 = vrot.slane %v469_v20, 4  ;;  %v474_v30 = vrot.slane %v472_v21, 5  ;;  %v482_v32 = vshrl.u32 %v13537_v8, 16  ;;  %13223 = vmatprep.subr.msk.bf16.mxu0 %vm855_vm0, %v13544_v16  ;;  %v13599_v21 = vld [vmem:[%s13461_s14 + $0x54] sm:$0xf] }
  0x25   : > { %v452_v28 = vrot.slane %v451_v18, 4  ;;  %v443_v34 = vsel %vm13496_vm3, %v438_v22, %v442_v62  ;;  %v461_v35 = vor.u32 %v460_v23, %v456_v11  ;;  %v480_v36 = vrot.slane %v478_v25, 5 }
  0x26   : > { %v488_v37 = vshll.u32 %v13550_v19, 16  ;;  %v10709_v40 = vcombine.low %v433_v17, %v443_v34  ;;  %v475_v42 = vor.u32 %v474_v30, %v471_v29  ;;  %v484_v43 = vrot.slane %v482_v32, 4 }
  0x27   : > { %v457_v41 = vsel %vm13496_vm3, %v452_v28, %v456_v11  ;;  %v462_v46 = vrot.slane %v461_v35, 4  ;;  %v493_v48 = vshrl.u32 %v13557_v33, 16  ;;  %v496_v49 = vshll.u32 %v13557_v33, 16  ;;  %v13589_v11 = vld [vmem:[%s13461_s14 + $0x50] sm:$0x1] }
  0x28   : > { %v490_v47 = vrot.slane %v488_v37, 5  ;;  %12066 = vmatprep.mubr.msk.bf16.mxu0 %vm806_vm4, %v10709_v40  ;;  %v476_v51 = vrot.slane %v475_v42, 4  ;;  %v485_v52 = vor.u32 %v484_v43, %v480_v36  ;;  %v502_v53 = vshll.u32 %v13565_v39, 16  ;;  %v13602_v28 = vld [vmem:[%s13461_s14 + $0x58] sm:$0xf] }
  0x29   : > { %v506_v54 = vshrl.u32 %v13565_v39, 16  ;;  %v467_v56 = vsel %vm13496_vm3, %v462_v46, %v466_v24  ;;  %v495_v58 = vrot.slane %v493_v48, 4  ;;  %v498_v59 = vrot.slane %v496_v49, 5  ;;  %v13611_v46 = vld [vmem:[%s13461_s14 + $0x5c] sm:$0x1] }
  0x2a   : > { %v512_v60 = vshll.u32 %v13570_v44, 16  ;;  %v10710_v62 = vcombine.low %v457_v41, %v467_v56  ;;  %v481_v63 = vsel %vm13496_vm3, %v476_v51, %v480_v36  ;;  %v486_v1 = vrot.slane %v485_v52, 4 }
  0x2b   : > { %v504_v2 = vrot.slane %v502_v53, 5  ;;  %v499_v6 = vor.u32 %v498_v59, %v495_v58  ;;  %v508_v7 = vrot.slane %v506_v54, 4  ;;  %v517_v14 = vshrl.u32 %v13578_v55, 16 }
  0x2c   : > { %v514_v9 = vrot.slane %v512_v60, 5  ;;  %12067 = vmatmul.mubr.msk.bf16.gmra.mrb[4].mxu0 %vm806_vm4, %v10710_v62  ;;  %v491_v15 = vsel %vm13496_vm3, %v486_v1, %v490_v47  ;;  %v520_v17 = vshll.u32 %v13578_v55, 16  ;;  %v526_v18 = vshll.u32 %v13584_v61, 16 }
  0x2d   : > { %v530_v20 = vshrl.u32 %v13584_v61, 16  ;;  %v10711_v22 = vcombine.low %v481_v63, %v491_v15  ;;  %v500_v23 = vrot.slane %v499_v6, 4  ;;  %v509_v24 = vor.u32 %v508_v7, %v504_v2 }
  0x2e   : > { %v519_v25 = vrot.slane %v517_v14, 4  ;;  %v522_v29 = vrot.slane %v520_v17, 5  ;;  %v528_v30 = vrot.slane %v526_v18, 5  ;;  %v536_v34 = vshll.u32 %v13589_v11, 16 }
  0x2f   : > { %v532_v32 = vrot.slane %v530_v20, 4  ;;  %12070 = vmatprep.mubr.msk.bf16.mxu0 %vm806_vm4, %v10711_v22  ;;  %v505_v35 = vsel %vm13496_vm3, %v500_v23, %v504_v2  ;;  %v510_v36 = vrot.slane %v509_v24, 4  ;;  %v541_v37 = vshrl.u32 %v13599_v21, 16  ;;  %v1312_v23 = vld [vmem:[%s13461_s14] sm:$0xe] }
  0x30   : > { %v544_v40 = vshll.u32 %v13599_v21, 16  ;;  %v523_v41 = vor.u32 %v522_v29, %v519_v25  ;;  %v538_v43 = vrot.slane %v536_v34, 5  ;;  %v550_v47 = vshll.u32 %v13602_v28, 16  ;;  %v1313_v29 = vld [vmem:[%s13461_s14 + $0xc] sm:$0xe] }
  0x31   : > { %v533_v42 = vor.u32 %v532_v32, %v528_v30  ;;  %v515_v48 = vsel %vm13496_vm3, %v510_v36, %v514_v9  ;;  %v543_v49 = vrot.slane %v541_v37, 4  ;;  %v554_v52 = vshrl.u32 %v13602_v28, 16  ;;  %v1315_v36 = vld [vmem:[%s13461_s14 + $0x24] sm:$0xe] }
  0x32   : > { %v546_v51 = vrot.slane %v544_v40, 5  ;;  %v10712_v53 = vcombine.low %v505_v35, %v515_v48  ;;  %v524_v54 = vrot.slane %v523_v41, 4  ;;  %v552_v58 = vrot.slane %v550_v47, 5  ;;  %v1316_v41 = vld [vmem:[%s13461_s14 + $0x30] sm:$0xe] }
  0x33   : > { %v534_v56 = vrot.slane %v533_v42, 4  ;;  %v556_v60 = vrot.slane %v554_v52, 4  ;;  %v560_v62 = vshll.u32 %v13611_v46, 16  ;;  %v10739_v18 = vcombine.low %v13464_v3, %v13467_v4  ;;  %v1314_v3 = vld [vmem:[%s13461_s14 + $0x18] sm:$0xe] }
  0x34   : > { %v547_v59 = vor.u32 %v546_v51, %v543_v49  ;;  %12071 = vmatmul.mubr.msk.bf16.gmra.mrb[8].mxu0 %vm806_vm4, %v10712_v53  ;;  %v529_v63 = vsel %vm13496_vm3, %v524_v54, %v528_v30  ;;  %v1372_v22 = vrot.slane %v13481_v12, 5  ;;  %v10740_v24 = vcombine.low %v13477_v10, %v13481_v12  ;;  %v13651_v10 = vld [vmem:[%s17313_s1 + $0xc] sm:$0xf]  ;;  %v1317_v51 = vld [vmem:[%s13461_s14 + $0x3c] sm:$0xe] }
  0x35   : > { %v539_v1 = vsel %vm13496_vm3, %v534_v56, %v538_v43  ;;  %v557_v7 = vor.u32 %v556_v60, %v552_v58  ;;  %v562_v9 = vrot.slane %v560_v62, 5  ;;  %v1574_v25 = vsel %vm855_vm0, %v13544_v16, 0  ;;  %v1318_v54 = vld [vmem:[%s13461_s14 + $0x48] sm:$0xe]  ;;  %v1319_v60 = vld [vmem:[%s13461_s14 + $0x54] sm:$0xe] }
  0x36   : > { %v10713_v2 = vcombine.low %v529_v63, %v539_v1  ;;  %v548_v6 = vrot.slane %v547_v59, 4  ;;  %v1368_v30 = vrot.slane %v13470_v5, 5  ;;  %v1375_v32 = vrot.slane %v13484_v13, 5 }
  0x37   : > { %v558_v15 = vrot.slane %v557_v7, 4  ;;  %v10741_v34 = vcombine.low %v13492_v26, %v13501_v31  ;;  %v10742_v12 = vcombine.low %v13515_v45, %v13518_v50  ;;  %v10771_v16 = vrot.slane %v1312_v23, 9 }
  0x38   : > { %12074 = vmatprep.mubr.msk.bf16.mxu0 %vm806_vm4, %v10713_v2  ;;  %v553_v14 = vsel %vm13496_vm3, %v548_v6, %v552_v58  ;;  %v1365_v5 = vrot.slane %v13467_v4, 5  ;;  %v10743_v13 = vcombine.low %v13534_v0, %v13537_v8  ;;  %v10772_v26 = vrot.slane %v1313_v29, 9 }
  0x39   : > { %v563_v17 = vsel %vm13496_vm3, %v558_v15, %v562_v9  ;;  %v1374_v37 = vrot.slane %v1372_v22, 4  ;;  %v10773_v40 = vrot.slane %v1314_v3, 9  ;;  %v1379_v43 = vrot.slane %v13501_v31, 5 }
  0x3a   : > { %v10714_v20 = vcombine.low %v553_v14, %v563_v17  ;;  %v13663_v42 = vsel %vm13644_vm7, %v10771_v16, %v1365_v5  ;;  %v1367_v45 = vrot.slane %v1365_v5, 4  ;;  %v1382_v4 = vrot.slane %v13505_v38, 5 }
  0x3b   : > { %v13670_v0 = vsel %vm13644_vm7, %v10772_v26, %v1372_v22  ;;  %v13674_v47 = vsel %vm13644_vm7, %v1374_v37, %v1375_v32  ;;  %v10774_v48 = vrot.slane %v1315_v36, 9  ;;  %v1386_v49 = vrot.slane %v13518_v50, 5 }
  0x3c   : > { %12075 = vmatmul.mubr.msk.bf16.gmra.mrb[12].mxu0 %vm806_vm4, %v10714_v20  ;;  %v13680_v31 = vsel %vm13644_vm7, %v1367_v45, %v1368_v30  ;;  %v10789_v38 = vcombine.low %v13670_v0, %v13674_v47  ;;  %v13688_v52 = vsel %vm13644_vm7, %v10773_v40, %v1379_v43  ;;  %v1381_v53 = vrot.slane %v1379_v43, 4  ;;  %v338_v45 = vld [vmem:[%s13461_s14 + $0x6c] sm:$0xf]  ;;  %v13776_v43 = vld [vmem:[%s13461_s14 + $0x7c] sm:$0xf] }
  0x3d   : > { %12096 = vmatprep.mubr.msk.bf16.mxu0 %vm806_vm4, %v10739_v18  ;;  %v10788_v50 = vcombine.low %v13663_v42, %v13680_v31  ;;  %v13695_v56 = vsel %vm13644_vm7, %v10774_v48, %v1386_v49  ;;  %v1388_v58 = vrot.slane %v1386_v49, 4  ;;  %v1389_v59 = vrot.slane %v13526_v57, 5  ;;  %v344_v49 = vld [vmem:[%s13461_s14 + $0x90] sm:$0xf]  ;;  %v361_v42 = vld [vmem:[%s13461_s14 + $0x68] sm:$0x1] }
  0x3e   : > { %v13701_v62 = vsel %vm13644_vm7, %v1381_v53, %v1382_v4  ;;  %v10775_v63 = vrot.slane %v1316_v41, 9  ;;  %v1393_v1 = vrot.slane %v13537_v8, 5  ;;  %v1396_v2 = vrot.slane %v13550_v19, 5  ;;  %v1320_v0 = vld [vmem:[%s13461_s14 + $0x60] sm:$0xe] }
  0x3f   : > { %v10790_v6 = vcombine.low %v13688_v52, %v13701_v62  ;;  %v13709_v7 = vsel %vm13644_vm7, %v1388_v58, %v1389_v59  ;;  %v10776_v9 = vrot.slane %v1317_v51, 9  ;;  %v1400_v57 = vrot.slane %v13565_v39, 5  ;;  %v13788_v51 = vld [vmem:[%s13461_s14 + $0x94] sm:$0xf]  ;;  %v346_v58 = vld [vmem:[%s13461_s14 + $0x9c] sm:$0xf] }
  0x40   : > { %v10791_v14 = vcombine.low %v13695_v56, %v13709_v7  ;;  %v13716_v15 = vsel %vm13644_vm7, %v10775_v63, %v1393_v1  ;;  %v1395_v8 = vrot.slane %v1393_v1, 4  ;;  %v1403_v19 = vrot.slane %v13570_v44, 5  ;;  %v13796_v59 = vld [vmem:[%s13461_s14 + $0xa0] sm:$0xf]  ;;  %v13800_v63 = vld [vmem:[%s13461_s14 + $0xac] sm:$0xf] }
  0x41   : > { %v13721_v17 = vsel %vm13644_vm7, %v10776_v9, %v1400_v57  ;;  %v1402_v18 = vrot.slane %v1400_v57, 4  ;;  %v10777_v20 = vrot.slane %v1318_v54, 9  ;;  %v1407_v22 = vrot.slane %v13584_v61, 5  ;;  %v350_v9 = vld [vmem:[%s13461_s14 + $0xb4] sm:$0xf] }
  0x42   : > { %v13727_v23 = vsel %vm13644_vm7, %v1395_v8, %v1396_v2  ;;  %v1414_v29 = vrot.slane %v13602_v28, 5  ;;  %v1417_v16 = vrot.slane %v13611_v46, 5  ;;  %v10744_v36 = vcombine.low %v13557_v33, %v13565_v39  ;;  %v336_v33 = vld [vmem:[%s13461_s14 + $0x60] sm:$0xf]  ;;  %v337_v39 = vld [vmem:[%s13461_s14 + $0x64] sm:$0xf] }
  0x43   : > { %v10792_v44 = vcombine.low %v13716_v15, %v13727_v23  ;;  %v13736_v3 = vsel %vm13644_vm7, %v1402_v18, %v1403_v19  ;;  %v13740_v30 = vsel %vm13644_vm7, %v10777_v20, %v1407_v22  ;;  %v1409_v32 = vrot.slane %v1407_v22, 4  ;;  %v13808_v57 = vld [vmem:[%s13461_s14 + $0xb8] sm:$0xf]  ;;  %v13821_v19 = vld [vmem:[%s17313_s1 + $0x10] sm:$0xf] }
  0x44   : > { %12097 = vmatmul.mubr.msk.bf16.vlgmr.msra.gmra.mrb[0].mxu0 %vm806_vm4, %v10740_v24  ;;  %v1410_v24 = vrot.slane %v13589_v11, 5  ;;  %v10793_v11 = vcombine.low %v13721_v17, %v13736_v3  ;;  %v10745_v37 = vcombine.low %v13578_v55, %v13584_v61  ;;  %v10746_v40 = vcombine.low %v13599_v21, %v13602_v28  ;;  %v13771_v55 = vld [vmem:[%s13461_s14 + $0x70] sm:$0xf]  ;;  %v340_v61 = vld [vmem:[%s13461_s14 + $0x78] sm:$0xf] }
  0x45   : > { %12129 = vmatpush3.bf16.msra.mxu0 %v1574_v25  ;;  %12100 = vmatprep.mubr.msk.bf16.mxu0 %vm806_vm4, %v10741_v34  ;;  %v10778_v25 = vrot.slane %v1319_v60, 9  ;;  %v10747_v41 = vcombine.low %v336_v33, %v337_v39  ;;  %v10748_v4 = vcombine.low %v338_v45, %v13771_v55  ;;  %v10749_v48 = vcombine.low %v340_v61, %v13776_v43  ;;  %v342_v21 = vld [vmem:[%s13461_s14 + $0x84] sm:$0xf]  ;;  %v13784_v28 = vld [vmem:[%s13461_s14 + $0x88] sm:$0xf] }
  0x46   : > { %13224 = vmatprep.subr.msk.bf16.mxu0 %vm855_vm0, %v13651_v10  ;;  %v1411_v5 = vsel %vm13644_vm7, %v1409_v32, %v1410_v24  ;;  %v10750_v53 = vcombine.low %v342_v21, %v13784_v28  ;;  %v10751_v54 = vcombine.low %v344_v49, %v13788_v51  ;;  %v348_v60 = vld [vmem:[%s13461_s14 + $0xa8] sm:$0xf]  ;;  %v10752_v1 = vcombine.low %v346_v58, %v13796_v59  ;;  %v362_v62 = vld [vmem:[%s13461_s14 + $0x74] sm:$0x1]  ;;  %v1322_v17 = vld [vmem:[%s13461_s14 + $0x78] sm:$0xe] }
  0x47   : > { %v13746_v34 = vsel %vm13644_vm7, %v10778_v25, %v1414_v29  ;;  %v10753_v2 = vcombine.low %v348_v60, %v13800_v63  ;;  %v10754_v15 = vcombine.low %v350_v9, %v13808_v57  ;;  %v1933_v8 = vsel %vm855_vm0, %v13651_v10, 0  ;;  %v1325_v21 = vld [vmem:[%s13461_s14 + $0x9c] sm:$0xe]  ;;  %v367_v49 = vld [vmem:[%s13461_s14 + $0xb0] sm:$0x1] }
  0x48   : > { %v1421_v10 = vrot.slane %v337_v39, 5  ;;  %v10779_v47 = vrot.slane %v1320_v0, 9  ;;  %v1428_v52 = vrot.slane %v13771_v55, 5  ;;  %v1435_v7 = vrot.slane %v13776_v43, 5  ;;  %v368_v0 = vld [vmem:[%s13461_s14 + $0xbc] sm:$0x1] }
  0x49   : > { %v1431_v23 = vrot.slane %v362_v62, 5  ;;  %v10781_v24 = vrot.slane %v1322_v17, 9  ;;  %v1456_v61 = vrot.slane %v13796_v59, 5  ;;  %v10784_v58 = vrot.slane %v1325_v21, 9  ;;  %v13268_v17 = vld [vmem:[%s13461_s14 + $0x24] sm:$0xff]  }
  0x4a   : > { %v1423_v31 = vrot.slane %v1421_v10, 4  ;;  %v1430_v22 = vrot.slane %v1428_v52, 4  ;;  %v1437_v25 = vrot.slane %v1435_v7, 4  ;;  %v1466_v9 = vrot.slane %v367_v49, 5 }
  0x4b   : > { %v1436_v32 = vsel %vm13644_vm7, %v10781_v24, %v1435_v7  ;;  %v1458_v60 = vrot.slane %v1456_v61, 4  ;;  %v13266_v7 = vld [vmem:[%s13461_s14 + $0xc] sm:$0xff]  }
  0x4c   : > { %12101 = vmatmul.mubr.msk.bf16.gmra.mrb[4].mxu0 %vm806_vm4, %v10742_v12  ;;  %v1416_v12 = vrot.slane %v1414_v29, 4  ;;  %v1432_v3 = vsel %vm13644_vm7, %v1430_v22, %v1431_v23  ;;  %v13269_v22 = vld [vmem:[%s13461_s14 + $0x30] sm:$0xff]   ;;  %v13270_v23 = vld [vmem:[%s13461_s14 + $0x3c] sm:$0xff]  }
  0x4d   : > { %12104 = vmatprep.mubr.msk.bf16.mxu0 %vm806_vm4, %v10743_v13  ;;  %v10794_v13 = vcombine.low %v13740_v30, %v1411_v5  ;;  %v1442_v30 = vrot.slane %v13784_v28, 5  ;;  %v365_v5 = vld [vmem:[%s13461_s14 + $0x98] sm:$0x1]  ;;  %v1463_v28 = vrot.slane %v13800_v63, 5  ;;  %v13929_v24 = vld [vmem:[%s13461_s14 + $0x50] sm:$0x1] }
  0x4e   : > { %v13756_v26 = vsel %vm13644_vm7, %v1416_v12, %v1417_v16  ;;  %v364_v12 = vld [vmem:[%s13461_s14 + $0x8c] sm:$0x1]  ;;  %v1449_v16 = vrot.slane %v13788_v51, 5  ;;  %v1326_v51 = vld [vmem:[%s13461_s14 + $0xa8] sm:$0xe] }
  0x4f   : > { %v10795_v46 = vcombine.low %v13746_v34, %v13756_v26  ;;  %v1323_v34 = vld [vmem:[%s13461_s14 + $0x84] sm:$0xe]  ;;  %v1445_v33 = vrot.slane %v364_v12, 5  ;;  %v10785_v59 = vrot.slane %v1326_v51, 9  ;;  %v13272_v12 = vld [vmem:[%s13461_s14 + $0x54] sm:$0xff]  }
  0x50   : > { %v13979_v51 = vld [vmem:[%s13461_s14 + $0x7c] sm:$0xf] }
  0x54   : > { %12105 = vmatmul.mubr.msk.bf16.gmra.mrb[8].mxu0 %vm806_vm4, %v10744_v36  ;;  %v1324_v36 = vld [vmem:[%s13461_s14 + $0x90] sm:$0xe] }
  0x55   : > { %12108 = vmatprep.mubr.msk.bf16.mxu0 %vm806_vm4, %v10745_v37  ;;  %v10782_v37 = vrot.slane %v1323_v34, 9  ;;  %v10783_v39 = vrot.slane %v1324_v36, 9  ;;  %v13952_v36 = vld [vmem:[%s13461_s14 + $0x68] sm:$0x1] }
  0x57   : > { %v1443_v45 = vsel %vm13644_vm7, %v10782_v37, %v1442_v30  ;;  %v1450_v43 = vsel %vm13644_vm7, %v10783_v39, %v1449_v16  ;;  %v2972_v37 = vrot.slane %v13952_v36, 5  ;;  %v13273_v39 = vld [vmem:[%s13461_s14 + $0x60] sm:$0xff]  }
  0x5c   : > { %12109 = vmatmul.mubr.msk.bf16.gmra.mrb[12].mxu0 %vm806_vm4, %v10746_v40  ;;  %v1451_v40 = vrot.slane %v1449_v16, 4 }
  0x5d   : > { %12112 = vmatprep.mubr.msk.bf16.mxu0 %vm806_vm4, %v10747_v41  ;;  %v1452_v41 = vrot.slane %v365_v5, 5  ;;  %v13949_v5 = vld [vmem:[%s13461_s14 + $0x64] sm:$0xf] }
  0x64   : > { %12113 = vmatmul.mubr.msk.bf16.gmra.mrb[16].mxu0 %vm806_vm4, %v10748_v4  ;;  %v1453_v4 = vsel %vm13644_vm7, %v1451_v40, %v1452_v41  ;;  %v10885_v40 = vld [vmem:[%s13461_s14 + $0xc] sm:$0xf] }
  0x65   : > { %12116 = vmatprep.mubr.msk.bf16.mxu0 %vm806_vm4, %v10749_v48  ;;  %v366_v48 = vld [vmem:[%s13461_s14 + $0xa4] sm:$0x1]  ;;  %v2180_v21 = vshll.u32 %v10885_v40, 16 }
  0x6c   : > { %12117 = vmatmul.mubr.msk.bf16.gmra.mrb[20].mxu0 %vm806_vm4, %v10750_v53 }
  0x6d   : > { %12120 = vmatprep.mubr.msk.bf16.mxu0 %vm806_vm4, %v10751_v54  ;;  %v10800_v54 = vcombine.low %v1450_v43, %v1453_v4  ;;  %v10888_v43 = vld [vmem:[%s13461_s14 + $0x18] sm:$0xf]  ;;  %v13281_v4 = vld [vmem:[%s13461_s14 + $0xc0] sm:$0xff]  }
  0x74   : > { %12121 = vmatmul.mubr.msk.bf16.gmra.mrb[24].mxu0 %vm806_vm4, %v10752_v1  ;;  %v1459_v1 = vrot.slane %v366_v48, 5  ;;  %v2177_v48 = vshrl.u32 %v10885_v40, 16 }
  0x75   : > { %12124 = vmatprep.mubr.msk.bf16.mxu0 %vm806_vm4, %v10753_v2  ;;  %v1465_v2 = vrot.slane %v1463_v28, 4 }
  0x76   : > { %v1460_v63 = vsel %vm13644_vm7, %v1458_v60, %v1459_v1  ;;  %v10975_v60 = vld [vmem:[%s13461_s14 + $0x78] sm:$0xe]  ;;  %v2983_v1 = vrot.slane %v13979_v51, 5 }
  0x7c   : > { %12125 = vmatmul.mubr.msk.bf16.gmra.mrb[28].mxu0 %vm806_vm4, %v10754_v15  ;;  %v1457_v15 = vsel %vm13644_vm7, %v10784_v58, %v1456_v61  ;;  %v2204_v58 = vshll.u32 %v10888_v43, 16 }
  0x7d   : > { %12130 = vmatprep.mubr.msk.bf16.mxu0 %vm806_vm4, %v10788_v50  ;;  %v1422_v50 = vsel %vm13644_vm7, %v10779_v47, %v1421_v10  ;;  %v1464_v10 = vsel %vm13644_vm7, %v10785_v59, %v1463_v28  ;;  %v1327_v47 = vld [vmem:[%s13461_s14 + $0xb4] sm:$0xe] }
  0x84   : > { %12131 = vmatmul.mubr.msk.bf16.vlgmr.msra.gmra.mrb[0].mxu0 %vm806_vm4, %v10789_v38  ;;  %v1424_v38 = vrot.slane %v361_v42, 5  ;;  %v1467_v42 = vsel %vm13644_vm7, %v1465_v2, %v1466_v9  ;;  %v13989_v2 = vld [vmem:[%s13461_s14 + $0x1c] sm:$0xf]  ;;  %v10991_v9 = vrot.slane %v10975_v60, 9 }
  0x85   : > { %12163 = vmatpush3.bf16.msra.mxu0 %v1933_v8  ;;  %12134 = vmatprep.mubr.msk.bf16.mxu0 %vm806_vm4, %v10790_v6  ;;  %v1321_v6 = vld [vmem:[%s13461_s14 + $0x6c] sm:$0xe]  ;;  %v1470_v8 = vrot.slane %v13808_v57, 5 }
  0x86   : > { %13225 = vmatprep.subr.msk.bf16.mxu0 %vm855_vm0, %v13821_v19  ;;  %v1425_v56 = vsel %vm13644_vm7, %v1423_v31, %v1424_v38  ;;  %v10780_v20 = vrot.slane %v1321_v6, 9  ;;  %v10801_v31 = vcombine.low %v1457_v15, %v1460_v63  ;;  %v10802_v38 = vcombine.low %v1464_v10, %v1467_v42  ;;  %v13993_v10 = vld [vmem:[%s13461_s14 + $0x14] sm:$0x1] }
  0x87   : > { %v10796_v18 = vcombine.low %v1422_v50, %v1425_v56  ;;  %v1472_v50 = vrot.slane %v1470_v8, 4  ;;  %v1473_v56 = vrot.slane %v368_v0, 5  ;;  %v2179_v15 = vrot.slane %v2177_v48, 4 }
  0x88   : > { %v2985_v63 = vrot.slane %v2983_v1, 4  ;;  %v2182_v42 = vrot.slane %v2180_v21, 5  ;;  %v10894_v21 = vld [vmem:[%s13461_s14 + $0x30] sm:$0xf] }
  0x89   : > { %v1474_v62 = vsel %vm13644_vm7, %v1472_v50, %v1473_v56  ;;  %v2206_v50 = vrot.slane %v2204_v58, 5  ;;  %v2210_v56 = vshll.u32 %v13989_v2, 16 }
  0x8c   : > { %12135 = vmatmul.mubr.msk.bf16.gmra.mrb[4].mxu0 %vm806_vm4, %v10791_v14  ;;  %v363_v14 = vld [vmem:[%s13461_s14 + $0x80] sm:$0x1] }
  0x8d   : > { %12138 = vmatprep.mubr.msk.bf16.mxu0 %vm806_vm4, %v10792_v44  ;;  %v1438_v29 = vrot.slane %v363_v14, 5  ;;  %v1429_v44 = vsel %vm13644_vm7, %v10780_v20, %v1428_v52  ;;  %v10786_v52 = vrot.slane %v1327_v47, 9  ;;  %v13267_v14 = vld [vmem:[%s13461_s14 + $0x18] sm:$0xff]   ;;  %v13916_v20 = vld [vmem:[%s17313_s1 + $0x14] sm:$0xf] }
  0x8f   : > { %v1471_v57 = vsel %vm13644_vm7, %v10786_v52, %v1470_v8  ;;  %v13275_v8 = vld [vmem:[%s13461_s14 + $0x78] sm:$0xff]  }
  0x90   : > { %v10803_v6 = vcombine.low %v1471_v57, %v1474_v62  ;;  %v2214_v62 = vshrl.u32 %v13989_v2, 16 }
  0x94   : > { %12139 = vmatmul.mubr.msk.bf16.gmra.mrb[8].mxu0 %vm806_vm4, %v10793_v11  ;;  %v1439_v11 = vsel %vm13644_vm7, %v1437_v25, %v1438_v29  ;;  %v10971_v25 = vld [vmem:[%s13461_s14 + $0x48] sm:$0xe] }
  0x95   : > { %12142 = vmatprep.mubr.msk.bf16.mxu0 %vm806_vm4, %v10794_v13  ;;  %v10797_v13 = vcombine.low %v1429_v44, %v1432_v3  ;;  %v10798_v26 = vcombine.low %v1436_v32, %v1439_v11  ;;  %v2958_v44 = vrot.slane %v13929_v24, 5  ;;  %v10987_v3 = vrot.slane %v10971_v25, 9  ;;  %v13271_v32 = vld [vmem:[%s13461_s14 + $0x48] sm:$0xff]   ;;  %v14021_v25 = vld [vmem:[%s13461_s14 + $0x94] sm:$0xf] }
  0x9c   : > { %12143 = vmatmul.mubr.msk.bf16.gmra.mrb[12].mxu0 %vm806_vm4, %v10795_v46  ;;  %v1444_v46 = vrot.slane %v1442_v30, 4 }
  0x9d   : > { %12146 = vmatprep.mubr.msk.bf16.mxu0 %vm806_vm4, %v10796_v18  ;;  %v2659_v18 = vsel %vm855_vm0, %v13821_v19, 0  ;;  %v13926_v19 = vld [vmem:[%s13461_s14 + $0x4c] sm:$0xf] }
  0x9e   : > { %v1446_v55 = vsel %vm13644_vm7, %v1444_v46, %v1445_v33  ;;  %v2955_v29 = vrot.slane %v13926_v19, 5 }
  0x9f   : > { %v10799_v53 = vcombine.low %v1443_v45, %v1446_v55  ;;  %v13274_v45 = vld [vmem:[%s13461_s14 + $0x6c] sm:$0xff]  }
  0xa0   : > { %v2957_v30 = vrot.slane %v2955_v29, 4  ;;  %v13938_v11 = vsel %vm13644_vm7, %v10987_v3, %v2955_v29  ;;  %v13966_v55 = vld [vmem:[%s13461_s14 + $0x10] sm:$0xf]  ;;  %v14024_v29 = vld [vmem:[%s13461_s14 + $0x98] sm:$0x1]  ;;  %v14027_v3 = vrot.slane %v2210_v56, 5 }
  0xa1   : > { %v2186_v28 = vshll.u32 %v13966_v55, 16  ;;  %v2190_v49 = vshrl.u32 %v13966_v55, 16 }
  0xa2   : > { %v13943_v34 = vsel %vm13644_vm7, %v2957_v30, %v2958_v44  ;;  %v10977_v30 = vld [vmem:[%s13461_s14 + $0x90] sm:$0xe] }
  0xa3   : > { %v13995_v0 = vrot.slane %v2186_v28, 5  ;;  %v2192_v47 = vrot.slane %v2190_v49, 4  ;;  %v14038_v28 = vld [vmem:[%s13461_s14 + $0x34] sm:$0xf] }
  0xa4   : > { %12147 = vmatmul.mubr.msk.bf16.gmra.mrb[16].mxu0 %vm806_vm4, %v10797_v13  ;;  %v10973_v13 = vld [vmem:[%s13461_s14 + $0x60] sm:$0xe] }
  0xa5   : > { %12150 = vmatprep.mubr.msk.bf16.mxu0 %vm806_vm4, %v10798_v26  ;;  %v2969_v26 = vrot.slane %v13949_v5, 5  ;;  %v10989_v46 = vrot.slane %v10973_v13, 9  ;;  %v2216_v13 = vrot.slane %v2214_v62, 4  ;;  %v2262_v62 = vshrl.u32 %v14038_v28, 16 }
  0xa7   : > { %v2971_v33 = vrot.slane %v2969_v26, 4  ;;  %v13962_v41 = vsel %vm13644_vm7, %v10989_v46, %v2969_v26  ;;  %v10993_v46 = vrot.slane %v10977_v30, 9 }
  0xa9   : > { %v13970_v61 = vsel %vm13644_vm7, %v2971_v33, %v2972_v37  ;;  %v13277_v33 = vld [vmem:[%s13461_s14 + $0x90] sm:$0xff]  }
  0xaa   : > { %17421 = vst [vmem:[#allocation3_spill] sm:$0xff] %v13970_v61 }
  0xac   : > { %12151 = vmatmul.mubr.msk.bf16.gmra.mrb[20].mxu0 %vm806_vm4, %v10799_v53  ;;  %v13982_v53 = vld [vmem:[%s13461_s14 + $0x80] sm:$0x1] }
  0xad   : > { %12154 = vmatprep.mubr.msk.bf16.mxu0 %vm806_vm4, %v10800_v54  ;;  %v2201_v54 = vshrl.u32 %v10888_v43, 16  ;;  %v2986_v59 = vrot.slane %v13982_v53, 5 }
  0xaf   : > { %v2203_v52 = vrot.slane %v2201_v54, 4  ;;  %v14005_v57 = vsel %vm13644_vm7, %v2985_v63, %v2986_v59  ;;  %v13278_v54 = vld [vmem:[%s13461_s14 + $0x9c] sm:$0xff]  }
  0xb0   : > { %17423 = vst [vmem:[#allocation5_spill] sm:$0xff] %v14005_v57 }
  0xb1   : > { %v2207_v44 = vor.u32 %v2206_v50, %v2203_v52  ;;  %v2252_v52 = vshll.u32 %v10894_v21, 16  ;;  %v2258_v50 = vshll.u32 %v14038_v28, 16 }
  0xb4   : > { %12155 = vmatmul.mubr.msk.bf16.gmra.mrb[24].mxu0 %vm806_vm4, %v10801_v31  ;;  %v13999_v31 = vsel %vm13644_vm7, %v10991_v9, %v2983_v1  ;;  %v14045_v1 = vrot.slane %v2207_v44, 4  ;;  %v2217_v9 = vor.u32 %v2216_v13, %v14027_v3  ;;  %v10979_v44 = vld [vmem:[%s13461_s14 + $0xa8] sm:$0xe] }
  0xb5   : > { %12158 = vmatprep.mubr.msk.bf16.mxu0 %vm806_vm4, %v10802_v38  ;;  %17422 = vst [vmem:[#allocation4_spill] sm:$0xff] %v13999_v31  ;;  %v13276_v38 = vld [vmem:[%s13461_s14 + $0x84] sm:$0xff]  }
  0xb6   : > { %v14079_v13 = vrot.slane %v2217_v9, 4  ;;  %v13280_v9 = vld [vmem:[%s13461_s14 + $0xb4] sm:$0xff]  }
  0xbc   : > { %12159 = vmatmul.mubr.msk.bf16.gmra.mrb[28].mxu0 %vm806_vm4, %v10803_v6 }
  0xbd   : > { %12164 = vmatprep.mubr.msk.bf16.mxu0 %vm806_vm4, %v13266_v7  ;;  %v2196_v7 = vshll.u32 %v13993_v10, 16 }
  0xbf   : > { %v2198_v60 = vrot.slane %v2196_v7, 5  ;;  %v14063_v7 = vld [vmem:[%s13461_s14 + $0xac] sm:$0xf] }
  0xc0   : > { %v3011_v30 = vrot.slane %v14063_v7, 5 }
  0xc4   : > { %12165 = vmatmul.mubr.msk.bf16.vlgmr.msra.gmra.mrb[0].mxu0 %vm806_vm4, %v13267_v14  ;;  %v14012_v14 = vld [vmem:[%s13461_s14 + $0x20] sm:$0x1] }
  0xc5   : > { %12197 = vmatpush3.bf16.msra.mxu0 %v2659_v18  ;;  %12168 = vmatprep.mubr.msk.bf16.mxu0 %vm806_vm4, %v13268_v17  ;;  %v10891_v17 = vld [vmem:[%s13461_s14 + $0x24] sm:$0xf]  ;;  %v2183_v18 = vor.u32 %v2182_v42, %v2179_v15  ;;  %v14055_v42 = vld [vmem:[%s13461_s14 + $0x2c] sm:$0x1] }
  0xc6   : > { %13226 = vmatprep.subr.msk.bf16.mxu0 %vm855_vm0, %v13916_v20  ;;  %v2225_v26 = vshrl.u32 %v10891_v17, 16  ;;  %v2228_v37 = vshll.u32 %v10891_v17, 16  ;;  %v14066_v17 = vld [vmem:[%s13461_s14 + $0xb0] sm:$0x1] }
  0xc7   : > { %v2184_v43 = vrot.slane %v2183_v18, 4 }
  0xc8   : > { %v2227_v15 = vrot.slane %v2225_v26, 4  ;;  %v2230_v63 = vrot.slane %v2228_v37, 5  ;;  %v10897_v37 = vld [vmem:[%s13461_s14 + $0x3c] sm:$0xf] }
  0xc9   : > { %v2189_v18 = vsel %vm13496_vm3, %v2184_v43, %v13995_v0  ;;  %v13279_v43 = vld [vmem:[%s13461_s14 + $0xa8] sm:$0xff]  }
  0xca   : > { %v2231_v26 = vor.u32 %v2230_v63, %v2227_v15  ;;  %v2273_v63 = vshrl.u32 %v10897_v37, 16 }
  0xcc   : > { %12169 = vmatmul.mubr.msk.bf16.gmra.mrb[4].mxu0 %vm806_vm4, %v13269_v22  ;;  %v2193_v22 = vor.u32 %v2192_v47, %v13995_v0  ;;  %v2244_v0 = vshll.u32 %v14055_v42, 16 }
  0xcd   : > { %12172 = vmatprep.mubr.msk.bf16.mxu0 %vm806_vm4, %v13270_v23  ;;  %v14018_v23 = vld [vmem:[%s13461_s14 + $0x28] sm:$0xf] }
  0xce   : > { %v2234_v40 = vshll.u32 %v14018_v23, 16  ;;  %v2238_v48 = vshrl.u32 %v14018_v23, 16  ;;  %v2194_v58 = vrot.slane %v2193_v22, 4 }
  0xd0   : > { %v14057_v47 = vrot.slane %v2234_v40, 5  ;;  %v2240_v56 = vrot.slane %v2238_v48, 4  ;;  %v14084_v40 = vld [vmem:[%s13461_s14 + $0x40] sm:$0xf] }
  0xd2   : > { %v2241_v48 = vor.u32 %v2240_v56, %v14057_v47  ;;  %v2282_v56 = vshll.u32 %v14084_v40, 16 }
  0xd4   : > { %12173 = vmatmul.mubr.msk.bf16.gmra.mrb[8].mxu0 %vm806_vm4, %v13271_v32  ;;  %v2997_v32 = vrot.slane %v14021_v25, 5 }
  0xd5   : > { %12176 = vmatprep.mubr.msk.bf16.mxu0 %vm806_vm4, %v13272_v12  ;;  %v3000_v12 = vrot.slane %v14024_v29, 5 }
  0xd6   : > { %v14042_v49 = vsel %vm13644_vm7, %v10993_v46, %v2997_v32  ;;  %v10995_v46 = vrot.slane %v10979_v44, 9 }
  0xd7   : > { %17424 = vst [vmem:[#allocation6_spill] sm:$0xff] %v14042_v49 }
  0xdc   : > { %12177 = vmatmul.mubr.msk.bf16.gmra.mrb[12].mxu0 %vm806_vm4, %v13273_v39  ;;  %v2220_v39 = vshll.u32 %v14012_v14, 16 }
  0xdd   : > { %12180 = vmatprep.mubr.msk.bf16.mxu0 %vm806_vm4, %v13274_v45  ;;  %v2999_v45 = vrot.slane %v2997_v32, 4  ;;  %v3014_v32 = vrot.slane %v14066_v17, 5 }
  0xde   : > { %v14072_v22 = vrot.slane %v2220_v39, 5  ;;  %v2254_v39 = vrot.slane %v2252_v52, 5  ;;  %v10900_v52 = vld [vmem:[%s13461_s14 + $0x48] sm:$0xf] }
  0xdf   : > { %v14049_v59 = vsel %vm13644_vm7, %v2999_v45, %v3000_v12  ;;  %v2199_v12 = vsel %vm13496_vm3, %v2194_v58, %v2198_v60  ;;  %v3013_v45 = vrot.slane %v3011_v30, 4  ;;  %v2264_v58 = vrot.slane %v2262_v62, 4 }
  0xe0   : > { %17425 = vst [vmem:[#allocation7_spill] sm:$0xff] %v14049_v59  ;;  %v14095_v60 = vsel %vm13644_vm7, %v10995_v46, %v3011_v30  ;;  %v10934_v15 = vcombine.low %v2189_v18, %v2199_v12  ;;  %v2286_v62 = vshrl.u32 %v14084_v40, 16  ;;  %v2232_v30 = vrot.slane %v2231_v26, 4  ;;  %v14122_v26 = vld [vmem:[%s13461_s14 + $0xc8] sm:$0x1] }
  0xe1   : > { %17426 = vst [vmem:[#allocation8_spill] sm:$0xff] %v14095_v60  ;;  %v14101_v44 = vsel %vm13644_vm7, %v3013_v45, %v3014_v32  ;;  %v2246_v12 = vrot.slane %v2244_v0, 5  ;;  %v2297_v45 = vshrl.u32 %v10900_v52, 16  ;;  %v2275_v0 = vrot.slane %v2273_v63, 4 }
  0xe2   : > { %17427 = vst [vmem:[#allocation9_spill] sm:$0xff] %v14101_v44  ;;  %v2300_v18 = vshll.u32 %v10900_v52, 16  ;;  %v2306_v60 = vshll.u32 %v13926_v19, 16  ;;  %v14147_v52 = vld [vmem:[%s13461_s14 + $0x58] sm:$0xf] }
  0xe4   : > { %12181 = vmatmul.mubr.msk.bf16.gmra.mrb[16].mxu0 %vm806_vm4, %v13275_v8  ;;  %v14119_v8 = vld [vmem:[%s13461_s14 + $0xc4] sm:$0xf] }
  0xe5   : > { %12184 = vmatprep.mubr.msk.bf16.mxu0 %vm806_vm4, %v13276_v38  ;;  %v2249_v38 = vshrl.u32 %v10894_v21, 16  ;;  %v14089_v21 = vld [vmem:[%s13461_s14 + $0x38] sm:$0x1] }
  0xe6   : > { %v2268_v32 = vshll.u32 %v14089_v21, 16 }
  0xec   : > { %12185 = vmatmul.mubr.msk.bf16.gmra.mrb[20].mxu0 %vm806_vm4, %v13277_v33  ;;  %v2251_v33 = vrot.slane %v2249_v38, 4  ;;  %v2276_v38 = vshll.u32 %v10897_v37, 16 }
  0xed   : > { %12188 = vmatprep.mubr.msk.bf16.mxu0 %vm806_vm4, %v13278_v54  ;;  %v14091_v54 = vrot.slane %v2258_v50, 5  ;;  %v2213_v50 = vsel %vm13496_vm3, %v14045_v1, %v14027_v3  ;;  %v2223_v3 = vsel %vm13496_vm3, %v14079_v13, %v14072_v22  ;;  %v2242_v1 = vrot.slane %v2241_v48, 4  ;;  %v14129_v13 = vld [vmem:[%s13461_s14 + $0x44] sm:$0x1] }
  0xee   : > { %v2255_v37 = vor.u32 %v2254_v39, %v2251_v33  ;;  %v2278_v33 = vrot.slane %v2276_v38, 5  ;;  %v10981_v39 = vld [vmem:[%s13461_s14 + $0xc0] sm:$0xe]  ;;  %v3028_v22 = vrot.slane %v14122_v26, 5  ;;  %v14131_v48 = vrot.slane %v2282_v56, 5 }
  0xef   : > { %v2265_v46 = vor.u32 %v2264_v58, %v14091_v54  ;;  %v2288_v58 = vrot.slane %v2286_v62, 4  ;;  %v10997_v6 = vrot.slane %v10981_v39, 9  ;;  %v14139_v38 = vrot.slane %v2268_v32, 5  ;;  %v10903_v62 = vld [vmem:[%s13461_s14 + $0x54] sm:$0xf] }
  0xf0   : > { %v14137_v63 = vrot.slane %v2255_v37, 4  ;;  %v2247_v44 = vsel %vm13496_vm3, %v2242_v1, %v2246_v12  ;;  %v2310_v56 = vshrl.u32 %v13926_v19, 16  ;;  %v2292_v37 = vshll.u32 %v14129_v13, 16 }
  0xf1   : > { %v2289_v12 = vor.u32 %v2288_v58, %v14131_v48  ;;  %v2299_v1 = vrot.slane %v2297_v45, 4  ;;  %v2302_v19 = vrot.slane %v2300_v18, 5  ;;  %v14168_v45 = vrot.slane %v2306_v60, 5 }
  0xf2   : > { %v2312_v18 = vrot.slane %v2310_v56, 4  ;;  %v2261_v58 = vsel %vm13496_vm3, %v14137_v63, %v14091_v54  ;;  %v14188_v63 = vld [vmem:[%s13461_s14 + $0x70] sm:$0xf] }
  0xf3   : > { %v2290_v56 = vrot.slane %v2289_v12, 4  ;;  %v2358_v12 = vshrl.u32 %v13949_v5, 16 }
  0xf4   : > { %12189 = vmatmul.mubr.msk.bf16.gmra.mrb[24].mxu0 %vm806_vm4, %v13279_v43  ;;  %v3025_v43 = vrot.slane %v14119_v8, 5 }
  0xf5   : > { %12192 = vmatprep.mubr.msk.bf16.mxu0 %vm806_vm4, %v13280_v9  ;;  %v2237_v9 = vsel %vm13496_vm3, %v2232_v30, %v14057_v47  ;;  %v14153_v47 = vrot.slane %v2265_v46, 4  ;;  %v2279_v30 = vor.u32 %v2278_v33, %v2275_v0  ;;  %v2330_v46 = vshll.u32 %v14147_v52, 16 }
  0xf6   : > { %v3027_v16 = vrot.slane %v3025_v43, 4  ;;  %v14151_v39 = vsel %vm13644_vm7, %v10997_v6, %v3025_v43  ;;  %v2321_v6 = vshrl.u32 %v10903_v62, 16  ;;  %v2324_v43 = vshll.u32 %v10903_v62, 16 }
  0xf7   : > { %17428 = vst [vmem:[#allocation10_spill] sm:$0xff] %v14151_v39  ;;  %v2334_v0 = vshrl.u32 %v14147_v52, 16  ;;  %v3129_v33 = vsel %vm855_vm0, %v13916_v20, 0  ;;  %v10906_v20 = vld [vmem:[%s13461_s14 + $0x60] sm:$0xf]  ;;  %v2280_v60 = vrot.slane %v2279_v30, 4  ;;  %v2303_v62 = vor.u32 %v2302_v19, %v2299_v1 }
  0xf8   : > { %v14158_v32 = vsel %vm13644_vm7, %v3027_v16, %v3028_v22  ;;  %v10935_v16 = vcombine.low %v2213_v50, %v2223_v3  ;;  %v10936_v22 = vcombine.low %v2237_v9, %v2247_v44  ;;  %v2294_v50 = vrot.slane %v2292_v37, 5  ;;  %v14180_v3 = vld [vmem:[%s13461_s14 + $0x5c] sm:$0x1]  ;;  %v10909_v44 = vld [vmem:[%s13461_s14 + $0x6c] sm:$0xf] }
  0xf9   : > { %17429 = vst [vmem:[#allocation11_spill] sm:$0xff] %v14158_v32  ;;  %v2323_v9 = vrot.slane %v2321_v6, 4  ;;  %v2326_v59 = vrot.slane %v2324_v43, 5  ;;  %v14185_v32 = vrot.slane %v2330_v46, 5  ;;  %v2336_v54 = vrot.slane %v2334_v0, 4 }
  0xfa   : > { %v2313_v39 = vor.u32 %v2312_v18, %v14168_v45  ;;  %v2348_v37 = vshll.u32 %v10906_v20, 16  ;;  %v2354_v30 = vshll.u32 %v13949_v5, 16  ;;  %v2372_v1 = vshll.u32 %v10909_v44, 16  ;;  %v10912_v5 = vld [vmem:[%s13461_s14 + $0x78] sm:$0xf] }
  0xfb   : > { %v2285_v19 = vsel %vm13496_vm3, %v2280_v60, %v14131_v48  ;;  %v2295_v6 = vsel %vm13496_vm3, %v2290_v56, %v2294_v50  ;;  %v2378_v43 = vshll.u32 %v14188_v63, 16  ;;  %v2382_v46 = vshrl.u32 %v14188_v63, 16 }
  0xfc   : > { %12193 = vmatmul.mubr.msk.bf16.gmra.mrb[28].mxu0 %vm806_vm4, %v13281_v4  ;;  %v2271_v4 = vsel %vm13496_vm3, %v14153_v47, %v14139_v38  ;;  %v2340_v38 = vshll.u32 %v14180_v3, 16  ;;  %v2345_v47 = vshrl.u32 %v10906_v20, 16  ;;  %v2304_v0 = vrot.slane %v2303_v62, 4 }
  0xfd   : > { %12198 = vmatprep.mubr.msk.bf16.mxu0 %vm806_vm4, %v10934_v15  ;;  %v2316_v15 = vshll.u32 %v13929_v24, 16  ;;  %v2369_v24 = vshrl.u32 %v10909_v44, 16  ;;  %v2327_v20 = vor.u32 %v2326_v59, %v2323_v9  ;;  %v2337_v49 = vor.u32 %v2336_v54, %v14185_v32  ;;  %v14206_v44 = vld [vmem:[%s17313_s1 + $0x18] sm:$0xf]  ;;  %v14213_v54 = vld [vmem:[%s13461_s14 + $0x74] sm:$0x1] }
  0xfe   : > { %v2314_v48 = vrot.slane %v2313_v39, 4  ;;  %v2342_v50 = vrot.slane %v2340_v38, 5  ;;  %v2347_v60 = vrot.slane %v2345_v47, 4  ;;  %v2350_v56 = vrot.slane %v2348_v37, 5 }
  0xff   : > { %v2318_v18 = vrot.slane %v2316_v15, 5  ;;  %v14210_v62 = vrot.slane %v2354_v30, 5  ;;  %v2360_v59 = vrot.slane %v2358_v12, 4  ;;  %v2371_v15 = vrot.slane %v2369_v24, 4 }
 0x100   : > { %v2374_v9 = vrot.slane %v2372_v1, 5  ;;  %v14215_v57 = vrot.slane %v2378_v43, 5  ;;  %v2384_v31 = vrot.slane %v2382_v46, 4  ;;  %v2393_v61 = vshrl.u32 %v10912_v5, 16  ;;  %v10915_v46 = vld [vmem:[%s13461_s14 + $0x84] sm:$0xf] }
 0x101   : > { %v2396_v39 = vshll.u32 %v10912_v5, 16  ;;  %v2406_v38 = vshrl.u32 %v13979_v51, 16  ;;  %v10937_v47 = vcombine.low %v2261_v58, %v2271_v4  ;;  %v10938_v37 = vcombine.low %v2285_v19, %v2295_v6 }
 0x102   : > { %v2309_v30 = vsel %vm13496_vm3, %v2304_v0, %v14168_v45  ;;  %v2319_v12 = vsel %vm13496_vm3, %v2314_v48, %v2318_v18  ;;  %v2351_v24 = vor.u32 %v2350_v56, %v2347_v60  ;;  %v2361_v1 = vor.u32 %v2360_v59, %v14210_v62 }
 0x103   : > { %v2364_v43 = vshll.u32 %v13952_v36, 16  ;;  %v2385_v58 = vor.u32 %v2384_v31, %v14215_v57  ;;  %v2395_v4 = vrot.slane %v2393_v61, 4  ;;  %v2398_v19 = vrot.slane %v2396_v39, 5  ;;  %v10918_v39 = vld [vmem:[%s13461_s14 + $0x90] sm:$0xf] }
 0x104   : > { %12199 = vmatmul.mubr.msk.bf16.vlgmr.msra.gmra.mrb[0].mxu0 %vm806_vm4, %v10935_v16  ;;  %v2328_v16 = vrot.slane %v2327_v20, 4  ;;  %v14231_v20 = vld [vmem:[%s13461_s14 + $0x88] sm:$0xf]  ;;  %v2408_v36 = vrot.slane %v2406_v38, 4  ;;  %v2417_v18 = vshrl.u32 %v10915_v46, 16  ;;  %v2420_v5 = vshll.u32 %v10915_v46, 16 }
 0x105   : > { %12231 = vmatpush3.bf16.msra.mxu0 %v3129_v33  ;;  %12202 = vmatprep.mubr.msk.bf16.mxu0 %vm806_vm4, %v10936_v22  ;;  %v2338_v33 = vrot.slane %v2337_v49, 4  ;;  %v2402_v22 = vshll.u32 %v13979_v51, 16  ;;  %v2388_v49 = vshll.u32 %v14213_v54, 16  ;;  %v2375_v51 = vor.u32 %v2374_v9, %v2371_v15  ;;  %v14249_v38 = vld [vmem:[%s13461_s14 + $0x8c] sm:$0x1] }
 0x106   : > { %13227 = vmatprep.subr.msk.bf16.mxu0 %vm855_vm0, %v14206_v44  ;;  %v2333_v45 = vsel %vm13496_vm3, %v2328_v16, %v14185_v32  ;;  %v2426_v31 = vshll.u32 %v14231_v20, 16  ;;  %v2430_v61 = vshrl.u32 %v14231_v20, 16  ;;  %v2352_v48 = vrot.slane %v2351_v24, 4 }
 0x107   : > { %v2343_v6 = vsel %vm13496_vm3, %v2338_v33, %v2342_v50  ;;  %v14239_v0 = vrot.slane %v2402_v22, 5  ;;  %v2362_v32 = vrot.slane %v2361_v1, 4  ;;  %v2366_v60 = vrot.slane %v2364_v43, 5 }
 0x108   : > { %v2390_v56 = vrot.slane %v2388_v49, 5  ;;  %v2376_v50 = vrot.slane %v2375_v51, 4  ;;  %v2386_v59 = vrot.slane %v2385_v58, 4  ;;  %v2399_v15 = vor.u32 %v2398_v19, %v2395_v4 }
 0x109   : > { %v2412_v9 = vshll.u32 %v13982_v53, 16  ;;  %v10939_v16 = vcombine.low %v2309_v30, %v2319_v12  ;;  %v10940_v33 = vcombine.low %v2333_v45, %v2343_v6  ;;  %v2409_v22 = vor.u32 %v2408_v36, %v14239_v0  ;;  %v10921_v30 = vld [vmem:[%s13461_s14 + $0x9c] sm:$0xf]  ;;  %v14260_v12 = vld [vmem:[%s13461_s14 + $0xa0] sm:$0xf] }
 0x10a   : > { %v14251_v24 = vrot.slane %v2426_v31, 5  ;;  %v2432_v1 = vrot.slane %v2430_v61, 4  ;;  %v2357_v43 = vsel %vm13496_vm3, %v2352_v48, %v14210_v62  ;;  %v2367_v49 = vsel %vm13496_vm3, %v2362_v32, %v2366_v60 }
 0x10b   : > { %v2441_v53 = vshrl.u32 %v10918_v39, 16  ;;  %v2444_v46 = vshll.u32 %v10918_v39, 16  ;;  %v2381_v51 = vsel %vm13496_vm3, %v2376_v50, %v14215_v57  ;;  %v2391_v58 = vsel %vm13496_vm3, %v2386_v59, %v2390_v56 }
 0x10c   : > { %12203 = vmatmul.mubr.msk.bf16.gmra.mrb[4].mxu0 %vm806_vm4, %v10937_v47  ;;  %v2419_v47 = vrot.slane %v2417_v18, 4  ;;  %v2400_v4 = vrot.slane %v2399_v15, 4  ;;  %v2414_v19 = vrot.slane %v2412_v9, 5  ;;  %v2410_v45 = vrot.slane %v2409_v22, 4 }
 0x10d   : > { %12206 = vmatprep.mubr.msk.bf16.mxu0 %vm806_vm4, %v10938_v37  ;;  %v2422_v37 = vrot.slane %v2420_v5, 5  ;;  %v2436_v62 = vshll.u32 %v14249_v38, 16  ;;  %v2450_v6 = vshll.u32 %v14021_v25, 16  ;;  %v2454_v36 = vshrl.u32 %v14021_v25, 16 }
 0x10e   : > { %v2465_v18 = vshrl.u32 %v10921_v30, 16  ;;  %v2468_v5 = vshll.u32 %v10921_v30, 16  ;;  %v2474_v31 = vshll.u32 %v14260_v12, 16  ;;  %v2478_v57 = vshrl.u32 %v14260_v12, 16 }
 0x10f   : > { %v2423_v61 = vor.u32 %v2422_v37, %v2419_v47  ;;  %v2433_v48 = vor.u32 %v2432_v1, %v14251_v24  ;;  %v2443_v32 = vrot.slane %v2441_v53, 4  ;;  %v2446_v60 = vrot.slane %v2444_v46, 5  ;;  %v10924_v1 = vld [vmem:[%s13461_s14 + $0xa8] sm:$0xf] }
 0x110   : > { %v10941_v56 = vcombine.low %v2357_v43, %v2367_v49  ;;  %v10942_v50 = vcombine.low %v2381_v51, %v2391_v58  ;;  %v2405_v25 = vsel %vm13496_vm3, %v2400_v4, %v14239_v0  ;;  %v2415_v59 = vsel %vm13496_vm3, %v2410_v45, %v2414_v19  ;;  %v10927_v19 = vld [vmem:[%s13461_s14 + $0xb4] sm:$0xf]  ;;  %v14291_v45 = vld [vmem:[%s13461_s14 + $0xb8] sm:$0xf] }
 0x111   : > { %v2438_v15 = vrot.slane %v2436_v62, 5  ;;  %v14280_v9 = vrot.slane %v2450_v6, 5  ;;  %v2456_v39 = vrot.slane %v2454_v36, 4  ;;  %v2470_v22 = vrot.slane %v2468_v5, 5 }
 0x112   : > { %v2476_v47 = vrot.slane %v2474_v31, 5  ;;  %v2480_v37 = vrot.slane %v2478_v57, 4  ;;  %v2424_v43 = vrot.slane %v2423_v61, 4  ;;  %v2434_v49 = vrot.slane %v2433_v48, 4 }
 0x113   : > { %v2447_v53 = vor.u32 %v2446_v60, %v2443_v32  ;;  %v2460_v0 = vshll.u32 %v14024_v29, 16  ;;  %v10943_v30 = vcombine.low %v2405_v25, %v2415_v59  ;;  %v2457_v51 = vor.u32 %v2456_v39, %v14280_v9 }
 0x114   : > { %12207 = vmatmul.mubr.msk.bf16.gmra.mrb[8].mxu0 %vm806_vm4, %v10939_v16  ;;  %v14283_v16 = vld [vmem:[%s13461_s14 + $0xa4] sm:$0x1]  ;;  %v2489_v58 = vshrl.u32 %v10924_v1, 16  ;;  %v2492_v4 = vshll.u32 %v10924_v1, 16  ;;  %v2481_v6 = vor.u32 %v2480_v37, %v2476_v47  ;;  %v2498_v36 = vshll.u32 %v14063_v7, 16 }
 0x115   : > { %12210 = vmatprep.mubr.msk.bf16.mxu0 %vm806_vm4, %v10940_v33  ;;  %v2467_v33 = vrot.slane %v2465_v18, 4  ;;  %v2484_v46 = vshll.u32 %v14283_v16, 16  ;;  %v2502_v18 = vshrl.u32 %v14063_v7, 16  ;;  %v2429_v29 = vsel %vm13496_vm3, %v2424_v43, %v14251_v24 }
 0x116   : > { %v2439_v5 = vsel %vm13496_vm3, %v2434_v49, %v2438_v15  ;;  %v2448_v31 = vrot.slane %v2447_v53, 4  ;;  %v2462_v57 = vrot.slane %v2460_v0, 5  ;;  %v2513_v61 = vshrl.u32 %v10927_v19, 16  ;;  %v10930_v49 = vld [vmem:[%s13461_s14 + $0xc0] sm:$0xf] }
 0x117   : > { %v2471_v62 = vor.u32 %v2470_v22, %v2467_v33  ;;  %v2516_v48 = vshll.u32 %v10927_v19, 16  ;;  %v2522_v32 = vshll.u32 %v14291_v45, 16  ;;  %v2526_v60 = vshrl.u32 %v14291_v45, 16 }
 0x118   : > { %v2486_v7 = vrot.slane %v2484_v46, 5  ;;  %v2494_v25 = vrot.slane %v2492_v4, 5  ;;  %v2482_v39 = vrot.slane %v2481_v6, 4  ;;  %v2500_v24 = vrot.slane %v2498_v36, 5 }
 0x119   : > { %v2472_v59 = vrot.slane %v2471_v62, 4  ;;  %v2504_v33 = vrot.slane %v2502_v18, 4  ;;  %v10944_v22 = vcombine.low %v2429_v29, %v2439_v5  ;;  %v2515_v15 = vrot.slane %v2513_v61, 4 }
 0x11a   : > { %v2518_v37 = vrot.slane %v2516_v48, 5  ;;  %v2524_v1 = vrot.slane %v2522_v32, 5  ;;  %v2528_v43 = vrot.slane %v2526_v60, 4  ;;  %v2453_v53 = vsel %vm13496_vm3, %v2448_v31, %v14280_v9 }
 0x11b   : > { %v2487_v4 = vsel %vm13496_vm3, %v2482_v39, %v2486_v7  ;;  %v2505_v19 = vor.u32 %v2504_v33, %v2500_v24  ;;  %v2508_v62 = vshll.u32 %v14066_v17, 16  ;;  %v2537_v9 = vshrl.u32 %v10930_v49, 16 }
 0x11c   : > { %12211 = vmatmul.mubr.msk.bf16.gmra.mrb[12].mxu0 %vm806_vm4, %v10941_v56  ;;  %v2458_v56 = vrot.slane %v2457_v51, 4  ;;  %v14311_v51 = vld [vmem:[%s13461_s14 + $0xbc] sm:$0x1]  ;;  %v2540_v6 = vshll.u32 %v10930_v49, 16  ;;  %v2546_v36 = vshll.u32 %v14119_v8, 16  ;;  %v2550_v18 = vshrl.u32 %v14119_v8, 16 }
 0x11d   : > { %12214 = vmatprep.mubr.msk.bf16.mxu0 %vm806_vm4, %v10942_v50  ;;  %v2491_v50 = vrot.slane %v2489_v58, 4  ;;  %v2477_v58 = vsel %vm13496_vm3, %v2472_v59, %v2476_v47  ;;  %v2519_v29 = vor.u32 %v2518_v37, %v2515_v15  ;;  %v2529_v5 = vor.u32 %v2528_v43, %v2524_v1  ;;  %v10966_v49 = vld [vmem:[%s13461_s14 + $0xc] sm:$0xe] }
 0x11e   : > { %v2463_v0 = vsel %vm13496_vm3, %v2458_v56, %v2462_v57  ;;  %v10946_v47 = vcombine.low %v2477_v58, %v2487_v4  ;;  %v2506_v61 = vrot.slane %v2505_v19, 4  ;;  %v2510_v48 = vrot.slane %v2508_v62, 5 }
 0x11f   : > { %v2495_v46 = vor.u32 %v2494_v25, %v2491_v50  ;;  %v10945_v31 = vcombine.low %v2453_v53, %v2463_v0  ;;  %v2539_v32 = vrot.slane %v2537_v9, 4  ;;  %v2542_v60 = vrot.slane %v2540_v6, 5 }
 0x120   : > { %v2548_v17 = vrot.slane %v2546_v36, 5  ;;  %v2552_v56 = vrot.slane %v2550_v18, 4  ;;  %v2520_v7 = vrot.slane %v2519_v29, 4  ;;  %v2530_v50 = vrot.slane %v2529_v5, 4  ;;  %v10967_v36 = vld [vmem:[%s13461_s14 + $0x18] sm:$0xe] }
 0x121   : > { %v2496_v57 = vrot.slane %v2495_v46, 4  ;;  %v2511_v59 = vsel %vm13496_vm3, %v2506_v61, %v2510_v48  ;;  %v2543_v39 = vor.u32 %v2542_v60, %v2539_v32  ;;  %v2920_v43 = vrot.slane %v13966_v55, 5  ;;  %v10968_v18 = vld [vmem:[%s13461_s14 + $0x24] sm:$0xe] }
 0x122   : > { %v2553_v33 = vor.u32 %v2552_v56, %v2548_v17  ;;  %v2525_v15 = vsel %vm13496_vm3, %v2520_v7, %v2524_v1  ;;  %v10982_v4 = vrot.slane %v10966_v49, 9  ;;  %v2927_v62 = vrot.slane %v13989_v2, 5  ;;  %v10970_v56 = vld [vmem:[%s13461_s14 + $0x3c] sm:$0xe] }
 0x123   : > { %v2501_v8 = vsel %vm13496_vm3, %v2496_v57, %v2500_v24  ;;  %v2544_v0 = vrot.slane %v2543_v39, 4  ;;  %v2922_v19 = vrot.slane %v2920_v43, 4  ;;  %v10984_v57 = vrot.slane %v10968_v18, 9 }
 0x124   : > { %12215 = vmatmul.mubr.msk.bf16.gmra.mrb[16].mxu0 %vm806_vm4, %v10943_v30  ;;  %v2532_v30 = vshll.u32 %v14311_v51, 16  ;;  %v10947_v24 = vcombine.low %v2501_v8, %v2511_v59  ;;  %v2554_v46 = vrot.slane %v2553_v33, 4  ;;  %v2921_v9 = vsel %vm13644_vm7, %v10982_v4, %v2920_v43  ;;  %v10972_v43 = vld [vmem:[%s13461_s14 + $0x54] sm:$0xe] }
 0x125   : > { %12218 = vmatprep.mubr.msk.bf16.mxu0 %vm806_vm4, %v10944_v22  ;;  %v2556_v22 = vshll.u32 %v14122_v26, 16  ;;  %v2923_v26 = vrot.slane %v13993_v10, 5  ;;  %v2549_v1 = vsel %vm13496_vm3, %v2544_v0, %v2548_v17  ;;  %v2934_v10 = vrot.slane %v14018_v23, 5  ;;  %v10969_v17 = vld [vmem:[%s13461_s14 + $0x30] sm:$0xe] }
 0x126   : > { %v2534_v25 = vrot.slane %v2532_v30, 5  ;;  %v10983_v30 = vrot.slane %v10967_v36, 9  ;;  %v2937_v61 = vrot.slane %v14055_v42, 5  ;;  %v2941_v32 = vrot.slane %v14038_v28, 5  ;;  %v10976_v36 = vld [vmem:[%s13461_s14 + $0x84] sm:$0xe] }
 0x127   : > { %v2558_v58 = vrot.slane %v2556_v22, 5  ;;  %v2924_v6 = vsel %vm13644_vm7, %v2922_v19, %v2923_v26  ;;  %v2936_v2 = vrot.slane %v2934_v10, 4  ;;  %v2935_v60 = vsel %vm13644_vm7, %v10984_v57, %v2934_v10  ;;  %v10974_v19 = vld [vmem:[%s13461_s14 + $0x6c] sm:$0xe] }
 0x128   : > { %v2535_v37 = vsel %vm13496_vm3, %v2530_v50, %v2534_v25  ;;  %v10999_v5 = vcombine.low %v2921_v9, %v2924_v6  ;;  %v2928_v23 = vsel %vm13644_vm7, %v10983_v30, %v2927_v62  ;;  %v2948_v42 = vrot.slane %v14084_v40, 5 }
 0x129   : > { %v10948_v53 = vcombine.low %v2525_v15, %v2535_v37  ;;  %v2559_v55 = vsel %vm13496_vm3, %v2554_v46, %v2558_v58  ;;  %v10985_v25 = vrot.slane %v10969_v17, 9  ;;  %v2943_v8 = vrot.slane %v2941_v32, 4  ;;  %v14374_v15 = vld [vmem:[%s17313_s1 + $0x1c] sm:$0xf] }
 0x12a   : > { %v10949_v29 = vcombine.low %v2549_v1, %v2559_v55  ;;  %v2944_v59 = vrot.slane %v14089_v21, 5  ;;  %v3488_v28 = vsel %vm855_vm0, %v14206_v44, 0  ;;  %v10986_v39 = vrot.slane %v10970_v56, 9  ;;  %v17436_v56 = vld [vmem:[#allocation6_spill] sm:$0xff] }
 0x12b   : > { %v2950_v33 = vrot.slane %v2948_v42, 4  ;;  %v2951_v22 = vrot.slane %v14129_v13, 5  ;;  %v2942_v40 = vsel %vm13644_vm7, %v10985_v25, %v2941_v32  ;;  %v2962_v37 = vrot.slane %v14147_v52, 5 }
 0x12c   : > { %12219 = vmatmul.mubr.msk.bf16.gmra.mrb[20].mxu0 %vm806_vm4, %v10945_v31  ;;  %v2929_v31 = vrot.slane %v2927_v62, 4  ;;  %v2945_v21 = vsel %vm13644_vm7, %v2943_v8, %v2944_v59  ;;  %v2949_v13 = vsel %vm13644_vm7, %v10986_v39, %v2948_v42  ;;  %v2965_v46 = vrot.slane %v14180_v3, 5  ;;  %v17439_v59 = vld [vmem:[#allocation8_spill] sm:$0xff] }
 0x12d   : > { %12222 = vmatprep.mubr.msk.bf16.mxu0 %vm806_vm4, %v10946_v47  ;;  %v2930_v47 = vrot.slane %v14012_v14, 5  ;;  %v2938_v14 = vsel %vm13644_vm7, %v2936_v2, %v2937_v61  ;;  %v2952_v44 = vsel %vm13644_vm7, %v2950_v33, %v2951_v22  ;;  %v11002_v49 = vcombine.low %v2942_v40, %v2945_v21  ;;  %v17434_v61 = vld [vmem:[#allocation5_spill] sm:$0xff]  ;;  %v17442_v40 = vld [vmem:[#allocation10_spill] sm:$0xff]  ;;  %v17443_v21 = vld [vmem:[#allocation11_spill] sm:$0xff] }
 0x12e   : > { %v11001_v50 = vcombine.low %v2935_v60, %v2938_v14  ;;  %v2964_v0 = vrot.slane %v2962_v37, 4  ;;  %v2976_v4 = vrot.slane %v14188_v63, 5  ;;  %v10990_v1 = vrot.slane %v10974_v19, 9  ;;  %v10980_v60 = vld [vmem:[%s13461_s14 + $0xb4] sm:$0xe] }
 0x12f   : > { %v2931_v48 = vsel %vm13644_vm7, %v2929_v31, %v2930_v47  ;;  %v2979_v62 = vrot.slane %v14213_v54, 5  ;;  %v17430_v3 = vcombine.low %v13938_v11, %v13943_v34  ;;  %v2990_v6 = vrot.slane %v14231_v20, 5  ;;  %v17431_v11 = vld [vmem:[#allocation3_spill] sm:$0xff]  ;;  %v13339_v33 = vld [vmem:[%s13461_s14 + $0x6c] sm:$0xf] }
 0x130   : > { %v11000_v7 = vcombine.low %v2928_v23, %v2931_v48  ;;  %v2966_v52 = vsel %vm13644_vm7, %v2964_v0, %v2965_v46  ;;  %v2978_v55 = vrot.slane %v2976_v4, 4  ;;  %v2977_v9 = vsel %vm13644_vm7, %v10990_v1, %v2976_v4  ;;  %v10978_v31 = vld [vmem:[%s13461_s14 + $0x9c] sm:$0xe]  ;;  %v11100_v4 = vld [vmem:[%s13461_s14 + $0x28] sm:$0xf] }
 0x131   : > { %v10992_v18 = vrot.slane %v10976_v36, 9  ;;  %v2992_v54 = vrot.slane %v2990_v6, 4  ;;  %v17432_v34 = vcombine.low %v13962_v41, %v17431_v11  ;;  %v3004_v30 = vrot.slane %v14260_v12, 5  ;;  %v17433_v41 = vld [vmem:[#allocation4_spill] sm:$0xff] }
 0x132   : > { %v2980_v63 = vsel %vm13644_vm7, %v2978_v55, %v2979_v62  ;;  %v10994_v57 = vrot.slane %v10978_v31, 9  ;;  %v3007_v2 = vrot.slane %v14283_v16, 5  ;;  %v17435_v23 = vcombine.low %v17433_v41, %v17434_v61  ;;  %v14469_v62 = vld [vmem:[%s13461_s14 + $0x7c] sm:$0xf] }
 0x133   : > { %v11007_v10 = vcombine.low %v2977_v9, %v2980_v63  ;;  %v3018_v32 = vrot.slane %v14291_v45, 5  ;;  %v10996_v14 = vrot.slane %v10980_v60, 9  ;;  %v3021_v42 = vrot.slane %v14311_v51, 5  ;;  %v13282_v51 = vld [vmem:[%s13461_s14 + $0x18] sm:$0xff]   ;;  %v13283_v9 = vld [vmem:[%s13461_s14 + $0x24] sm:$0xff]  }
 0x134   : > { %12223 = vmatmul.mubr.msk.bf16.gmra.mrb[24].mxu0 %vm806_vm4, %v10947_v24  ;;  %v11003_v24 = vcombine.low %v2949_v13, %v2952_v44  ;;  %v3005_v48 = vsel %vm13644_vm7, %v10994_v57, %v3004_v30  ;;  %v589_v22 = vshrl.u32 %v13339_v33, 16  ;;  %v17444_v13 = vcombine.low %v17442_v40, %v17443_v21  ;;  %v11096_v44 = vld [vmem:[%s13461_s14 + $0x18] sm:$0xf]  ;;  %v14484_v57 = vld [vmem:[%s17313_s1 + $0x20] sm:$0xf] }
 0x135   : > { %12226 = vmatprep.mubr.msk.bf16.mxu0 %vm806_vm4, %v10948_v53  ;;  %v10988_v53 = vrot.slane %v10972_v43, 9  ;;  %v3020_v17 = vrot.slane %v3018_v32, 4  ;;  %v3019_v45 = vsel %vm13644_vm7, %v10996_v14, %v3018_v32  ;;  %v592_v43 = vshll.u32 %v13339_v33, 16  ;;  %v13345_v61 = vld [vmem:[%s13461_s14 + $0x9c] sm:$0xf] }
 0x136   : > { %v3732_v0 = vshrl.u32 %v11096_v44, 16  ;;  %v3735_v46 = vshll.u32 %v11096_v44, 16  ;;  %v14465_v19 = vrot.slane %v589_v22, 4  ;;  %v4214_v11 = vsel %vm855_vm0, %v14374_v15, 0  ;;  %v14499_v14 = vld [vmem:[%s13461_s14 + $0x94] sm:$0xf] }
 0x137   : > { %v2963_v58 = vsel %vm13644_vm7, %v10988_v53, %v2962_v37  ;;  %v3022_v25 = vsel %vm13644_vm7, %v3020_v17, %v3021_v42  ;;  %v11097_v37 = vld [vmem:[%s13461_s14 + $0x1c] sm:$0xf]  ;;  %v11099_v53 = vld [vmem:[%s13461_s14 + $0x24] sm:$0xf]  ;;  %v14473_v63 = vrot.slane %v592_v43, 5  ;;  %v688_v42 = vshll.u32 %v13345_v61, 16 }
 0x138   : > { %v11005_v26 = vcombine.low %v2963_v58, %v2966_v52  ;;  %v11013_v8 = vcombine.low %v3019_v45, %v3022_v25  ;;  %v3741_v58 = vshll.u32 %v11097_v37, 16  ;;  %v3745_v52 = vshrl.u32 %v11097_v37, 16  ;;  %v14524_v22 = vld [vmem:[%s13461_s14 + $0xa0] sm:$0xf]  ;;  %v13286_v43 = vld [vmem:[%s13461_s14 + $0x48] sm:$0xff]  }
 0x139   : > { %v13285_v21 = vld [vmem:[%s13461_s14 + $0x3c] sm:$0xff]  }
 0x13a   : > { %v14479_v31 = vrot.slane %v3741_v58, 5  ;;  %v14534_v58 = vld [vmem:[%s13461_s14 + $0xac] sm:$0xf] }
 0x13c   : > { %12227 = vmatmul.mubr.msk.bf16.gmra.mrb[28].mxu0 %vm806_vm4, %v10949_v29  ;;  %v2993_v29 = vrot.slane %v14249_v38, 5  ;;  %v3006_v38 = vrot.slane %v3004_v30, 4  ;;  %v3737_v30 = vrot.slane %v3735_v46, 5  ;;  %v14531_v46 = vrot.slane %v688_v42, 5 }
 0x13d   : > { %12232 = vmatprep.mubr.msk.bf16.mxu0 %vm806_vm4, %v10999_v5  ;;  %v2991_v5 = vsel %vm13644_vm7, %v10992_v18, %v2990_v6  ;;  %v13343_v6 = vld [vmem:[%s13461_s14 + $0x84] sm:$0xf]  ;;  %v3756_v18 = vshrl.u32 %v11099_v53, 16 }
 0x13e   : > { %v2994_v20 = vsel %vm13644_vm7, %v2992_v54, %v2993_v29  ;;  %v3008_v12 = vsel %vm13644_vm7, %v3006_v38, %v3007_v2  ;;  %v637_v36 = vshrl.u32 %v13343_v6, 16  ;;  %v3759_v54 = vshll.u32 %v11099_v53, 16  ;;  %v13344_v2 = vld [vmem:[%s13461_s14 + $0x90] sm:$0xf] }
 0x13f   : > { %v11009_v47 = vcombine.low %v2991_v5, %v2994_v20  ;;  %v11011_v16 = vcombine.low %v3005_v48, %v3008_v12  ;;  %v640_v29 = vshll.u32 %v13343_v6, 16  ;;  %v3769_v5 = vshrl.u32 %v11100_v4, 16  ;;  %v14494_v12 = vld [vmem:[%s13461_s14 + $0x88] sm:$0xf] }
 0x140   : > { %v3734_v20 = vrot.slane %v3732_v0, 4  ;;  %v661_v41 = vshrl.u32 %v13344_v2, 16  ;;  %v3758_v60 = vrot.slane %v3756_v18, 4  ;;  %v14509_v45 = vrot.slane %v637_v36, 4  ;;  %v14543_v18 = vld [vmem:[%s13461_s14 + $0x34] sm:$0xf] }
 0x141   : > { %v14511_v25 = vrot.slane %v640_v29, 5  ;;  %v14549_v29 = vld [vmem:[%s13461_s14 + $0x5c] sm:$0x1] }
 0x144   : > { %12233 = vmatmul.mubr.msk.bf16.vlgmr.msra.gmra.mrb[0].mxu0 %vm806_vm4, %v11000_v7  ;;  %v17437_v7 = vld [vmem:[#allocation7_spill] sm:$0xff] }
 0x145   : > { %12265 = vmatpush3.bf16.msra.mxu0 %v3488_v28  ;;  %12236 = vmatprep.mubr.msk.bf16.mxu0 %vm806_vm4, %v11001_v50  ;;  %v17438_v50 = vcombine.low %v17436_v56, %v17437_v7  ;;  %v17440_v28 = vld [vmem:[#allocation9_spill] sm:$0xff]  ;;  %v14503_v56 = vld [vmem:[%s13461_s14 + $0x20] sm:$0x1] }
 0x146   : > { %13228 = vmatprep.subr.msk.bf16.mxu0 %vm855_vm0, %v14374_v15  ;;  %v17441_v39 = vcombine.low %v17439_v59, %v17440_v28  ;;  %v664_v15 = vshll.u32 %v13344_v2, 16  ;;  %v14515_v28 = vld [vmem:[%s13461_s14 + $0x2c] sm:$0x1]  ;;  %v3751_v53 = vshll.u32 %v14503_v56, 16 }
 0x14c   : > { %12237 = vmatmul.mubr.msk.bf16.gmra.mrb[4].mxu0 %vm806_vm4, %v11002_v49  ;;  %v14460_v49 = vld [vmem:[%s13461_s14 + $0x70] sm:$0xf] }
 0x14d   : > { %12240 = vmatprep.mubr.msk.bf16.mxu0 %vm806_vm4, %v11003_v24  ;;  %v602_v24 = vshrl.u32 %v14460_v49, 16 }
 0x154   : > { %12241 = vmatmul.mubr.msk.bf16.gmra.mrb[8].mxu0 %vm806_vm4, %v17430_v3  ;;  %v13290_v3 = vld [vmem:[%s13461_s14 + $0x78] sm:$0xff]  }
 0x155   : > { %12244 = vmatprep.mubr.msk.bf16.mxu0 %vm806_vm4, %v11005_v26  ;;  %v13341_v26 = vld [vmem:[%s13461_s14 + $0x78] sm:$0xf] }
 0x156   : > { %v613_v1 = vshrl.u32 %v13341_v26, 16  ;;  %v616_v55 = vshll.u32 %v13341_v26, 16  ;;  %v3775_v26 = vshll.u32 %v14515_v28, 16 }
 0x158   : > { %v14486_v38 = vrot.slane %v613_v1, 4  ;;  %v14491_v48 = vrot.slane %v616_v55, 5  ;;  %v13351_v1 = vld [vmem:[%s13461_s14 + $0xb4] sm:$0xf]  ;;  %v3777_v2 = vrot.slane %v3775_v26, 5 }
 0x159   : > { %v733_v55 = vshrl.u32 %v13351_v1, 16 }
 0x15c   : > { %12245 = vmatmul.mubr.msk.bf16.gmra.mrb[12].mxu0 %vm806_vm4, %v17432_v34  ;;  %v3765_v34 = vshll.u32 %v11100_v4, 16 }
 0x15d   : > { %12248 = vmatprep.mubr.msk.bf16.mxu0 %vm806_vm4, %v11007_v10  ;;  %v13284_v10 = vld [vmem:[%s13461_s14 + $0x30] sm:$0xff]  }
 0x15e   : > { %v14507_v7 = vrot.slane %v3765_v34, 5 }
 0x164   : > { %12249 = vmatmul.mubr.msk.bf16.gmra.mrb[16].mxu0 %vm806_vm4, %v17435_v23  ;;  %v685_v23 = vshrl.u32 %v13345_v61, 16 }
 0x165   : > { %12252 = vmatprep.mubr.msk.bf16.mxu0 %vm806_vm4, %v11009_v47  ;;  %v3747_v47 = vrot.slane %v3745_v52, 4  ;;  %v13289_v52 = vld [vmem:[%s13461_s14 + $0x6c] sm:$0xff]  }
 0x166   : > { %v14521_v33 = vrot.slane %v685_v23, 4 }
 0x167   : > { %v3748_v59 = vor.u32 %v3747_v47, %v14479_v31 }
 0x169   : > { %v3749_v36 = vrot.slane %v3748_v59, 4 }
 0x16c   : > { %12253 = vmatmul.mubr.msk.bf16.gmra.mrb[20].mxu0 %vm806_vm4, %v17438_v50  ;;  %v3771_v50 = vrot.slane %v3769_v5, 4  ;;  %v11182_v5 = vld [vmem:[%s13461_s14 + $0x54] sm:$0xe] }
 0x16d   : > { %12256 = vmatprep.mubr.msk.bf16.mxu0 %vm806_vm4, %v11011_v16  ;;  %v3761_v16 = vrot.slane %v3759_v54, 5  ;;  %v14546_v54 = vld [vmem:[%s13461_s14 + $0x58] sm:$0xf] }
 0x16e   : > { %v3772_v4 = vor.u32 %v3771_v50, %v14507_v7  ;;  %v14560_v50 = vrot.slane %v733_v55, 4 }
 0x16f   : > { %v3762_v0 = vor.u32 %v3761_v16, %v3758_v60  ;;  %v3789_v60 = vshll.u32 %v14543_v18, 16 }
 0x170   : > { %v3773_v47 = vrot.slane %v3772_v4, 4  ;;  %v14583_v4 = vld [vmem:[%s13461_s14 + $0x40] sm:$0xf] }
 0x171   : > { %v3763_v34 = vrot.slane %v3762_v0, 4 }
 0x172   : > { %v3778_v55 = vsel %vm13496_vm3, %v3773_v47, %v3777_v2  ;;  %v11184_v2 = vld [vmem:[%s13461_s14 + $0x6c] sm:$0xe] }
 0x174   : > { %12257 = vmatmul.mubr.msk.bf16.gmra.mrb[24].mxu0 %vm806_vm4, %v17441_v39  ;;  %v14517_v39 = vrot.slane %v661_v41, 4 }
 0x175   : > { %12260 = vmatprep.mubr.msk.bf16.mxu0 %vm806_vm4, %v11013_v8  ;;  %v3738_v8 = vor.u32 %v3737_v30, %v3734_v20  ;;  %v4510_v20 = vrot.slane %v14546_v54, 5  ;;  %v4513_v30 = vrot.slane %v14549_v29, 5 }
 0x177   : > { %v3739_v6 = vrot.slane %v3738_v8, 4  ;;  %v4512_v16 = vrot.slane %v4510_v20, 4  ;;  %v14563_v8 = vld [vmem:[%s13461_s14 + $0xb8] sm:$0xf] }
 0x179   : > { %v14587_v26 = vsel %vm13644_vm7, %v4512_v16, %v4513_v30  ;;  %v14609_v30 = vld [vmem:[%s13461_s14 + $0x74] sm:$0x1]  ;;  %v14620_v16 = vsel %vm855_vm0, %v14484_v57, 0 }
 0x17a   : > { %17445 = vst [vmem:[#allocation3_spill] sm:$0xff] %v14587_v26 }
 0x17c   : > { %12261 = vmatmul.mubr.msk.bf16.gmra.mrb[28].mxu0 %vm806_vm4, %v17444_v13  ;;  %v13349_v13 = vld [vmem:[%s13461_s14 + $0xa8] sm:$0xf] }
 0x17d   : > { %12266 = vmatprep.mubr.msk.bf16.mxu0 %vm806_vm4, %v13282_v51  ;;  %v14519_v51 = vrot.slane %v664_v15, 5  ;;  %v709_v44 = vshrl.u32 %v13349_v13, 16  ;;  %v712_v37 = vshll.u32 %v13349_v13, 16  ;;  %v11198_v15 = vrot.slane %v11182_v5, 9  ;;  %v14568_v13 = vld [vmem:[%s13461_s14 + $0x3c] sm:$0xf] }
 0x17e   : > { %v3813_v5 = vshll.u32 %v14583_v4, 16 }
 0x17f   : > { %v14555_v61 = vrot.slane %v709_v44, 4  ;;  %v14558_v42 = vrot.slane %v712_v37, 5  ;;  %v3744_v37 = vsel %vm13496_vm3, %v3739_v6, %v14479_v31 }
 0x184   : > { %12267 = vmatmul.mubr.msk.bf16.vlgmr.msra.gmra.mrb[0].mxu0 %vm806_vm4, %v13283_v9  ;;  %v736_v9 = vshll.u32 %v13351_v1, 16  ;;  %v3768_v1 = vsel %vm13496_vm3, %v3763_v34, %v14507_v7  ;;  %v3807_v34 = vshll.u32 %v14568_v13, 16 }
 0x185   : > { %12299 = vmatpush3.bf16.msra.mxu0 %v4214_v11  ;;  %12270 = vmatprep.mubr.msk.bf16.mxu0 %vm806_vm4, %v13284_v10  ;;  %v11102_v10 = vld [vmem:[%s13461_s14 + $0x30] sm:$0xf]  ;;  %v3753_v11 = vrot.slane %v3751_v53, 5  ;;  %v13288_v53 = vld [vmem:[%s13461_s14 + $0x60] sm:$0xff]   ;;  %v14612_v47 = vcombine.low %v3768_v1, %v3778_v55 }
 0x186   : > { %13229 = vmatprep.subr.msk.bf16.mxu0 %vm855_vm0, %v14484_v57  ;;  %v3780_v41 = vshrl.u32 %v11102_v10, 16  ;;  %v3783_v23 = vshll.u32 %v11102_v10, 16  ;;  %v14574_v44 = vrot.slane %v736_v9, 5  ;;  %v3793_v10 = vshrl.u32 %v14543_v18, 16 }
 0x187   : > { %v3754_v0 = vsel %vm13496_vm3, %v3749_v36, %v3753_v11  ;;  %v14596_v36 = vrot.slane %v3789_v60, 5  ;;  %v3804_v11 = vshrl.u32 %v14568_v13, 16  ;;  %v11200_v13 = vrot.slane %v11184_v2, 9 }
 0x188   : > { %v3782_v31 = vrot.slane %v3780_v41, 4  ;;  %v3785_v6 = vrot.slane %v3783_v23, 5  ;;  %v14601_v7 = vcombine.low %v3744_v37, %v3754_v0  ;;  %v13353_v23 = vld [vmem:[%s13461_s14 + $0x60] sm:$0xf]  ;;  %v14627_v40 = vrot.slane %v3793_v10, 4 }
 0x189   : > { %v565_v60 = vshrl.u32 %v13353_v23, 16  ;;  %v568_v37 = vshll.u32 %v13353_v23, 16 }
 0x18a   : > { %v3786_v1 = vor.u32 %v3785_v6, %v3782_v31  ;;  %v13355_v6 = vld [vmem:[%s13461_s14 + $0x68] sm:$0x1] }
 0x18b   : > { %v567_v9 = vrot.slane %v565_v60, 4  ;;  %v570_v57 = vrot.slane %v568_v37, 5  ;;  %v584_v60 = vshll.u32 %v13355_v6, 16  ;;  %v14649_v6 = vrot.slane %v3804_v11, 4  ;;  %v14662_v11 = vld [vmem:[%s13461_s14 + $0x44] sm:$0x1] }
 0x18c   : > { %12271 = vmatmul.mubr.msk.bf16.gmra.mrb[4].mxu0 %vm806_vm4, %v13285_v21  ;;  %v13287_v21 = vld [vmem:[%s13461_s14 + $0x54] sm:$0xff]  }
 0x18d   : > { %12274 = vmatprep.mubr.msk.bf16.mxu0 %vm806_vm4, %v13286_v43  ;;  %v14572_v43 = vsel %vm13644_vm7, %v11198_v15, %v4510_v20  ;;  %v14606_v20 = vld [vmem:[%s13461_s14 + $0x70] sm:$0xf]  ;;  %v4527_v15 = vrot.slane %v14609_v30, 5 }
 0x18e   : > { %v4524_v41 = vrot.slane %v14606_v20, 5 }
 0x190   : > { %v4526_v55 = vrot.slane %v4524_v41, 4  ;;  %v14631_v17 = vsel %vm13644_vm7, %v11200_v13, %v4524_v41  ;;  %v595_v41 = vor.u32 %v14473_v63, %v14465_v19  ;;  %v598_v13 = vshll.u32 %v14460_v49, 16 }
 0x191   : > { %17446 = vst [vmem:[#allocation4_spill] sm:$0xff] %v14631_v17  ;;  %v14652_v63 = vrot.slane %v3786_v1, 4  ;;  %v14656_v49 = vrot.slane %v3813_v5, 5 }
 0x192   : > { %v14637_v23 = vsel %vm13644_vm7, %v4526_v55, %v4527_v15  ;;  %v604_v15 = vrot.slane %v602_v24, 4  ;;  %v600_v19 = vrot.slane %v598_v13, 5  ;;  %v14671_v13 = vld [vmem:[%s13461_s14 + $0x8c] sm:$0x1] }
 0x193   : > { %17447 = vst [vmem:[#allocation5_spill] sm:$0xff] %v14637_v23 }
 0x194   : > { %12275 = vmatmul.mubr.msk.bf16.gmra.mrb[8].mxu0 %vm806_vm4, %v13287_v21  ;;  %v14623_v21 = vld [vmem:[%s13461_s14 + $0x38] sm:$0x1]  ;;  %v605_v1 = vor.u32 %v604_v15, %v600_v19  ;;  %v13292_v15 = vld [vmem:[%s13461_s14 + $0x90] sm:$0xff]  }
 0x195   : > { %12278 = vmatprep.mubr.msk.bf16.mxu0 %vm806_vm4, %v13288_v53  ;;  %v13354_v53 = vld [vmem:[%s13461_s14 + $0x64] sm:$0xf]  ;;  %v3799_v2 = vshll.u32 %v14623_v21, 16 }
 0x196   : > { %v574_v0 = vshll.u32 %v13354_v53, 16  ;;  %v578_v59 = vshrl.u32 %v13354_v53, 16  ;;  %v571_v53 = vor.u32 %v570_v57, %v567_v9  ;;  %v596_v57 = vrot.slane %v595_v41, 4 }
 0x197   : > { %v606_v17 = vrot.slane %v605_v1, 4  ;;  %v13357_v1 = vld [vmem:[%s13461_s14 + $0x80] sm:$0x1]  ;;  %v14695_v26 = vrot.slane %v3799_v2, 5  ;;  %v646_v2 = vshll.u32 %v14494_v12, 16 }
 0x198   : > { %v576_v32 = vrot.slane %v574_v0, 5  ;;  %v580_v31 = vrot.slane %v578_v59, 4  ;;  %v586_v0 = vrot.slane %v584_v60, 5  ;;  %v13356_v59 = vld [vmem:[%s13461_s14 + $0x74] sm:$0x1]  ;;  %v572_v9 = vrot.slane %v571_v53, 4 }
 0x199   : > { %v608_v55 = vshll.u32 %v13356_v59, 16  ;;  %v11186_v60 = vld [vmem:[%s13461_s14 + $0x84] sm:$0xe]  ;;  %v14665_v53 = vld [vmem:[%s13461_s14 + $0x88] sm:$0xf]  ;;  %v601_v23 = vsel %vm13496_vm3, %v596_v57, %v600_v19  ;;  %v622_v19 = vshll.u32 %v14469_v62, 16 }
 0x19a   : > { %v581_v37 = vor.u32 %v580_v31, %v576_v32  ;;  %v14654_v31 = vrot.slane %v3807_v34, 5  ;;  %v3817_v34 = vshrl.u32 %v14583_v4, 16  ;;  %v13291_v59 = vld [vmem:[%s13461_s14 + $0x84] sm:$0xff]  }
 0x19b   : > { %v610_v41 = vrot.slane %v608_v55, 5  ;;  %v3823_v55 = vshll.u32 %v14662_v11, 16 }
 0x19c   : > { %12279 = vmatmul.mubr.msk.bf16.gmra.mrb[12].mxu0 %vm806_vm4, %v13289_v52  ;;  %v582_v24 = vrot.slane %v581_v37, 4  ;;  %v3796_v52 = vor.u32 %v14627_v40, %v14596_v36  ;;  %v11202_v37 = vrot.slane %v11186_v60, 9  ;;  %v4538_v40 = vrot.slane %v14665_v53, 5 }
 0x19d   : > { %12282 = vmatprep.mubr.msk.bf16.mxu0 %vm806_vm4, %v13290_v3  ;;  %v577_v3 = vsel %vm13496_vm3, %v572_v9, %v576_v32  ;;  %v4541_v32 = vrot.slane %v14671_v13, 5  ;;  %v611_v57 = vsel %vm13496_vm3, %v606_v17, %v610_v41  ;;  %v17448_v60 = vshrl.u32 %v14469_v62, 16  ;;  %v13294_v62 = vld [vmem:[%s13461_s14 + $0xa8] sm:$0xff]  }
 0x19e   : > { %v587_v5 = vsel %vm13496_vm3, %v582_v24, %v586_v0  ;;  %v14684_v9 = vsel %vm13644_vm7, %v11202_v37, %v4538_v40  ;;  %v4540_v0 = vrot.slane %v4538_v40, 4  ;;  %v619_v24 = vor.u32 %v14491_v48, %v14486_v38  ;;  %v11108_v48 = vld [vmem:[%s13461_s14 + $0x48] sm:$0xf] }
 0x19f   : > { %v10715_v10 = vcombine.low %v577_v3, %v587_v5  ;;  %v628_v3 = vrot.slane %v17448_v60, 4  ;;  %v632_v5 = vshll.u32 %v13357_v1, 16  ;;  %v10716_v37 = vcombine.low %v601_v23, %v611_v57 }
 0x1a0   : > { %v14699_v40 = vsel %vm13644_vm7, %v4540_v0, %v4541_v32  ;;  %v643_v38 = vor.u32 %v14511_v25, %v14509_v45  ;;  %v620_v17 = vrot.slane %v619_v24, 4  ;;  %v3810_v23 = vor.u32 %v14654_v31, %v14649_v6  ;;  %v14720_v24 = vld [vmem:[%s13461_s14 + $0x4c] sm:$0xf] }
 0x1a1   : > { %12078 = vmatprep.mubr.msk.bf16.mxu1 %vm806_vm4, %v10715_v10  ;;  %v624_v10 = vrot.slane %v622_v19, 5  ;;  %v17449_v45 = vshrl.u32 %v14494_v12, 16  ;;  %v3792_v0 = vsel %vm13496_vm3, %v14652_v63, %v14596_v36  ;;  %v634_v57 = vrot.slane %v632_v5, 5  ;;  %v13293_v12 = vld [vmem:[%s13461_s14 + $0x9c] sm:$0xff]  }
 0x1a2   : > { %12079 = vmatmul.mubr.msk.bf16.vlgmr.msra.gmra.mrb[0].mxu1 %vm806_vm4, %v10716_v37  ;;  %v644_v41 = vrot.slane %v643_v38, 4  ;;  %v648_v19 = vrot.slane %v646_v2, 5  ;;  %v3797_v6 = vrot.slane %v3796_v52, 4  ;;  %v3819_v31 = vrot.slane %v3817_v34, 4 }
 0x1a3   : > { %v652_v25 = vrot.slane %v17449_v45, 4  ;;  %v14722_v60 = vrot.slane %v3823_v55, 5  ;;  %v3828_v1 = vshrl.u32 %v11108_v48, 16  ;;  %v625_v37 = vsel %vm13496_vm3, %v620_v17, %v624_v10 }
 0x1a4   : > { %12283 = vmatmul.mubr.msk.bf16.gmra.mrb[16].mxu0 %vm806_vm4, %v13291_v59  ;;  %v13358_v59 = vld [vmem:[%s13461_s14 + $0x8c] sm:$0x1]  ;;  %v14728_v36 = vrot.slane %v3810_v23, 4  ;;  %v3831_v63 = vshll.u32 %v11108_v48, 16  ;;  %v649_v52 = vsel %vm13496_vm3, %v644_v41, %v648_v19  ;;  %v667_v5 = vor.u32 %v14519_v51, %v14517_v39  ;;  %v11111_v51 = vld [vmem:[%s13461_s14 + $0x54] sm:$0xf] }
 0x1a5   : > { %12286 = vmatprep.mubr.msk.bf16.mxu0 %vm806_vm4, %v13292_v15  ;;  %v656_v32 = vshll.u32 %v13358_v59, 16  ;;  %v629_v15 = vor.u32 %v628_v3, %v624_v10  ;;  %v653_v45 = vor.u32 %v652_v25, %v648_v19  ;;  %v3837_v3 = vshll.u32 %v14720_v24, 16 }
 0x1a6   : > { %v670_v17 = vshll.u32 %v14499_v14, 16  ;;  %v3802_v10 = vsel %vm13496_vm3, %v3797_v6, %v14695_v26  ;;  %v3820_v48 = vor.u32 %v3819_v31, %v14656_v49  ;;  %v17450_v23 = vshrl.u32 %v14499_v14, 16 }
 0x1a7   : > { %v630_v38 = vrot.slane %v629_v15, 4  ;;  %v658_v59 = vrot.slane %v656_v32, 5  ;;  %v654_v55 = vrot.slane %v653_v45, 4  ;;  %v14745_v25 = vrot.slane %v3828_v1, 4 }
 0x1a8   : > { %v676_v41 = vrot.slane %v17450_v23, 4  ;;  %v3841_v39 = vshrl.u32 %v14720_v24, 16  ;;  %v668_v15 = vrot.slane %v667_v5, 4  ;;  %v672_v14 = vrot.slane %v670_v17, 5  ;;  %v13296_v17 = vld [vmem:[%s13461_s14 + $0xc0] sm:$0xff]  }
 0x1a9   : > { %v635_v34 = vsel %vm13496_vm3, %v630_v38, %v634_v57  ;;  %v659_v32 = vsel %vm13496_vm3, %v654_v55, %v658_v59  ;;  %v13359_v57 = vld [vmem:[%s13461_s14 + $0x98] sm:$0x1]  ;;  %v691_v6 = vor.u32 %v14531_v46, %v14521_v33  ;;  %v14756_v31 = vrot.slane %v3831_v63, 5  ;;  %v13360_v38 = vld [vmem:[%s13461_s14 + $0xa4] sm:$0x1] }
 0x1aa   : > { %v10717_v2 = vcombine.low %v625_v37, %v635_v34  ;;  %v10718_v26 = vcombine.low %v649_v52, %v659_v32  ;;  %v680_v19 = vshll.u32 %v13359_v57, 16  ;;  %v694_v1 = vshll.u32 %v14524_v22, 16  ;;  %v14765_v59 = vld [vmem:[%s13461_s14 + $0x50] sm:$0x1]  ;;  %v13295_v33 = vld [vmem:[%s13461_s14 + $0xb4] sm:$0xff]  }
 0x1ab   : > { %v14762_v45 = vcombine.low %v3792_v0, %v3802_v10  ;;  %v3852_v52 = vshrl.u32 %v11111_v51, 16  ;;  %v677_v34 = vor.u32 %v676_v41, %v672_v14  ;;  %v3816_v46 = vsel %vm13496_vm3, %v14728_v36, %v14656_v49 }
 0x1ac   : > { %12287 = vmatmul.mubr.msk.bf16.gmra.mrb[20].mxu0 %vm806_vm4, %v13293_v12  ;;  %12082 = vmatprep.mubr.msk.bf16.mxu1 %vm806_vm4, %v10717_v2  ;;  %v17451_v12 = vshrl.u32 %v14524_v22, 16  ;;  %v682_v55 = vrot.slane %v680_v19, 5  ;;  %v14773_v63 = vrot.slane %v3820_v48, 4  ;;  %v692_v22 = vrot.slane %v691_v6, 4 }
 0x1ad   : > { %12290 = vmatprep.mubr.msk.bf16.mxu0 %vm806_vm4, %v13294_v62  ;;  %v704_v62 = vshll.u32 %v13360_v38, 16  ;;  %12083 = vmatmul.mubr.msk.bf16.gmra.mrb[4].mxu1 %vm806_vm4, %v10718_v26  ;;  %v696_v5 = vrot.slane %v694_v1, 5  ;;  %v14776_v0 = vrot.slane %v3837_v3, 5  ;;  %v3843_v10 = vrot.slane %v3841_v39, 4 }
 0x1ae   : > { %v700_v37 = vrot.slane %v17451_v12, 4  ;;  %v673_v2 = vsel %vm13496_vm3, %v668_v15, %v672_v14  ;;  %v678_v23 = vrot.slane %v677_v34, 4  ;;  %v3834_v41 = vor.u32 %v14756_v31, %v14745_v25  ;;  %v11114_v34 = vld [vmem:[%s13461_s14 + $0x60] sm:$0xf] }
 0x1af   : > { %v3847_v32 = vshll.u32 %v14765_v59, 16  ;;  %v706_v57 = vrot.slane %v704_v62, 5  ;;  %v14783_v19 = vrot.slane %v3852_v52, 4  ;;  %v3855_v48 = vshll.u32 %v11111_v51, 16  ;;  %v13361_v62 = vld [vmem:[%s13461_s14 + $0xb0] sm:$0x1] }
 0x1b0   : > { %v701_v26 = vor.u32 %v700_v37, %v696_v5  ;;  %v683_v6 = vsel %vm13496_vm3, %v678_v23, %v682_v55  ;;  %v715_v3 = vor.u32 %v14558_v42, %v14555_v61  ;;  %v697_v25 = vsel %vm13496_vm3, %v692_v22, %v696_v5  ;;  %v13297_v5 = vld [vmem:[%s13461_s14 + $0xcc] sm:$0xff]  }
 0x1b1   : > { %v10719_v39 = vcombine.low %v673_v2, %v683_v6  ;;  %v718_v14 = vshll.u32 %v14534_v58, 16  ;;  %v3844_v51 = vor.u32 %v3843_v10, %v14776_v0  ;;  %v3861_v31 = vshll.u32 %v14546_v54, 16  ;;  %v14811_v10 = vld [vmem:[%s13461_s14 + $0x64] sm:$0xf] }
 0x1b2   : > { %v702_v15 = vrot.slane %v701_v26, 4  ;;  %v3865_v61 = vshrl.u32 %v14546_v54, 16  ;;  %v17452_v42 = vshrl.u32 %v14534_v58, 16  ;;  %v716_v37 = vrot.slane %v715_v3, 4  ;;  %v13362_v26 = vld [vmem:[%s13461_s14 + $0xbc] sm:$0x1] }
 0x1b3   : > { %12086 = vmatprep.mubr.msk.bf16.mxu1 %vm806_vm4, %v10719_v39  ;;  %v720_v38 = vrot.slane %v718_v14, 5  ;;  %v728_v52 = vshll.u32 %v13361_v62, 16  ;;  %v742_v54 = vshll.u32 %v14563_v8, 16  ;;  %v17453_v58 = vshrl.u32 %v14563_v8, 16  ;;  %v14831_v62 = vld [vmem:[%s13461_s14 + $0x68] sm:$0x1] }
 0x1b4   : > { %12291 = vmatmul.mubr.msk.bf16.gmra.mrb[24].mxu0 %vm806_vm4, %v13295_v33  ;;  %v724_v1 = vrot.slane %v17452_v42, 4  ;;  %v707_v12 = vsel %vm13496_vm3, %v702_v15, %v706_v57  ;;  %v739_v33 = vor.u32 %v14574_v44, %v14560_v50  ;;  %v752_v57 = vshll.u32 %v13362_v26, 16 }
 0x1b5   : > { %12294 = vmatprep.mubr.msk.bf16.mxu0 %vm806_vm4, %v13296_v17  ;;  %v10720_v55 = vcombine.low %v697_v25, %v707_v12  ;;  %v748_v22 = vrot.slane %v17453_v58, 4  ;;  %v3857_v17 = vrot.slane %v3855_v48, 5  ;;  %v730_v23 = vrot.slane %v728_v52, 5  ;;  %v11117_v52 = vld [vmem:[%s13461_s14 + $0x6c] sm:$0xf] }
 0x1b6   : > { %v725_v2 = vor.u32 %v724_v1, %v720_v38  ;;  %v14814_v6 = vrot.slane %v3861_v31, 5  ;;  %v3867_v3 = vrot.slane %v3865_v61, 4  ;;  %v740_v39 = vrot.slane %v739_v33, 4 }
 0x1b7   : > { %12087 = vmatmul.mubr.msk.bf16.gmra.mrb[8].mxu1 %vm806_vm4, %v10720_v55  ;;  %v744_v50 = vrot.slane %v742_v54, 5  ;;  %v3876_v44 = vshrl.u32 %v11114_v34, 16  ;;  %v3879_v8 = vshll.u32 %v11114_v34, 16  ;;  %v721_v48 = vsel %vm13496_vm3, %v716_v37, %v720_v38  ;;  %v11120_v54 = vld [vmem:[%s13461_s14 + $0x78] sm:$0xf] }
 0x1b8   : > { %v726_v25 = vrot.slane %v725_v2, 4  ;;  %v3885_v15 = vshll.u32 %v14811_v10, 16  ;;  %v3889_v14 = vshrl.u32 %v14811_v10, 16  ;;  %v754_v31 = vrot.slane %v752_v57, 5 }
 0x1b9   : > { %v749_v42 = vor.u32 %v748_v22, %v744_v50  ;;  %v3826_v61 = vsel %vm13496_vm3, %v14773_v63, %v14722_v60  ;;  %v3835_v1 = vrot.slane %v3834_v41, 4  ;;  %v3849_v12 = vrot.slane %v3847_v32, 5 }
 0x1ba   : > { %v731_v37 = vsel %vm13496_vm3, %v726_v25, %v730_v23  ;;  %v3845_v38 = vrot.slane %v3844_v51, 4  ;;  %v745_v55 = vsel %vm13496_vm3, %v740_v39, %v744_v50  ;;  %v3858_v60 = vor.u32 %v3857_v17, %v14783_v19  ;;  %v14843_v51 = vld [vmem:[%s13461_s14 + $0x7c] sm:$0xf] }
 0x1bb   : > { %v10721_v34 = vcombine.low %v721_v48, %v731_v37  ;;  %v750_v33 = vrot.slane %v749_v42, 4  ;;  %v3868_v63 = vor.u32 %v3867_v3, %v14814_v6  ;;  %v3871_v41 = vshll.u32 %v14549_v29, 16 }
 0x1bc   : > { %12295 = vmatmul.mubr.msk.bf16.gmra.mrb[28].mxu0 %vm806_vm4, %v13297_v5  ;;  %v3878_v32 = vrot.slane %v3876_v44, 4  ;;  %v3881_v58 = vrot.slane %v3879_v8, 5  ;;  %v14840_v22 = vrot.slane %v3885_v15, 5  ;;  %v3895_v2 = vshll.u32 %v14831_v62, 16 }
 0x1bd   : > { %12300 = vmatprep.mubr.msk.bf16.mxu0 %vm806_vm4, %v14601_v7  ;;  %v3891_v7 = vrot.slane %v3889_v14, 4  ;;  %12090 = vmatprep.mubr.msk.bf16.mxu1 %vm806_vm4, %v10721_v34  ;;  %v755_v5 = vsel %vm13496_vm3, %v750_v33, %v754_v31  ;;  %v3900_v19 = vshrl.u32 %v11117_v52, 16  ;;  %v3903_v17 = vshll.u32 %v11117_v52, 16  ;;  %v11123_v14 = vld [vmem:[%s13461_s14 + $0x84] sm:$0xf] }
 0x1be   : > { %v10722_v23 = vcombine.low %v745_v55, %v755_v5  ;;  %v3909_v29 = vshll.u32 %v14606_v20, 16  ;;  %v3913_v26 = vshrl.u32 %v14606_v20, 16  ;;  %v3924_v57 = vshrl.u32 %v11120_v54, 16  ;;  %v14869_v34 = vld [vmem:[%s13461_s14 + $0x80] sm:$0x1] }
 0x1bf   : > { %v3927_v3 = vshll.u32 %v11120_v54, 16  ;;  %v3840_v39 = vsel %vm13496_vm3, %v3835_v1, %v14776_v0  ;;  %v3850_v50 = vsel %vm13496_vm3, %v3845_v38, %v3849_v12  ;;  %v3933_v44 = vshll.u32 %v14843_v51, 16 }
 0x1c0   : > { %v3937_v8 = vshrl.u32 %v14843_v51, 16  ;;  %12091 = vmatmul.mubr.msk.bf16.gmra.mrb[12].mxu1 %vm806_vm4, %v10722_v23  ;;  %v3859_v48 = vrot.slane %v3858_v60, 4  ;;  %v3873_v25 = vrot.slane %v3871_v41, 5  ;;  %v3882_v15 = vor.u32 %v3881_v58, %v3878_v32  ;;  %v14890_v23 = vld [vmem:[%s13461_s14 + $0x94] sm:$0xf] }
 0x1c1   : > { %v3892_v20 = vor.u32 %v3891_v7, %v14840_v22  ;;  %v3869_v0 = vrot.slane %v3868_v63, 4  ;;  %v3897_v42 = vrot.slane %v3895_v2, 5  ;;  %v3902_v31 = vrot.slane %v3900_v19, 4 }
 0x1c2   : > { %v3905_v1 = vrot.slane %v3903_v17, 5  ;;  %v14866_v12 = vrot.slane %v3909_v29, 5  ;;  %v3915_v37 = vrot.slane %v3913_v26, 4  ;;  %v3926_v38 = vrot.slane %v3924_v57, 4  ;;  %v11126_v17 = vld [vmem:[%s13461_s14 + $0x90] sm:$0xf] }
 0x1c3   : > { %v3929_v52 = vrot.slane %v3927_v3, 5  ;;  %v14871_v55 = vrot.slane %v3933_v44, 5  ;;  %v3948_v33 = vshrl.u32 %v11123_v14, 16  ;;  %v3951_v60 = vshll.u32 %v11123_v14, 16 }
 0x1c4   : > { %12301 = vmatmul.mubr.msk.bf16.vlgmr.msra.gmra.mrb[0].mxu0 %vm806_vm4, %v14612_v47  ;;  %v3939_v47 = vrot.slane %v3937_v8, 4  ;;  %v3883_v63 = vrot.slane %v3882_v15, 4  ;;  %v3893_v41 = vrot.slane %v3892_v20, 4  ;;  %v11148_v32 = vcombine.low %v3816_v46, %v3826_v61 }
 0x1c5   : > { %12333 = vmatpush3.bf16.msra.mxu0 %v14620_v16  ;;  %12304 = vmatprep.mubr.msk.bf16.mxu0 %vm806_vm4, %v14762_v45  ;;  %v3957_v16 = vshll.u32 %v14665_v53, 16  ;;  %v3961_v45 = vshrl.u32 %v14665_v53, 16  ;;  %v11149_v54 = vcombine.low %v3840_v39, %v3850_v50  ;;  %v3864_v58 = vsel %vm13496_vm3, %v3859_v48, %v14814_v6 }
 0x1c6   : > { %v3874_v7 = vsel %vm13496_vm3, %v3869_v0, %v3873_v25  ;;  %v3906_v5 = vor.u32 %v3905_v1, %v3902_v31  ;;  %v3916_v2 = vor.u32 %v3915_v37, %v14866_v12  ;;  %v3919_v19 = vshll.u32 %v14609_v30, 16  ;;  %v11129_v0 = vld [vmem:[%s13461_s14 + $0x9c] sm:$0xf]  ;;  %v14908_v37 = vld [vmem:[%s13461_s14 + $0xa0] sm:$0xf] }
 0x1c7   : > { %v3943_v53 = vshll.u32 %v14869_v34, 16  ;;  %v3930_v49 = vor.u32 %v3929_v52, %v3926_v38  ;;  %v3940_v36 = vor.u32 %v3939_v47, %v14871_v55  ;;  %v3950_v46 = vrot.slane %v3948_v33, 4  ;;  %v14911_v38 = vld [vmem:[%s13461_s14 + $0x98] sm:$0x1] }
 0x1c8   : > { %v3953_v61 = vrot.slane %v3951_v60, 5  ;;  %v3888_v6 = vsel %vm13496_vm3, %v3883_v63, %v14840_v22  ;;  %v3898_v29 = vsel %vm13496_vm3, %v3893_v41, %v3897_v42  ;;  %v14898_v26 = vrot.slane %v3957_v16, 5 }
 0x1c9   : > { %v3963_v30 = vrot.slane %v3961_v45, 4  ;;  %v3972_v57 = vshrl.u32 %v11126_v17, 16  ;;  %v3975_v3 = vshll.u32 %v11126_v17, 16  ;;  %v3981_v39 = vshll.u32 %v14890_v23, 16  ;;  %v11132_v45 = vld [vmem:[%s13461_s14 + $0xa8] sm:$0xf] }
 0x1ca   : > { %v3985_v50 = vshrl.u32 %v14890_v23, 16  ;;  %v3907_v22 = vrot.slane %v3906_v5, 4  ;;  %v3917_v44 = vrot.slane %v3916_v2, 4  ;;  %v3921_v8 = vrot.slane %v3919_v19, 5 }
 0x1cb   : > { %v3945_v48 = vrot.slane %v3943_v53, 5  ;;  %v3931_v25 = vrot.slane %v3930_v49, 4  ;;  %v3941_v15 = vrot.slane %v3940_v36, 4  ;;  %v3954_v20 = vor.u32 %v3953_v61, %v3950_v46 }
 0x1cc   : > { %12305 = vmatmul.mubr.msk.bf16.gmra.mrb[4].mxu0 %vm806_vm4, %v11148_v32  ;;  %v3967_v14 = vshll.u32 %v14671_v13, 16  ;;  %v11150_v42 = vcombine.low %v3864_v58, %v3874_v7  ;;  %v11151_v31 = vcombine.low %v3888_v6, %v3898_v29  ;;  %v3964_v1 = vor.u32 %v3963_v30, %v14898_v26  ;;  %v14922_v32 = vld [vmem:[%s13461_s14 + $0xac] sm:$0xf] }
 0x1cd   : > { %12308 = vmatprep.mubr.msk.bf16.mxu0 %vm806_vm4, %v11149_v54  ;;  %v3974_v52 = vrot.slane %v3972_v57, 4  ;;  %v3977_v47 = vrot.slane %v3975_v3, 5  ;;  %v14913_v33 = vrot.slane %v3981_v39, 5  ;;  %v3987_v60 = vrot.slane %v3985_v50, 4  ;;  %v14941_v39 = vld [vmem:[%s13461_s14 + $0xa4] sm:$0x1] }
 0x1ce   : > { %v3912_v63 = vsel %vm13496_vm3, %v3907_v22, %v14866_v12  ;;  %v3922_v13 = vsel %vm13496_vm3, %v3917_v44, %v3921_v8  ;;  %v3996_v41 = vshrl.u32 %v11129_v0, 16  ;;  %v3999_v16 = vshll.u32 %v11129_v0, 16 }
 0x1cf   : > { %v3936_v54 = vsel %vm13496_vm3, %v3931_v25, %v14871_v55  ;;  %v3946_v58 = vsel %vm13496_vm3, %v3941_v15, %v3945_v48  ;;  %v3955_v7 = vrot.slane %v3954_v20, 4  ;;  %v3969_v5 = vrot.slane %v3967_v14, 5  ;;  %v14948_v48 = vld [vmem:[%s13461_s14 + $0xb0] sm:$0x1] }
 0x1d0   : > { %v3965_v2 = vrot.slane %v3964_v1, 4  ;;  %v3991_v12 = vshll.u32 %v14911_v38, 16  ;;  %v4005_v19 = vshll.u32 %v14908_v37, 16  ;;  %v4009_v53 = vshrl.u32 %v14908_v37, 16 }
 0x1d1   : > { %v4020_v17 = vshrl.u32 %v11132_v45, 16  ;;  %v4023_v49 = vshll.u32 %v11132_v45, 16  ;;  %v4029_v55 = vshll.u32 %v14922_v32, 16  ;;  %v4033_v36 = vshrl.u32 %v14922_v32, 16  ;;  %v14961_v45 = vld [vmem:[%s13461_s14 + $0xc4] sm:$0xf] }
 0x1d2   : > { %v3978_v46 = vor.u32 %v3977_v47, %v3974_v52  ;;  %v3988_v61 = vor.u32 %v3987_v60, %v14913_v33  ;;  %v3998_v6 = vrot.slane %v3996_v41, 4  ;;  %v4001_v29 = vrot.slane %v3999_v16, 5  ;;  %v14955_v52 = vld [vmem:[%s13461_s14 + $0xb8] sm:$0xf]  ;;  %v11138_v16 = vld [vmem:[%s13461_s14 + $0xc0] sm:$0xf] }
 0x1d3   : > { %v11152_v30 = vcombine.low %v3912_v63, %v3922_v13  ;;  %v11153_v57 = vcombine.low %v3936_v54, %v3946_v58  ;;  %v3960_v3 = vsel %vm13496_vm3, %v3955_v7, %v14898_v26  ;;  %v3970_v50 = vsel %vm13496_vm3, %v3965_v2, %v3969_v5  ;;  %v11135_v26 = vld [vmem:[%s13461_s14 + $0xb4] sm:$0xf] }
 0x1d4   : > { %12309 = vmatmul.mubr.msk.bf16.gmra.mrb[8].mxu0 %vm806_vm4, %v11150_v42  ;;  %v3993_v22 = vrot.slane %v3991_v12, 5  ;;  %v14945_v44 = vrot.slane %v4005_v19, 5  ;;  %v4011_v8 = vrot.slane %v4009_v53, 4  ;;  %v4022_v25 = vrot.slane %v4020_v17, 4 }
 0x1d5   : > { %12312 = vmatprep.mubr.msk.bf16.mxu0 %vm806_vm4, %v11151_v31  ;;  %v4025_v15 = vrot.slane %v4023_v49, 5  ;;  %v14950_v20 = vrot.slane %v4029_v55, 5  ;;  %v4035_v14 = vrot.slane %v4033_v36, 4  ;;  %v3979_v0 = vrot.slane %v3978_v46, 4 }
 0x1d6   : > { %v3989_v42 = vrot.slane %v3988_v61, 4  ;;  %v4002_v31 = vor.u32 %v4001_v29, %v3998_v6  ;;  %v4015_v1 = vshll.u32 %v14941_v39, 16  ;;  %v4039_v47 = vshll.u32 %v14948_v48, 16 }
 0x1d7   : > { %v11154_v60 = vcombine.low %v3960_v3, %v3970_v50  ;;  %v4012_v63 = vor.u32 %v4011_v8, %v14945_v44  ;;  %v4044_v13 = vshrl.u32 %v11135_v26, 16  ;;  %v4047_v41 = vshll.u32 %v11135_v26, 16  ;;  %v11141_v8 = vld [vmem:[%s13461_s14 + $0xcc] sm:$0xf] }
 0x1d8   : > { %v4026_v54 = vor.u32 %v4025_v15, %v4022_v25  ;;  %v4036_v58 = vor.u32 %v4035_v14, %v14950_v20  ;;  %v4053_v7 = vshll.u32 %v14955_v52, 16  ;;  %v4057_v5 = vshrl.u32 %v14955_v52, 16 }
 0x1d9   : > { %v3984_v2 = vsel %vm13496_vm3, %v3979_v0, %v14913_v33  ;;  %v3994_v12 = vsel %vm13496_vm3, %v3989_v42, %v3993_v22  ;;  %v4003_v19 = vrot.slane %v4002_v31, 4  ;;  %v4017_v53 = vrot.slane %v4015_v1, 5  ;;  %v14976_v22 = vld [vmem:[%s13461_s14 + $0xbc] sm:$0x1]  ;;  %v14980_v0 = vld [vmem:[%s13461_s14 + $0xd0] sm:$0xf] }
 0x1da   : > { %v4068_v17 = vshrl.u32 %v11138_v16, 16  ;;  %v4071_v49 = vshll.u32 %v11138_v16, 16  ;;  %v4077_v55 = vshll.u32 %v14961_v45, 16  ;;  %v4081_v36 = vshrl.u32 %v14961_v45, 16 }
 0x1db   : > { %v4013_v46 = vrot.slane %v4012_v63, 4  ;;  %v4041_v61 = vrot.slane %v4039_v47, 5  ;;  %v4046_v6 = vrot.slane %v4044_v13, 4  ;;  %v4049_v29 = vrot.slane %v4047_v41, 5  ;;  %v14988_v47 = vld [vmem:[%s13461_s14 + $0xc8] sm:$0x1] }
 0x1dc   : > { %12313 = vmatmul.mubr.msk.bf16.gmra.mrb[12].mxu0 %vm806_vm4, %v11152_v30  ;;  %v4027_v33 = vrot.slane %v4026_v54, 4  ;;  %v4037_v30 = vrot.slane %v4036_v58, 4  ;;  %v4059_v3 = vrot.slane %v4057_v5, 4  ;;  %v11155_v50 = vcombine.low %v3984_v2, %v3994_v12 }
 0x1dd   : > { %12316 = vmatprep.mubr.msk.bf16.mxu0 %vm806_vm4, %v11153_v57  ;;  %v4055_v57 = vrot.slane %v4053_v7, 5  ;;  %v4070_v25 = vrot.slane %v4068_v17, 4  ;;  %v4073_v15 = vrot.slane %v4071_v49, 5  ;;  %v4079_v14 = vrot.slane %v4077_v55, 5 }
 0x1de   : > { %v4083_v26 = vrot.slane %v4081_v36, 4  ;;  %v4008_v42 = vsel %vm13496_vm3, %v4003_v19, %v14945_v44  ;;  %v4018_v31 = vsel %vm13496_vm3, %v4013_v46, %v4017_v53  ;;  %v4050_v1 = vor.u32 %v4049_v29, %v4046_v6 }
 0x1df   : > { %v4032_v63 = vsel %vm13496_vm3, %v4027_v33, %v14950_v20  ;;  %v4042_v13 = vsel %vm13496_vm3, %v4037_v30, %v4041_v61  ;;  %v4060_v41 = vor.u32 %v4059_v3, %v4055_v57  ;;  %v4063_v16 = vshll.u32 %v14976_v22, 16  ;;  %v15002_v33 = vld [vmem:[%s13461_s14 + $0xd4] sm:$0x1] }
 0x1e0   : > { %v4092_v44 = vshrl.u32 %v11141_v8, 16  ;;  %v4095_v54 = vshll.u32 %v11141_v8, 16  ;;  %v4101_v58 = vshll.u32 %v14980_v0, 16  ;;  %v4105_v7 = vshrl.u32 %v14980_v0, 16 }
 0x1e1   : > { %v4084_v5 = vor.u32 %v4083_v26, %v4079_v14  ;;  %v4087_v2 = vshll.u32 %v14988_v47, 16  ;;  %v11156_v20 = vcombine.low %v4008_v42, %v4018_v31  ;;  %v11157_v12 = vcombine.low %v4032_v63, %v4042_v13  ;;  %v13363_v42 = vld [vmem:[%s13461_s14 + $0x1c] sm:$0xf] }
 0x1e2   : > { %v4051_v19 = vrot.slane %v4050_v1, 4  ;;  %v4061_v53 = vrot.slane %v4060_v41, 4  ;;  %v4065_v17 = vrot.slane %v4063_v16, 5  ;;  %v4094_v49 = vrot.slane %v4092_v44, 4  ;;  %v11177_v1 = vld [vmem:[%s13461_s14 + $0x18] sm:$0xe] }
 0x1e3   : > { %v4097_v55 = vrot.slane %v4095_v54, 5  ;;  %v4103_v36 = vrot.slane %v4101_v58, 5  ;;  %v4107_v46 = vrot.slane %v4105_v7, 4  ;;  %v4085_v6 = vrot.slane %v4084_v5, 4 }
 0x1e4   : > { %12317 = vmatmul.mubr.msk.bf16.gmra.mrb[16].mxu0 %vm806_vm4, %v11154_v60  ;;  %v4074_v60 = vor.u32 %v4073_v15, %v4070_v25  ;;  %v4089_v29 = vrot.slane %v4087_v2, 5  ;;  %v4056_v30 = vsel %vm13496_vm3, %v4051_v19, %v4055_v57  ;;  %v4066_v3 = vsel %vm13496_vm3, %v4061_v53, %v4065_v17  ;;  %v11179_v19 = vld [vmem:[%s13461_s14 + $0x30] sm:$0xe] }
 0x1e5   : > { %12320 = vmatprep.mubr.msk.bf16.mxu0 %vm806_vm4, %v11155_v50  ;;  %v4098_v50 = vor.u32 %v4097_v55, %v4094_v49  ;;  %v4108_v8 = vor.u32 %v4107_v46, %v4103_v36  ;;  %v4111_v25 = vshll.u32 %v15002_v33, 16  ;;  %v4475_v31 = vrot.slane %v13363_v42, 5 }
 0x1e6   : > { %v4075_v61 = vrot.slane %v4074_v60, 4  ;;  %v4090_v26 = vsel %vm13496_vm3, %v4085_v6, %v4089_v29  ;;  %v11158_v57 = vcombine.low %v4056_v30, %v4066_v3  ;;  %v11193_v44 = vrot.slane %v11177_v1, 9  ;;  %v13364_v60 = vld [vmem:[%s13461_s14 + $0x28] sm:$0xf] }
 0x1e7   : > { %v4099_v13 = vrot.slane %v4098_v50, 4  ;;  %v4109_v41 = vrot.slane %v4108_v8, 4  ;;  %v4113_v16 = vrot.slane %v4111_v25, 5  ;;  %v4477_v54 = vrot.slane %v4475_v31, 4  ;;  %v11180_v50 = vld [vmem:[%s13461_s14 + $0x3c] sm:$0xe] }
 0x1e8   : > { %v4080_v15 = vsel %vm13496_vm3, %v4075_v61, %v4079_v14  ;;  %v4478_v58 = vrot.slane %v14503_v56, 5  ;;  %v4482_v5 = vrot.slane %v13364_v60, 5  ;;  %v4476_v2 = vsel %vm13644_vm7, %v11193_v44, %v4475_v31  ;;  %v11181_v8 = vld [vmem:[%s13461_s14 + $0x48] sm:$0xe] }
 0x1e9   : > { %v11159_v63 = vcombine.low %v4080_v15, %v4090_v26  ;;  %v4104_v14 = vsel %vm13496_vm3, %v4099_v13, %v4103_v36  ;;  %v4114_v7 = vsel %vm13496_vm3, %v4109_v41, %v4113_v16  ;;  %v4489_v56 = vrot.slane %v14543_v18, 5 }
 0x1ea   : > { %v11160_v53 = vcombine.low %v4104_v14, %v4114_v7  ;;  %v4484_v55 = vrot.slane %v4482_v5, 4  ;;  %v4485_v36 = vrot.slane %v14515_v28, 5  ;;  %v11195_v46 = vrot.slane %v11179_v19, 9 }
 0x1eb   : > { %v4491_v61 = vrot.slane %v4489_v56, 4  ;;  %v4492_v6 = vrot.slane %v14623_v21, 5  ;;  %v4496_v30 = vrot.slane %v14583_v4, 5  ;;  %v4503_v21 = vrot.slane %v14720_v24, 5 }
 0x1ec   : > { %12321 = vmatmul.mubr.msk.bf16.gmra.mrb[20].mxu0 %vm806_vm4, %v11156_v20  ;;  %v4479_v20 = vsel %vm13644_vm7, %v4477_v54, %v4478_v58  ;;  %v4486_v29 = vsel %vm13644_vm7, %v4484_v55, %v4485_v36  ;;  %v4490_v3 = vsel %vm13644_vm7, %v11195_v46, %v4489_v56  ;;  %v11196_v26 = vrot.slane %v11180_v50, 9  ;;  %v17456_v46 = vld [vmem:[#allocation4_spill] sm:$0xff] }
 0x1ed   : > { %12324 = vmatprep.mubr.msk.bf16.mxu0 %vm806_vm4, %v11157_v12  ;;  %v11178_v12 = vld [vmem:[%s13461_s14 + $0x24] sm:$0xe]  ;;  %v11210_v17 = vcombine.low %v4476_v2, %v4479_v20  ;;  %v4493_v28 = vsel %vm13644_vm7, %v4491_v61, %v4492_v6  ;;  %v4498_v42 = vrot.slane %v4496_v30, 4  ;;  %v4499_v31 = vrot.slane %v14662_v11, 5  ;;  %v17457_v61 = vld [vmem:[#allocation5_spill] sm:$0xff] }
 0x1ee   : > { %v11194_v49 = vrot.slane %v11178_v12, 9  ;;  %v11212_v15 = vcombine.low %v4490_v3, %v4493_v28  ;;  %v11197_v1 = vrot.slane %v11181_v8, 9  ;;  %v4506_v4 = vrot.slane %v14765_v59, 5  ;;  %v11183_v59 = vld [vmem:[%s13461_s14 + $0x60] sm:$0xe] }
 0x1ef   : > { %v4500_v24 = vsel %vm13644_vm7, %v4498_v42, %v4499_v31  ;;  %v4517_v41 = vrot.slane %v14811_v10, 5  ;;  %v11199_v54 = vrot.slane %v11183_v59, 9  ;;  %v4520_v14 = vrot.slane %v14831_v62, 5  ;;  %v17454_v62 = vld [vmem:[#allocation3_spill] sm:$0xff] }
 0x1f0   : > { %v4483_v18 = vsel %vm13644_vm7, %v11194_v49, %v4482_v5  ;;  %v4504_v13 = vsel %vm13644_vm7, %v11197_v1, %v4503_v21  ;;  %v4531_v10 = vrot.slane %v14843_v51, 5  ;;  %v11185_v5 = vld [vmem:[%s13461_s14 + $0x78] sm:$0xe]  ;;  %v4534_v56 = vrot.slane %v14869_v34, 5  ;;  %v11187_v49 = vld [vmem:[%s13461_s14 + $0x90] sm:$0xe] }
 0x1f1   : > { %v11211_v25 = vcombine.low %v4483_v18, %v4486_v29  ;;  %v4519_v58 = vrot.slane %v4517_v41, 4  ;;  %v4518_v7 = vsel %vm13644_vm7, %v11199_v54, %v4517_v41  ;;  %v11201_v20 = vrot.slane %v11185_v5, 9  ;;  %v11190_v1 = vld [vmem:[%s13461_s14 + $0xb4] sm:$0xe]  ;;  %v11192_v54 = vld [vmem:[%s13461_s14 + $0xcc] sm:$0xe] }
 0x1f2   : > { %v4533_v12 = vrot.slane %v4531_v10, 4  ;;  %v17455_v19 = vcombine.low %v14572_v43, %v17454_v62  ;;  %v11203_v34 = vrot.slane %v11187_v49, 9  ;;  %v4548_v43 = vrot.slane %v14911_v38, 5  ;;  %v11189_v38 = vld [vmem:[%s13461_s14 + $0xa8] sm:$0xe] }
 0x1f3   : > { %v4521_v60 = vsel %vm13644_vm7, %v4519_v58, %v4520_v14  ;;  %v17458_v6 = vcombine.low %v17456_v46, %v17457_v61  ;;  %v4552_v18 = vrot.slane %v14908_v37, 5  ;;  %v4559_v3 = vrot.slane %v14922_v32, 5 }
 0x1f4   : > { %12325 = vmatmul.mubr.msk.bf16.gmra.mrb[24].mxu0 %vm806_vm4, %v11158_v57  ;;  %v4505_v57 = vrot.slane %v4503_v21, 4  ;;  %v11216_v2 = vcombine.low %v4518_v7, %v4521_v60  ;;  %v4535_v51 = vsel %vm13644_vm7, %v4533_v12, %v4534_v56  ;;  %v4555_v8 = vrot.slane %v14941_v39, 5 }
 0x1f5   : > { %12328 = vmatprep.mubr.msk.bf16.mxu0 %vm806_vm4, %v11159_v63  ;;  %v4497_v63 = vsel %vm13644_vm7, %v11196_v26, %v4496_v30  ;;  %v11188_v30 = vld [vmem:[%s13461_s14 + $0x9c] sm:$0xe]  ;;  %v4554_v21 = vrot.slane %v4552_v18, 4  ;;  %v4562_v37 = vrot.slane %v14948_v48, 5  ;;  %v17459_v26 = vcombine.low %v14684_v9, %v14699_v40  ;;  %v11191_v40 = vld [vmem:[%s13461_s14 + $0xc0] sm:$0xe] }
 0x1f6   : > { %v4507_v11 = vsel %vm13644_vm7, %v4505_v57, %v4506_v4  ;;  %v11213_v16 = vcombine.low %v4497_v63, %v4500_v24  ;;  %v11204_v50 = vrot.slane %v11188_v30, 9  ;;  %v4566_v31 = vrot.slane %v14955_v52, 5 }
 0x1f7   : > { %v11214_v44 = vcombine.low %v4504_v13, %v4507_v11  ;;  %v4556_v42 = vsel %vm13644_vm7, %v4554_v21, %v4555_v8  ;;  %v4573_v9 = vrot.slane %v14961_v45, 5  ;;  %v11206_v63 = vrot.slane %v11190_v1, 9 }
 0x1f8   : > { %v4553_v32 = vsel %vm13644_vm7, %v11204_v50, %v4552_v18  ;;  %v4568_v24 = vrot.slane %v4566_v31, 4  ;;  %v4569_v13 = vrot.slane %v14976_v22, 5  ;;  %v11207_v11 = vrot.slane %v11191_v40, 9 }
 0x1f9   : > { %v11221_v57 = vcombine.low %v4553_v32, %v4556_v42  ;;  %v4575_v41 = vrot.slane %v4573_v9, 4  ;;  %v4576_v52 = vrot.slane %v14988_v47, 5  ;;  %v4567_v59 = vsel %vm13644_vm7, %v11206_v63, %v4566_v31 }
 0x1fa   : > { %v4570_v45 = vsel %vm13644_vm7, %v4568_v24, %v4569_v13  ;;  %v11208_v14 = vrot.slane %v11192_v54, 9  ;;  %v4583_v60 = vrot.slane %v15002_v33, 5  ;;  %v11275_v33 = vld [vmem:[%s17315_s3 + $0x4] sm:$0xf] }
 0x1fb   : > { %v4577_v22 = vsel %vm13644_vm7, %v4575_v41, %v4576_v52  ;;  %v11223_v47 = vcombine.low %v4567_v59, %v4570_v45  ;;  %13230 = vmatprep.subr.msk.bf16.mxu1 %vm855_vm0, %v11275_v33 }
 0x1fc   : > { %12329 = vmatmul.mubr.msk.bf16.gmra.mrb[28].mxu0 %vm806_vm4, %v11160_v53  ;;  %v4532_v53 = vsel %vm13644_vm7, %v11201_v20, %v4531_v10  ;;  %v6075_v20 = vsel %vm855_vm0, %v11275_v33, 0 }
 0x1fd   : > { %12334 = vmatprep.mubr.msk.bf16.mxu0 %vm806_vm4, %v11210_v17  ;;  %v4545_v17 = vrot.slane %v14890_v23, 5  ;;  %v11218_v55 = vcombine.low %v4532_v53, %v4535_v51  ;;  %12367 = vmatpush3.bf16.msra.mxu1 %v6075_v20 }
 0x1ff   : > { %v4547_v36 = vrot.slane %v4545_v17, 4  ;;  %v4546_v29 = vsel %vm13644_vm7, %v11203_v34, %v4545_v17 }
 0x201   : > { %v4549_v23 = vsel %vm13644_vm7, %v4547_v36, %v4548_v43 }
 0x202   : > { %v11220_v28 = vcombine.low %v4546_v29, %v4549_v23 }
 0x204   : > { %12335 = vmatmul.mubr.msk.bf16.vlgmr.msra.gmra.mrb[0].mxu0 %vm806_vm4, %v11211_v25  ;;  %v11205_v25 = vrot.slane %v11189_v38, 9 }
 0x205   : > { %12338 = vmatprep.mubr.msk.bf16.mxu0 %vm806_vm4, %v11212_v15  ;;  %v4561_v15 = vrot.slane %v4559_v3, 4 }
 0x206   : > { %v4560_v39 = vsel %vm13644_vm7, %v11205_v25, %v4559_v3  ;;  %v15215_v25 = vld [vmem:[%s17315_s3] sm:$0xf] }
 0x207   : > { %v4563_v48 = vsel %vm13644_vm7, %v4561_v15, %v4562_v37  ;;  %13231 = vmatprep.subr.msk.bf16.mxu1 %vm855_vm0, %v15215_v25 }
 0x208   : > { %v11222_v4 = vcombine.low %v4560_v39, %v4563_v48 }
 0x20c   : > { %12339 = vmatmul.mubr.msk.bf16.gmra.mrb[4].mxu0 %vm806_vm4, %v11213_v16  ;;  %v4580_v16 = vrot.slane %v14980_v0, 5 }
 0x20d   : > { %12342 = vmatprep.mubr.msk.bf16.mxu0 %vm806_vm4, %v11214_v44  ;;  %v4574_v44 = vsel %vm13644_vm7, %v11207_v11, %v4573_v9 }
 0x20e   : > { %v11224_v58 = vcombine.low %v4574_v44, %v4577_v22  ;;  %v4582_v7 = vrot.slane %v4580_v16, 4  ;;  %v4581_v0 = vsel %vm13644_vm7, %v11208_v14, %v4580_v16 }
 0x210   : > { %v4584_v10 = vsel %vm13644_vm7, %v4582_v7, %v4583_v60 }
 0x211   : > { %v11225_v5 = vcombine.low %v4581_v0, %v4584_v10 }
 0x214   : > { %12343 = vmatmul.mubr.msk.bf16.gmra.mrb[8].mxu0 %vm806_vm4, %v17455_v19 }
 0x215   : > { %12346 = vmatprep.mubr.msk.bf16.mxu0 %vm806_vm4, %v11216_v2  ;;  %v13391_v2 = vmov 0  }
 0x216   : > { %4958 = vst.msk [vmem:[#allocation2 + $0x18] sm:$0xf] %vm4950_vm8, %v13391_v2  ;;  %4951 = vst.msk [vmem:[#allocation2] sm:$0xf] %vm4950_vm8, %v13391_v2 }
 0x217   : > { %4952 = vst.msk [vmem:[#allocation2 + $0x4] sm:$0xf] %vm4950_vm8, %v13391_v2  ;;  %4955 = vst.msk [vmem:[#allocation2 + $0xc] sm:$0xf] %vm4950_vm8, %v13391_v2 }
 0x218   : > { %4956 = vst.msk [vmem:[#allocation2 + $0x10] sm:$0xf] %vm4950_vm8, %v13391_v2  ;;  %4959 = vst.msk [vmem:[#allocation2 + $0x1c] sm:$0xf] %vm4950_vm8, %v13391_v2 }
 0x219   : > { %4961 = vst.msk [vmem:[#allocation2 + $0x24] sm:$0xf] %vm4950_vm8, %v13391_v2  ;;  %4962 = vst.msk [vmem:[#allocation2 + $0x28] sm:$0xf] %vm4950_vm8, %v13391_v2 }
 0x21a   : > { %4964 = vst.msk [vmem:[#allocation2 + $0x30] sm:$0xf] %vm4950_vm8, %v13391_v2  ;;  %4965 = vst.msk [vmem:[#allocation2 + $0x34] sm:$0xf] %vm4950_vm8, %v13391_v2 }
 0x21b   : > { %4967 = vst.msk [vmem:[#allocation2 + $0x3c] sm:$0xf] %vm4950_vm8, %v13391_v2  ;;  %4968 = vst.msk [vmem:[#allocation2 + $0x40] sm:$0xf] %vm4950_vm8, %v13391_v2 }
 0x21c   : > { %12347 = vmatmul.mubr.msk.bf16.gmra.mrb[12].mxu0 %vm806_vm4, %v17458_v6  ;;  %4970 = vst.msk [vmem:[#allocation2 + $0x48] sm:$0xf] %vm4950_vm8, %v13391_v2  ;;  %4971 = vst.msk [vmem:[#allocation2 + $0x4c] sm:$0xf] %vm4950_vm8, %v13391_v2 }
 0x21d   : > { %12350 = vmatprep.mubr.msk.bf16.mxu0 %vm806_vm4, %v11218_v55  ;;  %4973 = vst.msk [vmem:[#allocation2 + $0x54] sm:$0xf] %vm4950_vm8, %v13391_v2  ;;  %4974 = vst.msk [vmem:[#allocation2 + $0x58] sm:$0xf] %vm4950_vm8, %v13391_v2  ;;  %v5543_v12 = vld [vmem:[#allocation2] sm:$0xf] }
 0x21e   : > { %4976 = vst.msk [vmem:[#allocation2 + $0x60] sm:$0xf] %vm4950_vm8, %v13391_v2  ;;  %4977 = vst.msk [vmem:[#allocation2 + $0x64] sm:$0xf] %vm4950_vm8, %v13391_v2  ;;  %v5544_v56 = vld [vmem:[#allocation2 + $0x4] sm:$0xf] }
 0x21f   : > { %4979 = vst.msk [vmem:[#allocation2 + $0x6c] sm:$0xf] %vm4950_vm8, %v13391_v2  ;;  %4980 = vst.msk [vmem:[#allocation2 + $0x70] sm:$0xf] %vm4950_vm8, %v13391_v2  ;;  %v5593_v62 = vshrl.u32 %v5543_v12, 16  ;;  %v5596_v19 = vshll.u32 %v5543_v12, 16 }
 0x220   : > { %4982 = vst.msk [vmem:[#allocation2 + $0x78] sm:$0xf] %vm4950_vm8, %v13391_v2  ;;  %4983 = vst.msk [vmem:[#allocation2 + $0x7c] sm:$0xf] %vm4950_vm8, %v13391_v2  ;;  %v5602_v53 = vshll.u32 %v5544_v56, 16  ;;  %v5606_v51 = vshrl.u32 %v5544_v56, 16 }
 0x221   : > { %4985 = vst.msk [vmem:[#allocation2 + $0x84] sm:$0xf] %vm4950_vm8, %v13391_v2  ;;  %4986 = vst.msk [vmem:[#allocation2 + $0x88] sm:$0xf] %vm4950_vm8, %v13391_v2  ;;  %v5595_v17 = vrot.slane %v5593_v62, 4  ;;  %v5598_v49 = vrot.slane %v5596_v19, 5 }
 0x222   : > { %4988 = vst.msk [vmem:[#allocation2 + $0x90] sm:$0xf] %vm4950_vm8, %v13391_v2  ;;  %4989 = vst.msk [vmem:[#allocation2 + $0x94] sm:$0xf] %vm4950_vm8, %v13391_v2  ;;  %v5604_v55 = vrot.slane %v5602_v53, 5  ;;  %v5608_v34 = vrot.slane %v5606_v51, 4 }
 0x223   : > { %4991 = vst.msk [vmem:[#allocation2 + $0x9c] sm:$0xf] %vm4950_vm8, %v13391_v2  ;;  %4992 = vst.msk [vmem:[#allocation2 + $0xa0] sm:$0xf] %vm4950_vm8, %v13391_v2  ;;  %v5599_v61 = vor.u32 %v5598_v49, %v5595_v17  ;;  %v5438_v19 = vld [vmem:[#allocation2 + $0x18] sm:$0xf] }
 0x224   : > { %12351 = vmatmul.mubr.msk.bf16.gmra.mrb[16].mxu0 %vm806_vm4, %v17459_v26  ;;  %4994 = vst.msk [vmem:[#allocation2 + $0xa8] sm:$0xf] %vm4950_vm8, %v13391_v2  ;;  %4995 = vst.msk [vmem:[#allocation2 + $0xac] sm:$0xf] %vm4950_vm8, %v13391_v2  ;;  %v5609_v6 = vor.u32 %v5608_v34, %v5604_v55 }
 0x225   : > { %12354 = vmatprep.mubr.msk.bf16.mxu0 %vm806_vm4, %v11220_v28  ;;  %4997 = vst.msk [vmem:[#allocation2 + $0xb4] sm:$0xf] %vm4950_vm8, %v13391_v2  ;;  %4998 = vst.msk [vmem:[#allocation2 + $0xb8] sm:$0xf] %vm4950_vm8, %v13391_v2  ;;  %v5600_v30 = vrot.slane %v5599_v61, 4 }
 0x226   : > { %5000 = vst.msk [vmem:[#allocation2 + $0xc0] sm:$0xf] %vm4950_vm8, %v13391_v2  ;;  %5001 = vst.msk [vmem:[#allocation2 + $0xc4] sm:$0xf] %vm4950_vm8, %v13391_v2  ;;  %v5610_v3 = vrot.slane %v5609_v6, 4 }
 0x227   : > { %5003 = vst.msk [vmem:[#allocation2 + $0xcc] sm:$0xf] %vm4950_vm8, %v13391_v2  ;;  %5004 = vst.msk [vmem:[#allocation2 + $0xd0] sm:$0xf] %vm4950_vm8, %v13391_v2  ;;  %v5605_v28 = vsel %vm13496_vm3, %v5600_v30, %v5604_v55  ;;  %v5429_v61 = vld [vmem:[#allocation2 + $0xc] sm:$0xf] }
 0x228   : > { %4960 = vst.msk [vmem:[#allocation2 + $0x20] sm:$0x1] %vm4953_vm9, %v13391_v2  ;;  %4954 = vst.msk [vmem:[#allocation2 + $0x8] sm:$0x1] %vm4953_vm9, %v13391_v2 }
 0x229   : > { %4957 = vst.msk [vmem:[#allocation2 + $0x14] sm:$0x1] %vm4953_vm9, %v13391_v2  ;;  %4963 = vst.msk [vmem:[#allocation2 + $0x2c] sm:$0x1] %vm4953_vm9, %v13391_v2 }
 0x22a   : > { %4966 = vst.msk [vmem:[#allocation2 + $0x38] sm:$0x1] %vm4953_vm9, %v13391_v2  ;;  %4969 = vst.msk [vmem:[#allocation2 + $0x44] sm:$0x1] %vm4953_vm9, %v13391_v2 }
 0x22b   : > { %4972 = vst.msk [vmem:[#allocation2 + $0x50] sm:$0x1] %vm4953_vm9, %v13391_v2  ;;  %4975 = vst.msk [vmem:[#allocation2 + $0x5c] sm:$0x1] %vm4953_vm9, %v13391_v2 }
 0x22c   : > { %12355 = vmatmul.mubr.msk.bf16.gmra.mrb[20].mxu0 %vm806_vm4, %v11221_v57  ;;  %4978 = vst.msk [vmem:[#allocation2 + $0x68] sm:$0x1] %vm4953_vm9, %v13391_v2  ;;  %4981 = vst.msk [vmem:[#allocation2 + $0x74] sm:$0x1] %vm4953_vm9, %v13391_v2  ;;  %v15244_v57 = vld [vmem:[%s17314_s2] ss:$0 sm:$0xff] }
 0x22d   : > { %12358 = vmatprep.mubr.msk.bf16.mxu0 %vm806_vm4, %v11222_v4  ;;  %4984 = vst.msk [vmem:[#allocation2 + $0x80] sm:$0x1] %vm4953_vm9, %v13391_v2  ;;  %4987 = vst.msk [vmem:[#allocation2 + $0x8c] sm:$0x1] %vm4953_vm9, %v13391_v2 }
 0x22e   : > { %4990 = vst.msk [vmem:[#allocation2 + $0x98] sm:$0x1] %vm4953_vm9, %v13391_v2  ;;  %4993 = vst.msk [vmem:[#allocation2 + $0xa4] sm:$0x1] %vm4953_vm9, %v13391_v2 }
 0x22f   : > { %4996 = vst.msk [vmem:[#allocation2 + $0xb0] sm:$0x1] %vm4953_vm9, %v13391_v2  ;;  %4999 = vst.msk [vmem:[#allocation2 + $0xbc] sm:$0x1] %vm4953_vm9, %v13391_v2  ;;  %v5576_v43 = vld [vmem:[#allocation2 + $0x8] sm:$0x1] }
 0x230   : > { %5002 = vst.msk [vmem:[#allocation2 + $0xc8] sm:$0x1] %vm4953_vm9, %v13391_v2  ;;  %5005 = vst.msk [vmem:[#allocation2 + $0xd4] sm:$0x1] %vm4953_vm9, %v13391_v2  ;;  %v5612_v18 = vshll.u32 %v5576_v43, 16 }
 0x232   : > { %v5614_v38 = vrot.slane %v5612_v18, 5 }
 0x234   : > { %12359 = vmatmul.mubr.msk.bf16.gmra.mrb[24].mxu0 %vm806_vm4, %v11223_v47  ;;  %v5615_v50 = vsel %vm13496_vm3, %v5610_v3, %v5614_v38 }
 0x235   : > { %12362 = vmatprep.mubr.msk.bf16.mxu0 %vm806_vm4, %v11224_v58  ;;  %v11276_v21 = vcombine.low %v5605_v28, %v5615_v50 }
 0x237   : > { %12368 = vmatprep.mubr.msk.bf16.mxu1 %vm806_vm4, %v11276_v21  ;;  %v5442_v21 = vld [vmem:[#allocation2 + $0x20] sm:$0x1] }
 0x23c   : > { %12363 = vmatmul.mubr.msk.bf16.gmra.mrb[28].mxu0 %vm806_vm4, %v11225_v5 }
 0x275   : > { %v15197_v36 = vpop.f32.mrb[0].mxu1 }
 0x276   : > { %v15199_v46 = vpop.f32.mrb[1].mxu1 }
 0x277   : > { %v15201_v29 = vpop.f32.mrb[2].mxu1 }
 0x278   : > { %v15203_v23 = vpop.f32.mrb[3].mxu1 }
 0x280   : > { %v15210_v8 = vpop.f32.mrb[4].mxu1 }
 0x281   : > { %v15217_v15 = vpop.f32.mrb[5].mxu1 }
 0x282   : > { %v15221_v37 = vpop.f32.mrb[6].mxu1 }
 0x283   : > { %v15223_v26 = vpop.f32.mrb[7].mxu1 }
 0x28a   : > { %v15225_v32 = vpop.f32.mrb[8].mxu1 }
 0x28b   : > { %v15227_v42 = vpop.f32.mrb[9].mxu1 }
 0x28c   : > { %v15229_v31 = vpop.f32.mrb[10].mxu1 }
 0x28d   : > { %v15231_v39 = vpop.f32.mrb[11].mxu1 }
 0x293   : > { %v15233_v48 = vpop.f32.mrb[12].mxu1 }
 0x294   : > { %v15235_v1 = vpop.f32.mrb[13].mxu1 }
 0x295   : > { %v15237_v9 = vpop.f32.mrb[14].mxu1 }
 0x296   : > { %v15239_v40 = vpop.f32.mrb[15].mxu1 }
 0x2d7   : > { %v12336_v4 = vpop.f32.mrb[0].mxu0 }
 0x2d8   : > { %v4888_v63 = vadd.f32 %v12336_v4, %v15244_v57  ;;  %v4720_v24 = vpop.f32.mrb[1].mxu0 }
 0x2d9   : > { %v4886_v13 = vadd.f32 %v15244_v57, %v4720_v24  ;;  %v12337_v11 = vpop.f32.mrb[2].mxu0 }
 0x2da   : > { %v4920_v41 = vmax.f32 %v4888_v63, 0.0  ;;  %v4889_v52 = vadd.f32 %v12337_v11, %v15244_v57  ;;  %v4723_v59 = vpop.f32.mrb[3].mxu0 }
 0x2db   : > { %v4918_v45 = vmax.f32 %v4886_v13, 0.0  ;;  %v4887_v16 = vadd.f32 %v15244_v57, %v4723_v59 }
 0x2dc   : > { %v11675_v44 = vpack.c.bf16 %v4920_v41, %v4920_v41  ;;  %v4921_v22 = vmax.f32 %v4889_v52, 0.0  ;;  %v5435_v41 = vld [vmem:[#allocation2 + $0x14] sm:$0x1] }
 0x2dd   : > { %v11673_v54 = vpack.c.bf16 %v4918_v45, %v4918_v45  ;;  %v4919_v47 = vmax.f32 %v4887_v16, 0.0 }
 0x2de   : > { %v5123_v58 = vshrl.u32 %v11675_v44, 16  ;;  %v11676_v14 = vpack.c.bf16 %v4921_v22, %v4921_v22  ;;  %v5126_v7 = vshll.u32 %v11675_v44, 16 }
 0x2df   : > { %v5106_v60 = vshrl.u32 %v11673_v54, 16  ;;  %v5109_v0 = vshll.u32 %v11673_v54, 16  ;;  %v11674_v10 = vpack.c.bf16 %v4919_v47, %v4919_v47  ;;  %v12340_v5 = vpop.f32.mrb[4].mxu0 }
 0x2e0   : > { %v5125_v2 = vrot.slane %v5123_v58, 7  ;;  %v5131_v33 = vshrl.u32 %v11676_v14, 16  ;;  %v5134_v20 = vshll.u32 %v11676_v14, 16  ;;  %v4892_v12 = vadd.f32 %v12340_v5, %v15244_v57  ;;  %v4736_v56 = vpop.f32.mrb[5].mxu0 }
 0x2e1   : > { %v5108_v53 = vrot.slane %v5106_v60, 7  ;;  %v5114_v51 = vshrl.u32 %v11674_v10, 16  ;;  %v5117_v17 = vshll.u32 %v11674_v10, 16  ;;  %v4890_v49 = vadd.f32 %v15244_v57, %v4736_v56  ;;  %v12341_v55 = vpop.f32.mrb[6].mxu0 }
 0x2e2   : > { %v5128_v34 = vor.u32 %v5126_v7, %v5125_v2  ;;  %v5129_v43 = vrot.slane %v5125_v2, 4  ;;  %v5133_v18 = vrot.slane %v5131_v33, 7  ;;  %v4924_v30 = vmax.f32 %v4892_v12, 0.0  ;;  %v4739_v3 = vpop.f32.mrb[7].mxu0  ;;  %v5452_v12 = vld [vmem:[#allocation2 + $0x30] sm:$0xf] }
 0x2e3   : > { %v5111_v38 = vor.u32 %v5109_v0, %v5108_v53  ;;  %v5112_v28 = vrot.slane %v5108_v53, 4  ;;  %v5116_v4 = vrot.slane %v5114_v51, 7  ;;  %v4922_v63 = vmax.f32 %v4890_v49, 0.0 }
 0x2e4   : > { %v5439_v24 = vsel %vm15253_vm13, %v5128_v34, %v5438_v19  ;;  %v5136_v13 = vor.u32 %v5134_v20, %v5133_v18  ;;  %v5138_v11 = vrot.slane %v5133_v18, 4  ;;  %v11679_v52 = vpack.c.bf16 %v4924_v30, %v4924_v30 }
 0x2e5   : > { %5440 = vst [vmem:[#allocation2 + $0x18] sm:$0xf] %v5439_v24  ;;  %v5430_v59 = vsel %vm15253_vm13, %v5111_v38, %v5429_v61  ;;  %v5119_v45 = vor.u32 %v5117_v17, %v5116_v4  ;;  %v5121_v16 = vrot.slane %v5116_v4, 4  ;;  %v11677_v44 = vpack.c.bf16 %v4922_v63, %v4922_v63 }
 0x2e6   : > { %5431 = vst [vmem:[#allocation2 + $0xc] sm:$0xf] %v5430_v59  ;;  %v5137_v22 = vsel %vm15260_vm14, %v5129_v43, %v5136_v13  ;;  %v5443_v54 = vsel %vm15266_vm15, %v5138_v11, %v5442_v21  ;;  %v5157_v47 = vshrl.u32 %v11679_v52, 16  ;;  %v5160_v7 = vshll.u32 %v11679_v52, 16 }
 0x2e7   : > { %5441 = vst.msk [vmem:[#allocation2 + $0x1c] sm:$0xf] %vm4950_vm8, %v5137_v22  ;;  %5444 = vst [vmem:[#allocation2 + $0x20] sm:$0x1] %v5443_v54  ;;  %v5120_v58 = vsel %vm15260_vm14, %v5112_v28, %v5119_v45  ;;  %v5436_v14 = vsel %vm15266_vm15, %v5121_v16, %v5435_v41  ;;  %v5140_v60 = vshrl.u32 %v11677_v44, 16  ;;  %v12344_v0 = vpop.f32.mrb[8].mxu0  ;;  %v4893_v5 = vadd.f32 %v12341_v55, %v15244_v57 }
 0x2e8   : > { %5432 = vst.msk [vmem:[#allocation2 + $0x10] sm:$0xf] %vm4950_vm8, %v5120_v58  ;;  %5437 = vst [vmem:[#allocation2 + $0x14] sm:$0x1] %v5436_v14  ;;  %v15284_v10 = vrot.slane %v5157_v47, 7  ;;  %v4891_v2 = vadd.f32 %v15244_v57, %v4739_v3  ;;  %v4896_v33 = vadd.f32 %v12344_v0, %v15244_v57  ;;  %v4752_v20 = vpop.f32.mrb[9].mxu0 }
 0x2e9   : > { %v5142_v56 = vrot.slane %v5140_v60, 7  ;;  %v5143_v19 = vshll.u32 %v11677_v44, 16  ;;  %v4894_v53 = vadd.f32 %v15244_v57, %v4752_v20  ;;  %v12345_v51 = vpop.f32.mrb[10].mxu0  ;;  %v15292_v17 = vsel %vm855_vm0, %v15215_v25, 0  ;;  %v5445_v55 = vld [vmem:[#allocation2 + $0x24] sm:$0xf] }
 0x2ea   : > { %v5162_v49 = vor.u32 %v5160_v7, %v15284_v10  ;;  %v5163_v34 = vrot.slane %v15284_v10, 4  ;;  %v4925_v43 = vmax.f32 %v4893_v5, 0.0  ;;  %v4923_v61 = vmax.f32 %v4891_v2, 0.0  ;;  %v4755_v18 = vpop.f32.mrb[11].mxu0  ;;  %v5456_v44 = vld [vmem:[#allocation2 + $0x38] sm:$0x1] }
 0x2eb   : > { %v5145_v30 = vor.u32 %v5143_v19, %v5142_v56  ;;  %v5146_v3 = vrot.slane %v5142_v56, 4  ;;  %v4928_v38 = vmax.f32 %v4896_v33, 0.0  ;;  %v4926_v28 = vmax.f32 %v4894_v53, 0.0  ;;  %v5449_v22 = vld [vmem:[#allocation2 + $0x2c] sm:$0x1] }
 0x2ec   : > { %v5453_v21 = vsel %vm15253_vm13, %v5162_v49, %v5452_v12  ;;  %v11680_v4 = vpack.c.bf16 %v4925_v43, %v4925_v43  ;;  %v11678_v63 = vpack.c.bf16 %v4923_v61, %v4923_v61  ;;  %v4897_v25 = vadd.f32 %v12345_v51, %v15244_v57  ;;  %v5466_v20 = vld [vmem:[#allocation2 + $0x48] sm:$0xf]  ;;  %v5459_v61 = vld [vmem:[#allocation2 + $0x3c] sm:$0xf] }
 0x2ed   : > { %5454 = vst [vmem:[#allocation2 + $0x30] sm:$0xf] %v5453_v21  ;;  %v5446_v24 = vsel %vm15253_vm13, %v5145_v30, %v5445_v55  ;;  %v11683_v13 = vpack.c.bf16 %v4928_v38, %v4928_v38  ;;  %v11681_v11 = vpack.c.bf16 %v4926_v28, %v4926_v28  ;;  %v4895_v41 = vadd.f32 %v15244_v57, %v4755_v18 }
 0x2ee   : > { %5447 = vst [vmem:[#allocation2 + $0x24] sm:$0xf] %v5446_v24  ;;  %v5165_v52 = vshrl.u32 %v11680_v4, 16  ;;  %v5168_v59 = vshll.u32 %v11680_v4, 16  ;;  %v5148_v45 = vshrl.u32 %v11678_v63, 16  ;;  %v5151_v16 = vshll.u32 %v11678_v63, 16 }
 0x2ef   : > { %v5191_v54 = vshrl.u32 %v11683_v13, 16  ;;  %v5194_v47 = vshll.u32 %v11683_v13, 16  ;;  %v5174_v58 = vshrl.u32 %v11681_v11, 16  ;;  %v5177_v14 = vshll.u32 %v11681_v11, 16  ;;  %v12348_v7 = vpop.f32.mrb[12].mxu0 }
 0x2f0   : > { %v5167_v60 = vrot.slane %v5165_v52, 7  ;;  %v5150_v0 = vrot.slane %v5148_v45, 7  ;;  %v4929_v10 = vmax.f32 %v4897_v25, 0.0  ;;  %v4927_v5 = vmax.f32 %v4895_v41, 0.0  ;;  %v4768_v2 = vpop.f32.mrb[13].mxu0 }
 0x2f1   : > { %v15302_v33 = vrot.slane %v5191_v54, 7  ;;  %v15304_v12 = vrot.slane %v5174_v58, 7  ;;  %v4900_v56 = vadd.f32 %v12348_v7, %v15244_v57  ;;  %v4898_v19 = vadd.f32 %v15244_v57, %v4768_v2  ;;  %v12349_v53 = vpop.f32.mrb[14].mxu0  ;;  %v5470_v58 = vld [vmem:[#allocation2 + $0x50] sm:$0x1] }
 0x2f2   : > { %v5170_v51 = vor.u32 %v5168_v59, %v5167_v60  ;;  %v5172_v49 = vrot.slane %v5167_v60, 4  ;;  %v5153_v55 = vor.u32 %v5151_v16, %v5150_v0  ;;  %v5155_v43 = vrot.slane %v5150_v0, 4  ;;  %v4771_v18 = vpop.f32.mrb[15].mxu0 }
 0x2f3   : > { %v5196_v30 = vor.u32 %v5194_v47, %v15302_v33  ;;  %v5197_v38 = vrot.slane %v15302_v33, 4  ;;  %v5179_v28 = vor.u32 %v5177_v14, %v15304_v12  ;;  %v5180_v21 = vrot.slane %v15304_v12, 4  ;;  %v5463_v33 = vld [vmem:[#allocation2 + $0x44] sm:$0x1] }
 0x2f4   : > { %v5171_v4 = vsel %vm15260_vm14, %v5163_v34, %v5170_v51  ;;  %v5457_v63 = vsel %vm15266_vm15, %v5172_v49, %v5456_v44  ;;  %v5154_v25 = vsel %vm15260_vm14, %v5146_v3, %v5153_v55  ;;  %v5450_v24 = vsel %vm15266_vm15, %v5155_v43, %v5449_v22 }
 0x2f5   : > { %5455 = vst.msk [vmem:[#allocation2 + $0x34] sm:$0xf] %vm4950_vm8, %v5171_v4  ;;  %5458 = vst [vmem:[#allocation2 + $0x38] sm:$0x1] %v5457_v63  ;;  %v5467_v13 = vsel %vm15253_vm13, %v5196_v30, %v5466_v20  ;;  %v5460_v34 = vsel %vm15253_vm13, %v5179_v28, %v5459_v61  ;;  %v11684_v11 = vpack.c.bf16 %v4929_v10, %v4929_v10  ;;  %v4932_v3 = vmax.f32 %v4900_v56, 0.0 }
 0x2f6   : > { %5448 = vst.msk [vmem:[#allocation2 + $0x28] sm:$0xf] %vm4950_vm8, %v5154_v25  ;;  %5451 = vst [vmem:[#allocation2 + $0x2c] sm:$0x1] %v5450_v24  ;;  %v11682_v41 = vpack.c.bf16 %v4927_v5, %v4927_v5  ;;  %v4930_v52 = vmax.f32 %v4898_v19, 0.0  ;;  %v4901_v59 = vadd.f32 %v12349_v53, %v15244_v57  ;;  %v4899_v45 = vadd.f32 %v15244_v57, %v4771_v18 }
 0x2f7   : > { %5468 = vst [vmem:[#allocation2 + $0x48] sm:$0xf] %v5467_v13  ;;  %5461 = vst [vmem:[#allocation2 + $0x3c] sm:$0xf] %v5460_v34  ;;  %v5199_v16 = vshrl.u32 %v11684_v11, 16  ;;  %v5202_v44 = vshll.u32 %v11684_v11, 16  ;;  %v11687_v14 = vpack.c.bf16 %v4932_v3, %v4932_v3 }
 0x2f8   : > { %v5182_v22 = vshrl.u32 %v11682_v41, 16  ;;  %v5185_v54 = vshll.u32 %v11682_v41, 16  ;;  %v12352_v47 = vpop.f32.mrb[16].mxu0  ;;  %v11685_v7 = vpack.c.bf16 %v4930_v52, %v4930_v52  ;;  %v4933_v60 = vmax.f32 %v4901_v59, 0.0  ;;  %v5480_v34 = vld [vmem:[#allocation2 + $0x60] sm:$0xf] }
 0x2f9   : > { %v4931_v0 = vmax.f32 %v4899_v45, 0.0  ;;  %v4784_v10 = vpop.f32.mrb[17].mxu0  ;;  %v5201_v5 = vrot.slane %v5199_v16, 7  ;;  %v12708_v20 = vadd.f32 %v12352_v47, %v15197_v36  ;;  %v5225_v19 = vshrl.u32 %v11687_v14, 16  ;;  %v5473_v11 = vld [vmem:[#allocation2 + $0x54] sm:$0xf] }
 0x2fa   : > { %v5184_v2 = vrot.slane %v5182_v22, 7  ;;  %v12709_v12 = vadd.f32 %v4784_v10, %v15199_v46  ;;  %v12353_v56 = vpop.f32.mrb[18].mxu0  ;;  %v5228_v53 = vshll.u32 %v11687_v14, 16  ;;  %v5208_v51 = vshrl.u32 %v11685_v7, 16  ;;  %v5545_v59 = vld [vmem:[#allocation2 + $0xc] sm:$0xf] }
 0x2fb   : > { %v5211_v49 = vshll.u32 %v11685_v7, 16  ;;  %v4787_v55 = vpop.f32.mrb[19].mxu0  ;;  %v5204_v43 = vor.u32 %v5202_v44, %v5201_v5  ;;  %v5206_v61 = vrot.slane %v5201_v5, 4  ;;  %v5227_v28 = vrot.slane %v5225_v19, 7  ;;  %v5477_v5 = vld [vmem:[#allocation2 + $0x5c] sm:$0x1] }
 0x2fc   : > { %v5187_v18 = vor.u32 %v5185_v54, %v5184_v2  ;;  %v5189_v30 = vrot.slane %v5184_v2, 4  ;;  %v5210_v4 = vrot.slane %v5208_v51, 7  ;;  %v11688_v63 = vpack.c.bf16 %v4933_v60, %v4933_v60 }
 0x2fd   : > { %v11686_v25 = vpack.c.bf16 %v4931_v0, %v4931_v0  ;;  %v5205_v24 = vsel %vm15260_vm14, %v5197_v38, %v5204_v43  ;;  %v5471_v36 = vsel %vm15266_vm15, %v5206_v61, %v5470_v58  ;;  %v5230_v41 = vor.u32 %v5228_v53, %v5227_v28  ;;  %v5484_v58 = vld [vmem:[#allocation2 + $0x68] sm:$0x1] }
 0x2fe   : > { %v5188_v46 = vsel %vm15260_vm14, %v5180_v21, %v5187_v18  ;;  %v5464_v13 = vsel %vm15266_vm15, %v5189_v30, %v5463_v33  ;;  %5469 = vst.msk [vmem:[#allocation2 + $0x4c] sm:$0xf] %vm4950_vm8, %v5205_v24  ;;  %5472 = vst [vmem:[#allocation2 + $0x50] sm:$0x1] %v5471_v36  ;;  %v5231_v3 = vrot.slane %v5227_v28, 4  ;;  %v5213_v38 = vor.u32 %v5211_v49, %v5210_v4 }
 0x2ff   : > { %5462 = vst.msk [vmem:[#allocation2 + $0x40] sm:$0xf] %vm4950_vm8, %v5188_v46  ;;  %5465 = vst [vmem:[#allocation2 + $0x44] sm:$0x1] %v5464_v13  ;;  %v5214_v52 = vrot.slane %v5210_v4, 4  ;;  %v5233_v45 = vshrl.u32 %v11688_v63, 16  ;;  %v5481_v54 = vsel %vm15253_vm13, %v5230_v41, %v5480_v34  ;;  %v4904_v14 = vadd.f32 %v12708_v20, %v15244_v57 }
 0x300   : > { %v5236_v16 = vshll.u32 %v11688_v63, 16  ;;  %v5216_v44 = vshrl.u32 %v11686_v25, 16  ;;  %v5219_v21 = vshll.u32 %v11686_v25, 16  ;;  %v15340_v22 = vpop.f32.mrb[20].mxu0  ;;  %v5474_v47 = vsel %vm15253_vm13, %v5213_v38, %v5473_v11  ;;  %5482 = vst [vmem:[#allocation2 + $0x60] sm:$0xf] %v5481_v54 }
 0x301   : > { %v4902_v7 = vadd.f32 %v12709_v12, %v15244_v57  ;;  %v15348_v60 = vpop.f32.mrb[21].mxu0  ;;  %5475 = vst [vmem:[#allocation2 + $0x54] sm:$0xf] %v5474_v47  ;;  %v5235_v0 = vrot.slane %v5233_v45, 7  ;;  %v12710_v2 = vadd.f32 %v12353_v56, %v15201_v29  ;;  %v12711_v33 = vadd.f32 %v4787_v55, %v15203_v23  ;;  %v5546_v24 = vld [vmem:[#allocation2 + $0x10] sm:$0xf] }
 0x302   : > { %v5218_v10 = vrot.slane %v5216_v44, 7  ;;  %v15352_v19 = vpop.f32.mrb[22].mxu0  ;;  %v4936_v53 = vmax.f32 %v4904_v14, 0.0  ;;  %v5617_v49 = vshrl.u32 %v5545_v59, 16  ;;  %v5620_v43 = vshll.u32 %v5545_v59, 16 }
 0x303   : > { %v4934_v51 = vmax.f32 %v4902_v7, 0.0  ;;  %v15354_v20 = vpop.f32.mrb[23].mxu0  ;;  %v5238_v12 = vor.u32 %v5236_v16, %v5235_v0  ;;  %v5240_v61 = vrot.slane %v5235_v0, 4  ;;  %v4905_v63 = vadd.f32 %v12710_v2, %v15244_v57  ;;  %v5577_v11 = vld [vmem:[#allocation2 + $0x14] sm:$0x1] }
 0x304   : > { %v5221_v18 = vor.u32 %v5219_v21, %v5218_v10  ;;  %v5223_v30 = vrot.slane %v5218_v10, 4  ;;  %v11691_v28 = vpack.c.bf16 %v4936_v53, %v4936_v53  ;;  %v4903_v29 = vadd.f32 %v12711_v33, %v15244_v57  ;;  %v5494_v47 = vld [vmem:[#allocation2 + $0x78] sm:$0xf] }
 0x305   : > { %v11689_v4 = vpack.c.bf16 %v4934_v51, %v4934_v51  ;;  %v5239_v23 = vsel %vm15260_vm14, %v5231_v3, %v5238_v12  ;;  %v5485_v56 = vsel %vm15266_vm15, %v5240_v61, %v5484_v58  ;;  %v4937_v41 = vmax.f32 %v4905_v63, 0.0  ;;  %v5487_v58 = vld [vmem:[#allocation2 + $0x6c] sm:$0xf] }
 0x306   : > { %v5222_v55 = vsel %vm15260_vm14, %v5214_v52, %v5221_v18  ;;  %v5478_v25 = vsel %vm15266_vm15, %v5223_v30, %v5477_v5  ;;  %5483 = vst.msk [vmem:[#allocation2 + $0x64] sm:$0xf] %vm4950_vm8, %v5239_v23  ;;  %5486 = vst [vmem:[#allocation2 + $0x68] sm:$0x1] %v5485_v56  ;;  %v5259_v36 = vshrl.u32 %v11691_v28, 16  ;;  %v5262_v46 = vshll.u32 %v11691_v28, 16 }
 0x307   : > { %5476 = vst.msk [vmem:[#allocation2 + $0x58] sm:$0xf] %vm4950_vm8, %v5222_v55  ;;  %5479 = vst [vmem:[#allocation2 + $0x5c] sm:$0x1] %v5478_v25  ;;  %v5242_v13 = vshrl.u32 %v11689_v4, 16  ;;  %v5245_v34 = vshll.u32 %v11689_v4, 16  ;;  %v11692_v14 = vpack.c.bf16 %v4937_v41, %v4937_v41 }
 0x308   : > { %v4935_v3 = vmax.f32 %v4903_v29, 0.0  ;;  %v5619_v38 = vrot.slane %v5617_v49, 4  ;;  %v5622_v59 = vrot.slane %v5620_v43, 5  ;;  %v15368_v52 = vpop.f32.mrb[24].mxu0  ;;  %v5261_v45 = vrot.slane %v5259_v36, 7 }
 0x309   : > { %v5244_v16 = vrot.slane %v5242_v13, 7  ;;  %v5626_v44 = vshll.u32 %v5546_v24, 16  ;;  %v5630_v21 = vshrl.u32 %v5546_v24, 16  ;;  %v15370_v54 = vpop.f32.mrb[25].mxu0  ;;  %v5636_v10 = vshll.u32 %v5577_v11, 16 }
 0x30a   : > { %v11690_v7 = vpack.c.bf16 %v4935_v3, %v4935_v3  ;;  %v5623_v0 = vor.u32 %v5622_v59, %v5619_v38  ;;  %v15372_v5 = vpop.f32.mrb[26].mxu0  ;;  %v5264_v2 = vor.u32 %v5262_v46, %v5261_v45  ;;  %v5265_v33 = vrot.slane %v5261_v45, 4  ;;  %v5547_v49 = vld [vmem:[#allocation2 + $0x18] sm:$0xf]  ;;  %v5548_v28 = vld [vmem:[#allocation2 + $0x1c] sm:$0xf] }
 0x30b   : > { %v5247_v53 = vor.u32 %v5245_v34, %v5244_v16  ;;  %v5248_v51 = vrot.slane %v5244_v16, 4  ;;  %v15374_v43 = vpop.f32.mrb[27].mxu0  ;;  %v5267_v12 = vshrl.u32 %v11692_v14, 16  ;;  %v5270_v61 = vshll.u32 %v11692_v14, 16  ;;  %v5498_v55 = vld [vmem:[#allocation2 + $0x80] sm:$0x1] }
 0x30c   : > { %v5250_v18 = vshrl.u32 %v11690_v7, 16  ;;  %v5253_v30 = vshll.u32 %v11690_v7, 16  ;;  %v5495_v4 = vsel %vm15253_vm13, %v5264_v2, %v5494_v47  ;;  %v5624_v29 = vrot.slane %v5623_v0, 4  ;;  %v5491_v46 = vld [vmem:[#allocation2 + $0x74] sm:$0x1] }
 0x30d   : > { %v5488_v63 = vsel %vm15253_vm13, %v5247_v53, %v5487_v58  ;;  %v5628_v23 = vrot.slane %v5626_v44, 5  ;;  %5496 = vst [vmem:[#allocation2 + $0x78] sm:$0xf] %v5495_v4  ;;  %v5269_v56 = vrot.slane %v5267_v12, 7  ;;  %v5632_v24 = vrot.slane %v5630_v21, 4 }
 0x30e   : > { %5489 = vst [vmem:[#allocation2 + $0x6c] sm:$0xf] %v5488_v63  ;;  %v5252_v25 = vrot.slane %v5250_v18, 7  ;;  %v5638_v36 = vrot.slane %v5636_v10, 5  ;;  %v5641_v34 = vshrl.u32 %v5547_v49, 16  ;;  %v5644_v11 = vshll.u32 %v5547_v49, 16 }
 0x30f   : > { %v5629_v13 = vsel %vm13496_vm3, %v5624_v29, %v5628_v23  ;;  %v5650_v41 = vshll.u32 %v5548_v28, 16  ;;  %v5272_v3 = vor.u32 %v5270_v61, %v5269_v56  ;;  %v5274_v38 = vrot.slane %v5269_v56, 4  ;;  %v5578_v16 = vld [vmem:[#allocation2 + $0x20] sm:$0x1]  ;;  %v15382_v44 = vpop.f32.mrb[28].mxu0 }
 0x310   : > { %v5255_v59 = vor.u32 %v5253_v30, %v5252_v25  ;;  %v5257_v45 = vrot.slane %v5252_v25, 4  ;;  %v5633_v47 = vor.u32 %v5632_v24, %v5628_v23  ;;  %v5643_v58 = vrot.slane %v5641_v34, 4  ;;  %v15384_v21 = vpop.f32.mrb[29].mxu0  ;;  %v15408_v23 = vld [vmem:[#allocation2 + $0x24] sm:$0xf] }
 0x311   : > { %v5646_v14 = vrot.slane %v5644_v11, 5  ;;  %v5652_v7 = vrot.slane %v5650_v41, 5  ;;  %v5273_v0 = vsel %vm15260_vm14, %v5265_v33, %v5272_v3  ;;  %v5499_v10 = vsel %vm15266_vm15, %v5274_v38, %v5498_v55  ;;  %v15394_v49 = vpop.f32.mrb[30].mxu0 }
 0x312   : > { %v5256_v2 = vsel %vm15260_vm14, %v5248_v51, %v5255_v59  ;;  %v5492_v53 = vsel %vm15266_vm15, %v5257_v45, %v5491_v46  ;;  %5497 = vst.msk [vmem:[#allocation2 + $0x7c] sm:$0xf] %vm4950_vm8, %v5273_v0  ;;  %5500 = vst [vmem:[#allocation2 + $0x80] sm:$0x1] %v5499_v10  ;;  %v5634_v12 = vrot.slane %v5633_v47, 4  ;;  %v5654_v33 = vshrl.u32 %v5548_v28, 16 }
 0x313   : > { %5490 = vst.msk [vmem:[#allocation2 + $0x70] sm:$0xf] %vm4950_vm8, %v5256_v2  ;;  %5493 = vst [vmem:[#allocation2 + $0x74] sm:$0x1] %v5492_v53  ;;  %v5647_v61 = vor.u32 %v5646_v14, %v5643_v58  ;;  %v5660_v18 = vshll.u32 %v5578_v16, 16  ;;  %v15398_v30 = vpop.f32.mrb[31].mxu0  ;;  %v12712_v51 = vadd.f32 %v15340_v22, %v15210_v8  ;;  %v12713_v4 = vadd.f32 %v15348_v60, %v15217_v15 }
 0x314   : > { %v12714_v63 = vadd.f32 %v15352_v19, %v15221_v37  ;;  %v12715_v29 = vadd.f32 %v15354_v20, %v15223_v26  ;;  %v5639_v28 = vsel %vm13496_vm3, %v5634_v12, %v5638_v36  ;;  %v5656_v55 = vrot.slane %v5654_v33, 4  ;;  %v15415_v60 = vld [vmem:[#allocation2 + $0x28] sm:$0xf]  ;;  %v5579_v0 = vld [vmem:[#allocation2 + $0x2c] sm:$0x1] }
 0x315   : > { %v5648_v56 = vrot.slane %v5647_v61, 4  ;;  %v5662_v25 = vrot.slane %v5660_v18, 5  ;;  %v11277_v24 = vcombine.low %v5629_v13, %v5639_v28  ;;  %v4908_v8 = vadd.f32 %v12712_v51, %v15244_v57  ;;  %v15420_v37 = vld [vmem:[%s17315_s3 + $0x8] sm:$0xf]  ;;  %v15580_v6 = vld [vmem:[#allocation2 + $0x78] sm:$0xf] }
 0x316   : > { %v4906_v22 = vadd.f32 %v12713_v4, %v15244_v57  ;;  %v4909_v15 = vadd.f32 %v12714_v63, %v15244_v57  ;;  %v5657_v19 = vor.u32 %v5656_v55, %v5652_v7  ;;  %v4907_v20 = vadd.f32 %v12715_v29, %v15244_v57  ;;  %v5508_v29 = vld [vmem:[#allocation2 + $0x90] sm:$0xf] }
 0x317   : > { %v5653_v26 = vsel %vm13496_vm3, %v5648_v56, %v5652_v7  ;;  %v5665_v36 = vshrl.u32 %v15408_v23, 16  ;;  %12369 = vmatmul.mubr.msk.bf16.vlgmr.msra.gmra.mrb[16].mxu1 %vm806_vm4, %v11277_v24  ;;  %v4940_v46 = vmax.f32 %v4908_v8, 0.0  ;;  %v5668_v11 = vshll.u32 %v15408_v23, 16 }
 0x318   : > { %v4938_v13 = vmax.f32 %v4906_v22, 0.0  ;;  %v4941_v34 = vmax.f32 %v4909_v15, 0.0  ;;  %v5658_v41 = vrot.slane %v5657_v19, 4  ;;  %12401 = vmatpush3.bf16.msra.mxu1 %v15292_v17  ;;  %v4939_v3 = vmax.f32 %v4907_v20, 0.0 }
 0x319   : > { %v5667_v38 = vrot.slane %v5665_v36, 4  ;;  %v5674_v59 = vshll.u32 %v15415_v60, 16  ;;  %v11695_v45 = vpack.c.bf16 %v4940_v46, %v4940_v46  ;;  %v5670_v58 = vrot.slane %v5668_v11, 5  ;;  %13232 = vmatprep.subr.msk.bf16.mxu1 %vm855_vm0, %v15420_v37  ;;  %v5512_v46 = vld [vmem:[#allocation2 + $0x98] sm:$0x1] }
 0x31a   : > { %v11693_v16 = vpack.c.bf16 %v4938_v13, %v4938_v13  ;;  %v11696_v47 = vpack.c.bf16 %v4941_v34, %v4941_v34  ;;  %v5663_v14 = vsel %vm13496_vm3, %v5658_v41, %v5662_v25  ;;  %v11694_v7 = vpack.c.bf16 %v4939_v3, %v4939_v3  ;;  %v5501_v25 = vld [vmem:[#allocation2 + $0x84] sm:$0xf]  ;;  %v5505_v13 = vld [vmem:[#allocation2 + $0x8c] sm:$0x1] }
 0x31b   : > { %v5676_v10 = vrot.slane %v5674_v59, 5  ;;  %v5678_v2 = vshrl.u32 %v15415_v60, 16  ;;  %v11278_v17 = vcombine.low %v5653_v26, %v5663_v14  ;;  %v5293_v53 = vshrl.u32 %v11695_v45, 16  ;;  %v15436_v59 = vld [vmem:[#allocation2 + $0x30] sm:$0xf] }
 0x31c   : > { %v5296_v12 = vshll.u32 %v11695_v45, 16  ;;  %v5276_v61 = vshrl.u32 %v11693_v16, 16  ;;  %v5279_v33 = vshll.u32 %v11693_v16, 16  ;;  %v5301_v18 = vshrl.u32 %v11696_v47, 16  ;;  %v5580_v14 = vld [vmem:[#allocation2 + $0x38] sm:$0x1] }
 0x31d   : > { %v5304_v51 = vshll.u32 %v11696_v47, 16  ;;  %v5284_v4 = vshrl.u32 %v11694_v7, 16  ;;  %12372 = vmatprep.mubr.msk.bf16.mxu1 %vm806_vm4, %v11278_v17  ;;  %v5295_v63 = vrot.slane %v5293_v53, 7  ;;  %v5287_v56 = vshll.u32 %v11694_v7, 16 }
 0x31e   : > { %v5278_v28 = vrot.slane %v5276_v61, 7  ;;  %v5671_v55 = vor.u32 %v5670_v58, %v5667_v38  ;;  %v5303_v24 = vrot.slane %v5301_v18, 7  ;;  %v5680_v22 = vrot.slane %v5678_v2, 4  ;;  %v15442_v58 = vld [vmem:[#allocation2 + $0x34] sm:$0xf] }
 0x31f   : > { %v5286_v8 = vrot.slane %v5284_v4, 7  ;;  %v5684_v15 = vshll.u32 %v5579_v0, 16  ;;  %v5298_v26 = vor.u32 %v5296_v12, %v5295_v63  ;;  %v5299_v19 = vrot.slane %v5295_v63, 4  ;;  %v15457_v18 = vld [vmem:[#allocation2 + $0x3c] sm:$0xf] }
 0x320   : > { %v5281_v20 = vor.u32 %v5279_v33, %v5278_v28  ;;  %v5282_v36 = vrot.slane %v5278_v28, 4  ;;  %v5306_v34 = vor.u32 %v5304_v51, %v5303_v24  ;;  %v5308_v11 = vrot.slane %v5303_v24, 4 }
 0x321   : > { %v5289_v41 = vor.u32 %v5287_v56, %v5286_v8  ;;  %v5291_v3 = vrot.slane %v5286_v8, 4  ;;  %v5509_v38 = vsel %vm15253_vm13, %v5298_v26, %v5508_v29  ;;  %v5672_v16 = vrot.slane %v5671_v55, 4 }
 0x322   : > { %v5502_v45 = vsel %vm15253_vm13, %v5281_v20, %v5501_v25  ;;  %v5681_v47 = vor.u32 %v5680_v22, %v5676_v10  ;;  %5510 = vst [vmem:[#allocation2 + $0x90] sm:$0xf] %v5509_v38  ;;  %v5307_v7 = vsel %vm15260_vm14, %v5299_v19, %v5306_v34  ;;  %v5513_v0 = vsel %vm15266_vm15, %v5308_v11, %v5512_v46  ;;  %v15477_v34 = vld [vmem:[#allocation2 + $0x40] sm:$0xf] }
 0x323   : > { %5503 = vst [vmem:[#allocation2 + $0x84] sm:$0xf] %v5502_v45  ;;  %v5290_v2 = vsel %vm15260_vm14, %v5282_v36, %v5289_v41  ;;  %v5506_v17 = vsel %vm15266_vm15, %v5291_v3, %v5505_v13  ;;  %5511 = vst.msk [vmem:[#allocation2 + $0x94] sm:$0xf] %vm4950_vm8, %v5307_v7  ;;  %v5677_v53 = vsel %vm13496_vm3, %v5672_v16, %v5676_v10  ;;  %v5686_v61 = vrot.slane %v5684_v15, 5 }
 0x324   : > { %5514 = vst [vmem:[#allocation2 + $0x98] sm:$0x1] %v5513_v0  ;;  %5504 = vst.msk [vmem:[#allocation2 + $0x88] sm:$0xf] %vm4950_vm8, %v5290_v2  ;;  %v5682_v12 = vrot.slane %v5681_v47, 4  ;;  %v5689_v33 = vshrl.u32 %v15436_v59, 16  ;;  %v12716_v10 = vadd.f32 %v15368_v52, %v15225_v32  ;;  %v12717_v55 = vadd.f32 %v15370_v54, %v15227_v42 }
 0x325   : > { %5507 = vst [vmem:[#allocation2 + $0x8c] sm:$0x1] %v5506_v17  ;;  %v5692_v51 = vshll.u32 %v15436_v59, 16  ;;  %v5698_v4 = vshll.u32 %v15442_v58, 16  ;;  %v5702_v63 = vshrl.u32 %v15442_v58, 16  ;;  %v5708_v29 = vshll.u32 %v5580_v14, 16 }
 0x326   : > { %v5687_v28 = vsel %vm13496_vm3, %v5682_v12, %v5686_v61  ;;  %v5691_v56 = vrot.slane %v5689_v33, 4  ;;  %v4912_v26 = vadd.f32 %v12716_v10, %v15244_v57  ;;  %v4910_v19 = vadd.f32 %v12717_v55, %v15244_v57  ;;  %v5522_v12 = vld [vmem:[#allocation2 + $0xa8] sm:$0xf]  ;;  %v5515_v61 = vld [vmem:[#allocation2 + $0x9c] sm:$0xf] }
 0x327   : > { %v11279_v25 = vcombine.low %v5677_v53, %v5687_v28  ;;  %v5694_v24 = vrot.slane %v5692_v51, 5  ;;  %v5700_v8 = vrot.slane %v5698_v4, 5  ;;  %v5704_v22 = vrot.slane %v5702_v63, 4  ;;  %v15486_v4 = vld [vmem:[#allocation2 + $0x44] sm:$0x1] }
 0x328   : > { %v5710_v15 = vrot.slane %v5708_v29, 5  ;;  %v12718_v20 = vadd.f32 %v15372_v5, %v15229_v31  ;;  %v12719_v32 = vadd.f32 %v15374_v43, %v15231_v39  ;;  %v5713_v42 = vshrl.u32 %v15457_v18, 16  ;;  %v15488_v29 = vld [vmem:[#allocation2 + $0x48] sm:$0xf] }
 0x329   : > { %12373 = vmatmul.mubr.msk.bf16.gmra.mrb[20].mxu1 %vm806_vm4, %v11279_v25  ;;  %v5695_v36 = vor.u32 %v5694_v24, %v5691_v56  ;;  %v5705_v46 = vor.u32 %v5704_v22, %v5700_v8  ;;  %v4944_v52 = vmax.f32 %v4912_v26, 0.0  ;;  %v4942_v54 = vmax.f32 %v4910_v19, 0.0 }
 0x32a   : > { %v4913_v13 = vadd.f32 %v12718_v20, %v15244_v57  ;;  %v5716_v11 = vshll.u32 %v15457_v18, 16  ;;  %v4911_v31 = vadd.f32 %v12719_v32, %v15244_v57  ;;  %v5715_v5 = vrot.slane %v5713_v42, 4 }
 0x32b   : > { %v5696_v41 = vrot.slane %v5695_v36, 4  ;;  %v5706_v3 = vrot.slane %v5705_v46, 4  ;;  %v11699_v38 = vpack.c.bf16 %v4944_v52, %v4944_v52  ;;  %v11697_v45 = vpack.c.bf16 %v4942_v54, %v4942_v54 }
 0x32c   : > { %v4945_v16 = vmax.f32 %v4913_v13, 0.0  ;;  %v5718_v47 = vrot.slane %v5716_v11, 5  ;;  %v4943_v14 = vmax.f32 %v4911_v31, 0.0  ;;  %v5722_v7 = vshll.u32 %v15477_v34, 16  ;;  %v5526_v13 = vld [vmem:[#allocation2 + $0xb0] sm:$0x1] }
 0x32d   : > { %v5701_v39 = vsel %vm13496_vm3, %v5696_v41, %v5700_v8  ;;  %v5711_v43 = vsel %vm13496_vm3, %v5706_v3, %v5710_v15  ;;  %v5327_v2 = vshrl.u32 %v11699_v38, 16  ;;  %v5330_v17 = vshll.u32 %v11699_v38, 16  ;;  %v5519_v11 = vld [vmem:[#allocation2 + $0xa4] sm:$0x1] }
 0x32e   : > { %v11280_v0 = vcombine.low %v5701_v39, %v5711_v43  ;;  %v5310_v53 = vshrl.u32 %v11697_v45, 16  ;;  %v5313_v57 = vshll.u32 %v11697_v45, 16  ;;  %v11700_v33 = vpack.c.bf16 %v4945_v16, %v4945_v16  ;;  %v15498_v16 = vld [vmem:[#allocation2 + $0x4c] sm:$0xf] }
 0x32f   : > { %v11698_v51 = vpack.c.bf16 %v4943_v14, %v4943_v14  ;;  %v5719_v63 = vor.u32 %v5718_v47, %v5715_v5  ;;  %v5329_v28 = vrot.slane %v5327_v2, 7  ;;  %v5724_v10 = vrot.slane %v5722_v7, 5  ;;  %v15502_v14 = vld [vmem:[#allocation2 + $0x50] sm:$0x1] }
 0x330   : > { %12376 = vmatprep.mubr.msk.bf16.mxu1 %vm806_vm4, %v11280_v0  ;;  %v5312_v56 = vrot.slane %v5310_v53, 7  ;;  %v5726_v55 = vshrl.u32 %v15477_v34, 16  ;;  %v5335_v25 = vshrl.u32 %v11700_v33, 16  ;;  %v5338_v24 = vshll.u32 %v11700_v33, 16 }
 0x331   : > { %v5318_v8 = vshrl.u32 %v11698_v51, 16  ;;  %v5321_v22 = vshll.u32 %v11698_v51, 16  ;;  %v5332_v15 = vor.u32 %v5330_v17, %v5329_v28  ;;  %v5333_v26 = vrot.slane %v5329_v28, 4 }
 0x332   : > { %v5315_v19 = vor.u32 %v5313_v57, %v5312_v56  ;;  %v5316_v20 = vrot.slane %v5312_v56, 4  ;;  %v5337_v36 = vrot.slane %v5335_v25, 7  ;;  %v5720_v32 = vrot.slane %v5719_v63, 4 }
 0x333   : > { %v5320_v46 = vrot.slane %v5318_v8, 7  ;;  %v5728_v42 = vrot.slane %v5726_v55, 4  ;;  %v5523_v52 = vsel %vm15253_vm13, %v5332_v15, %v5522_v12  ;;  %v5732_v41 = vshll.u32 %v15486_v4, 16 }
 0x334   : > { %v5516_v54 = vsel %vm15253_vm13, %v5315_v19, %v5515_v61  ;;  %v5737_v3 = vshrl.u32 %v15488_v29, 16  ;;  %5524 = vst [vmem:[#allocation2 + $0xa8] sm:$0xf] %v5523_v52  ;;  %v5340_v31 = vor.u32 %v5338_v24, %v5337_v36  ;;  %v5342_v5 = vrot.slane %v5337_v36, 4 }
 0x335   : > { %5517 = vst [vmem:[#allocation2 + $0x9c] sm:$0xf] %v5516_v54  ;;  %v5323_v38 = vor.u32 %v5321_v22, %v5320_v46  ;;  %v5325_v45 = vrot.slane %v5320_v46, 4  ;;  %v5725_v47 = vsel %vm13496_vm3, %v5720_v32, %v5724_v10  ;;  %v5729_v39 = vor.u32 %v5728_v42, %v5724_v10  ;;  %v15524_v10 = vld [vmem:[#allocation2 + $0x54] sm:$0xf] }
 0x336   : > { %v5734_v43 = vrot.slane %v5732_v41, 5  ;;  %v5739_v7 = vrot.slane %v5737_v3, 4  ;;  %v5341_v0 = vsel %vm15260_vm14, %v5333_v26, %v5340_v31  ;;  %v5527_v2 = vsel %vm15266_vm15, %v5342_v5, %v5526_v13 }
 0x337   : > { %v5324_v17 = vsel %vm15260_vm14, %v5316_v20, %v5323_v38  ;;  %v5520_v53 = vsel %vm15266_vm15, %v5325_v45, %v5519_v11  ;;  %5525 = vst.msk [vmem:[#allocation2 + $0xac] sm:$0xf] %vm4950_vm8, %v5341_v0  ;;  %5528 = vst [vmem:[#allocation2 + $0xb0] sm:$0x1] %v5527_v2  ;;  %v5730_v12 = vrot.slane %v5729_v39, 4  ;;  %v5740_v57 = vshll.u32 %v15488_v29, 16 }
 0x338   : > { %5518 = vst.msk [vmem:[#allocation2 + $0xa0] sm:$0xf] %vm4950_vm8, %v5324_v17  ;;  %5521 = vst [vmem:[#allocation2 + $0xa4] sm:$0x1] %v5520_v53  ;;  %v5746_v61 = vshll.u32 %v15498_v16, 16  ;;  %v5750_v33 = vshrl.u32 %v15498_v16, 16  ;;  %v12720_v63 = vadd.f32 %v15382_v44, %v15233_v48  ;;  %v12721_v28 = vadd.f32 %v15384_v21, %v15235_v1 }
 0x339   : > { %v5756_v51 = vshll.u32 %v15502_v14, 16  ;;  %v12722_v56 = vadd.f32 %v15394_v49, %v15237_v9  ;;  %v5735_v55 = vsel %vm13496_vm3, %v5730_v12, %v5734_v43  ;;  %v5742_v25 = vrot.slane %v5740_v57, 5  ;;  %v13365_v48 = vld [vmem:[%s17314_s2] ss:$0 sm:$0xff]  ;;  %v15540_v38 = vld [vmem:[#allocation2 + $0x58] sm:$0xf] }
 0x33a   : > { %v5748_v24 = vrot.slane %v5746_v61, 5  ;;  %v5752_v8 = vrot.slane %v5750_v33, 4  ;;  %v11281_v22 = vcombine.low %v5725_v47, %v5735_v55  ;;  %v4916_v44 = vadd.f32 %v13365_v48, %v12720_v63 }
 0x33b   : > { %v5758_v15 = vrot.slane %v5756_v51, 5  ;;  %v4914_v26 = vadd.f32 %v13365_v48, %v12721_v28  ;;  %v5743_v1 = vor.u32 %v5742_v25, %v5739_v7  ;;  %v4917_v19 = vadd.f32 %v13365_v48, %v12722_v56  ;;  %v5536_v7 = vld [vmem:[#allocation2 + $0xc0] sm:$0xf]  ;;  %v5529_v51 = vld [vmem:[#allocation2 + $0xb4] sm:$0xf] }
 0x33c   : > { %v5753_v21 = vor.u32 %v5752_v8, %v5748_v24  ;;  %v12723_v9 = vadd.f32 %v15398_v30, %v15239_v40  ;;  %12377 = vmatmul.mubr.msk.bf16.gmra.mrb[24].mxu1 %vm806_vm4, %v11281_v22  ;;  %v4948_v49 = vmax.f32 %v4916_v44, 0.0  ;;  %v5761_v36 = vshrl.u32 %v15524_v10, 16 }
 0x33d   : > { %v4946_v20 = vmax.f32 %v4914_v26, 0.0  ;;  %v5764_v46 = vshll.u32 %v15524_v10, 16  ;;  %v5744_v32 = vrot.slane %v5743_v1, 4  ;;  %v4949_v52 = vmax.f32 %v4917_v19, 0.0 }
 0x33e   : > { %v5754_v42 = vrot.slane %v5753_v21, 4  ;;  %v4915_v54 = vadd.f32 %v13365_v48, %v12723_v9  ;;  %v11703_v13 = vpack.c.bf16 %v4948_v49, %v4948_v49  ;;  %v5763_v41 = vrot.slane %v5761_v36, 4  ;;  %v15545_v48 = vld [vmem:[#allocation2 + $0x60] sm:$0xf]  ;;  %v15547_v21 = vld [vmem:[#allocation2 + $0x5c] sm:$0x1] }
 0x33f   : > { %v11701_v11 = vpack.c.bf16 %v4946_v20, %v4946_v20  ;;  %v5766_v3 = vrot.slane %v5764_v46, 5  ;;  %v5749_v31 = vsel %vm13496_vm3, %v5744_v32, %v5748_v24  ;;  %v11704_v30 = vpack.c.bf16 %v4949_v52, %v4949_v52  ;;  %v5533_v20 = vld [vmem:[#allocation2 + $0xbc] sm:$0x1]  ;;  %v15553_v32 = vld [vmem:[#allocation2 + $0x64] sm:$0xf] }
 0x340   : > { %v5759_v40 = vsel %vm13496_vm3, %v5754_v42, %v5758_v15  ;;  %v4947_v5 = vmax.f32 %v4915_v54, 0.0  ;;  %v5361_v47 = vshrl.u32 %v11703_v13, 16  ;;  %v5364_v39 = vshll.u32 %v11703_v13, 16  ;;  %v5540_v15 = vld [vmem:[#allocation2 + $0xc8] sm:$0x1] }
 0x341   : > { %v11282_v45 = vcombine.low %v5749_v31, %v5759_v40  ;;  %v5344_v43 = vshrl.u32 %v11701_v11, 16  ;;  %v5347_v0 = vshll.u32 %v11701_v11, 16  ;;  %v5369_v2 = vshrl.u32 %v11704_v30, 16  ;;  %v15566_v40 = vld [vmem:[#allocation2 + $0x6c] sm:$0xf] }
 0x342   : > { %v5372_v17 = vshll.u32 %v11704_v30, 16  ;;  %v11702_v53 = vpack.c.bf16 %v4947_v5, %v4947_v5  ;;  %v5363_v12 = vrot.slane %v5361_v47, 7  ;;  %v5767_v61 = vor.u32 %v5766_v3, %v5763_v41  ;;  %v15563_v3 = vld [vmem:[#allocation2 + $0x68] sm:$0x1] }
 0x343   : > { %12380 = vmatprep.mubr.msk.bf16.mxu1 %vm806_vm4, %v11282_v45  ;;  %v5346_v57 = vrot.slane %v5344_v43, 7  ;;  %v5770_v33 = vshll.u32 %v15540_v38, 16  ;;  %v5371_v63 = vrot.slane %v5369_v2, 7  ;;  %v5774_v55 = vshrl.u32 %v15540_v38, 16 }
 0x344   : > { %v5352_v28 = vshrl.u32 %v11702_v53, 16  ;;  %v5355_v56 = vshll.u32 %v11702_v53, 16  ;;  %v5366_v25 = vor.u32 %v5364_v39, %v5363_v12  ;;  %v5367_v24 = vrot.slane %v5363_v12, 4  ;;  %v15574_v39 = vld [vmem:[#allocation2 + $0x70] sm:$0xf] }
 0x345   : > { %v5349_v8 = vor.u32 %v5347_v0, %v5346_v57  ;;  %v5350_v22 = vrot.slane %v5346_v57, 4  ;;  %v5374_v44 = vor.u32 %v5372_v17, %v5371_v63  ;;  %v5376_v26 = vrot.slane %v5371_v63, 4  ;;  %v15578_v17 = vld [vmem:[#allocation2 + $0x74] sm:$0x1] }
 0x346   : > { %v5354_v1 = vrot.slane %v5352_v28, 7  ;;  %v5768_v19 = vrot.slane %v5767_v61, 4  ;;  %v5537_v9 = vsel %vm15253_vm13, %v5366_v25, %v5536_v7  ;;  %v5772_v36 = vrot.slane %v5770_v33, 5  ;;  %v15584_v61 = vld [vmem:[#allocation2 + $0x7c] sm:$0xf] }
 0x347   : > { %v5530_v49 = vsel %vm15253_vm13, %v5349_v8, %v5529_v51  ;;  %v5776_v46 = vrot.slane %v5774_v55, 4  ;;  %5538 = vst [vmem:[#allocation2 + $0xc0] sm:$0xf] %v5537_v9  ;;  %v5375_v42 = vsel %vm15260_vm14, %v5367_v24, %v5374_v44  ;;  %v5541_v52 = vsel %vm15266_vm15, %v5376_v26, %v5540_v15 }
 0x348   : > { %5531 = vst [vmem:[#allocation2 + $0xb4] sm:$0xf] %v5530_v49  ;;  %v5357_v54 = vor.u32 %v5355_v56, %v5354_v1  ;;  %v5359_v13 = vrot.slane %v5354_v1, 4  ;;  %5539 = vst.msk [vmem:[#allocation2 + $0xc4] sm:$0xf] %vm4950_vm8, %v5375_v42  ;;  %v5773_v62 = vsel %vm13496_vm3, %v5768_v19, %v5772_v36  ;;  %v5780_v41 = vshll.u32 %v15547_v21, 16 }
 0x349   : > { %5542 = vst [vmem:[#allocation2 + $0xc8] sm:$0x1] %v5541_v52  ;;  %v5777_v11 = vor.u32 %v5776_v46, %v5772_v36  ;;  %v5785_v31 = vshrl.u32 %v15545_v48, 16  ;;  %v5788_v45 = vshll.u32 %v15545_v48, 16  ;;  %v5794_v47 = vshll.u32 %v15553_v32, 16 }
 0x34a   : > { %v5358_v30 = vsel %vm15260_vm14, %v5350_v22, %v5357_v54  ;;  %v5534_v5 = vsel %vm15266_vm15, %v5359_v13, %v5533_v20  ;;  %v5782_v7 = vrot.slane %v5780_v41, 5  ;;  %v5798_v2 = vshrl.u32 %v15553_v32, 16  ;;  %v15593_v19 = vld [vmem:[#allocation2 + $0x80] sm:$0x1] }
 0x34b   : > { %5532 = vst.msk [vmem:[#allocation2 + $0xb8] sm:$0xf] %vm4950_vm8, %v5358_v30  ;;  %5535 = vst [vmem:[#allocation2 + $0xbc] sm:$0x1] %v5534_v5  ;;  %v5778_v43 = vrot.slane %v5777_v11, 4  ;;  %v5787_v0 = vrot.slane %v5785_v31, 4 }
 0x34c   : > { %v5790_v50 = vrot.slane %v5788_v45, 5  ;;  %v5796_v53 = vrot.slane %v5794_v47, 5  ;;  %v5804_v12 = vshll.u32 %v15563_v3, 16  ;;  %v5809_v57 = vshrl.u32 %v15566_v40, 16  ;;  %v15600_v11 = vld [vmem:[#allocation2 + $0x84] sm:$0xf] }
 0x34d   : > { %v5783_v33 = vsel %vm13496_vm3, %v5778_v43, %v5782_v7  ;;  %v5800_v51 = vrot.slane %v5798_v2, 4  ;;  %v5812_v63 = vshll.u32 %v15566_v40, 16  ;;  %v5818_v28 = vshll.u32 %v15574_v39, 16  ;;  %v15604_v45 = vld [vmem:[#allocation2 + $0x88] sm:$0xf] }
 0x34e   : > { %v11283_v56 = vcombine.low %v5773_v62, %v5783_v33  ;;  %v5791_v55 = vor.u32 %v5790_v50, %v5787_v0  ;;  %v5806_v25 = vrot.slane %v5804_v12, 5  ;;  %v5811_v24 = vrot.slane %v5809_v57, 4 }
 0x34f   : > { %v5801_v8 = vor.u32 %v5800_v51, %v5796_v53  ;;  %v5814_v22 = vrot.slane %v5812_v63, 5  ;;  %v5820_v15 = vrot.slane %v5818_v28, 5  ;;  %v5822_v44 = vshrl.u32 %v15574_v39, 16 }
 0x350   : > { %12381 = vmatmul.mubr.msk.bf16.gmra.mrb[28].mxu1 %vm806_vm4, %v11283_v56  ;;  %v5792_v26 = vrot.slane %v5791_v55, 4  ;;  %v5828_v1 = vshll.u32 %v15578_v17, 16  ;;  %v5833_v9 = vshrl.u32 %v15580_v6, 16  ;;  %v5836_v49 = vshll.u32 %v15580_v6, 16  ;;  %v15616_v56 = vld [vmem:[#allocation2 + $0x90] sm:$0xf] }
 0x351   : > { %v5802_v20 = vrot.slane %v5801_v8, 4  ;;  %v5815_v36 = vor.u32 %v5814_v22, %v5811_v24  ;;  %v5824_v46 = vrot.slane %v5822_v44, 4  ;;  %v5842_v42 = vshll.u32 %v15584_v61, 16  ;;  %v15621_v22 = vld [vmem:[#allocation2 + $0x94] sm:$0xf] }
 0x352   : > { %v5797_v52 = vsel %vm13496_vm3, %v5792_v26, %v5796_v53  ;;  %v5830_v54 = vrot.slane %v5828_v1, 5  ;;  %v5835_v13 = vrot.slane %v5833_v9, 4  ;;  %v5838_v62 = vrot.slane %v5836_v49, 5  ;;  %v15610_v53 = vld [vmem:[#allocation2 + $0x8c] sm:$0x1] }
 0x353   : > { %v5807_v41 = vsel %vm13496_vm3, %v5802_v20, %v5806_v25  ;;  %v5816_v31 = vrot.slane %v5815_v36, 4  ;;  %v5825_v30 = vor.u32 %v5824_v46, %v5820_v15  ;;  %v5844_v5 = vrot.slane %v5842_v42, 5  ;;  %v15626_v36 = vld [vmem:[#allocation2 + $0x98] sm:$0x1] }
 0x354   : > { %v11284_v47 = vcombine.low %v5797_v52, %v5807_v41  ;;  %v5839_v43 = vor.u32 %v5838_v62, %v5835_v13  ;;  %v5846_v7 = vshrl.u32 %v15584_v61, 16  ;;  %v5852_v0 = vshll.u32 %v15593_v19, 16  ;;  %v15633_v62 = vld [vmem:[#allocation2 + $0x9c] sm:$0xf] }
 0x355   : > { %v5821_v2 = vsel %vm13496_vm3, %v5816_v31, %v5820_v15  ;;  %v5826_v50 = vrot.slane %v5825_v30, 4  ;;  %v5857_v12 = vshrl.u32 %v15600_v11, 16  ;;  %v5860_v57 = vshll.u32 %v15600_v11, 16 }
 0x356   : > { %12384 = vmatprep.mubr.msk.bf16.mxu1 %vm806_vm4, %v11284_v47  ;;  %v5840_v33 = vrot.slane %v5839_v43, 4  ;;  %v5848_v51 = vrot.slane %v5846_v7, 4  ;;  %v5854_v63 = vrot.slane %v5852_v0, 5  ;;  %v5866_v28 = vshll.u32 %v15604_v45, 16  ;;  %v15635_v47 = vld [vmem:[#allocation2 + $0xa0] sm:$0xf] }
 0x357   : > { %v5831_v55 = vsel %vm13496_vm3, %v5826_v50, %v5830_v54  ;;  %v5859_v25 = vrot.slane %v5857_v12, 4  ;;  %v5862_v24 = vrot.slane %v5860_v57, 5  ;;  %v5870_v8 = vshrl.u32 %v15604_v45, 16  ;;  %v15639_v50 = vld [vmem:[#allocation2 + $0xa4] sm:$0x1] }
 0x358   : > { %v11285_v15 = vcombine.low %v5821_v2, %v5831_v55  ;;  %v5845_v44 = vsel %vm13496_vm3, %v5840_v33, %v5844_v5  ;;  %v5849_v26 = vor.u32 %v5848_v51, %v5844_v5  ;;  %v5868_v1 = vrot.slane %v5866_v28, 5  ;;  %v15644_v28 = vld [vmem:[#allocation2 + $0xa8] sm:$0xf] }
 0x359   : > { %v5863_v9 = vor.u32 %v5862_v24, %v5859_v25  ;;  %v5872_v49 = vrot.slane %v5870_v8, 4  ;;  %v5876_v20 = vshll.u32 %v15610_v53, 16  ;;  %v5881_v46 = vshrl.u32 %v15616_v56, 16 }
 0x35a   : > { %12385 = vmatmul.mubr.msk.bf16.gmra.mrb[32].mxu1 %vm806_vm4, %v11285_v15  ;;  %v5850_v42 = vrot.slane %v5849_v26, 4  ;;  %v5884_v52 = vshll.u32 %v15616_v56, 16  ;;  %v5890_v54 = vshll.u32 %v15621_v22, 16  ;;  %v5894_v13 = vshrl.u32 %v15621_v22, 16 }
 0x35b   : > { %v5864_v41 = vrot.slane %v5863_v9, 4  ;;  %v5873_v31 = vor.u32 %v5872_v49, %v5868_v1  ;;  %v5878_v30 = vrot.slane %v5876_v20, 5  ;;  %v5883_v5 = vrot.slane %v5881_v46, 4  ;;  %v15653_v46 = vld [vmem:[#allocation2 + $0xac] sm:$0xf] }
 0x35c   : > { %v5855_v43 = vsel %vm13496_vm3, %v5850_v42, %v5854_v63  ;;  %v5886_v7 = vrot.slane %v5884_v52, 5  ;;  %v5892_v0 = vrot.slane %v5890_v54, 5  ;;  %v5896_v2 = vrot.slane %v5894_v13, 4 }
 0x35d   : > { %v11286_v12 = vcombine.low %v5845_v44, %v5855_v43  ;;  %v5869_v57 = vsel %vm13496_vm3, %v5864_v41, %v5868_v1  ;;  %v5874_v33 = vrot.slane %v5873_v31, 4  ;;  %v5900_v51 = vshll.u32 %v15626_v36, 16  ;;  %v15656_v41 = vld [vmem:[#allocation2 + $0xb0] sm:$0x1] }
 0x35e   : > { %v5887_v55 = vor.u32 %v5886_v7, %v5883_v5  ;;  %v5897_v25 = vor.u32 %v5896_v2, %v5892_v0  ;;  %v5905_v24 = vshrl.u32 %v15633_v62, 16  ;;  %v5908_v63 = vshll.u32 %v15633_v62, 16  ;;  %v15665_v7 = vld [vmem:[#allocation2 + $0xb4] sm:$0xf] }
 0x35f   : > { %12388 = vmatprep.mubr.msk.bf16.mxu1 %vm806_vm4, %v11286_v12  ;;  %v5879_v8 = vsel %vm13496_vm3, %v5874_v33, %v5878_v30  ;;  %v5902_v15 = vrot.slane %v5900_v51, 5  ;;  %v5914_v44 = vshll.u32 %v15635_v47, 16  ;;  %v5918_v26 = vshrl.u32 %v15635_v47, 16 }
 0x360   : > { %v11287_v1 = vcombine.low %v5869_v57, %v5879_v8  ;;  %v5888_v9 = vrot.slane %v5887_v55, 4  ;;  %v5898_v49 = vrot.slane %v5897_v25, 4  ;;  %v5907_v20 = vrot.slane %v5905_v24, 4 }
 0x361   : > { %v5910_v42 = vrot.slane %v5908_v63, 5  ;;  %v5916_v52 = vrot.slane %v5914_v44, 5  ;;  %v5920_v54 = vrot.slane %v5918_v26, 4  ;;  %v5924_v13 = vshll.u32 %v15639_v50, 16 }
 0x362   : > { %12389 = vmatmul.mubr.msk.bf16.gmra.mrb[36].mxu1 %vm806_vm4, %v11287_v1  ;;  %v5893_v31 = vsel %vm13496_vm3, %v5888_v9, %v5892_v0  ;;  %v5903_v30 = vsel %vm13496_vm3, %v5898_v49, %v5902_v15  ;;  %v5929_v5 = vshrl.u32 %v15644_v28, 16  ;;  %v5932_v43 = vshll.u32 %v15644_v28, 16  ;;  %v15669_v0 = vld [vmem:[#allocation2 + $0xb8] sm:$0xf] }
 0x363   : > { %v11288_v2 = vcombine.low %v5893_v31, %v5903_v30  ;;  %v5911_v12 = vor.u32 %v5910_v42, %v5907_v20  ;;  %v5921_v57 = vor.u32 %v5920_v54, %v5916_v52  ;;  %v5926_v33 = vrot.slane %v5924_v13, 5  ;;  %v15679_v54 = vld [vmem:[#allocation2 + $0xbc] sm:$0x1] }
 0x364   : > { %v5931_v51 = vrot.slane %v5929_v5, 4  ;;  %v5934_v55 = vrot.slane %v5932_v43, 5  ;;  %v5938_v25 = vshll.u32 %v15653_v46, 16  ;;  %v5942_v24 = vshrl.u32 %v15653_v46, 16 }
 0x365   : > { %12392 = vmatprep.mubr.msk.bf16.mxu1 %vm806_vm4, %v11288_v2  ;;  %v5912_v63 = vrot.slane %v5911_v12, 4  ;;  %v5922_v8 = vrot.slane %v5921_v57, 4  ;;  %v5948_v15 = vshll.u32 %v15656_v41, 16  ;;  %v5953_v44 = vshrl.u32 %v15665_v7, 16 }
 0x366   : > { %v5935_v26 = vor.u32 %v5934_v55, %v5931_v51  ;;  %v5940_v1 = vrot.slane %v5938_v25, 5  ;;  %v5944_v9 = vrot.slane %v5942_v24, 4  ;;  %v5956_v49 = vshll.u32 %v15665_v7, 16 }
 0x367   : > { %v5917_v20 = vsel %vm13496_vm3, %v5912_v63, %v5916_v52  ;;  %v5927_v42 = vsel %vm13496_vm3, %v5922_v8, %v5926_v33  ;;  %v5955_v13 = vrot.slane %v5953_v44, 4  ;;  %v5962_v2 = vshll.u32 %v15669_v0, 16 }
 0x368   : > { %v11289_v31 = vcombine.low %v5917_v20, %v5927_v42  ;;  %v5936_v30 = vrot.slane %v5935_v26, 4  ;;  %v5945_v5 = vor.u32 %v5944_v9, %v5940_v1  ;;  %v5958_v43 = vrot.slane %v5956_v49, 5 }
 0x369   : > { %v5966_v12 = vshrl.u32 %v15669_v0, 16  ;;  %v5950_v51 = vrot.slane %v5948_v15, 5  ;;  %v5972_v52 = vshll.u32 %v15679_v54, 16  ;;  %v5964_v25 = vrot.slane %v5962_v2, 5 }
 0x36a   : > { %12393 = vmatmul.mubr.msk.bf16.gmra.mrb[40].mxu1 %vm806_vm4, %v11289_v31  ;;  %v5946_v57 = vrot.slane %v5945_v5, 4  ;;  %v5959_v55 = vor.u32 %v5958_v43, %v5955_v13  ;;  %v5941_v24 = vsel %vm13496_vm3, %v5936_v30, %v5940_v1  ;;  %v11315_v49 = vcombine.low %v15524_v10, %v15540_v38 }
 0x36b   : > { %v5968_v33 = vrot.slane %v5966_v12, 4  ;;  %v5974_v9 = vrot.slane %v5972_v52, 5  ;;  %v11316_v15 = vcombine.low %v15545_v48, %v15553_v32  ;;  %v11317_v42 = vcombine.low %v15566_v40, %v15574_v39  ;;  %v6530_v48 = vld [vmem:[#allocation2] sm:$0xe] }
 0x36c   : > { %v5951_v63 = vsel %vm13496_vm3, %v5946_v57, %v5950_v51  ;;  %v5960_v44 = vrot.slane %v5959_v55, 4  ;;  %v11318_v1 = vcombine.low %v15580_v6, %v15584_v61  ;;  %v11319_v13 = vcombine.low %v15600_v11, %v15604_v45  ;;  %v13366_v57 = vld [vmem:[#allocation2] sm:$0xf]  ;;  %v15712_v51 = vld [vmem:[#allocation2 + $0x4] sm:$0xf] }
 0x36d   : > { %v11290_v8 = vcombine.low %v5941_v24, %v5951_v63  ;;  %v5969_v26 = vor.u32 %v5968_v33, %v5964_v25  ;;  %v11308_v55 = vcombine.low %v13366_v57, %v15712_v51  ;;  %v13368_v33 = vld [vmem:[#allocation2 + $0xc] sm:$0xf]  ;;  %v15717_v24 = vld [vmem:[#allocation2 + $0x10] sm:$0xf]  ;;  %v11311_v57 = vcombine.low %v15408_v23, %v15415_v60  ;;  %v6540_v23 = vld [vmem:[#allocation2 + $0x78] sm:$0xe] }
 0x36e   : > { %v5965_v2 = vsel %vm13496_vm3, %v5960_v44, %v5964_v25  ;;  %v11309_v63 = vcombine.low %v13368_v33, %v15717_v24  ;;  %v6789_v25 = vsel %vm855_vm0, %v15420_v37, 0  ;;  %v13370_v44 = vld [vmem:[#allocation2 + $0x18] sm:$0xf]  ;;  %v6538_v37 = vld [vmem:[#allocation2 + $0x60] sm:$0xe]  ;;  %v6643_v43 = vrot.slane %v15574_v39, 5 }
 0x36f   : > { %12396 = vmatprep.mubr.msk.bf16.mxu1 %vm806_vm4, %v11290_v8  ;;  %v5970_v20 = vrot.slane %v5969_v26, 4  ;;  %v6537_v8 = vld [vmem:[#allocation2 + $0x54] sm:$0xe]  ;;  %v15722_v26 = vld [vmem:[#allocation2 + $0x1c] sm:$0xf]  ;;  %v6674_v30 = vrot.slane %v15639_v50, 5  ;;  %v17466_v10 = vcombine.low %v15616_v56, %v15621_v22  ;;  %v17467_v6 = vcombine.low %v15633_v62, %v15635_v47 }
 0x370   : > { %v6539_v33 = vld [vmem:[#allocation2 + $0x6c] sm:$0xe]  ;;  %v6645_v5 = vrot.slane %v6643_v43, 4  ;;  %v6681_v31 = vrot.slane %v15656_v41, 5  ;;  %v13372_v39 = vld [vmem:[#allocation2 + $0x8] sm:$0x1]  ;;  %v17469_v62 = vcombine.low %v15665_v7, %v15669_v0 }
 0x371   : > { %v5975_v12 = vsel %vm13496_vm3, %v5970_v20, %v5974_v9  ;;  %v11310_v9 = vcombine.low %v13370_v44, %v15722_v26  ;;  %v15728_v20 = vld [vmem:[%s17315_s3 + $0xc] sm:$0xf]  ;;  %v6636_v44 = vrot.slane %v15553_v32, 5  ;;  %v11340_v32 = vrot.slane %v6530_v48, 9  ;;  %v6533_v48 = vld [vmem:[#allocation2 + $0x24] sm:$0xe] }
 0x372   : > { %v11291_v52 = vcombine.low %v5965_v2, %v5975_v12  ;;  %v6629_v2 = vrot.slane %v15540_v38, 5  ;;  %v11347_v12 = vrot.slane %v6537_v8, 9  ;;  %v6580_v38 = vrot.slane %v15712_v51, 5  ;;  %v8079_v41 = vld [vmem:[#allocation2 + $0x90] sm:$0xe] }
 0x373   : > { %v6587_v56 = vrot.slane %v15717_v24, 5 }
 0x374   : > { %12397 = vmatmul.mubr.msk.bf16.gmra.mrb[44].mxu1 %vm806_vm4, %v11291_v52  ;;  %v6632_v52 = vrot.slane %v15547_v21, 5  ;;  %v15744_v8 = vsel %vm13644_vm7, %v11347_v12, %v6629_v2  ;;  %v6639_v21 = vrot.slane %v15563_v3, 5  ;;  %v6582_v40 = vrot.slane %v6580_v38, 4 }
 0x375   : > { %12402 = vmatprep.mubr.msk.bf16.mxu1 %vm806_vm4, %v11308_v55  ;;  %v6631_v55 = vrot.slane %v6629_v2, 4  ;;  %v6541_v2 = vld [vmem:[#allocation2 + $0x84] sm:$0xe]  ;;  %v6581_v11 = vsel %vm13644_vm7, %v11340_v32, %v6580_v38  ;;  %v15911_v38 = vld [vmem:[%s17315_s3 + $0x10] sm:$0xf] }
 0x377   : > { %v15749_v60 = vsel %vm13644_vm7, %v6631_v55, %v6632_v52  ;;  %v11350_v55 = vrot.slane %v6540_v23, 9 }
 0x37c   : > { %12403 = vmatmul.mubr.msk.bf16.vlgmr.msra.gmra.mrb[16].mxu1 %vm806_vm4, %v11309_v63  ;;  %v11312_v63 = vcombine.low %v15436_v59, %v15442_v58  ;;  %v6638_v58 = vrot.slane %v6636_v44, 4  ;;  %v6543_v59 = vld [vmem:[#allocation2 + $0x9c] sm:$0xe] }
 0x37d   : > { %12435 = vmatpush3.bf16.msra.mxu1 %v6789_v25  ;;  %12406 = vmatprep.mubr.msk.bf16.mxu1 %vm806_vm4, %v11310_v9  ;;  %v11313_v25 = vcombine.low %v15457_v18, %v15477_v34  ;;  %v11348_v9 = vrot.slane %v6538_v37, 9  ;;  %v11349_v18 = vrot.slane %v6539_v33, 9  ;;  %v6646_v34 = vrot.slane %v15578_v17, 5 }
 0x37e   : > { %13233 = vmatprep.subr.msk.bf16.mxu1 %vm855_vm0, %v15728_v20  ;;  %v6650_v37 = vrot.slane %v15584_v61, 5  ;;  %v15763_v3 = vsel %vm13644_vm7, %v6638_v58, %v6639_v21  ;;  %v6653_v33 = vrot.slane %v15593_v19, 5  ;;  %v6657_v17 = vrot.slane %v15604_v45, 5  ;;  %v6542_v58 = vld [vmem:[#allocation2 + $0x90] sm:$0xe] }
 0x37f   : > { %v15758_v12 = vsel %vm13644_vm7, %v11348_v9, %v6636_v44  ;;  %v15767_v52 = vsel %vm13644_vm7, %v11349_v18, %v6643_v43  ;;  %v15776_v23 = vsel %vm13644_vm7, %v6645_v5, %v6646_v34  ;;  %v11351_v21 = vrot.slane %v6541_v2, 9 }
 0x380   : > { %v6652_v9 = vrot.slane %v6650_v37, 4  ;;  %v11314_v43 = vcombine.low %v15488_v29, %v15498_v16  ;;  %v6659_v18 = vrot.slane %v6657_v17, 4  ;;  %v15786_v44 = vsel %vm13644_vm7, %v11350_v55, %v6650_v37  ;;  %v6544_v37 = vld [vmem:[#allocation2 + $0xa8] sm:$0xe] }
 0x381   : > { %v6664_v29 = vrot.slane %v15621_v22, 5  ;;  %v11352_v2 = vrot.slane %v6542_v58, 9  ;;  %v6671_v55 = vrot.slane %v15635_v47, 5  ;;  %v6545_v58 = vld [vmem:[#allocation2 + $0xb4] sm:$0xe]  ;;  %v17468_v61 = vcombine.low %v15644_v28, %v15653_v46 }
 0x382   : > { %v15790_v5 = vsel %vm13644_vm7, %v6652_v9, %v6653_v33  ;;  %v6594_v22 = vrot.slane %v15722_v26, 5  ;;  %v6531_v47 = vld [vmem:[#allocation2 + $0xc] sm:$0xe]  ;;  %v13375_v26 = vld [vmem:[#allocation2 + $0x28] sm:$0xf] }
 0x383   : > { %v6666_v9 = vrot.slane %v6664_v29, 4  ;;  %v15809_v19 = vsel %vm13644_vm7, %v11352_v2, %v6664_v29  ;;  %v6673_v34 = vrot.slane %v6671_v55, 4  ;;  %v16093_v29 = vld [vmem:[#allocation2 + $0xac] sm:$0xf] }
 0x384   : > { %12407 = vmatmul.mubr.msk.bf16.gmra.mrb[20].mxu1 %vm806_vm4, %v11311_v57  ;;  %v6660_v57 = vrot.slane %v15610_v53, 5  ;;  %v6596_v28 = vrot.slane %v6594_v22, 4 }
 0x385   : > { %12410 = vmatprep.mubr.msk.bf16.mxu1 %vm806_vm4, %v11312_v63  ;;  %v15794_v63 = vsel %vm13644_vm7, %v11351_v21, %v6657_v17  ;;  %v6667_v17 = vrot.slane %v15626_v36, 5  ;;  %v11353_v21 = vrot.slane %v6543_v59, 9  ;;  %v11354_v36 = vrot.slane %v6544_v37, 9 }
 0x386   : > { %v15801_v53 = vsel %vm13644_vm7, %v6659_v18, %v6660_v57  ;;  %v6678_v18 = vrot.slane %v15653_v46, 5  ;;  %v6685_v59 = vrot.slane %v15669_v0, 5  ;;  %v15826_v50 = vsel %vm13644_vm7, %v6673_v34, %v6674_v30  ;;  %v13373_v46 = vld [vmem:[#allocation2 + $0x14] sm:$0x1] }
 0x387   : > { %v15815_v57 = vsel %vm13644_vm7, %v6666_v9, %v6667_v17  ;;  %v15819_v33 = vsel %vm13644_vm7, %v11353_v21, %v6671_v55  ;;  %v11355_v55 = vrot.slane %v6545_v58, 9  ;;  %v6688_v37 = vrot.slane %v15679_v54, 5  ;;  %v13376_v0 = vld [vmem:[#allocation2 + $0x34] sm:$0xf]  ;;  %v16075_v9 = vld [vmem:[#allocation2 + $0xa0] sm:$0xf] }
 0x388   : > { %v6680_v2 = vrot.slane %v6678_v18, 4  ;;  %v6687_v17 = vrot.slane %v6685_v59, 4  ;;  %v15836_v21 = vsel %vm13644_vm7, %v11354_v36, %v6678_v18  ;;  %v11341_v34 = vrot.slane %v6531_v47, 9 }
 0x389   : > { %v6601_v18 = vrot.slane %v13375_v26, 5  ;;  %v6608_v36 = vrot.slane %v13376_v0, 5 }
 0x38a   : > { %v15840_v30 = vsel %vm13644_vm7, %v6680_v2, %v6681_v31  ;;  %v15850_v54 = vsel %vm13644_vm7, %v6687_v17, %v6688_v37  ;;  %v13374_v31 = vld [vmem:[#allocation2 + $0x20] sm:$0x1] }
 0x38b   : > { %v6597_v51 = vrot.slane %v13374_v31, 5  ;;  %v6610_v32 = vrot.slane %v6608_v36, 4 }
 0x38c   : > { %12411 = vmatmul.mubr.msk.bf16.gmra.mrb[24].mxu1 %vm806_vm4, %v11313_v25  ;;  %v15846_v25 = vsel %vm13644_vm7, %v11355_v55, %v6685_v59  ;;  %v6588_v59 = vsel %vm13644_vm7, %v11341_v34, %v6587_v56  ;;  %v7147_v55 = vsel %vm855_vm0, %v15728_v20, 0  ;;  %v6534_v20 = vld [vmem:[#allocation2 + $0x30] sm:$0xe]  ;;  %v6536_v34 = vld [vmem:[#allocation2 + $0x48] sm:$0xe] }
 0x38d   : > { %12414 = vmatprep.mubr.msk.bf16.mxu1 %vm806_vm4, %v11314_v43  ;;  %v6598_v7 = vsel %vm13644_vm7, %v6596_v28, %v6597_v51  ;;  %v6618_v51 = vrot.slane %v15486_v4, 5  ;;  %v15940_v4 = vld [vmem:[#allocation2 + $0x28] sm:$0xf] }
 0x394   : > { %12415 = vmatmul.mubr.msk.bf16.gmra.mrb[28].mxu1 %vm806_vm4, %v11315_v49  ;;  %v6583_v49 = vrot.slane %v13372_v39, 5 }
 0x395   : > { %12418 = vmatprep.mubr.msk.bf16.mxu1 %vm806_vm4, %v11316_v15 }
 0x396   : > { %v6584_v45 = vsel %vm13644_vm7, %v6582_v40, %v6583_v49  ;;  %v13377_v40 = vld [vmem:[#allocation2 + $0x2c] sm:$0x1]  ;;  %v13378_v49 = vld [vmem:[#allocation2 + $0x38] sm:$0x1] }
 0x397   : > { %v11357_v15 = vcombine.low %v6581_v11, %v6584_v45  ;;  %v6604_v39 = vrot.slane %v13377_v40, 5  ;;  %v13379_v45 = vld [vmem:[#allocation2 + $0x40] sm:$0xf]  ;;  %v17471_v40 = vcombine.low %v15758_v12, %v15763_v3 }
 0x39c   : > { %12419 = vmatmul.mubr.msk.bf16.gmra.mrb[32].mxu1 %vm806_vm4, %v11317_v42  ;;  %v6589_v42 = vrot.slane %v6587_v56, 4  ;;  %v6615_v56 = vrot.slane %v13379_v45, 5 }
 0x39d   : > { %12422 = vmatprep.mubr.msk.bf16.mxu1 %vm806_vm4, %v11318_v1  ;;  %v6590_v1 = vrot.slane %v13373_v46, 5 }
 0x39f   : > { %v6591_v24 = vsel %vm13644_vm7, %v6589_v42, %v6590_v1  ;;  %v6622_v42 = vrot.slane %v15498_v16, 5  ;;  %v6617_v1 = vrot.slane %v6615_v56, 4  ;;  %v6625_v16 = vrot.slane %v15502_v14, 5  ;;  %v8070_v14 = vld [vmem:[#allocation2 + $0x24] sm:$0xe] }
 0x3a0   : > { %v11358_v2 = vcombine.low %v6588_v59, %v6591_v24 }
 0x3a1   : > { %v6624_v31 = vrot.slane %v6622_v42, 4  ;;  %v6619_v26 = vsel %vm13644_vm7, %v6617_v1, %v6618_v51  ;;  %v8074_v51 = vld [vmem:[#allocation2 + $0x54] sm:$0xe] }
 0x3a4   : > { %12423 = vmatmul.mubr.msk.bf16.gmra.mrb[36].mxu1 %vm806_vm4, %v11319_v13  ;;  %v6532_v13 = vld [vmem:[#allocation2 + $0x18] sm:$0xe] }
 0x3a5   : > { %12426 = vmatprep.mubr.msk.bf16.mxu1 %vm806_vm4, %v17466_v10  ;;  %v11342_v58 = vrot.slane %v6532_v13, 9  ;;  %v6603_v10 = vrot.slane %v6601_v18, 4  ;;  %v6535_v13 = vld [vmem:[#allocation2 + $0x3c] sm:$0xe] }
 0x3a6   : > { %v11345_v24 = vrot.slane %v6535_v13, 9 }
 0x3a7   : > { %v6595_v17 = vsel %vm13644_vm7, %v11342_v58, %v6594_v22  ;;  %v6605_v11 = vsel %vm13644_vm7, %v6603_v10, %v6604_v39  ;;  %v11344_v22 = vrot.slane %v6534_v20, 9  ;;  %v6626_v58 = vsel %vm13644_vm7, %v6624_v31, %v6625_v16  ;;  %v15952_v10 = vld [vmem:[#allocation2 + $0x4c] sm:$0xf]  ;;  %v15959_v39 = vld [vmem:[#allocation2 + $0x40] sm:$0xf] }
 0x3a8   : > { %v11359_v37 = vcombine.low %v6595_v17, %v6598_v7  ;;  %v6616_v7 = vsel %vm13644_vm7, %v11345_v24, %v6615_v56  ;;  %v15946_v17 = vld [vmem:[#allocation2 + $0x38] sm:$0x1]  ;;  %v11457_v20 = vrot.slane %v8070_v14, 9  ;;  %v8073_v56 = vld [vmem:[#allocation2 + $0x48] sm:$0xe]  ;;  %v8169_v31 = vrot.slane %v15952_v10, 5 }
 0x3a9   : > { %v6609_v28 = vsel %vm13644_vm7, %v11344_v22, %v6608_v36  ;;  %v11362_v0 = vcombine.low %v6616_v7, %v6619_v26  ;;  %v15973_v22 = vld [vmem:[#allocation2 + $0x5c] sm:$0x1]  ;;  %v15989_v16 = vld [vmem:[#allocation2 + $0x70] sm:$0xf]  ;;  %v8075_v14 = vld [vmem:[#allocation2 + $0x60] sm:$0xe] }
 0x3ac   : > { %12427 = vmatmul.mubr.msk.bf16.gmra.mrb[40].mxu1 %vm806_vm4, %v17467_v6  ;;  %v6611_v6 = vrot.slane %v13378_v49, 5  ;;  %v8072_v49 = vld [vmem:[#allocation2 + $0x3c] sm:$0xe] }
 0x3ad   : > { %12430 = vmatprep.mubr.msk.bf16.mxu1 %vm806_vm4, %v17468_v61  ;;  %v11343_v61 = vrot.slane %v6533_v48, 9  ;;  %v8148_v48 = vrot.slane %v15940_v4, 5 }
 0x3af   : > { %v15970_v45 = vsel %vm13644_vm7, %v11457_v20, %v8148_v48 }
 0x3b0   : > { %17472 = vst [vmem:[#allocation6_spill] sm:$0xff] %v15970_v45 }
 0x3b4   : > { %12431 = vmatmul.mubr.msk.bf16.gmra.mrb[44].mxu1 %vm806_vm4, %v17469_v62  ;;  %v6602_v62 = vsel %vm13644_vm7, %v11343_v61, %v6601_v18  ;;  %v11346_v18 = vrot.slane %v6536_v34, 9  ;;  %v15963_v61 = vld [vmem:[#allocation2 + $0x50] sm:$0x1]  ;;  %v15987_v34 = vld [vmem:[#allocation2 + $0x68] sm:$0x1] }
 0x3b5   : > { %12436 = vmatprep.mubr.msk.bf16.mxu1 %vm806_vm4, %v11357_v15  ;;  %v6612_v15 = vsel %vm13644_vm7, %v6610_v32, %v6611_v6  ;;  %v11360_v47 = vcombine.low %v6602_v62, %v6605_v11  ;;  %v8071_v32 = vld [vmem:[#allocation2 + $0x30] sm:$0xe]  ;;  %v15961_v6 = vld [vmem:[#allocation2 + $0x44] sm:$0x1]  ;;  %v15966_v11 = vld [vmem:[#allocation2 + $0x58] sm:$0xf] }
 0x3b6   : > { %v11361_v46 = vcombine.low %v6609_v28, %v6612_v15  ;;  %v6623_v36 = vsel %vm13644_vm7, %v11346_v18, %v6622_v42  ;;  %v11458_v12 = vrot.slane %v8071_v32, 9  ;;  %v8158_v42 = vrot.slane %v15946_v17, 5  ;;  %v15981_v28 = vld [vmem:[#allocation2 + $0x64] sm:$0xf] }
 0x3b7   : > { %v11363_v59 = vcombine.low %v6623_v36, %v6626_v58  ;;  %v11459_v62 = vrot.slane %v8072_v49, 9  ;;  %v8165_v13 = vrot.slane %v15961_v6, 5  ;;  %v11460_v58 = vrot.slane %v8073_v56, 9 }
 0x3b8   : > { %v8172_v36 = vrot.slane %v15963_v61, 5  ;;  %v11461_v49 = vrot.slane %v8074_v51, 9 }
 0x3b9   : > { %v16019_v20 = vsel %vm13644_vm7, %v11460_v58, %v8169_v31 }
 0x3ba   : > { %17479 = vst [vmem:[#allocation3_spill] sm:$0xff] %v16019_v20  ;;  %v7448_v20 = vshll.u32 %v15940_v4, 16 }
 0x3bc   : > { %12437 = vmatmul.mubr.msk.bf16.vlgmr.msra.gmra.mrb[16].mxu1 %vm806_vm4, %v11358_v2  ;;  %v15942_v2 = vld [vmem:[#allocation2 + $0x2c] sm:$0x1] }
 0x3bd   : > { %12469 = vmatpush3.bf16.msra.mxu1 %v7147_v55  ;;  %12440 = vmatprep.mubr.msk.bf16.mxu1 %vm806_vm4, %v11359_v37  ;;  %v15944_v55 = vld [vmem:[#allocation2 + $0x34] sm:$0xf]  ;;  %v17470_v37 = vcombine.low %v15744_v8, %v15749_v60  ;;  %v8150_v8 = vrot.slane %v8148_v48, 4  ;;  %v8151_v60 = vrot.slane %v15942_v2, 5 }
 0x3be   : > { %13234 = vmatprep.subr.msk.bf16.mxu1 %vm855_vm0, %v15911_v38  ;;  %v8155_v3 = vrot.slane %v15944_v55, 5  ;;  %v16009_v48 = vld [vmem:[#allocation2 + $0x74] sm:$0x1] }
 0x3bf   : > { %v15977_v15 = vsel %vm13644_vm7, %v8150_v8, %v8151_v60  ;;  %v8076_v8 = vld [vmem:[#allocation2 + $0x6c] sm:$0xe]  ;;  %v16027_v60 = vld [vmem:[#allocation2 + $0x80] sm:$0x1] }
 0x3c0   : > { %17473 = vst [vmem:[#allocation7_spill] sm:$0xff] %v15977_v15  ;;  %v8157_v1 = vrot.slane %v8155_v3, 4  ;;  %v15993_v24 = vsel %vm13644_vm7, %v11458_v12, %v8155_v3  ;;  %v11463_v58 = vrot.slane %v8076_v8, 9  ;;  %v7458_v15 = vshll.u32 %v15942_v2, 16 }
 0x3c1   : > { %17474 = vst [vmem:[#allocation8_spill] sm:$0xff] %v15993_v24  ;;  %v13314_v24 = vld [vmem:[#allocation2 + $0x60] sm:$0xff]  }
 0x3c2   : > { %v16001_v7 = vsel %vm13644_vm7, %v8157_v1, %v8158_v42  ;;  %v8179_v42 = vrot.slane %v15973_v22, 5  ;;  %v8183_v1 = vrot.slane %v15981_v28, 5 }
 0x3c3   : > { %17476 = vst [vmem:[#allocation10_spill] sm:$0xff] %v16001_v7 }
 0x3c4   : > { %12441 = vmatmul.mubr.msk.bf16.gmra.mrb[20].mxu1 %vm806_vm4, %v11360_v47  ;;  %v8162_v47 = vrot.slane %v15959_v39, 5 }
 0x3c5   : > { %12444 = vmatprep.mubr.msk.bf16.mxu1 %vm806_vm4, %v11361_v46  ;;  %v8200_v46 = vrot.slane %v16027_v60, 5 }
 0x3c6   : > { %v15997_v26 = vsel %vm13644_vm7, %v11459_v62, %v8162_v47  ;;  %v8164_v18 = vrot.slane %v8162_v47, 4  ;;  %v16036_v62 = vld [vmem:[#allocation2 + $0x88] sm:$0xf]  ;;  %v11462_v47 = vrot.slane %v8075_v14, 9  ;;  %v8193_v14 = vrot.slane %v16009_v48, 5 }
 0x3c7   : > { %17475 = vst [vmem:[#allocation9_spill] sm:$0xff] %v15997_v26  ;;  %v8204_v43 = vrot.slane %v16036_v62, 5 }
 0x3cc   : > { %12445 = vmatmul.mubr.msk.bf16.gmra.mrb[24].mxu1 %vm806_vm4, %v11362_v0  ;;  %v8171_v0 = vrot.slane %v8169_v31, 4  ;;  %v16045_v31 = vld [vmem:[#allocation2 + $0x8c] sm:$0x1] }
 0x3cd   : > { %12448 = vmatprep.mubr.msk.bf16.mxu1 %vm806_vm4, %v11363_v59  ;;  %v8176_v59 = vrot.slane %v15966_v11, 5 }
 0x3ce   : > { %v16033_v3 = vsel %vm13644_vm7, %v8171_v0, %v8172_v36  ;;  %v8190_v0 = vrot.slane %v15989_v16, 5 }
 0x3cf   : > { %17481 = vst [vmem:[#allocation4_spill] sm:$0xff] %v16033_v3  ;;  %v8178_v56 = vrot.slane %v8176_v59, 4 }
 0x3d0   : > { %v16067_v8 = vsel %vm13644_vm7, %v11463_v58, %v8190_v0  ;;  %v8080_v58 = vld [vmem:[#allocation2 + $0x9c] sm:$0xe] }
 0x3d1   : > { %v16049_v51 = vsel %vm13644_vm7, %v8178_v56, %v8179_v42  ;;  %v16063_v56 = vsel %vm13644_vm7, %v11462_v47, %v8183_v1  ;;  %17485 = vst [vmem:[#allocation14_spill] sm:$0xff] %v16067_v8  ;;  %v8192_v42 = vrot.slane %v8190_v0, 4  ;;  %v17489_v0 = vcombine.low %v15794_v63, %v15801_v53  ;;  %v16106_v63 = vld [vmem:[#allocation2 + $0xb0] sm:$0x1]  ;;  %v16115_v47 = vld [vmem:[#allocation2 + $0xb8] sm:$0xf] }
 0x3d2   : > { %17483 = vst [vmem:[#allocation12_spill] sm:$0xff] %v16049_v51  ;;  %17484 = vst [vmem:[#allocation13_spill] sm:$0xff] %v16063_v56  ;;  %v8232_v56 = vrot.slane %v16115_v47, 5 }
 0x3d4   : > { %12449 = vmatmul.mubr.msk.bf16.gmra.mrb[28].mxu1 %vm806_vm4, %v17470_v37  ;;  %v17477_v37 = vcombine.low %v15767_v52, %v15776_v23  ;;  %v17480_v52 = vcombine.low %v15786_v44, %v15790_v5  ;;  %v16025_v23 = vld [vmem:[#allocation2 + $0x7c] sm:$0xf]  ;;  %v16042_v5 = vsel %vm13644_vm7, %v11461_v49, %v8176_v59  ;;  %v8185_v59 = vrot.slane %v8183_v1, 4  ;;  %v8078_v49 = vld [vmem:[#allocation2 + $0x84] sm:$0xe] }
 0x3d5   : > { %12452 = vmatprep.mubr.msk.bf16.mxu1 %vm806_vm4, %v17471_v40  ;;  %v16015_v40 = vsel %vm13644_vm7, %v8164_v18, %v8165_v13  ;;  %17482 = vst [vmem:[#allocation5_spill] sm:$0xff] %v16042_v5  ;;  %v8077_v13 = vld [vmem:[#allocation2 + $0x78] sm:$0xe]  ;;  %v8186_v18 = vrot.slane %v15987_v34, 5  ;;  %v16059_v44 = vld [vmem:[#allocation2 + $0x98] sm:$0x1]  ;;  %v16081_v1 = vsel %vm13644_vm7, %v8192_v42, %v8193_v14 }
 0x3d6   : > { %17478 = vst [vmem:[#allocation11_spill] sm:$0xff] %v16015_v40  ;;  %v11464_v36 = vrot.slane %v8077_v13, 9  ;;  %17487 = vst [vmem:[#allocation16_spill] sm:$0xff] %v16081_v1  ;;  %v8218_v1 = vrot.slane %v16075_v9, 5  ;;  %v8234_v51 = vrot.slane %v8232_v56, 4 }
 0x3d7   : > { %v16071_v12 = vsel %vm13644_vm7, %v8185_v59, %v8186_v18  ;;  %v11465_v18 = vrot.slane %v8078_v49, 9  ;;  %v16091_v59 = vld [vmem:[#allocation2 + $0xa4] sm:$0x1]  ;;  %v17491_v49 = vcombine.low %v15809_v19, %v15815_v57  ;;  %v8214_v57 = vrot.slane %v16059_v44, 5 }
 0x3d8   : > { %17486 = vst [vmem:[#allocation15_spill] sm:$0xff] %v16071_v12  ;;  %v16137_v12 = vld [vmem:[#allocation2 + $0xc4] sm:$0xf] }
 0x3d9   : > { %v16112_v42 = vsel %vm13644_vm7, %v11465_v18, %v8204_v43  ;;  %v8225_v18 = vrot.slane %v16093_v29, 5 }
 0x3da   : > { %17492 = vst [vmem:[#allocation19_spill] sm:$0xff] %v16112_v42  ;;  %v8228_v42 = vrot.slane %v16106_v63, 5 }
 0x3dc   : > { %12453 = vmatmul.mubr.msk.bf16.gmra.mrb[32].mxu1 %vm806_vm4, %v17477_v37  ;;  %v8197_v37 = vrot.slane %v16025_v23, 5 }
 0x3dd   : > { %12456 = vmatprep.mubr.msk.bf16.mxu1 %vm806_vm4, %v17480_v52  ;;  %v16057_v52 = vld [vmem:[#allocation2 + $0x94] sm:$0xf] }
 0x3de   : > { %v8199_v32 = vrot.slane %v8197_v37, 4  ;;  %v16085_v13 = vsel %vm13644_vm7, %v11464_v36, %v8197_v37  ;;  %v8206_v36 = vrot.slane %v8204_v43, 4  ;;  %v8207_v37 = vrot.slane %v16045_v31, 5 }
 0x3df   : > { %17488 = vst [vmem:[#allocation17_spill] sm:$0xff] %v16085_v13  ;;  %v16127_v13 = vld [vmem:[#allocation2 + $0xbc] sm:$0x1] }
 0x3e0   : > { %v16099_v14 = vsel %vm13644_vm7, %v8199_v32, %v8200_v46  ;;  %v8211_v46 = vrot.slane %v16057_v52, 5  ;;  %v8081_v32 = vld [vmem:[#allocation2 + $0xa8] sm:$0xe]  ;;  %v16119_v19 = vsel %vm13644_vm7, %v8206_v36, %v8207_v37  ;;  %v8220_v37 = vrot.slane %v8218_v1, 4 }
 0x3e1   : > { %17490 = vst [vmem:[#allocation18_spill] sm:$0xff] %v16099_v14  ;;  %17493 = vst [vmem:[#allocation20_spill] sm:$0xff] %v16119_v19  ;;  %v8082_v14 = vld [vmem:[#allocation2 + $0xb4] sm:$0xe]  ;;  %v11468_v8 = vrot.slane %v8081_v32, 9  ;;  %v8227_v19 = vrot.slane %v8225_v18, 4 }
 0x3e2   : > { %v8213_v43 = vrot.slane %v8211_v46, 4  ;;  %v11469_v32 = vrot.slane %v8082_v14, 9  ;;  %v8239_v14 = vrot.slane %v16137_v12, 5 }
 0x3e4   : > { %12457 = vmatmul.mubr.msk.bf16.gmra.mrb[36].mxu1 %vm806_vm4, %v17489_v0  ;;  %v11466_v0 = vrot.slane %v8079_v41, 9  ;;  %v8221_v41 = vrot.slane %v16091_v59, 5  ;;  %v16141_v53 = vsel %vm13644_vm7, %v8213_v43, %v8214_v57  ;;  %v16161_v43 = vsel %vm13644_vm7, %v8227_v19, %v8228_v42 }
 0x3e5   : > { %12460 = vmatprep.mubr.msk.bf16.mxu1 %vm806_vm4, %v17491_v49  ;;  %v11467_v49 = vrot.slane %v8080_v58, 9  ;;  %17496 = vst [vmem:[#allocation23_spill] sm:$0xff] %v16141_v53  ;;  %17500 = vst [vmem:[#allocation27_spill] sm:$0xff] %v16161_v43  ;;  %v8083_v53 = vld [vmem:[#allocation2 + $0xc0] sm:$0xe]  ;;  %v16177_v42 = vsel %vm13644_vm7, %v11469_v32, %v8232_v56  ;;  %v7873_v32 = vsel %vm855_vm0, %v15911_v38, 0 }
 0x3e6   : > { %v16131_v36 = vsel %vm13644_vm7, %v11466_v0, %v8211_v46  ;;  %v16149_v46 = vsel %vm13644_vm7, %v8220_v37, %v8221_v41  ;;  %v8235_v0 = vrot.slane %v16127_v13, 5  ;;  %v17501_v41 = vcombine.low %v15819_v33, %v15826_v50  ;;  %17503 = vst [vmem:[#allocation28_spill] sm:$0xff] %v16177_v42  ;;  %v13310_v38 = vld [vmem:[#allocation2 + $0x30] sm:$0xff]   ;;  %v7345_v56 = vld [vmem:[#allocation2 + $0x18] sm:$0xf]  ;;  %v13312_v42 = vld [vmem:[#allocation2 + $0x48] sm:$0xff]  }
 0x3e7   : > { %17494 = vst [vmem:[#allocation21_spill] sm:$0xff] %v16131_v36  ;;  %v16135_v58 = vsel %vm13644_vm7, %v11467_v49, %v8218_v1  ;;  %17497 = vst [vmem:[#allocation24_spill] sm:$0xff] %v16149_v46  ;;  %v16153_v1 = vsel %vm13644_vm7, %v11468_v8, %v8225_v18  ;;  %v16155_v49 = vld [vmem:[#allocation2 + $0xc8] sm:$0x1]  ;;  %v17502_v18 = vcombine.low %v15836_v21, %v15840_v30  ;;  %v11470_v50 = vrot.slane %v8083_v53, 9  ;;  %v13308_v53 = vld [vmem:[#allocation2 + $0x18] sm:$0xff]  }
 0x3e8   : > { %17495 = vst [vmem:[#allocation22_spill] sm:$0xff] %v16135_v58  ;;  %17498 = vst [vmem:[#allocation25_spill] sm:$0xff] %v16153_v1  ;;  %v16181_v19 = vsel %vm13644_vm7, %v8234_v51, %v8235_v0  ;;  %v8241_v37 = vrot.slane %v8239_v14, 4  ;;  %v13307_v51 = vld [vmem:[#allocation2 + $0xc] sm:$0xff]   ;;  %v17507_v0 = vcombine.low %v15846_v25, %v15850_v54  ;;  %v7415_v57 = vshrl.u32 %v7345_v56, 16 }
 0x3e9   : > { %17499 = vst [vmem:[#allocation26_spill] sm:$0xff] %v16155_v49  ;;  %17504 = vst [vmem:[#allocation29_spill] sm:$0xff] %v16181_v19  ;;  %v16188_v21 = vsel %vm13644_vm7, %v11470_v50, %v8239_v14  ;;  %v13309_v14 = vld [vmem:[#allocation2 + $0x24] sm:$0xff]   ;;  %v7342_v25 = vld [vmem:[#allocation2 + $0xc] sm:$0xf] }
 0x3ea   : > { %17505 = vst [vmem:[#allocation30_spill] sm:$0xff] %v16188_v21  ;;  %v16212_v54 = vld [vmem:[#allocation2 + $0x10] sm:$0xf]  ;;  %v7391_v50 = vshrl.u32 %v7342_v25, 16  ;;  %v16222_v19 = vld [vmem:[#allocation2 + $0x14] sm:$0x1] }
 0x3eb   : > { %17508 = vst [vmem:[#allocation32_spill] sm:$0xff] %v16212_v54  ;;  %17510 = vst [vmem:[#allocation34_spill] sm:$0xff] %v16222_v19  ;;  %v7417_v46 = vrot.slane %v7415_v57, 4 }
 0x3ec   : > { %12461 = vmatmul.mubr.msk.bf16.gmra.mrb[40].mxu1 %vm806_vm4, %v17501_v41  ;;  %v8242_v41 = vrot.slane %v16155_v49, 5 }
 0x3ed   : > { %12464 = vmatprep.mubr.msk.bf16.mxu1 %vm806_vm4, %v17502_v18  ;;  %v16206_v18 = vld [vmem:[%s17315_s3 + $0x14] sm:$0xf] }
 0x3ee   : > { %v16192_v30 = vsel %vm13644_vm7, %v8241_v37, %v8242_v41  ;;  %v7394_v37 = vshll.u32 %v7342_v25, 16  ;;  %v7400_v41 = vshll.u32 %v16212_v54, 16 }
 0x3ef   : > { %17506 = vst [vmem:[#allocation31_spill] sm:$0xff] %v16192_v30  ;;  %v7418_v30 = vshll.u32 %v7345_v56, 16 }
 0x3f0   : > { %v7402_v33 = vrot.slane %v7400_v41, 5 }
 0x3f1   : > { %v7420_v58 = vrot.slane %v7418_v30, 5 }
 0x3f3   : > { %v7421_v5 = vor.u32 %v7420_v58, %v7417_v46 }
 0x3f4   : > { %12465 = vmatmul.mubr.msk.bf16.gmra.mrb[44].mxu1 %vm806_vm4, %v17507_v0  ;;  %v13311_v0 = vld [vmem:[#allocation2 + $0x3c] sm:$0xff]  }
 0x3f5   : > { %12470 = vmatprep.mubr.msk.bf16.mxu1 %vm806_vm4, %v13307_v51  ;;  %v7404_v51 = vshrl.u32 %v16212_v54, 16  ;;  %v16397_v54 = vld [vmem:[#allocation2 + $0x58] sm:$0xf] }
 0x3f6   : > { %17524 = vst [vmem:[#allocation48_spill] sm:$0xff] %v16397_v54 }
 0x3f7   : > { %v7406_v8 = vrot.slane %v7404_v51, 4 }
 0x3f9   : > { %v7407_v1 = vor.u32 %v7406_v8, %v7402_v33 }
 0x3fc   : > { %12471 = vmatmul.mubr.msk.bf16.vlgmr.msra.gmra.mrb[16].mxu1 %vm806_vm4, %v13308_v53  ;;  %v16217_v53 = vld [vmem:[#allocation2 + $0x1c] sm:$0xf] }
 0x3fd   : > { %12503 = vmatpush3.bf16.msra.mxu1 %v7873_v32  ;;  %12474 = vmatprep.mubr.msk.bf16.mxu1 %vm806_vm4, %v13309_v14  ;;  %17509 = vst [vmem:[#allocation33_spill] sm:$0xff] %v16217_v53  ;;  %v7393_v32 = vrot.slane %v7391_v50, 4  ;;  %v7396_v14 = vrot.slane %v7394_v37, 5  ;;  %v7424_v25 = vshll.u32 %v16217_v53, 16  ;;  %v7428_v21 = vshrl.u32 %v16217_v53, 16  ;;  %v13313_v50 = vld [vmem:[#allocation2 + $0x54] sm:$0xff]  }
 0x3fe   : > { %13235 = vmatprep.subr.msk.bf16.mxu1 %vm855_vm0, %v16206_v18  ;;  %v7410_v37 = vshll.u32 %v16222_v19, 16 }
 0x3ff   : > { %v7397_v43 = vor.u32 %v7396_v14, %v7393_v32  ;;  %v16227_v41 = vrot.slane %v7424_v25, 5  ;;  %v7430_v56 = vrot.slane %v7428_v21, 4  ;;  %v7351_v32 = vld [vmem:[#allocation2 + $0x30] sm:$0xf]  ;;  %v7408_v14 = vrot.slane %v7407_v1, 4 }
 0x400   : > { %v7412_v30 = vrot.slane %v7410_v37, 5  ;;  %v7452_v25 = vshrl.u32 %v15940_v4, 16  ;;  %v7463_v21 = vshrl.u32 %v7351_v32, 16  ;;  %v7466_v40 = vshll.u32 %v7351_v32, 16  ;;  %v7354_v37 = vld [vmem:[#allocation2 + $0x3c] sm:$0xf] }
 0x401   : > { %v7398_v8 = vrot.slane %v7397_v43, 4  ;;  %v7431_v3 = vor.u32 %v7430_v56, %v16227_v41  ;;  %v13315_v43 = vld [vmem:[#allocation2 + $0x6c] sm:$0xff]   ;;  %v7422_v1 = vrot.slane %v7421_v5, 4  ;;  %v16241_v56 = vrot.slane %v7448_v20, 5 }
 0x402   : > { %v7413_v46 = vsel %vm13496_vm3, %v7408_v14, %v7412_v30  ;;  %v7454_v32 = vrot.slane %v7452_v25, 4  ;;  %v7490_v5 = vshll.u32 %v7354_v37, 16  ;;  %v7496_v14 = vshll.u32 %v15959_v39, 16 }
 0x403   : > { %v7403_v58 = vsel %vm13496_vm3, %v7398_v8, %v7402_v33  ;;  %v7432_v4 = vrot.slane %v7431_v3, 4  ;;  %v7487_v8 = vshrl.u32 %v7354_v37, 16  ;;  %v7500_v20 = vshrl.u32 %v15959_v39, 16 }
 0x404   : > { %12475 = vmatmul.mubr.msk.bf16.gmra.mrb[20].mxu1 %vm806_vm4, %v13310_v38  ;;  %v16224_v38 = vld [vmem:[#allocation2 + $0x20] sm:$0x1]  ;;  %v16250_v3 = vcombine.low %v7403_v58, %v7413_v46  ;;  %v7427_v2 = vsel %vm13496_vm3, %v7422_v1, %v16227_v41  ;;  %v7520_v25 = vshll.u32 %v15952_v10, 16  ;;  %v7482_v58 = vshll.u32 %v15946_v17, 16 }
 0x405   : > { %12478 = vmatprep.mubr.msk.bf16.mxu1 %vm806_vm4, %v13311_v0  ;;  %17511 = vst [vmem:[#allocation35_spill] sm:$0xff] %v16224_v38  ;;  %v7348_v0 = vld [vmem:[#allocation2 + $0x24] sm:$0xf]  ;;  %v7434_v51 = vshll.u32 %v16224_v38, 16  ;;  %v7489_v46 = vrot.slane %v7487_v8, 4  ;;  %v7492_v41 = vrot.slane %v7490_v5, 5 }
 0x406   : > { %v7439_v36 = vshrl.u32 %v7348_v0, 16  ;;  %v7442_v57 = vshll.u32 %v7348_v0, 16  ;;  %v16262_v1 = vrot.slane %v7496_v14, 5  ;;  %v7502_v37 = vrot.slane %v7500_v20, 4  ;;  %v13317_v38 = vld [vmem:[#allocation2 + $0x84] sm:$0xff]  }
 0x407   : > { %v7436_v26 = vrot.slane %v7434_v51, 5  ;;  %v7468_v51 = vrot.slane %v7466_v40, 5  ;;  %v7460_v8 = vrot.slane %v7458_v15, 5  ;;  %v7484_v14 = vrot.slane %v7482_v58, 5 }
 0x408   : > { %v7441_v7 = vrot.slane %v7439_v36, 4  ;;  %v7444_v0 = vrot.slane %v7442_v57, 5  ;;  %v7465_v36 = vrot.slane %v7463_v21, 4  ;;  %v7524_v21 = vshrl.u32 %v15952_v10, 16 }
 0x409   : > { %v7437_v40 = vsel %vm13496_vm3, %v7432_v4, %v7436_v26  ;;  %v16264_v10 = vrot.slane %v7520_v25, 5  ;;  %v7503_v20 = vor.u32 %v7502_v37, %v16262_v1 }
 0x40a   : > { %v7445_v30 = vor.u32 %v7444_v0, %v7441_v7  ;;  %v7469_v39 = vor.u32 %v7468_v51, %v7465_v36  ;;  %v7526_v53 = vrot.slane %v7524_v21, 4  ;;  %v7548_v36 = vshrl.u32 %v15966_v11, 16 }
 0x40b   : > { %v16269_v17 = vcombine.low %v7427_v2, %v7437_v40  ;;  %v7493_v21 = vor.u32 %v7492_v41, %v7489_v46  ;;  %v7504_v58 = vrot.slane %v7503_v20, 4  ;;  %v7530_v46 = vshll.u32 %v15963_v61, 16 }
 0x40c   : > { %12479 = vmatmul.mubr.msk.bf16.gmra.mrb[24].mxu1 %vm806_vm4, %v13312_v42  ;;  %v7472_v42 = vshll.u32 %v15944_v55, 16  ;;  %v7446_v51 = vrot.slane %v7445_v30, 4  ;;  %v7470_v5 = vrot.slane %v7469_v39, 4  ;;  %v7527_v2 = vor.u32 %v7526_v53, %v16264_v10  ;;  %v13318_v53 = vld [vmem:[#allocation2 + $0x90] sm:$0xff]  }
 0x40d   : > { %12482 = vmatprep.mubr.msk.bf16.mxu1 %vm806_vm4, %v13313_v50  ;;  %v7476_v50 = vshrl.u32 %v15944_v55, 16  ;;  %v7357_v55 = vld [vmem:[#allocation2 + $0x48] sm:$0xf]  ;;  %v7550_v30 = vrot.slane %v7548_v36, 4  ;;  %v7572_v39 = vshrl.u32 %v15981_v28, 16 }
 0x40e   : > { %v16245_v45 = vrot.slane %v7472_v42, 5  ;;  %v7514_v57 = vshll.u32 %v7357_v55, 16  ;;  %v7360_v42 = vld [vmem:[#allocation2 + $0x54] sm:$0xf] }
 0x40f   : > { %v7478_v33 = vrot.slane %v7476_v50, 4  ;;  %v7455_v50 = vor.u32 %v7454_v32, %v16241_v56  ;;  %v7535_v0 = vshrl.u32 %v7360_v42, 16  ;;  %v7538_v4 = vshll.u32 %v7360_v42, 16 }
 0x410   : > { %v7516_v7 = vrot.slane %v7514_v57, 5  ;;  %v7544_v32 = vshll.u32 %v15966_v11, 16  ;;  %v7363_v57 = vld [vmem:[#allocation2 + $0x60] sm:$0xf]  ;;  %v7475_v41 = vsel %vm13496_vm3, %v7470_v5, %v16245_v45 }
 0x411   : > { %v7537_v42 = vrot.slane %v7535_v0, 4  ;;  %v7540_v11 = vrot.slane %v7538_v4, 5  ;;  %v7559_v15 = vshrl.u32 %v7363_v57, 16  ;;  %v7494_v0 = vrot.slane %v7493_v21, 4 }
 0x412   : > { %v16275_v40 = vrot.slane %v7544_v32, 5  ;;  %v7528_v4 = vrot.slane %v7527_v2, 4  ;;  %v7596_v2 = vshrl.u32 %v15989_v16, 16 }
 0x413   : > { %v7561_v61 = vrot.slane %v7559_v15, 4  ;;  %v7499_v21 = vsel %vm13496_vm3, %v7494_v0, %v16262_v1 }
 0x414   : > { %12483 = vmatmul.mubr.msk.bf16.gmra.mrb[28].mxu1 %vm806_vm4, %v13314_v24  ;;  %v7511_v24 = vshrl.u32 %v7357_v55, 16  ;;  %v13316_v55 = vld [vmem:[#allocation2 + $0x78] sm:$0xff]   ;;  %v7551_v32 = vor.u32 %v7550_v30, %v16275_v40  ;;  %v13320_v30 = vld [vmem:[#allocation2 + $0xa8] sm:$0xff]   ;;  %v16340_v0 = vrot.slane %v7596_v2, 4 }
 0x415   : > { %12486 = vmatprep.mubr.msk.bf16.mxu1 %vm806_vm4, %v13315_v43  ;;  %v7479_v43 = vor.u32 %v7478_v33, %v16245_v45  ;;  %v7456_v33 = vrot.slane %v7455_v50, 4  ;;  %v7562_v50 = vshll.u32 %v7363_v57, 16  ;;  %v7554_v57 = vshll.u32 %v15973_v22, 16 }
 0x416   : > { %v7513_v26 = vrot.slane %v7511_v24, 4  ;;  %v7506_v24 = vshll.u32 %v15961_v6, 16  ;;  %v7451_v6 = vsel %vm13496_vm3, %v7446_v51, %v16241_v56 }
 0x417   : > { %v7480_v25 = vrot.slane %v7479_v43, 4  ;;  %v7461_v43 = vsel %vm13496_vm3, %v7456_v33, %v7460_v8  ;;  %v7564_v36 = vrot.slane %v7562_v50, 5  ;;  %v7574_v33 = vrot.slane %v7572_v39, 4  ;;  %v16316_v39 = vld [vmem:[#allocation2 + $0x1c] sm:$0xf] }
 0x418   : > { %v7517_v19 = vor.u32 %v7516_v7, %v7513_v26  ;;  %v7366_v26 = vld [vmem:[#allocation2 + $0x6c] sm:$0xf]  ;;  %v13319_v7 = vld [vmem:[#allocation2 + $0x9c] sm:$0xff]   ;;  %v7532_v8 = vrot.slane %v7530_v46, 5  ;;  %v16297_v20 = vcombine.low %v7451_v6, %v7461_v43  ;;  %v16313_v50 = vrot.slane %v7551_v32, 4  ;;  %17512 = vst [vmem:[#allocation36_spill] sm:$0xff] %v16316_v39 }
 0x419   : > { %v7485_v37 = vsel %vm13496_vm3, %v7480_v25, %v7484_v14  ;;  %v7583_v5 = vshrl.u32 %v7366_v26, 16  ;;  %v7586_v14 = vshll.u32 %v7366_v26, 16  ;;  %v7369_v25 = vld [vmem:[#allocation2 + $0x78] sm:$0xf]  ;;  %v16325_v46 = vld [vmem:[#allocation2 + $0x20] sm:$0x1] }
 0x41a   : > { %v7518_v56 = vrot.slane %v7517_v19, 4  ;;  %v16299_v19 = vcombine.low %v7475_v41, %v7485_v37  ;;  %v13321_v6 = vld [vmem:[#allocation2 + $0xb4] sm:$0xff]   ;;  %17513 = vst [vmem:[#allocation37_spill] sm:$0xff] %v16325_v46  ;;  %v16333_v37 = vrot.slane %v7554_v57, 5  ;;  %v16375_v26 = vld [vmem:[#allocation2 + $0x40] sm:$0xf] }
 0x41b   : > { %v16321_v43 = vrot.slane %v7583_v5, 4  ;;  %v16345_v32 = vld [vmem:[#allocation2 + $0x34] sm:$0xf]  ;;  %v9624_v5 = vld [vmem:[#allocation2 + $0x24] sm:$0xe]  ;;  %17518 = vst [vmem:[#allocation42_spill] sm:$0xff] %v16375_v26 }
 0x41c   : > { %12487 = vmatmul.mubr.msk.bf16.gmra.mrb[32].mxu1 %vm806_vm4, %v13316_v55  ;;  %v7508_v55 = vrot.slane %v7506_v24, 5  ;;  %v7523_v1 = vsel %vm13496_vm3, %v7518_v56, %v16264_v10  ;;  %v9623_v10 = vld [vmem:[#allocation2 + $0x18] sm:$0xe]  ;;  %v7616_v56 = vshll.u32 %v16025_v23, 16  ;;  %17516 = vst [vmem:[#allocation40_spill] sm:$0xff] %v16345_v32 }
 0x41d   : > { %12490 = vmatprep.mubr.msk.bf16.mxu1 %vm806_vm4, %v13317_v38  ;;  %v7568_v38 = vshll.u32 %v15981_v28, 16  ;;  %v7541_v28 = vor.u32 %v7540_v11, %v7537_v42  ;;  %v7533_v42 = vsel %vm13496_vm3, %v7528_v4, %v7532_v8  ;;  %v7592_v11 = vshll.u32 %v15989_v16, 16  ;;  %v16343_v4 = vld [vmem:[#allocation2 + $0x2c] sm:$0x1]  ;;  %v16385_v41 = vld [vmem:[#allocation2 + $0x50] sm:$0x1] }
 0x41e   : > { %v7509_v45 = vsel %vm13496_vm3, %v7504_v58, %v7508_v55  ;;  %v16323_v58 = vrot.slane %v7586_v14, 5  ;;  %v7607_v16 = vshrl.u32 %v7369_v25, 16  ;;  %v7610_v55 = vshll.u32 %v7369_v25, 16  ;;  %17515 = vst [vmem:[#allocation39_spill] sm:$0xff] %v16343_v4  ;;  %v16379_v57 = vld [vmem:[#allocation2 + $0x4c] sm:$0xf] }
 0x41f   : > { %v16292_v51 = vrot.slane %v7568_v38, 5  ;;  %v16301_v24 = vrot.slane %v7541_v28, 4  ;;  %v16311_v15 = vcombine.low %v7499_v21, %v7509_v45  ;;  %v7565_v38 = vor.u32 %v7564_v36, %v7561_v61  ;;  %v16335_v28 = vld [vmem:[#allocation2 + $0x28] sm:$0xf]  ;;  %v16356_v45 = vld [vmem:[#allocation2 + $0x84] sm:$0xf] }
 0x420   : > { %17514 = vst [vmem:[#allocation38_spill] sm:$0xff] %v16335_v28  ;;  %v9689_v8 = vrot.slane %v16316_v39, 5  ;;  %v16363_v25 = vrot.slane %v7607_v16, 4  ;;  %v16365_v21 = vld [vmem:[#allocation2 + $0x38] sm:$0x1]  ;;  %17520 = vst [vmem:[#allocation44_spill] sm:$0xff] %v16379_v57 }
 0x421   : > { %v7575_v22 = vor.u32 %v7574_v33, %v16292_v51  ;;  %v16352_v36 = vrot.slane %v7565_v38, 4  ;;  %17517 = vst [vmem:[#allocation41_spill] sm:$0xff] %v16365_v21  ;;  %v9696_v38 = vrot.slane %v16335_v28, 5  ;;  %v16377_v16 = vld [vmem:[#allocation2 + $0x44] sm:$0x1]  ;;  %17522 = vst [vmem:[#allocation46_spill] sm:$0xff] %v16385_v41 }
 0x422   : > { %v9691_v2 = vrot.slane %v9689_v8, 4  ;;  %17519 = vst [vmem:[#allocation43_spill] sm:$0xff] %v16377_v16  ;;  %v9703_v14 = vrot.slane %v16345_v32, 5  ;;  %v13322_v28 = vld [vmem:[#allocation2 + $0xc0] sm:$0xff]   ;;  %v9706_v49 = vrot.slane %v16365_v21, 5 }
 0x423   : > { %v16354_v33 = vrot.slane %v7575_v22, 4  ;;  %v9625_v22 = vld [vmem:[#allocation2 + $0x30] sm:$0xe]  ;;  %v16410_v32 = vld [vmem:[#allocation2 + $0x5c] sm:$0x1] }
 0x424   : > { %12491 = vmatmul.mubr.msk.bf16.gmra.mrb[36].mxu1 %vm806_vm4, %v13318_v53  ;;  %v16327_v53 = vcombine.low %v7523_v1, %v7533_v42  ;;  %v11570_v42 = vrot.slane %v9623_v10, 9  ;;  %v16373_v1 = vrot.slane %v7616_v56, 5  ;;  %v11571_v10 = vrot.slane %v9624_v5, 9  ;;  %17528 = vst [vmem:[#allocation52_spill] sm:$0xff] %v16410_v32 }
 0x425   : > { %12494 = vmatprep.mubr.msk.bf16.mxu1 %vm806_vm4, %v13319_v7  ;;  %v16338_v7 = vrot.slane %v7592_v11, 5  ;;  %v16367_v11 = vrot.slane %v7610_v55, 5  ;;  %v9699_v56 = vrot.slane %v16343_v4, 5  ;;  %v11572_v5 = vrot.slane %v9625_v22, 9 }
 0x426   : > { %v16383_v55 = vsel %vm13644_vm7, %v11570_v42, %v9689_v8  ;;  %v9627_v42 = vld [vmem:[#allocation2 + $0x48] sm:$0xe]  ;;  %v9705_v39 = vrot.slane %v9703_v14, 4  ;;  %v9717_v22 = vrot.slane %v16379_v57, 5  ;;  %v9630_v57 = vld [vmem:[#allocation2 + $0x6c] sm:$0xe] }
 0x427   : > { %17521 = vst [vmem:[#allocation45_spill] sm:$0xff] %v16383_v55  ;;  %v16416_v8 = vsel %vm13644_vm7, %v11572_v5, %v9703_v14  ;;  %v9713_v55 = vrot.slane %v16377_v16, 5  ;;  %v11574_v21 = vrot.slane %v9627_v42, 9  ;;  %v9724_v5 = vrot.slane %v16397_v54, 5 }
 0x428   : > { %17529 = vst [vmem:[#allocation53_spill] sm:$0xff] %v16416_v8  ;;  %v9727_v16 = vrot.slane %v16410_v32, 5  ;;  %v16487_v32 = vld [vmem:[%s17315_s3 + $0x18] sm:$0xf] }
 0x42c   : > { %12495 = vmatmul.mubr.msk.bf16.gmra.mrb[40].mxu1 %vm806_vm4, %v13320_v30  ;;  %v9692_v30 = vrot.slane %v16325_v46, 5  ;;  %v9626_v46 = vld [vmem:[#allocation2 + $0x3c] sm:$0xe] }
 0x42d   : > { %12498 = vmatprep.mubr.msk.bf16.mxu1 %vm806_vm4, %v13321_v6  ;;  %v9698_v6 = vrot.slane %v9696_v38, 4 }
 0x42e   : > { %v16389_v61 = vsel %vm13644_vm7, %v9691_v2, %v9692_v30  ;;  %v16399_v2 = vld [vmem:[#allocation2 + $0x64] sm:$0xf]  ;;  %v16403_v30 = vsel %vm13644_vm7, %v11571_v10, %v9696_v38  ;;  %v9710_v38 = vrot.slane %v16375_v26, 5  ;;  %v9628_v10 = vld [vmem:[#allocation2 + $0x54] sm:$0xe] }
 0x42f   : > { %17523 = vst [vmem:[#allocation47_spill] sm:$0xff] %v16389_v61  ;;  %17525 = vst [vmem:[#allocation49_spill] sm:$0xff] %v16399_v2  ;;  %v16407_v4 = vsel %vm13644_vm7, %v9698_v6, %v9699_v56  ;;  %v11573_v61 = vrot.slane %v9626_v46, 9  ;;  %v16420_v6 = vld [vmem:[#allocation2 + $0x68] sm:$0x1]  ;;  %v16424_v56 = vsel %vm13644_vm7, %v9705_v39, %v9706_v49  ;;  %v9719_v46 = vrot.slane %v9717_v22, 4 }
 0x430   : > { %17526 = vst [vmem:[#allocation50_spill] sm:$0xff] %v16403_v30  ;;  %17527 = vst [vmem:[#allocation51_spill] sm:$0xff] %v16407_v4  ;;  %v9712_v14 = vrot.slane %v9710_v38, 4  ;;  %v9629_v4 = vld [vmem:[#allocation2 + $0x60] sm:$0xe]  ;;  %v9731_v54 = vrot.slane %v16399_v2, 5 }
 0x431   : > { %17530 = vst [vmem:[#allocation54_spill] sm:$0xff] %v16420_v6  ;;  %17531 = vst [vmem:[#allocation55_spill] sm:$0xff] %v16424_v56  ;;  %v16434_v30 = vld [vmem:[#allocation2 + $0x70] sm:$0xf]  ;;  %v16436_v49 = vld [vmem:[#allocation2 + $0x74] sm:$0x1]  ;;  %v16442_v42 = vsel %vm13644_vm7, %v11573_v61, %v9710_v38 }
 0x432   : > { %17532 = vst [vmem:[#allocation56_spill] sm:$0xff] %v16436_v49  ;;  %v16438_v39 = vld [vmem:[#allocation2 + $0x7c] sm:$0xf]  ;;  %17534 = vst [vmem:[#allocation58_spill] sm:$0xff] %v16442_v42  ;;  %v11575_v56 = vrot.slane %v9628_v10, 9  ;;  %v16450_v8 = vsel %vm13644_vm7, %v9712_v14, %v9713_v55  ;;  %v11576_v38 = vrot.slane %v9629_v4, 9 }
 0x433   : > { %17533 = vst [vmem:[#allocation57_spill] sm:$0xff] %v16438_v39  ;;  %17536 = vst [vmem:[#allocation60_spill] sm:$0xff] %v16450_v8  ;;  %v16454_v26 = vld [vmem:[#allocation2 + $0x80] sm:$0x1]  ;;  %v16456_v61 = vld [vmem:[#allocation2 + $0x88] sm:$0xf] }
 0x434   : > { %12499 = vmatmul.mubr.msk.bf16.gmra.mrb[44].mxu1 %vm806_vm4, %v13322_v28  ;;  %v9720_v28 = vrot.slane %v16385_v41, 5  ;;  %v9726_v41 = vrot.slane %v9724_v5, 4  ;;  %17537 = vst [vmem:[#allocation61_spill] sm:$0xff] %v16454_v26  ;;  %17538 = vst [vmem:[#allocation62_spill] sm:$0xff] %v16456_v61  ;;  %v16466_v55 = vsel %vm13644_vm7, %v11575_v56, %v9724_v5  ;;  %v16468_v10 = vld [vmem:[#allocation2 + $0x8c] sm:$0x1] }
 0x435   : > { %12504 = vmatprep.mubr.msk.bf16.mxu1 %vm806_vm4, %v16250_v3  ;;  %v16446_v3 = vsel %vm13644_vm7, %v11574_v21, %v9717_v22  ;;  %17540 = vst [vmem:[#allocation64_spill] sm:$0xff] %v16466_v55  ;;  %17541 = vst [vmem:[#allocation65_spill] sm:$0xff] %v16468_v10  ;;  %v16470_v14 = vld [vmem:[#allocation2 + $0x94] sm:$0xf]  ;;  %v9733_v21 = vrot.slane %v9731_v54, 4  ;;  %v8343_v56 = vsel %vm855_vm0, %v16206_v18, 0 }
 0x436   : > { %17535 = vst [vmem:[#allocation59_spill] sm:$0xff] %v16446_v3  ;;  %v16462_v22 = vsel %vm13644_vm7, %v9719_v46, %v9720_v28  ;;  %17542 = vst [vmem:[#allocation66_spill] sm:$0xff] %v16470_v14  ;;  %v16476_v2 = vsel %vm13644_vm7, %v9726_v41, %v9727_v16  ;;  %v9734_v46 = vrot.slane %v16420_v6, 5  ;;  %v9631_v28 = vld [vmem:[#allocation2 + $0x78] sm:$0xe]  ;;  %v11577_v5 = vrot.slane %v9630_v57, 9 }
 0x437   : > { %17539 = vst [vmem:[#allocation63_spill] sm:$0xff] %v16462_v22  ;;  %17543 = vst [vmem:[#allocation67_spill] sm:$0xff] %v16476_v2  ;;  %v9738_v8 = vrot.slane %v16434_v30, 5  ;;  %v9632_v42 = vld [vmem:[#allocation2 + $0x84] sm:$0xe]  ;;  %v16493_v16 = vsel %vm13644_vm7, %v11576_v38, %v9731_v54  ;;  %v9741_v57 = vrot.slane %v16436_v49, 5 }
 0x438   : > { %v16489_v41 = vld [vmem:[#allocation2 + $0x98] sm:$0x1]  ;;  %17544 = vst [vmem:[#allocation68_spill] sm:$0xff] %v16493_v16  ;;  %v16497_v18 = vsel %vm13644_vm7, %v9733_v21, %v9734_v46  ;;  %v9745_v4 = vrot.slane %v16438_v39, 5  ;;  %v11578_v22 = vrot.slane %v9631_v28, 9  ;;  %v9748_v3 = vrot.slane %v16454_v26, 5 }
 0x439   : > { %17545 = vst [vmem:[#allocation69_spill] sm:$0xff] %v16497_v18  ;;  %v9740_v55 = vrot.slane %v9738_v8, 4  ;;  %v9633_v54 = vld [vmem:[#allocation2 + $0x90] sm:$0xe]  ;;  %v16508_v21 = vld [vmem:[#allocation2 + $0xac] sm:$0xf]  ;;  %v16512_v38 = vsel %vm13644_vm7, %v11577_v5, %v9738_v8 }
 0x43a   : > { %v9747_v46 = vrot.slane %v9745_v4, 4  ;;  %v9752_v49 = vrot.slane %v16456_v61, 5  ;;  %v16517_v28 = vld [vmem:[#allocation2 + $0xa0] sm:$0xf]  ;;  %v16519_v2 = vld [vmem:[#allocation2 + $0xa4] sm:$0x1] }
 0x43b   : > { %v9755_v8 = vrot.slane %v16468_v10, 5  ;;  %v8935_v5 = vld [vmem:[#allocation2 + $0xb0] sm:$0x1]  ;;  %v11580_v61 = vrot.slane %v9633_v54, 9  ;;  %v9762_v10 = vrot.slane %v16489_v41, 5 }
 0x43c   : > { %12505 = vmatmul.mubr.msk.bf16.vlgmr.msra.gmra.mrb[16].mxu1 %vm806_vm4, %v16269_v17  ;;  %v11579_v17 = vrot.slane %v9632_v42, 9  ;;  %v9759_v42 = vrot.slane %v16470_v14, 5  ;;  %v16535_v16 = vsel %vm13644_vm7, %v9747_v46, %v9748_v3  ;;  %v9754_v26 = vrot.slane %v9752_v49, 4  ;;  %v9635_v14 = vld [vmem:[#allocation2 + $0xa8] sm:$0xe]  ;;  %v17637_v27 = vld [vmem:[#allocation58_spill] sm:$0xff] }
 0x43d   : > { %12537 = vmatpush3.bf16.msra.mxu1 %v8343_v56  ;;  %12508 = vmatprep.mubr.msk.bf16.mxu1 %vm806_vm4, %v16297_v20  ;;  %v16523_v20 = vsel %vm13644_vm7, %v9740_v55, %v9741_v57  ;;  %v16527_v56 = vsel %vm13644_vm7, %v11578_v22, %v9745_v4  ;;  %17548 = vst [vmem:[#allocation72_spill] sm:$0xff] %v16535_v16  ;;  %v9634_v55 = vld [vmem:[#allocation2 + $0x9c] sm:$0xe]  ;;  %v17549_v57 = vshrl.u32 %v16025_v23, 16  ;;  %v16544_v6 = vld [vmem:[#allocation2 + $0xb8] sm:$0xf] }
 0x43e   : > { %13236 = vmatprep.subr.msk.bf16.mxu1 %vm855_vm0, %v16487_v32  ;;  %17546 = vst [vmem:[#allocation70_spill] sm:$0xff] %v16523_v20  ;;  %17547 = vst [vmem:[#allocation71_spill] sm:$0xff] %v16527_v56  ;;  %v9761_v4 = vrot.slane %v9759_v42, 4  ;;  %v16546_v18 = vld [vmem:[#allocation2 + $0xc4] sm:$0xf]  ;;  %v16550_v3 = vsel %vm13644_vm7, %v11579_v17, %v9752_v49  ;;  %v16554_v23 = vsel %vm13644_vm7, %v9754_v26, %v9755_v8  ;;  %v9766_v46 = vrot.slane %v16517_v28, 5 }
 0x43f   : > { %v16539_v39 = vrot.slane %v17549_v57, 4  ;;  %17550 = vst [vmem:[#allocation73_spill] sm:$0xff] %v16550_v3  ;;  %17551 = vst [vmem:[#allocation74_spill] sm:$0xff] %v16554_v23  ;;  %v16558_v54 = vsel %vm13644_vm7, %v11580_v61, %v9759_v42  ;;  %v8938_v57 = vld [vmem:[#allocation2 + $0xbc] sm:$0x1]  ;;  %v11581_v49 = vrot.slane %v9634_v55, 9 }
 0x440   : > { %17552 = vst [vmem:[#allocation75_spill] sm:$0xff] %v16558_v54  ;;  %v16565_v16 = vsel %vm13644_vm7, %v9761_v4, %v9762_v10  ;;  %v9773_v17 = vrot.slane %v16508_v21, 5  ;;  %v9636_v56 = vld [vmem:[#allocation2 + $0xb4] sm:$0xe]  ;;  %v8941_v26 = vld [vmem:[#allocation2 + $0xc8] sm:$0x1] }
 0x441   : > { %17553 = vst [vmem:[#allocation76_spill] sm:$0xff] %v16565_v16  ;;  %v9768_v61 = vrot.slane %v9766_v46, 4  ;;  %v9769_v42 = vrot.slane %v16519_v2, 5  ;;  %v11582_v20 = vrot.slane %v9635_v14, 9  ;;  %v16575_v22 = vsel %vm13644_vm7, %v11581_v49, %v9766_v46  ;;  %v9637_v23 = vld [vmem:[#allocation2 + $0xc0] sm:$0xe] }
 0x442   : > { %v9775_v10 = vrot.slane %v9773_v17, 4  ;;  %v9776_v55 = vrot.slane %v8935_v5, 5  ;;  %v9780_v4 = vrot.slane %v16544_v6, 5  ;;  %v9787_v46 = vrot.slane %v16546_v18, 5 }
 0x443   : > { %v16582_v8 = vsel %vm13644_vm7, %v9768_v61, %v9769_v42  ;;  %v16586_v14 = vsel %vm13644_vm7, %v11582_v20, %v9773_v17  ;;  %v11584_v42 = vrot.slane %v9637_v23, 9  ;;  %v9790_v3 = vrot.slane %v8941_v26, 5 }
 0x444   : > { %12509 = vmatmul.mubr.msk.bf16.gmra.mrb[20].mxu1 %vm806_vm4, %v16299_v19  ;;  %v11583_v19 = vrot.slane %v9636_v56, 9  ;;  %v11598_v5 = vcombine.low %v16575_v22, %v16582_v8  ;;  %v16593_v49 = vsel %vm13644_vm7, %v9775_v10, %v9776_v55  ;;  %v9782_v16 = vrot.slane %v9780_v4, 4  ;;  %v17082_v22 = vld [vmem:[%s17316_s4] ss:$0 sm:$0xff] }
 0x445   : > { %12512 = vmatprep.mubr.msk.bf16.mxu1 %vm806_vm4, %v16311_v15  ;;  %v9783_v15 = vrot.slane %v8938_v57, 5  ;;  %v11599_v61 = vcombine.low %v16586_v14, %v16593_v49  ;;  %v9789_v54 = vrot.slane %v9787_v46, 4  ;;  %v7640_v20 = vshll.u32 %v16036_v62, 16 }
 0x446   : > { %v7644_v56 = vshrl.u32 %v16036_v62, 16  ;;  %v16601_v17 = vsel %vm13644_vm7, %v11583_v19, %v9780_v4  ;;  %v7634_v57 = vshll.u32 %v16356_v45, 16  ;;  %v16612_v23 = vsel %vm13644_vm7, %v11584_v42, %v9787_v46 }
 0x447   : > { %v16605_v10 = vsel %vm13644_vm7, %v9782_v16, %v9783_v15  ;;  %v16616_v62 = vsel %vm13644_vm7, %v9789_v54, %v9790_v3  ;;  %v17554_v26 = vor.u32 %v16323_v58, %v16321_v43  ;;  %v17555_v16 = vor.u32 %v16340_v0, %v16338_v7 }
 0x448   : > { %v7623_v15 = vor.u32 %v16539_v39, %v16373_v1  ;;  %v11601_v55 = vcombine.low %v16612_v23, %v16616_v62  ;;  %v17556_v3 = vsel %vm13496_vm3, %v16313_v50, %v16333_v37  ;;  %v17557_v43 = vsel %vm13496_vm3, %v16301_v24, %v16275_v40  ;;  %v7375_v37 = vld [vmem:[#allocation2 + $0x90] sm:$0xf] }
 0x449   : > { %v7590_v4 = vrot.slane %v17554_v26, 4  ;;  %v7600_v19 = vrot.slane %v17555_v16, 4  ;;  %v11429_v58 = vcombine.low %v17557_v43, %v17556_v3  ;;  %v17558_v0 = vshll.u32 %v15987_v34, 16 }
 0x44a   : > { %v17559_v39 = vshll.u32 %v16009_v48, 16  ;;  %v7626_v42 = vshll.u32 %v16027_v60, 16  ;;  %v16645_v26 = vrot.slane %v7640_v20, 5  ;;  %v7646_v50 = vrot.slane %v7644_v56, 4 }
 0x44b   : > { %v7580_v54 = vrot.slane %v17558_v0, 5  ;;  %v7571_v34 = vsel %vm13496_vm3, %v16352_v36, %v16292_v51  ;;  %v7613_v40 = vor.u32 %v16367_v11, %v16363_v25  ;;  %v17560_v24 = vshrl.u32 %v16356_v45, 16  ;;  %v7378_v11 = vld [vmem:[#allocation2 + $0x9c] sm:$0xf] }
 0x44c   : > { %12513 = vmatmul.mubr.msk.bf16.gmra.mrb[24].mxu1 %vm806_vm4, %v16327_v53  ;;  %v7604_v46 = vrot.slane %v17559_v39, 5  ;;  %v7636_v53 = vrot.slane %v7634_v57, 5  ;;  %v7595_v20 = vsel %vm13496_vm3, %v7590_v4, %v16338_v7  ;;  %v7624_v16 = vrot.slane %v7623_v15, 4 }
 0x44d   : > { %12516 = vmatprep.mubr.msk.bf16.mxu1 %vm806_vm4, %v11429_v58  ;;  %v7633_v48 = vrot.slane %v17560_v24, 4  ;;  %v7581_v60 = vsel %vm13496_vm3, %v16354_v33, %v7580_v54  ;;  %v7655_v51 = vshrl.u32 %v7375_v37, 16  ;;  %v7658_v36 = vshll.u32 %v7375_v37, 16 }
 0x44e   : > { %v7605_v56 = vsel %vm13496_vm3, %v7600_v19, %v7604_v46  ;;  %v7664_v25 = vshll.u32 %v16057_v52, 16  ;;  %v7668_v45 = vshrl.u32 %v16057_v52, 16  ;;  %v7628_v57 = vrot.slane %v7626_v42, 5 }
 0x44f   : > { %v7647_v3 = vor.u32 %v7646_v50, %v16645_v26  ;;  %v7688_v33 = vshll.u32 %v16075_v9, 16  ;;  %v7692_v43 = vshrl.u32 %v16075_v9, 16  ;;  %v11430_v58 = vcombine.low %v7571_v34, %v7581_v60 }
 0x450   : > { %v11431_v7 = vcombine.low %v7595_v20, %v7605_v56  ;;  %v7614_v4 = vrot.slane %v7613_v40, 4  ;;  %v7637_v0 = vor.u32 %v7636_v53, %v7633_v48  ;;  %v7629_v19 = vsel %vm13496_vm3, %v7624_v16, %v7628_v57  ;;  %v7381_v20 = vld [vmem:[#allocation2 + $0xa8] sm:$0xf] }
 0x451   : > { %v7650_v15 = vshll.u32 %v16045_v31, 16  ;;  %v7679_v54 = vshrl.u32 %v7378_v11, 16  ;;  %v7682_v39 = vshll.u32 %v7378_v11, 16  ;;  %v7657_v52 = vrot.slane %v7655_v51, 4 }
 0x452   : > { %v7660_v46 = vrot.slane %v7658_v36, 5  ;;  %v7666_v42 = vrot.slane %v7664_v25, 5  ;;  %v7670_v37 = vrot.slane %v7668_v45, 4  ;;  %v7648_v50 = vrot.slane %v7647_v3, 4  ;;  %v7384_v25 = vld [vmem:[#allocation2 + $0xb4] sm:$0xf] }
 0x453   : > { %v7690_v24 = vrot.slane %v7688_v33, 5  ;;  %v7694_v9 = vrot.slane %v7692_v43, 4  ;;  %v7619_v34 = vsel %vm13496_vm3, %v7614_v4, %v16373_v1  ;;  %v7638_v40 = vrot.slane %v7637_v0, 4 }
 0x454   : > { %12517 = vmatmul.mubr.msk.bf16.gmra.mrb[28].mxu1 %vm806_vm4, %v11430_v58  ;;  %v11432_v48 = vcombine.low %v7619_v34, %v7629_v19  ;;  %v7652_v31 = vrot.slane %v7650_v15, 5  ;;  %v7681_v53 = vrot.slane %v7679_v54, 4  ;;  %v7684_v60 = vrot.slane %v7682_v39, 5 }
 0x455   : > { %12520 = vmatprep.mubr.msk.bf16.mxu1 %vm806_vm4, %v11431_v7  ;;  %v7661_v56 = vor.u32 %v7660_v46, %v7657_v52  ;;  %v7671_v16 = vor.u32 %v7670_v37, %v7666_v42  ;;  %v7712_v51 = vshll.u32 %v16093_v29, 16  ;;  %v7716_v36 = vshrl.u32 %v16093_v29, 16 }
 0x456   : > { %v7653_v45 = vsel %vm13496_vm3, %v7648_v50, %v7652_v31  ;;  %v7695_v11 = vor.u32 %v7694_v9, %v7690_v24  ;;  %v7736_v57 = vshll.u32 %v16115_v47, 16  ;;  %v7740_v1 = vshrl.u32 %v16115_v47, 16  ;;  %v7387_v31 = vld [vmem:[#allocation2 + $0xc0] sm:$0xf] }
 0x457   : > { %v7643_v3 = vsel %vm13496_vm3, %v7638_v40, %v16645_v26  ;;  %v7674_v33 = vshll.u32 %v16059_v44, 16  ;;  %v7703_v43 = vshrl.u32 %v7381_v20, 16  ;;  %v7706_v58 = vshll.u32 %v7381_v20, 16 }
 0x458   : > { %v7685_v7 = vor.u32 %v7684_v60, %v7681_v53  ;;  %v7698_v29 = vshll.u32 %v16091_v59, 16  ;;  %v7727_v4 = vshrl.u32 %v7384_v25, 16  ;;  %v7730_v0 = vshll.u32 %v7384_v25, 16 }
 0x459   : > { %v11433_v19 = vcombine.low %v7643_v3, %v7653_v45  ;;  %v7672_v15 = vrot.slane %v7671_v16, 4  ;;  %v7714_v54 = vrot.slane %v7712_v51, 5  ;;  %v7718_v39 = vrot.slane %v7716_v36, 4 }
 0x45a   : > { %v7662_v47 = vrot.slane %v7661_v56, 4  ;;  %v7696_v52 = vrot.slane %v7695_v11, 4  ;;  %v7738_v46 = vrot.slane %v7736_v57, 5  ;;  %v7742_v37 = vrot.slane %v7740_v1, 4 }
 0x45b   : > { %v7676_v44 = vrot.slane %v7674_v33, 5  ;;  %v7705_v26 = vrot.slane %v7703_v43, 4  ;;  %v7708_v50 = vrot.slane %v7706_v58, 5  ;;  %v7686_v9 = vrot.slane %v7685_v7, 4 }
 0x45c   : > { %12521 = vmatmul.mubr.msk.bf16.gmra.mrb[32].mxu1 %vm806_vm4, %v11432_v48  ;;  %v7700_v34 = vrot.slane %v7698_v29, 5  ;;  %v7729_v59 = vrot.slane %v7727_v4, 4  ;;  %v7732_v40 = vrot.slane %v7730_v0, 5  ;;  %v7719_v60 = vor.u32 %v7718_v39, %v7714_v54 }
 0x45d   : > { %12524 = vmatprep.mubr.msk.bf16.mxu1 %vm806_vm4, %v11433_v19  ;;  %v7677_v53 = vsel %vm13496_vm3, %v7672_v15, %v7676_v44  ;;  %v7760_v48 = vshll.u32 %v16137_v12, 16  ;;  %v7764_v20 = vshrl.u32 %v16137_v12, 16  ;;  %v7667_v56 = vsel %vm13496_vm3, %v7662_v47, %v7666_v42  ;;  %v17561_v47 = vld [vmem:[#allocation32_spill] sm:$0xff] }
 0x45e   : > { %v7701_v16 = vsel %vm13496_vm3, %v7696_v52, %v7700_v34  ;;  %v7743_v51 = vor.u32 %v7742_v37, %v7738_v46  ;;  %v7709_v36 = vor.u32 %v7708_v50, %v7705_v26  ;;  %v7722_v25 = vshll.u32 %v16106_v63, 16  ;;  %v17562_v26 = vld [vmem:[#allocation26_spill] sm:$0xff] }
 0x45f   : > { %v7751_v45 = vshrl.u32 %v7387_v31, 16  ;;  %v7754_v11 = vshll.u32 %v7387_v31, 16  ;;  %v11434_v57 = vcombine.low %v7667_v56, %v7677_v53  ;;  %v7691_v1 = vsel %vm13496_vm3, %v7686_v9, %v7690_v24 }
 0x460   : > { %v7733_v3 = vor.u32 %v7732_v40, %v7729_v59  ;;  %v7746_v33 = vshll.u32 %v16127_v13, 16  ;;  %v11435_v12 = vcombine.low %v7691_v1, %v7701_v16  ;;  %v7720_v43 = vrot.slane %v7719_v60, 4  ;;  %v17564_v16 = vld [vmem:[#allocation33_spill] sm:$0xff] }
 0x461   : > { %v7762_v58 = vrot.slane %v7760_v48, 5  ;;  %v7766_v42 = vrot.slane %v7764_v20, 4  ;;  %v7744_v7 = vrot.slane %v7743_v51, 4  ;;  %v7710_v29 = vrot.slane %v7709_v36, 4  ;;  %v8068_v48 = vld [vmem:[#allocation2 + $0xc] sm:$0xe] }
 0x462   : > { %v7724_v63 = vrot.slane %v7722_v25, 5  ;;  %v7753_v4 = vrot.slane %v7751_v45, 4  ;;  %v7756_v0 = vrot.slane %v7754_v11, 5  ;;  %v7734_v19 = vrot.slane %v7733_v3, 4  ;;  %v17563_v20 = vld [vmem:[#allocation34_spill] sm:$0xff] }
 0x463   : > { %v7748_v15 = vrot.slane %v7746_v33, 5  ;;  %v7767_v39 = vor.u32 %v7766_v42, %v7762_v58  ;;  %v8134_v52 = vrot.slane %v17561_v47, 5  ;;  %v7715_v37 = vsel %vm13496_vm3, %v7710_v29, %v7714_v54  ;;  %v8069_v3 = vld [vmem:[#allocation2 + $0x18] sm:$0xe] }
 0x464   : > { %12525 = vmatmul.mubr.msk.bf16.gmra.mrb[36].mxu1 %vm806_vm4, %v11434_v57  ;;  %v7725_v24 = vsel %vm13496_vm3, %v7720_v43, %v7724_v63  ;;  %v7757_v44 = vor.u32 %v7756_v0, %v7753_v4  ;;  %v7770_v50 = vshll.u32 %v17562_v26, 16  ;;  %v7739_v34 = vsel %vm13496_vm3, %v7734_v19, %v7738_v46  ;;  %v17565_v33 = vld [vmem:[#allocation35_spill] sm:$0xff]  ;;  %v17566_v4 = vld [vmem:[#allocation6_spill] sm:$0xff]  ;;  %v17578_v26 = vld [vmem:[#allocation5_spill] sm:$0xff] }
 0x465   : > { %12528 = vmatprep.mubr.msk.bf16.mxu1 %vm806_vm4, %v11435_v12  ;;  %v7749_v13 = vsel %vm13496_vm3, %v7744_v7, %v7748_v15  ;;  %v11436_v9 = vcombine.low %v7715_v37, %v7725_v24  ;;  %v7768_v40 = vrot.slane %v7767_v39, 4  ;;  %v8136_v31 = vrot.slane %v8134_v52, 4  ;;  %v11537_v63 = vld [vmem:[%s17315_s3 + $0x1c] sm:$0xf]  ;;  %v17569_v15 = vld [vmem:[#allocation8_spill] sm:$0xff]  ;;  %v17570_v24 = vld [vmem:[#allocation10_spill] sm:$0xff] }
 0x466   : > { %v11437_v59 = vcombine.low %v7739_v34, %v7749_v13  ;;  %v7758_v53 = vrot.slane %v7757_v44, 4  ;;  %v7772_v60 = vrot.slane %v7770_v50, 5  ;;  %v8137_v56 = vrot.slane %v17563_v20, 5  ;;  %v17567_v0 = vld [vmem:[#allocation7_spill] sm:$0xff]  ;;  %v17576_v37 = vld [vmem:[#allocation4_spill] sm:$0xff]  ;;  %v17581_v34 = vld [vmem:[#allocation13_spill] sm:$0xff] }
 0x467   : > { %v8141_v51 = vrot.slane %v17564_v16, 5  ;;  %v11455_v36 = vrot.slane %v8068_v48, 9  ;;  %v8144_v12 = vrot.slane %v17565_v33, 5  ;;  %v11456_v43 = vrot.slane %v8069_v3, 9  ;;  %v17573_v13 = vld [vmem:[#allocation11_spill] sm:$0xff]  ;;  %v17579_v50 = vld [vmem:[#allocation12_spill] sm:$0xff] }
 0x468   : > { %v7773_v54 = vsel %vm13496_vm3, %v7768_v40, %v7772_v60  ;;  %v8138_v46 = vsel %vm13644_vm7, %v8136_v31, %v8137_v56  ;;  %v7763_v25 = vsel %vm13496_vm3, %v7758_v53, %v7762_v58  ;;  %v8702_v29 = vsel %vm855_vm0, %v16487_v32, 0  ;;  %v17572_v32 = vld [vmem:[#allocation9_spill] sm:$0xff]  ;;  %v17584_v31 = vld [vmem:[#allocation14_spill] sm:$0xff]  ;;  %v17585_v53 = vld [vmem:[#allocation16_spill] sm:$0xff] }
 0x469   : > { %v11438_v45 = vcombine.low %v7763_v25, %v7773_v54  ;;  %v8135_v11 = vsel %vm13644_vm7, %v11455_v36, %v8134_v52  ;;  %v8143_v1 = vrot.slane %v8141_v51, 4  ;;  %v8142_v58 = vsel %vm13644_vm7, %v11456_v43, %v8141_v51  ;;  %v17575_v52 = vld [vmem:[#allocation3_spill] sm:$0xff]  ;;  %v17587_v48 = vld [vmem:[#allocation17_spill] sm:$0xff]  ;;  %v17588_v20 = vld [vmem:[#allocation18_spill] sm:$0xff] }
 0x46a   : > { %v11472_v57 = vcombine.low %v8135_v11, %v8138_v46  ;;  %v17568_v19 = vcombine.low %v17566_v4, %v17567_v0  ;;  %v17571_v39 = vcombine.low %v17569_v15, %v17570_v24  ;;  %v17574_v47 = vcombine.low %v17572_v32, %v17573_v13  ;;  %v17590_v54 = vld [vmem:[#allocation19_spill] sm:$0xff]  ;;  %v17591_v16 = vld [vmem:[#allocation20_spill] sm:$0xff]  ;;  %v17593_v36 = vld [vmem:[#allocation21_spill] sm:$0xff] }
 0x46b   : > { %v8145_v42 = vsel %vm13644_vm7, %v8143_v1, %v8144_v12  ;;  %v17577_v44 = vcombine.low %v17575_v52, %v17576_v37  ;;  %v17586_v60 = vcombine.low %v17584_v31, %v17585_v53  ;;  %v17589_v56 = vcombine.low %v17587_v48, %v17588_v20  ;;  %v17594_v46 = vld [vmem:[#allocation23_spill] sm:$0xff]  ;;  %v17597_v11 = vld [vmem:[#allocation24_spill] sm:$0xff]  ;;  %v17599_v1 = vld [vmem:[#allocation25_spill] sm:$0xff] }
 0x46c   : > { %12529 = vmatmul.mubr.msk.bf16.gmra.mrb[40].mxu1 %vm806_vm4, %v11436_v9  ;;  %v11473_v7 = vcombine.low %v8142_v58, %v8145_v42  ;;  %v17580_v9 = vcombine.low %v17578_v26, %v17579_v50  ;;  %v17592_v51 = vcombine.low %v17590_v54, %v17591_v16  ;;  %v17595_v25 = vcombine.low %v17593_v36, %v17594_v46  ;;  %v17600_v3 = vld [vmem:[#allocation27_spill] sm:$0xff]  ;;  %v17602_v12 = vld [vmem:[#allocation28_spill] sm:$0xff]  ;;  %v17603_v43 = vld [vmem:[#allocation29_spill] sm:$0xff] }
 0x46d   : > { %12532 = vmatprep.mubr.msk.bf16.mxu1 %vm806_vm4, %v11437_v59  ;;  %v17582_v59 = vld [vmem:[#allocation15_spill] sm:$0xff]  ;;  %v17601_v33 = vcombine.low %v17599_v1, %v17600_v3  ;;  %v17604_v42 = vcombine.low %v17602_v12, %v17603_v43  ;;  %v13324_v0 = vld [vmem:[#allocation2 + $0x24] sm:$0xff]   ;;  %v13325_v15 = vld [vmem:[#allocation2 + $0x30] sm:$0xff]  }
 0x46e   : > { %v17583_v40 = vcombine.low %v17581_v34, %v17582_v59  ;;  %v13323_v58 = vld [vmem:[#allocation2 + $0x18] sm:$0xff]   ;;  %v16801_v24 = vld [vmem:[%s17315_s3 + $0x20] sm:$0xf]  ;;  %v13327_v32 = vld [vmem:[#allocation2 + $0x48] sm:$0xff]  }
 0x46f   : > { %v13329_v13 = vld [vmem:[#allocation2 + $0x60] sm:$0xff]   ;;  %v13331_v52 = vld [vmem:[#allocation2 + $0x78] sm:$0xff]   ;;  %v13333_v31 = vld [vmem:[#allocation2 + $0x90] sm:$0xff]  }
 0x470   : > { %v8897_v37 = vld [vmem:[#allocation2 + $0x18] sm:$0xf]  ;;  %v8900_v59 = vld [vmem:[#allocation2 + $0x24] sm:$0xf]  ;;  %v8903_v3 = vld [vmem:[#allocation2 + $0x30] sm:$0xf] }
 0x471   : > { %v8949_v34 = vshll.u32 %v8897_v37, 16  ;;  %v8970_v48 = vshrl.u32 %v8900_v59, 16  ;;  %v8973_v20 = vshll.u32 %v8900_v59, 16  ;;  %v13335_v12 = vld [vmem:[#allocation2 + $0xa8] sm:$0xff]  }
 0x473   : > { %v8951_v54 = vrot.slane %v8949_v34, 5 }
 0x474   : > { %12533 = vmatmul.mubr.msk.bf16.gmra.mrb[44].mxu1 %vm806_vm4, %v11438_v45  ;;  %v17596_v45 = vld [vmem:[#allocation22_spill] sm:$0xff] }
 0x475   : > { %12538 = vmatprep.mubr.msk.bf16.mxu1 %vm806_vm4, %v11472_v57  ;;  %v17598_v57 = vcombine.low %v17596_v45, %v17597_v11  ;;  %v8975_v45 = vrot.slane %v8973_v20, 5 }
 0x47c   : > { %12539 = vmatmul.mubr.msk.bf16.vlgmr.msra.gmra.mrb[16].mxu1 %vm806_vm4, %v11473_v7  ;;  %v17605_v7 = vld [vmem:[#allocation30_spill] sm:$0xff] }
 0x47d   : > { %12571 = vmatpush3.bf16.msra.mxu1 %v8702_v29  ;;  %12542 = vmatprep.mubr.msk.bf16.mxu1 %vm806_vm4, %v17568_v19  ;;  %v17606_v29 = vld [vmem:[#allocation31_spill] sm:$0xff]  ;;  %v9428_v19 = vsel %vm855_vm0, %v11537_v63, 0 }
 0x47e   : > { %13237 = vmatprep.subr.msk.bf16.mxu1 %vm855_vm0, %v11537_v63  ;;  %v17607_v4 = vcombine.low %v17605_v7, %v17606_v29  ;;  %v13328_v63 = vld [vmem:[#allocation2 + $0x54] sm:$0xff]   ;;  %v8994_v29 = vshrl.u32 %v8903_v3, 16 }
 0x484   : > { %12543 = vmatmul.mubr.msk.bf16.gmra.mrb[20].mxu1 %vm806_vm4, %v17571_v39  ;;  %v13326_v39 = vld [vmem:[#allocation2 + $0x3c] sm:$0xff]  }
 0x485   : > { %12546 = vmatprep.mubr.msk.bf16.mxu1 %vm806_vm4, %v17574_v47  ;;  %v13330_v47 = vld [vmem:[#allocation2 + $0x6c] sm:$0xff]  }
 0x48c   : > { %12547 = vmatmul.mubr.msk.bf16.gmra.mrb[24].mxu1 %vm806_vm4, %v17577_v44  ;;  %v17608_v44 = vld [vmem:[#allocation36_spill] sm:$0xff] }
 0x48d   : > { %12550 = vmatprep.mubr.msk.bf16.mxu1 %vm806_vm4, %v17580_v9  ;;  %v8955_v26 = vshll.u32 %v17608_v44, 16  ;;  %v8959_v50 = vshrl.u32 %v17608_v44, 16  ;;  %v8946_v9 = vshrl.u32 %v8897_v37, 16 }
 0x48f   : > { %v8957_v53 = vrot.slane %v8955_v26, 5 }
 0x494   : > { %12551 = vmatmul.mubr.msk.bf16.gmra.mrb[28].mxu1 %vm806_vm4, %v17583_v40  ;;  %v13332_v40 = vld [vmem:[#allocation2 + $0x84] sm:$0xff]  }
 0x495   : > { %12554 = vmatprep.mubr.msk.bf16.mxu1 %vm806_vm4, %v17586_v60  ;;  %v8961_v60 = vrot.slane %v8959_v50, 4  ;;  %v8996_v50 = vrot.slane %v8994_v29, 4 }
 0x497   : > { %v8962_v16 = vor.u32 %v8961_v60, %v8957_v53  ;;  %v13336_v60 = vld [vmem:[#allocation2 + $0xb4] sm:$0xff]  }
 0x499   : > { %v8963_v43 = vrot.slane %v8962_v16, 4  ;;  %v8909_v16 = vld [vmem:[#allocation2 + $0x48] sm:$0xf] }
 0x49c   : > { %12555 = vmatmul.mubr.msk.bf16.gmra.mrb[32].mxu1 %vm806_vm4, %v17589_v56  ;;  %v8948_v56 = vrot.slane %v8946_v9, 4 }
 0x49d   : > { %12558 = vmatprep.mubr.msk.bf16.mxu1 %vm806_vm4, %v17592_v51  ;;  %v17609_v51 = vld [vmem:[#allocation38_spill] sm:$0xff] }
 0x49e   : > { %v8979_v36 = vshll.u32 %v17609_v51, 16  ;;  %v8983_v46 = vshrl.u32 %v17609_v51, 16  ;;  %v8952_v11 = vor.u32 %v8951_v54, %v8948_v56  ;;  %v17613_v56 = vld [vmem:[#allocation42_spill] sm:$0xff]  ;;  %v13337_v51 = vld [vmem:[#allocation2 + $0xc0] sm:$0xff]  }
 0x49f   : > { %v9027_v54 = vshll.u32 %v17613_v56, 16 }
 0x4a4   : > { %12559 = vmatmul.mubr.msk.bf16.gmra.mrb[36].mxu1 %vm806_vm4, %v17595_v25  ;;  %v8972_v25 = vrot.slane %v8970_v48, 4 }
 0x4a5   : > { %12562 = vmatprep.mubr.msk.bf16.mxu1 %vm806_vm4, %v17598_v57  ;;  %v17610_v57 = vld [vmem:[#allocation37_spill] sm:$0xff] }
 0x4a6   : > { %v8965_v1 = vshll.u32 %v17610_v57, 16  ;;  %v8976_v7 = vor.u32 %v8975_v45, %v8972_v25  ;;  %v8912_v57 = vld [vmem:[#allocation2 + $0x54] sm:$0xf] }
 0x4a8   : > { %v16830_v26 = vrot.slane %v8976_v7, 4 }
 0x4ac   : > { %12563 = vmatmul.mubr.msk.bf16.gmra.mrb[40].mxu1 %vm806_vm4, %v17601_v33  ;;  %v13334_v33 = vld [vmem:[#allocation2 + $0x9c] sm:$0xff]  }
 0x4ad   : > { %12566 = vmatprep.mubr.msk.bf16.mxu1 %vm806_vm4, %v17604_v42  ;;  %v16820_v42 = vrot.slane %v8979_v36, 5 }
 0x4b4   : > { %12567 = vmatmul.mubr.msk.bf16.gmra.mrb[44].mxu1 %vm806_vm4, %v17607_v4  ;;  %v8997_v4 = vshll.u32 %v8903_v3, 16  ;;  %v17615_v3 = vld [vmem:[#allocation44_spill] sm:$0xff] }
 0x4b5   : > { %12572 = vmatprep.mubr.msk.bf16.mxu1 %vm806_vm4, %v13323_v58  ;;  %v8985_v58 = vrot.slane %v8983_v46, 4  ;;  %v17614_v46 = vld [vmem:[#allocation41_spill] sm:$0xff] }
 0x4b6   : > { %v8999_v9 = vrot.slane %v8997_v4, 5  ;;  %v9013_v25 = vshll.u32 %v17614_v46, 16  ;;  %v9638_v4 = vld [vmem:[#allocation2 + $0xcc] sm:$0xe]  ;;  %v8915_v46 = vld [vmem:[#allocation2 + $0x60] sm:$0xf] }
 0x4b7   : > { %v8986_v37 = vor.u32 %v8985_v58, %v16820_v42  ;;  %v16848_v58 = vld [vmem:[#allocation2 + $0xd4] sm:$0x1] }
 0x4b9   : > { %v8987_v36 = vrot.slane %v8986_v37, 4 }
 0x4bc   : > { %12573 = vmatmul.mubr.msk.bf16.vlgmr.msra.gmra.mrb[16].mxu1 %vm806_vm4, %v13324_v0  ;;  %v8906_v0 = vld [vmem:[#allocation2 + $0x3c] sm:$0xf] }
 0x4bd   : > { %12605 = vmatpush3.bf16.msra.mxu1 %v9428_v19  ;;  %12576 = vmatprep.mubr.msk.bf16.mxu1 %vm806_vm4, %v13325_v15  ;;  %v8953_v19 = vrot.slane %v8952_v11, 4  ;;  %v8967_v15 = vrot.slane %v8965_v1, 5  ;;  %v9018_v44 = vshrl.u32 %v8906_v0, 16  ;;  %v9031_v11 = vshrl.u32 %v17613_v56, 16 }
 0x4be   : > { %13238 = vmatprep.subr.msk.bf16.mxu1 %vm855_vm0, %v16801_v24  ;;  %v9000_v1 = vor.u32 %v8999_v9, %v8996_v50  ;;  %v9066_v9 = vshrl.u32 %v8912_v57, 16 }
 0x4bf   : > { %v8958_v34 = vsel %vm13496_vm3, %v8953_v19, %v8957_v53  ;;  %v9020_v45 = vrot.slane %v9018_v44, 4  ;;  %v8982_v53 = vsel %vm13496_vm3, %v16830_v26, %v16820_v42  ;;  %v9797_v19 = vrot.slane %v16848_v58, 5  ;;  %v13338_v44 = vld [vmem:[#allocation2 + $0xcc] sm:$0xff]  }
 0x4c0   : > { %v16854_v42 = vrot.slane %v9027_v54, 5  ;;  %v9001_v54 = vrot.slane %v9000_v1, 4  ;;  %v10180_v1 = vld [vmem:[%s17317_s5] sm:$0xf] }
 0x4c1   : > { %13239 = vmatprep.subr.msk.bf16.mxu0 %vm855_vm0, %v10180_v1 }
 0x4c4   : > { %12577 = vmatmul.mubr.msk.bf16.gmra.mrb[20].mxu1 %vm806_vm4, %v13326_v39  ;;  %v17611_v39 = vld [vmem:[#allocation40_spill] sm:$0xff] }
 0x4c5   : > { %12580 = vmatprep.mubr.msk.bf16.mxu1 %vm806_vm4, %v13327_v32  ;;  %v9003_v32 = vshll.u32 %v17611_v39, 16 }
 0x4c7   : > { %v16834_v59 = vrot.slane %v9003_v32, 5 }
 0x4cc   : > { %12581 = vmatmul.mubr.msk.bf16.gmra.mrb[24].mxu1 %vm806_vm4, %v13328_v63  ;;  %v9007_v63 = vshrl.u32 %v17611_v39, 16 }
 0x4cd   : > { %12584 = vmatprep.mubr.msk.bf16.mxu1 %vm806_vm4, %v13329_v13  ;;  %v17612_v13 = vld [vmem:[#allocation39_spill] sm:$0xff] }
 0x4d4   : > { %12585 = vmatmul.mubr.msk.bf16.gmra.mrb[28].mxu1 %vm806_vm4, %v13330_v47  ;;  %v8989_v47 = vshll.u32 %v17612_v13, 16  ;;  %v9033_v13 = vrot.slane %v9031_v11, 4 }
 0x4d5   : > { %12588 = vmatprep.mubr.msk.bf16.mxu1 %vm806_vm4, %v13331_v52  ;;  %v8968_v52 = vsel %vm13496_vm3, %v8963_v43, %v8967_v15  ;;  %v16846_v43 = vld [vmem:[#allocation2 + $0xd0] sm:$0xf]  ;;  %v17616_v15 = vld [vmem:[#allocation48_spill] sm:$0xff] }
 0x4d6   : > { %v11538_v48 = vcombine.low %v8958_v34, %v8968_v52  ;;  %v8991_v20 = vrot.slane %v8989_v47, 5  ;;  %v9075_v39 = vshll.u32 %v17616_v15, 16  ;;  %v9079_v32 = vshrl.u32 %v17616_v15, 16 }
 0x4d7   : > { %v9042_v47 = vshrl.u32 %v8909_v16, 16  ;;  %v9045_v52 = vshll.u32 %v8909_v16, 16 }
 0x4d8   : > { %v16870_v16 = vrot.slane %v9075_v39, 5  ;;  %v17618_v39 = vld [vmem:[#allocation49_spill] sm:$0xff] }
 0x4d9   : > { %v9047_v35 = vrot.slane %v9045_v52, 5  ;;  %v17619_v52 = vld [vmem:[#allocation46_spill] sm:$0xff] }
 0x4dc   : > { %12589 = vmatmul.mubr.msk.bf16.gmra.mrb[32].mxu1 %vm806_vm4, %v13332_v40  ;;  %v9009_v40 = vrot.slane %v9007_v63, 4  ;;  %v11585_v63 = vrot.slane %v9638_v4, 9  ;;  %v17617_v4 = vld [vmem:[#allocation43_spill] sm:$0xff] }
 0x4dd   : > { %12592 = vmatprep.mubr.msk.bf16.mxu1 %vm806_vm4, %v13333_v31  ;;  %v9021_v31 = vshll.u32 %v8906_v0, 16  ;;  %v9794_v0 = vrot.slane %v16846_v43, 5 }
 0x4de   : > { %v9010_v7 = vor.u32 %v9009_v40, %v16834_v59  ;;  %v8992_v40 = vsel %vm13496_vm3, %v8987_v36, %v8991_v20  ;;  %v9037_v20 = vshll.u32 %v17617_v4, 16  ;;  %v9044_v36 = vrot.slane %v9042_v47, 4 }
 0x4df   : > { %v9023_v29 = vrot.slane %v9021_v31, 5  ;;  %v9796_v37 = vrot.slane %v9794_v0, 4  ;;  %v16862_v34 = vsel %vm13644_vm7, %v11585_v63, %v9794_v0  ;;  %v9015_v31 = vrot.slane %v9013_v25, 5 }
 0x4e0   : > { %v9103_v63 = vshrl.u32 %v17618_v39, 16  ;;  %v9039_v47 = vrot.slane %v9037_v20, 5 }
 0x4e1   : > { %v16868_v56 = vsel %vm13644_vm7, %v9796_v37, %v9797_v19  ;;  %v11539_v19 = vcombine.low %v8982_v53, %v8992_v40  ;;  %v9061_v37 = vshll.u32 %v17619_v52, 16  ;;  %v9048_v53 = vor.u32 %v9047_v35, %v9044_v36 }
 0x4e2   : > { %v11602_v11 = vcombine.low %v16862_v34, %v16868_v56 }
 0x4e4   : > { %12593 = vmatmul.mubr.msk.bf16.gmra.mrb[36].mxu1 %vm806_vm4, %v13334_v33  ;;  %v9051_v33 = vshll.u32 %v17615_v3, 16 }
 0x4e5   : > { %12596 = vmatprep.mubr.msk.bf16.mxu1 %vm806_vm4, %v13335_v12  ;;  %v9055_v12 = vshrl.u32 %v17615_v3, 16  ;;  %v9011_v3 = vrot.slane %v9010_v7, 4  ;;  %v9090_v7 = vshrl.u32 %v8915_v46, 16 }
 0x4e6   : > { %v16858_v26 = vrot.slane %v9051_v33, 5  ;;  %v9024_v33 = vor.u32 %v9023_v29, %v9020_v45  ;;  %v9093_v45 = vshll.u32 %v8915_v46, 16  ;;  %v10237_v29 = vsel %vm855_vm0, %v10180_v1, 0  ;;  %v8918_v1 = vld [vmem:[#allocation2 + $0x6c] sm:$0xf] }
 0x4e7   : > { %v9057_v50 = vrot.slane %v9055_v12, 4  ;;  %v9034_v12 = vor.u32 %v9033_v13, %v16854_v42  ;;  %12673 = vmatpush3.bf16.msra.mxu0 %v10237_v29  ;;  %v9006_v13 = vsel %vm13496_vm3, %v9001_v54, %v16834_v59  ;;  %v9092_v46 = vrot.slane %v9090_v7, 4 }
 0x4e8   : > { %v9095_v4 = vrot.slane %v9093_v45, 5  ;;  %v9898_v29 = vsel %vm855_vm0, %v16801_v24, 0  ;;  %v9114_v35 = vshrl.u32 %v8918_v1, 16  ;;  %v8921_v24 = vld [vmem:[#allocation2 + $0x78] sm:$0xf] }
 0x4e9   : > { %v9058_v25 = vor.u32 %v9057_v50, %v16858_v26  ;;  %v9035_v50 = vrot.slane %v9034_v12, 4  ;;  %v9141_v52 = vshll.u32 %v8921_v24, 16 }
 0x4ec   : > { %12597 = vmatmul.mubr.msk.bf16.gmra.mrb[40].mxu1 %vm806_vm4, %v13336_v60  ;;  %v9069_v60 = vshll.u32 %v8912_v57, 16  ;;  %v9068_v57 = vrot.slane %v9066_v9, 4  ;;  %v17620_v9 = vld [vmem:[#allocation52_spill] sm:$0xff] }
 0x4ed   : > { %12600 = vmatprep.mubr.msk.bf16.mxu1 %vm806_vm4, %v13337_v51  ;;  %v9081_v51 = vrot.slane %v9079_v32, 4  ;;  %v9099_v32 = vshll.u32 %v17618_v39, 16  ;;  %v9085_v40 = vshll.u32 %v17620_v9, 16  ;;  %v9063_v39 = vrot.slane %v9061_v37, 5 }
 0x4ee   : > { %v9071_v0 = vrot.slane %v9069_v60, 5  ;;  %v9059_v60 = vrot.slane %v9058_v25, 4  ;;  %v9117_v25 = vshll.u32 %v8918_v1, 16  ;;  %v9116_v37 = vrot.slane %v9114_v35, 4 }
 0x4ef   : > { %v9082_v15 = vor.u32 %v9081_v51, %v16870_v16  ;;  %v16896_v54 = vrot.slane %v9099_v32, 5  ;;  %v9087_v36 = vrot.slane %v9085_v40, 5 }
 0x4f0   : > { %v9072_v51 = vor.u32 %v9071_v0, %v9068_v57  ;;  %v9040_v57 = vsel %vm13496_vm3, %v9035_v50, %v9039_v47  ;;  %v9049_v0 = vrot.slane %v9048_v53, 4  ;;  %v9119_v47 = vrot.slane %v9117_v25, 5 }
 0x4f1   : > { %v9083_v59 = vrot.slane %v9082_v15, 4  ;;  %v17621_v15 = vld [vmem:[#allocation54_spill] sm:$0xff] }
 0x4f2   : > { %v9073_v7 = vrot.slane %v9072_v51, 4  ;;  %v9109_v32 = vshll.u32 %v17621_v15, 16  ;;  %v9054_v40 = vsel %vm13496_vm3, %v9049_v0, %v16858_v26 }
 0x4f3   : > { %v9088_v45 = vsel %vm13496_vm3, %v9083_v59, %v9087_v36 }
 0x4f4   : > { %12601 = vmatmul.mubr.msk.bf16.gmra.mrb[44].mxu1 %vm806_vm4, %v13338_v44  ;;  %v9016_v44 = vsel %vm13496_vm3, %v9011_v3, %v9015_v31  ;;  %v9123_v31 = vshll.u32 %v16434_v30, 16  ;;  %v9127_v3 = vshrl.u32 %v16434_v30, 16  ;;  %v9064_v30 = vsel %vm13496_vm3, %v9059_v60, %v9063_v39 }
 0x4f5   : > { %12606 = vmatprep.mubr.msk.bf16.mxu1 %vm806_vm4, %v11538_v48  ;;  %v9025_v48 = vrot.slane %v9024_v33, 4  ;;  %v9105_v33 = vrot.slane %v9103_v63, 4  ;;  %v11540_v20 = vcombine.low %v9006_v13, %v9016_v44  ;;  %v17622_v44 = vld [vmem:[#allocation57_spill] sm:$0xff]  ;;  %v9078_v60 = vsel %vm13496_vm3, %v9073_v7, %v16870_v16 }
 0x4f6   : > { %v16913_v63 = vrot.slane %v9123_v31, 5  ;;  %v9129_v13 = vrot.slane %v9127_v3, 4  ;;  %v9147_v50 = vshll.u32 %v17622_v44, 16  ;;  %v9151_v53 = vshrl.u32 %v17622_v44, 16  ;;  %v8927_v31 = vld [vmem:[#allocation2 + $0x90] sm:$0xf] }
 0x4f7   : > { %v9030_v12 = vsel %vm13496_vm3, %v9025_v48, %v16854_v42  ;;  %v9106_v42 = vor.u32 %v9105_v33, %v16896_v54  ;;  %v9138_v48 = vshrl.u32 %v8921_v24, 16  ;;  %v11542_v51 = vcombine.low %v9054_v40, %v9064_v30  ;;  %v17624_v24 = vld [vmem:[#allocation62_spill] sm:$0xff]  ;;  %v17626_v44 = vld [vmem:[#allocation61_spill] sm:$0xff] }
 0x4f8   : > { %v11541_v9 = vcombine.low %v9030_v12, %v9040_v57  ;;  %v9111_v1 = vrot.slane %v9109_v32, 5  ;;  %v9130_v33 = vor.u32 %v9129_v13, %v16913_v63  ;;  %v9143_v39 = vrot.slane %v9141_v52, 5  ;;  %v17623_v12 = vld [vmem:[#allocation56_spill] sm:$0xff] }
 0x4f9   : > { %v9107_v59 = vrot.slane %v9106_v42, 4  ;;  %v9120_v3 = vor.u32 %v9119_v47, %v9116_v37  ;;  %v9133_v26 = vshll.u32 %v17623_v12, 16  ;;  %v9149_v36 = vrot.slane %v9147_v50, 5 }
 0x4fa   : > { %v9153_v35 = vrot.slane %v9151_v53, 4  ;;  %v9171_v57 = vshll.u32 %v17624_v24, 16  ;;  %v9175_v0 = vshrl.u32 %v17624_v24, 16  ;;  %v9186_v30 = vshrl.u32 %v8927_v31, 16 }
 0x4fb   : > { %v9189_v7 = vshll.u32 %v8927_v31, 16  ;;  %v9112_v32 = vsel %vm13496_vm3, %v9107_v59, %v9111_v1  ;;  %v9131_v13 = vrot.slane %v9130_v33, 4  ;;  %v9121_v52 = vrot.slane %v9120_v3, 4 }
 0x4fc   : > { %12607 = vmatmul.mubr.msk.bf16.vlgmr.msra.gmra.mrb[16].mxu1 %vm806_vm4, %v11539_v19  ;;  %v9096_v19 = vor.u32 %v9095_v4, %v9092_v46  ;;  %v11543_v46 = vcombine.low %v9078_v60, %v9088_v45  ;;  %v17625_v45 = vld [vmem:[#allocation66_spill] sm:$0xff]  ;;  %v9135_v37 = vrot.slane %v9133_v26, 5  ;;  %v9154_v47 = vor.u32 %v9153_v35, %v9149_v36 }
 0x4fd   : > { %12639 = vmatpush3.bf16.msra.mxu1 %v9898_v29  ;;  %12610 = vmatprep.mubr.msk.bf16.mxu1 %vm806_vm4, %v11540_v20  ;;  %v8924_v29 = vld [vmem:[#allocation2 + $0x84] sm:$0xf]  ;;  %v9140_v20 = vrot.slane %v9138_v48, 4  ;;  %v9199_v42 = vshrl.u32 %v17625_v45, 16  ;;  %v9157_v50 = vshll.u32 %v17626_v44, 16  ;;  %v16937_v40 = vrot.slane %v9171_v57, 5 }
 0x4fe   : > { %v9097_v4 = vrot.slane %v9096_v19, 4  ;;  %v9162_v16 = vshrl.u32 %v8924_v29, 16  ;;  %v9165_v25 = vshll.u32 %v8924_v29, 16  ;;  %v9195_v19 = vshll.u32 %v17625_v45, 16  ;;  %v8933_v45 = vld [vmem:[#allocation2 + $0xa8] sm:$0xf] }
 0x4ff   : > { %v9144_v48 = vor.u32 %v9143_v39, %v9140_v20  ;;  %v9177_v60 = vrot.slane %v9175_v0, 4  ;;  %v9191_v29 = vrot.slane %v9189_v7, 5  ;;  %v9136_v1 = vsel %vm13496_vm3, %v9131_v13, %v9135_v37  ;;  %v17627_v0 = vld [vmem:[#allocation65_spill] sm:$0xff] }
 0x500   : > { %v9102_v15 = vsel %vm13496_vm3, %v9097_v4, %v16896_v54  ;;  %v9164_v53 = vrot.slane %v9162_v16, 4  ;;  %v16939_v31 = vrot.slane %v9195_v19, 5  ;;  %v9201_v54 = vrot.slane %v9199_v42, 4  ;;  %v8930_v4 = vld [vmem:[#allocation2 + $0x9c] sm:$0xf] }
 0x501   : > { %v11544_v12 = vcombine.low %v9102_v15, %v9112_v32  ;;  %v9145_v59 = vrot.slane %v9144_v48, 4  ;;  %v9126_v33 = vsel %vm13496_vm3, %v9121_v52, %v16913_v63  ;;  %v9155_v20 = vrot.slane %v9154_v47, 4 }
 0x502   : > { %v9178_v3 = vor.u32 %v9177_v60, %v16937_v40  ;;  %v9210_v26 = vshrl.u32 %v8930_v4, 16  ;;  %v9213_v35 = vshll.u32 %v8930_v4, 16  ;;  %v11545_v16 = vcombine.low %v9126_v33, %v9136_v1 }
 0x503   : > { %v9202_v57 = vor.u32 %v9201_v54, %v16939_v31  ;;  %v9219_v63 = vshll.u32 %v16517_v28, 16  ;;  %v9223_v7 = vshrl.u32 %v16517_v28, 16  ;;  %v9205_v42 = vshll.u32 %v16489_v41, 16 }
 0x504   : > { %12611 = vmatmul.mubr.msk.bf16.gmra.mrb[20].mxu1 %vm806_vm4, %v11541_v9  ;;  %v9167_v9 = vrot.slane %v9165_v25, 5  ;;  %v9159_v25 = vrot.slane %v9157_v50, 5  ;;  %v9243_v15 = vshll.u32 %v16508_v21, 16  ;;  %v9247_v32 = vshrl.u32 %v16508_v21, 16  ;;  %v8936_v21 = vld [vmem:[#allocation2 + $0xb4] sm:$0xf] }
 0x505   : > { %12614 = vmatprep.mubr.msk.bf16.mxu1 %vm806_vm4, %v11542_v51  ;;  %v9188_v51 = vrot.slane %v9186_v30, 4  ;;  %v9181_v30 = vshll.u32 %v17627_v0, 16  ;;  %v9179_v48 = vrot.slane %v9178_v3, 4  ;;  %v9212_v52 = vrot.slane %v9210_v26, 4 }
 0x506   : > { %v9168_v39 = vor.u32 %v9167_v9, %v9164_v53  ;;  %v9160_v19 = vsel %vm13496_vm3, %v9155_v20, %v9159_v25  ;;  %v9203_v47 = vrot.slane %v9202_v57, 4  ;;  %v9234_v44 = vshrl.u32 %v8933_v45, 16 }
 0x507   : > { %v9192_v24 = vor.u32 %v9191_v29, %v9188_v51  ;;  %v9237_v50 = vshll.u32 %v8933_v45, 16  ;;  %v9183_v28 = vrot.slane %v9181_v30, 5  ;;  %v16960_v9 = vrot.slane %v9219_v63, 5 }
 0x508   : > { %v9169_v13 = vrot.slane %v9168_v39, 4  ;;  %v9225_v60 = vrot.slane %v9223_v7, 4  ;;  %v9207_v41 = vrot.slane %v9205_v42, 5  ;;  %v16963_v51 = vrot.slane %v9243_v15, 5  ;;  %v13380_v7 = vld [vmem:[#allocation2 + $0xb0] sm:$0x1] }
 0x509   : > { %v9193_v37 = vrot.slane %v9192_v24, 4  ;;  %v9249_v29 = vrot.slane %v9247_v32, 4  ;;  %v9184_v4 = vsel %vm13496_vm3, %v9179_v48, %v9183_v28  ;;  %v9229_v1 = vshll.u32 %v16519_v2, 16  ;;  %v8942_v15 = vld [vmem:[#allocation2 + $0xcc] sm:$0xf] }
 0x50a   : > { %v9174_v54 = vsel %vm13496_vm3, %v9169_v13, %v16937_v40  ;;  %v9208_v33 = vsel %vm13496_vm3, %v9203_v47, %v9207_v41  ;;  %v9236_v20 = vrot.slane %v9234_v44, 4  ;;  %v9239_v39 = vrot.slane %v9237_v50, 5 }
 0x50b   : > { %v9226_v3 = vor.u32 %v9225_v60, %v16960_v9  ;;  %v9258_v26 = vshrl.u32 %v8936_v21, 16  ;;  %v9267_v40 = vshll.u32 %v16544_v6, 16  ;;  %v9250_v25 = vor.u32 %v9249_v29, %v16963_v51 }
 0x50c   : > { %12615 = vmatmul.mubr.msk.bf16.gmra.mrb[24].mxu1 %vm806_vm4, %v11543_v46  ;;  %v9150_v46 = vsel %vm13496_vm3, %v9145_v59, %v9149_v36  ;;  %v9215_v36 = vrot.slane %v9213_v35, 5  ;;  %v9198_v59 = vsel %vm13496_vm3, %v9193_v37, %v16939_v31  ;;  %v9271_v35 = vshrl.u32 %v16544_v6, 16 }
 0x50d   : > { %12618 = vmatprep.mubr.msk.bf16.mxu1 %vm806_vm4, %v11544_v12  ;;  %v11546_v53 = vcombine.low %v9150_v46, %v9160_v19  ;;  %v9261_v2 = vshll.u32 %v8936_v21, 16  ;;  %v9291_v24 = vshll.u32 %v16546_v18, 16  ;;  %v9295_v31 = vshrl.u32 %v16546_v18, 16 }
 0x50e   : > { %v9216_v12 = vor.u32 %v9215_v36, %v9212_v52  ;;  %v11547_v57 = vcombine.low %v9174_v54, %v9184_v4  ;;  %v11548_v46 = vcombine.low %v9198_v59, %v9208_v33  ;;  %v9231_v30 = vrot.slane %v9229_v1, 5  ;;  %v13381_v59 = vld [vmem:[#allocation2 + $0xbc] sm:$0x1] }
 0x50f   : > { %v9240_v63 = vor.u32 %v9239_v39, %v9236_v20  ;;  %v9253_v45 = vshll.u32 %v13380_v7, 16  ;;  %v9227_v32 = vrot.slane %v9226_v3, 4  ;;  %v9260_v6 = vrot.slane %v9258_v26, 4 }
 0x510   : > { %v9217_v0 = vrot.slane %v9216_v12, 4  ;;  %v9269_v13 = vrot.slane %v9267_v40, 5  ;;  %v9273_v48 = vrot.slane %v9271_v35, 4  ;;  %v9251_v52 = vrot.slane %v9250_v25, 4 }
 0x511   : > { %v9263_v36 = vrot.slane %v9261_v2, 5  ;;  %v9293_v37 = vrot.slane %v9291_v24, 5  ;;  %v9297_v18 = vrot.slane %v9295_v31, 4  ;;  %v9306_v47 = vshrl.u32 %v8942_v15, 16 }
 0x512   : > { %v9309_v44 = vshll.u32 %v8942_v15, 16  ;;  %v9315_v50 = vshll.u32 %v16846_v43, 16  ;;  %v9241_v28 = vrot.slane %v9240_v63, 4  ;;  %v9255_v60 = vrot.slane %v9253_v45, 5 }
 0x513   : > { %v9222_v21 = vsel %vm13496_vm3, %v9217_v0, %v16960_v9  ;;  %v9232_v54 = vsel %vm13496_vm3, %v9227_v32, %v9231_v30  ;;  %v9274_v4 = vor.u32 %v9273_v48, %v9269_v13  ;;  %v9264_v1 = vor.u32 %v9263_v36, %v9260_v6 }
 0x514   : > { %12619 = vmatmul.mubr.msk.bf16.gmra.mrb[28].mxu1 %vm806_vm4, %v11545_v16  ;;  %v8939_v16 = vld [vmem:[#allocation2 + $0xc0] sm:$0xf]  ;;  %v9256_v12 = vsel %vm13496_vm3, %v9251_v52, %v9255_v60  ;;  %v9277_v33 = vshll.u32 %v13381_v59, 16  ;;  %v9298_v20 = vor.u32 %v9297_v18, %v9293_v37  ;;  %v9311_v39 = vrot.slane %v9309_v44, 5  ;;  %v17629_v44 = vld [vmem:[#allocation47_spill] sm:$0xff]  ;;  %v17634_v60 = vld [vmem:[#allocation53_spill] sm:$0xff] }
 0x515   : > { %12622 = vmatprep.mubr.msk.bf16.mxu1 %vm806_vm4, %v11546_v53  ;;  %v9282_v19 = vshrl.u32 %v8939_v16, 16  ;;  %v9285_v42 = vshll.u32 %v8939_v16, 16  ;;  %v9319_v53 = vshrl.u32 %v16846_v43, 16  ;;  %v9308_v43 = vrot.slane %v9306_v47, 4  ;;  %v13382_v16 = vld [vmem:[#allocation2 + $0xc8] sm:$0x1] }
 0x516   : > { %v9317_v3 = vrot.slane %v9315_v50, 5  ;;  %v11549_v40 = vcombine.low %v9222_v21, %v9232_v54  ;;  %v9246_v9 = vsel %vm13496_vm3, %v9241_v28, %v16963_v51  ;;  %v9301_v25 = vshll.u32 %v13382_v16, 16  ;;  %v17638_v21 = vld [vmem:[#allocation60_spill] sm:$0xff] }
 0x517   : > { %v9284_v41 = vrot.slane %v9282_v19, 4  ;;  %v9287_v29 = vrot.slane %v9285_v42, 5  ;;  %v9321_v26 = vrot.slane %v9319_v53, 4  ;;  %v11550_v2 = vcombine.low %v9246_v9, %v9256_v12  ;;  %v17632_v53 = vld [vmem:[#allocation51_spill] sm:$0xff]  ;;  %v17643_v59 = vld [vmem:[#allocation64_spill] sm:$0xff] }
 0x518   : > { %v9275_v24 = vrot.slane %v9274_v4, 4  ;;  %v9279_v31 = vrot.slane %v9277_v33, 5  ;;  %v9312_v0 = vor.u32 %v9311_v39, %v9308_v43  ;;  %v9325_v63 = vshll.u32 %v16848_v58, 16  ;;  %v17640_v4 = vld [vmem:[#allocation59_spill] sm:$0xff]  ;;  %v17646_v43 = vld [vmem:[#allocation68_spill] sm:$0xff]  ;;  %v17647_v39 = vld [vmem:[#allocation69_spill] sm:$0xff] }
 0x519   : > { %v9288_v35 = vor.u32 %v9287_v29, %v9284_v41  ;;  %v9322_v30 = vor.u32 %v9321_v26, %v9317_v3  ;;  %v9303_v45 = vrot.slane %v9301_v25, 5  ;;  %v17635_v41 = vld [vmem:[#allocation55_spill] sm:$0xff]  ;;  %v17639_v54 = vcombine.low %v17637_v27, %v17638_v21  ;;  %v17649_v26 = vld [vmem:[#allocation70_spill] sm:$0xff]  ;;  %v17654_v25 = vld [vmem:[#allocation73_spill] sm:$0xff] }
 0x51a   : > { %v9280_v51 = vsel %vm13496_vm3, %v9275_v24, %v9279_v31  ;;  %v9313_v15 = vrot.slane %v9312_v0, 4  ;;  %v9327_v6 = vrot.slane %v9325_v63, 5  ;;  %v17636_v29 = vcombine.low %v17634_v60, %v17635_v41  ;;  %v17641_v12 = vld [vmem:[#allocation63_spill] sm:$0xff] }
 0x51b   : > { %v9289_v7 = vrot.slane %v9288_v35, 4  ;;  %v9323_v32 = vrot.slane %v9322_v30, 4  ;;  %v17644_v33 = vld [vmem:[#allocation67_spill] sm:$0xff]  ;;  %v17652_v35 = vld [vmem:[#allocation72_spill] sm:$0xff] }
 0x51c   : > { %12623 = vmatmul.mubr.msk.bf16.gmra.mrb[32].mxu1 %vm806_vm4, %v11547_v57  ;;  %v9299_v57 = vrot.slane %v9298_v20, 4  ;;  %v9318_v58 = vsel %vm13496_vm3, %v9313_v15, %v9317_v3  ;;  %v17645_v20 = vcombine.low %v17643_v59, %v17644_v33  ;;  %v17648_v3 = vcombine.low %v17646_v43, %v17647_v39  ;;  %v17651_v9 = vld [vmem:[#allocation71_spill] sm:$0xff] }
 0x51d   : > { %12626 = vmatprep.mubr.msk.bf16.mxu1 %vm806_vm4, %v11548_v46  ;;  %v9265_v46 = vrot.slane %v9264_v1, 4  ;;  %v9294_v52 = vsel %vm13496_vm3, %v9289_v7, %v9293_v37  ;;  %v9328_v18 = vsel %vm13496_vm3, %v9323_v32, %v9327_v6  ;;  %v17631_v37 = vld [vmem:[#allocation50_spill] sm:$0xff]  ;;  %v17642_v1 = vcombine.low %v17640_v4, %v17641_v12  ;;  %v17657_v31 = vld [vmem:[#allocation75_spill] sm:$0xff] }
 0x51e   : > { %v9304_v19 = vsel %vm13496_vm3, %v9299_v57, %v9303_v45  ;;  %v11553_v47 = vcombine.low %v9318_v58, %v9328_v18  ;;  %v17633_v28 = vcombine.low %v17631_v37, %v17632_v53  ;;  %v17653_v16 = vcombine.low %v17651_v9, %v17652_v35  ;;  %v17658_v57 = vld [vmem:[#allocation76_spill] sm:$0xff] }
 0x51f   : > { %v9270_v42 = vsel %vm13496_vm3, %v9265_v46, %v9269_v13  ;;  %v11552_v36 = vcombine.low %v9294_v52, %v9304_v19  ;;  %v17628_v13 = vld [vmem:[#allocation45_spill] sm:$0xff]  ;;  %v17659_v46 = vcombine.low %v17657_v31, %v17658_v57 }
 0x520   : > { %v11551_v48 = vcombine.low %v9270_v42, %v9280_v51  ;;  %v17630_v50 = vcombine.low %v17628_v13, %v17629_v44 }
 0x524   : > { %12627 = vmatmul.mubr.msk.bf16.gmra.mrb[36].mxu1 %vm806_vm4, %v11549_v40  ;;  %v17650_v40 = vcombine.low %v16512_v38, %v17649_v26  ;;  %v17660_v38 = vcombine.low %v16601_v17, %v16605_v10 }
 0x525   : > { %12630 = vmatprep.mubr.msk.bf16.mxu1 %vm806_vm4, %v11550_v2  ;;  %v17655_v2 = vld [vmem:[#allocation74_spill] sm:$0xff] }
 0x526   : > { %v17656_v24 = vcombine.low %v17654_v25, %v17655_v2 }
 0x52c   : > { %12631 = vmatmul.mubr.msk.bf16.gmra.mrb[40].mxu1 %vm806_vm4, %v11551_v48 }
 0x52d   : > { %12634 = vmatprep.mubr.msk.bf16.mxu1 %vm806_vm4, %v11552_v36 }
 0x534   : > { %12635 = vmatmul.mubr.msk.bf16.gmra.mrb[44].mxu1 %vm806_vm4, %v11553_v47 }
 0x535   : > { %12640 = vmatprep.mubr.msk.bf16.mxu1 %vm806_vm4, %v17630_v50 }
 0x53c   : > { %12641 = vmatmul.mubr.msk.bf16.vlgmr.msra.gmra.mrb[16].mxu1 %vm806_vm4, %v17633_v28 }
 0x53d   : > { %12644 = vmatprep.mubr.msk.bf16.mxu1 %vm806_vm4, %v17636_v29 }
 0x544   : > { %12645 = vmatmul.mubr.msk.bf16.gmra.mrb[20].mxu1 %vm806_vm4, %v17639_v54 }
 0x545   : > { %12648 = vmatprep.mubr.msk.bf16.mxu1 %vm806_vm4, %v17642_v1 }
 0x54c   : > { %12649 = vmatmul.mubr.msk.bf16.gmra.mrb[24].mxu1 %vm806_vm4, %v17645_v20 }
 0x54d   : > { %12652 = vmatprep.mubr.msk.bf16.mxu1 %vm806_vm4, %v17648_v3 }
 0x554   : > { %12653 = vmatmul.mubr.msk.bf16.gmra.mrb[28].mxu1 %vm806_vm4, %v17650_v40 }
 0x555   : > { %12656 = vmatprep.mubr.msk.bf16.mxu1 %vm806_vm4, %v17653_v16 }
 0x55c   : > { %12657 = vmatmul.mubr.msk.bf16.gmra.mrb[32].mxu1 %vm806_vm4, %v17656_v24 }
 0x55d   : > { %12660 = vmatprep.mubr.msk.bf16.mxu1 %vm806_vm4, %v17659_v46 }
 0x564   : > { %12661 = vmatmul.mubr.msk.bf16.gmra.mrb[36].mxu1 %vm806_vm4, %v11598_v5 }
 0x565   : > { %12664 = vmatprep.mubr.msk.bf16.mxu1 %vm806_vm4, %v11599_v61 }
 0x56c   : > { %12665 = vmatmul.mubr.msk.bf16.gmra.mrb[40].mxu1 %vm806_vm4, %v17660_v38 }
 0x56d   : > { %12668 = vmatprep.mubr.msk.bf16.mxu1 %vm806_vm4, %v11601_v55 }
 0x574   : > { %12669 = vmatmul.mubr.msk.bf16.gmra.mrb[44].mxu1 %vm806_vm4, %v11602_v11 }
 0x60f   : > { %v12642_v8 = vpop.f32.mrb[16].mxu1 }
 0x610   : > { %v10102_v14 = vadd.f32 %v12642_v8, %v17082_v22  ;;  %v9934_v5 = vpop.f32.mrb[17].mxu1 }
 0x611   : > { %v10100_v49 = vadd.f32 %v17082_v22, %v9934_v5  ;;  %v12643_v61 = vpop.f32.mrb[18].mxu1 }
 0x612   : > { %v10134_v17 = vmax.f32 %v10102_v14, 0.0  ;;  %v10103_v10 = vadd.f32 %v12643_v61, %v17082_v22  ;;  %v9937_v55 = vpop.f32.mrb[19].mxu1 }
 0x613   : > { %v10132_v23 = vmax.f32 %v10100_v49, 0.0  ;;  %v10101_v62 = vadd.f32 %v17082_v22, %v9937_v55 }
 0x614   : > { %v11707_v34 = vpack.c.bf16 %v10134_v17, %v10134_v17  ;;  %v10135_v56 = vmax.f32 %v10103_v10, 0.0 }
 0x615   : > { %v11705_v11 = vpack.c.bf16 %v10132_v23, %v10132_v23  ;;  %v10133_v0 = vmax.f32 %v10101_v62, 0.0 }
 0x616   : > { %10578 = vst.msk [vmem:[%s17091_s18 + $0x8] sm:$0xf] %vm4950_vm8, %v11707_v34  ;;  %v10165_v30 = vpack.c.bf16 %v10135_v56, %v10134_v17  ;;  %v11708_v63 = vpack.c.bf16 %v10135_v56, %v10135_v56 }
 0x617   : > { %10576 = vst.msk [vmem:[%s17091_s18] sm:$0xf] %vm4950_vm8, %v11705_v11  ;;  %v10164_v7 = vpack.c.bf16 %v10133_v0, %v10132_v23  ;;  %v11706_v45 = vpack.c.bf16 %v10133_v0, %v10133_v0  ;;  %v12646_v51 = vpop.f32.mrb[20].mxu1 }
 0x618   : > { %10579 = vst.msk [vmem:[%s17091_s18 + $0xc] sm:$0xf] %vm4950_vm8, %v11708_v63  ;;  %v10106_v19 = vadd.f32 %v12646_v51, %v17082_v22  ;;  %v9950_v42 = vpop.f32.mrb[21].mxu1 }
 0x619   : > { %10577 = vst.msk [vmem:[%s17091_s18 + $0x4] sm:$0xf] %vm4950_vm8, %v11706_v45  ;;  %v10104_v15 = vadd.f32 %v17082_v22, %v9950_v42  ;;  %v12647_v32 = vpop.f32.mrb[22].mxu1  ;;  %12674 = vmatprep.mubr.msk.bf16.mxu0 %vm806_vm4, %v10164_v7 }
 0x61a   : > { %v10138_v6 = vmax.f32 %v10106_v19, 0.0  ;;  %v10107_v48 = vadd.f32 %v12647_v32, %v17082_v22  ;;  %v9953_v52 = vpop.f32.mrb[23].mxu1  ;;  %12675 = vmatmul.mubr.msk.bf16.vlgmr.msra.gmra.mrb[32].mxu0 %vm806_vm4, %v10165_v30 }
 0x61b   : > { %v10136_v36 = vmax.f32 %v10104_v15, 0.0  ;;  %v10105_v58 = vadd.f32 %v17082_v22, %v9953_v52 }
 0x61c   : > { %v11711_v18 = vpack.c.bf16 %v10138_v6, %v10138_v6  ;;  %v10139_v47 = vmax.f32 %v10107_v48, 0.0 }
 0x61d   : > { %v11709_v13 = vpack.c.bf16 %v10136_v36, %v10136_v36  ;;  %v10137_v44 = vmax.f32 %v10105_v58, 0.0 }
 0x61e   : > { %10582 = vst.msk [vmem:[%s17091_s18 + $0x18] sm:$0xf] %vm4950_vm8, %v11711_v18  ;;  %v10167_v50 = vpack.c.bf16 %v10139_v47, %v10138_v6  ;;  %v11712_v37 = vpack.c.bf16 %v10139_v47, %v10139_v47 }
 0x61f   : > { %10580 = vst.msk [vmem:[%s17091_s18 + $0x10] sm:$0xf] %vm4950_vm8, %v11709_v13  ;;  %v10166_v53 = vpack.c.bf16 %v10137_v44, %v10136_v36  ;;  %v11710_v28 = vpack.c.bf16 %v10137_v44, %v10137_v44  ;;  %v12650_v60 = vpop.f32.mrb[24].mxu1 }
 0x620   : > { %10583 = vst.msk [vmem:[%s17091_s18 + $0x1c] sm:$0xf] %vm4950_vm8, %v11712_v37  ;;  %v10110_v41 = vadd.f32 %v12650_v60, %v17082_v22  ;;  %v9966_v29 = vpop.f32.mrb[25].mxu1 }
 0x621   : > { %10581 = vst.msk [vmem:[%s17091_s18 + $0x14] sm:$0xf] %vm4950_vm8, %v11710_v28  ;;  %v10108_v27 = vadd.f32 %v17082_v22, %v9966_v29  ;;  %v12651_v21 = vpop.f32.mrb[26].mxu1  ;;  %12678 = vmatprep.mubr.msk.bf16.mxu0 %vm806_vm4, %v10166_v53 }
 0x622   : > { %v10142_v54 = vmax.f32 %v10110_v41, 0.0  ;;  %v10111_v4 = vadd.f32 %v12651_v21, %v17082_v22  ;;  %v9969_v12 = vpop.f32.mrb[27].mxu1  ;;  %12679 = vmatmul.mubr.msk.bf16.gmra.mrb[36].mxu0 %vm806_vm4, %v10167_v50 }
 0x623   : > { %v10140_v1 = vmax.f32 %v10108_v27, 0.0  ;;  %v10109_v59 = vadd.f32 %v17082_v22, %v9969_v12 }
 0x624   : > { %v11715_v33 = vpack.c.bf16 %v10142_v54, %v10142_v54  ;;  %v10143_v20 = vmax.f32 %v10111_v4, 0.0 }
 0x625   : > { %v11713_v43 = vpack.c.bf16 %v10140_v1, %v10140_v1  ;;  %v10141_v39 = vmax.f32 %v10109_v59, 0.0 }
 0x626   : > { %10586 = vst.msk [vmem:[%s17091_s18 + $0x28] sm:$0xf] %vm4950_vm8, %v11715_v33  ;;  %v10169_v3 = vpack.c.bf16 %v10143_v20, %v10142_v54  ;;  %v11716_v26 = vpack.c.bf16 %v10143_v20, %v10143_v20 }
 0x627   : > { %10584 = vst.msk [vmem:[%s17091_s18 + $0x20] sm:$0xf] %vm4950_vm8, %v11713_v43  ;;  %v10168_v40 = vpack.c.bf16 %v10141_v39, %v10140_v1  ;;  %v11714_v9 = vpack.c.bf16 %v10141_v39, %v10141_v39  ;;  %v12654_v35 = vpop.f32.mrb[28].mxu1 }
 0x628   : > { %10587 = vst.msk [vmem:[%s17091_s18 + $0x2c] sm:$0xf] %vm4950_vm8, %v11716_v26  ;;  %v10114_v16 = vadd.f32 %v12654_v35, %v17082_v22  ;;  %v9982_v25 = vpop.f32.mrb[29].mxu1 }
 0x629   : > { %10585 = vst.msk [vmem:[%s17091_s18 + $0x24] sm:$0xf] %vm4950_vm8, %v11714_v9  ;;  %v10112_v2 = vadd.f32 %v17082_v22, %v9982_v25  ;;  %v12655_v24 = vpop.f32.mrb[30].mxu1  ;;  %12682 = vmatprep.mubr.msk.bf16.mxu0 %vm806_vm4, %v10168_v40 }
 0x62a   : > { %v10146_v31 = vmax.f32 %v10114_v16, 0.0  ;;  %v10115_v57 = vadd.f32 %v12655_v24, %v17082_v22  ;;  %v9985_v46 = vpop.f32.mrb[31].mxu1  ;;  %12683 = vmatmul.mubr.msk.bf16.gmra.mrb[40].mxu0 %vm806_vm4, %v10169_v3 }
 0x62b   : > { %v10144_v38 = vmax.f32 %v10112_v2, 0.0  ;;  %v10113_v8 = vadd.f32 %v17082_v22, %v9985_v46 }
 0x62c   : > { %v11719_v14 = vpack.c.bf16 %v10146_v31, %v10146_v31  ;;  %v10147_v5 = vmax.f32 %v10115_v57, 0.0 }
 0x62d   : > { %v11717_v49 = vpack.c.bf16 %v10144_v38, %v10144_v38  ;;  %v10145_v61 = vmax.f32 %v10113_v8, 0.0 }
 0x62e   : > { %10590 = vst.msk [vmem:[%s17091_s18 + $0x38] sm:$0xf] %vm4950_vm8, %v11719_v14  ;;  %v10171_v17 = vpack.c.bf16 %v10147_v5, %v10146_v31  ;;  %v11720_v10 = vpack.c.bf16 %v10147_v5, %v10147_v5 }
 0x62f   : > { %10588 = vst.msk [vmem:[%s17091_s18 + $0x30] sm:$0xf] %vm4950_vm8, %v11717_v49  ;;  %v10170_v55 = vpack.c.bf16 %v10145_v61, %v10144_v38  ;;  %v11718_v23 = vpack.c.bf16 %v10145_v61, %v10145_v61  ;;  %v12658_v62 = vpop.f32.mrb[32].mxu1 }
 0x630   : > { %10591 = vst.msk [vmem:[%s17091_s18 + $0x3c] sm:$0xf] %vm4950_vm8, %v11720_v10  ;;  %v10118_v34 = vadd.f32 %v12658_v62, %v17082_v22  ;;  %v9998_v56 = vpop.f32.mrb[33].mxu1 }
 0x631   : > { %10589 = vst.msk [vmem:[%s17091_s18 + $0x34] sm:$0xf] %vm4950_vm8, %v11718_v23  ;;  %v10116_v11 = vadd.f32 %v17082_v22, %v9998_v56  ;;  %v12659_v0 = vpop.f32.mrb[34].mxu1  ;;  %12686 = vmatprep.mubr.msk.bf16.mxu0 %vm806_vm4, %v10170_v55 }
 0x632   : > { %v10150_v30 = vmax.f32 %v10118_v34, 0.0  ;;  %v10119_v63 = vadd.f32 %v12659_v0, %v17082_v22  ;;  %v10001_v7 = vpop.f32.mrb[35].mxu1  ;;  %12687 = vmatmul.mubr.msk.bf16.gmra.mrb[44].mxu0 %vm806_vm4, %v10171_v17 }
 0x633   : > { %v10148_v45 = vmax.f32 %v10116_v11, 0.0  ;;  %v10117_v51 = vadd.f32 %v17082_v22, %v10001_v7 }
 0x634   : > { %v11723_v19 = vpack.c.bf16 %v10150_v30, %v10150_v30  ;;  %v10151_v42 = vmax.f32 %v10119_v63, 0.0 }
 0x635   : > { %v11721_v15 = vpack.c.bf16 %v10148_v45, %v10148_v45  ;;  %v10149_v32 = vmax.f32 %v10117_v51, 0.0 }
 0x636   : > { %10594 = vst.msk [vmem:[%s17091_s18 + $0x48] sm:$0xf] %vm4950_vm8, %v11723_v19  ;;  %v10173_v6 = vpack.c.bf16 %v10151_v42, %v10150_v30  ;;  %v11724_v48 = vpack.c.bf16 %v10151_v42, %v10151_v42 }
 0x637   : > { %10592 = vst.msk [vmem:[%s17091_s18 + $0x40] sm:$0xf] %vm4950_vm8, %v11721_v15  ;;  %v10172_v52 = vpack.c.bf16 %v10149_v32, %v10148_v45  ;;  %v11722_v36 = vpack.c.bf16 %v10149_v32, %v10149_v32  ;;  %v12662_v58 = vpop.f32.mrb[36].mxu1 }
 0x638   : > { %10595 = vst.msk [vmem:[%s17091_s18 + $0x4c] sm:$0xf] %vm4950_vm8, %v11724_v48  ;;  %v10122_v18 = vadd.f32 %v12662_v58, %v17082_v22  ;;  %v10014_v47 = vpop.f32.mrb[37].mxu1 }
 0x639   : > { %10593 = vst.msk [vmem:[%s17091_s18 + $0x44] sm:$0xf] %vm4950_vm8, %v11722_v36  ;;  %v10120_v13 = vadd.f32 %v17082_v22, %v10014_v47  ;;  %v12663_v44 = vpop.f32.mrb[38].mxu1  ;;  %12690 = vmatprep.mubr.msk.bf16.mxu0 %vm806_vm4, %v10172_v52 }
 0x63a   : > { %v10154_v50 = vmax.f32 %v10122_v18, 0.0  ;;  %v10123_v37 = vadd.f32 %v12663_v44, %v17082_v22  ;;  %v10017_v53 = vpop.f32.mrb[39].mxu1  ;;  %12691 = vmatmul.mubr.msk.bf16.gmra.mrb[48].mxu0 %vm806_vm4, %v10173_v6 }
 0x63b   : > { %v10152_v28 = vmax.f32 %v10120_v13, 0.0  ;;  %v10121_v60 = vadd.f32 %v17082_v22, %v10017_v53 }
 0x63c   : > { %v11727_v41 = vpack.c.bf16 %v10154_v50, %v10154_v50  ;;  %v10155_v29 = vmax.f32 %v10123_v37, 0.0 }
 0x63d   : > { %v11725_v27 = vpack.c.bf16 %v10152_v28, %v10152_v28  ;;  %v10153_v21 = vmax.f32 %v10121_v60, 0.0 }
 0x63e   : > { %10598 = vst.msk [vmem:[%s17091_s18 + $0x58] sm:$0xf] %vm4950_vm8, %v11727_v41  ;;  %v10175_v54 = vpack.c.bf16 %v10155_v29, %v10154_v50  ;;  %v11728_v4 = vpack.c.bf16 %v10155_v29, %v10155_v29 }
 0x63f   : > { %10596 = vst.msk [vmem:[%s17091_s18 + $0x50] sm:$0xf] %vm4950_vm8, %v11725_v27  ;;  %v10174_v12 = vpack.c.bf16 %v10153_v21, %v10152_v28  ;;  %v11726_v1 = vpack.c.bf16 %v10153_v21, %v10153_v21  ;;  %v12666_v59 = vpop.f32.mrb[40].mxu1 }
 0x640   : > { %10599 = vst.msk [vmem:[%s17091_s18 + $0x5c] sm:$0xf] %vm4950_vm8, %v11728_v4  ;;  %v10126_v33 = vadd.f32 %v12666_v59, %v17082_v22  ;;  %v10030_v20 = vpop.f32.mrb[41].mxu1 }
 0x641   : > { %10597 = vst.msk [vmem:[%s17091_s18 + $0x54] sm:$0xf] %vm4950_vm8, %v11726_v1  ;;  %v10124_v43 = vadd.f32 %v17082_v22, %v10030_v20  ;;  %v12667_v39 = vpop.f32.mrb[42].mxu1  ;;  %12694 = vmatprep.mubr.msk.bf16.mxu0 %vm806_vm4, %v10174_v12 }
 0x642   : > { %v10158_v3 = vmax.f32 %v10126_v33, 0.0  ;;  %v10127_v26 = vadd.f32 %v12667_v39, %v17082_v22  ;;  %v10033_v40 = vpop.f32.mrb[43].mxu1  ;;  %12695 = vmatmul.mubr.msk.bf16.gmra.mrb[52].mxu0 %vm806_vm4, %v10175_v54 }
 0x643   : > { %v10156_v9 = vmax.f32 %v10124_v43, 0.0  ;;  %v10125_v35 = vadd.f32 %v17082_v22, %v10033_v40 }
 0x644   : > { %v11731_v16 = vpack.c.bf16 %v10158_v3, %v10158_v3  ;;  %v10159_v25 = vmax.f32 %v10127_v26, 0.0 }
 0x645   : > { %v11729_v2 = vpack.c.bf16 %v10156_v9, %v10156_v9  ;;  %v10157_v24 = vmax.f32 %v10125_v35, 0.0 }
 0x646   : > { %10602 = vst.msk [vmem:[%s17091_s18 + $0x68] sm:$0xf] %vm4950_vm8, %v11731_v16  ;;  %v10177_v31 = vpack.c.bf16 %v10159_v25, %v10158_v3  ;;  %v11732_v57 = vpack.c.bf16 %v10159_v25, %v10159_v25 }
 0x647   : > { %10600 = vst.msk [vmem:[%s17091_s18 + $0x60] sm:$0xf] %vm4950_vm8, %v11729_v2  ;;  %v10176_v46 = vpack.c.bf16 %v10157_v24, %v10156_v9  ;;  %v11730_v38 = vpack.c.bf16 %v10157_v24, %v10157_v24  ;;  %v12670_v8 = vpop.f32.mrb[44].mxu1 }
 0x648   : > { %10603 = vst.msk [vmem:[%s17091_s18 + $0x6c] sm:$0xf] %vm4950_vm8, %v11732_v57  ;;  %v10130_v14 = vadd.f32 %v12670_v8, %v17082_v22  ;;  %v10046_v5 = vpop.f32.mrb[45].mxu1 }
 0x649   : > { %10601 = vst.msk [vmem:[%s17091_s18 + $0x64] sm:$0xf] %vm4950_vm8, %v11730_v38  ;;  %v10128_v49 = vadd.f32 %v17082_v22, %v10046_v5  ;;  %v12671_v61 = vpop.f32.mrb[46].mxu1  ;;  %12698 = vmatprep.mubr.msk.bf16.mxu0 %vm806_vm4, %v10176_v46 }
 0x64a   : > { %v10162_v17 = vmax.f32 %v10130_v14, 0.0  ;;  %v10131_v10 = vadd.f32 %v12671_v61, %v17082_v22  ;;  %v10049_v55 = vpop.f32.mrb[47].mxu1  ;;  %12699 = vmatmul.mubr.msk.bf16.gmra.mrb[56].mxu0 %vm806_vm4, %v10177_v31 }
 0x64b   : > { %v10160_v23 = vmax.f32 %v10128_v49, 0.0  ;;  %v10129_v62 = vadd.f32 %v17082_v22, %v10049_v55  ;;  %v17205_v22 = vld [vmem:[%s17318_s6] ss:$0 sm:$0xff] }
 0x64c   : > { %v11735_v34 = vpack.c.bf16 %v10162_v17, %v10162_v17  ;;  %v10163_v56 = vmax.f32 %v10131_v10, 0.0 }
 0x64d   : > { %v11733_v11 = vpack.c.bf16 %v10160_v23, %v10160_v23  ;;  %v10161_v0 = vmax.f32 %v10129_v62, 0.0 }
 0x64e   : > { %10606 = vst.msk [vmem:[%s17091_s18 + $0x78] sm:$0xf] %vm4950_vm8, %v11735_v34  ;;  %v10179_v30 = vpack.c.bf16 %v10163_v56, %v10162_v17  ;;  %v11736_v63 = vpack.c.bf16 %v10163_v56, %v10163_v56 }
 0x64f   : > { %10604 = vst.msk [vmem:[%s17091_s18 + $0x70] sm:$0xf] %vm4950_vm8, %v11733_v11  ;;  %v10178_v7 = vpack.c.bf16 %v10161_v0, %v10160_v23  ;;  %v11734_v45 = vpack.c.bf16 %v10161_v0, %v10161_v0 }
 0x650   : > { %10607 = vst.msk [vmem:[%s17091_s18 + $0x7c] sm:$0xf] %vm4950_vm8, %v11736_v63 }
 0x651   : > { %10605 = vst.msk [vmem:[%s17091_s18 + $0x74] sm:$0xf] %vm4950_vm8, %v11734_v45  ;;  %12702 = vmatprep.mubr.msk.bf16.mxu0 %vm806_vm4, %v10178_v7 }
 0x652   : > { %12703 = vmatmul.mubr.msk.bf16.gmra.mrb[60].mxu0 %vm806_vm4, %v10179_v30 }
 0x6ed   : > { %v12676_v51 = vpop.f32.mrb[32].mxu0 }
 0x6ee   : > { %v10282_v19 = vadd.f32 %v12676_v51, %v17205_v22  ;;  %v10273_v42 = vpop.f32.mrb[33].mxu0 }
 0x6ef   : > { %v10274_v15 = vadd.f32 %v17205_v22, %v10273_v42  ;;  %v12677_v32 = vpop.f32.mrb[34].mxu0 }
 0x6f0   : > { %v10402_v6 = vmax.f32 %v10282_v19, 0.0  ;;  %v10285_v48 = vadd.f32 %v12677_v32, %v17205_v22  ;;  %v10276_v52 = vpop.f32.mrb[35].mxu0 }
 0x6f1   : > { %v10400_v36 = vmax.f32 %v10274_v15, 0.0  ;;  %v10277_v58 = vadd.f32 %v17205_v22, %v10276_v52 }
 0x6f2   : > { %10434 = vst.msk [vmem:[%s17212_s24 + $0x10] sm:$0xff] %vm806_vm4, %v10402_v6  ;;  %v10403_v18 = vmax.f32 %v10285_v48, 0.0 }
 0x6f3   : > { %10432 = vst.msk [vmem:[%s17212_s24] sm:$0xff] %vm806_vm4, %v10400_v36  ;;  %v10401_v47 = vmax.f32 %v10277_v58, 0.0 }
 0x6f4   : > { %10435 = vst.msk [vmem:[%s17212_s24 + $0x18] sm:$0xff] %vm806_vm4, %v10403_v18 }
 0x6f5   : > { %10433 = vst.msk [vmem:[%s17212_s24 + $0x8] sm:$0xff] %vm806_vm4, %v10401_v47  ;;  %v12680_v13 = vpop.f32.mrb[36].mxu0 }
 0x6f6   : > { %v10298_v44 = vadd.f32 %v12680_v13, %v17205_v22  ;;  %v10289_v50 = vpop.f32.mrb[37].mxu0 }
 0x6f7   : > { %v10290_v37 = vadd.f32 %v17205_v22, %v10289_v50  ;;  %v12681_v53 = vpop.f32.mrb[38].mxu0 }
 0x6f8   : > { %v10406_v28 = vmax.f32 %v10298_v44, 0.0  ;;  %v10301_v60 = vadd.f32 %v12681_v53, %v17205_v22  ;;  %v10292_v41 = vpop.f32.mrb[39].mxu0 }
 0x6f9   : > { %v10404_v29 = vmax.f32 %v10290_v37, 0.0  ;;  %v10293_v27 = vadd.f32 %v17205_v22, %v10292_v41 }
 0x6fa   : > { %10438 = vst.msk [vmem:[%s17212_s24 + $0x30] sm:$0xff] %vm806_vm4, %v10406_v28  ;;  %v10407_v21 = vmax.f32 %v10301_v60, 0.0 }
 0x6fb   : > { %10436 = vst.msk [vmem:[%s17212_s24 + $0x20] sm:$0xff] %vm806_vm4, %v10404_v29  ;;  %v10405_v54 = vmax.f32 %v10293_v27, 0.0 }
 0x6fc   : > { %10439 = vst.msk [vmem:[%s17212_s24 + $0x38] sm:$0xff] %vm806_vm4, %v10407_v21 }
 0x6fd   : > { %10437 = vst.msk [vmem:[%s17212_s24 + $0x28] sm:$0xff] %vm806_vm4, %v10405_v54  ;;  %v12684_v4 = vpop.f32.mrb[40].mxu0 }
 0x6fe   : > { %v10314_v12 = vadd.f32 %v12684_v4, %v17205_v22  ;;  %v10305_v1 = vpop.f32.mrb[41].mxu0 }
 0x6ff   : > { %v10306_v59 = vadd.f32 %v17205_v22, %v10305_v1  ;;  %v12685_v33 = vpop.f32.mrb[42].mxu0 }
 0x700   : > { %v10410_v20 = vmax.f32 %v10314_v12, 0.0  ;;  %v10317_v43 = vadd.f32 %v12685_v33, %v17205_v22  ;;  %v10308_v39 = vpop.f32.mrb[43].mxu0 }
 0x701   : > { %v10408_v3 = vmax.f32 %v10306_v59, 0.0  ;;  %v10309_v26 = vadd.f32 %v17205_v22, %v10308_v39 }
 0x702   : > { %10442 = vst.msk [vmem:[%s17212_s24 + $0x50] sm:$0xff] %vm806_vm4, %v10410_v20  ;;  %v10411_v40 = vmax.f32 %v10317_v43, 0.0 }
 0x703   : > { %10440 = vst.msk [vmem:[%s17212_s24 + $0x40] sm:$0xff] %vm806_vm4, %v10408_v3  ;;  %v10409_v9 = vmax.f32 %v10309_v26, 0.0 }
 0x704   : > { %10443 = vst.msk [vmem:[%s17212_s24 + $0x58] sm:$0xff] %vm806_vm4, %v10411_v40 }
 0x705   : > { %10441 = vst.msk [vmem:[%s17212_s24 + $0x48] sm:$0xff] %vm806_vm4, %v10409_v9  ;;  %v12688_v35 = vpop.f32.mrb[44].mxu0 }
 0x706   : > { %v10330_v16 = vadd.f32 %v12688_v35, %v17205_v22  ;;  %v10321_v25 = vpop.f32.mrb[45].mxu0 }
 0x707   : > { %v10322_v2 = vadd.f32 %v17205_v22, %v10321_v25  ;;  %v12689_v24 = vpop.f32.mrb[46].mxu0 }
 0x708   : > { %v10414_v31 = vmax.f32 %v10330_v16, 0.0  ;;  %v10333_v57 = vadd.f32 %v12689_v24, %v17205_v22  ;;  %v10324_v46 = vpop.f32.mrb[47].mxu0 }
 0x709   : > { %v10412_v38 = vmax.f32 %v10322_v2, 0.0  ;;  %v10325_v8 = vadd.f32 %v17205_v22, %v10324_v46 }
 0x70a   : > { %10446 = vst.msk [vmem:[%s17212_s24 + $0x70] sm:$0xff] %vm806_vm4, %v10414_v31  ;;  %v10415_v14 = vmax.f32 %v10333_v57, 0.0 }
 0x70b   : > { %10444 = vst.msk [vmem:[%s17212_s24 + $0x60] sm:$0xff] %vm806_vm4, %v10412_v38  ;;  %v10413_v5 = vmax.f32 %v10325_v8, 0.0 }
 0x70c   : > { %10447 = vst.msk [vmem:[%s17212_s24 + $0x78] sm:$0xff] %vm806_vm4, %v10415_v14 }
 0x70d   : > { %10445 = vst.msk [vmem:[%s17212_s24 + $0x68] sm:$0xff] %vm806_vm4, %v10413_v5  ;;  %v12692_v49 = vpop.f32.mrb[48].mxu0 }
 0x70e   : > { %v10346_v61 = vadd.f32 %v12692_v49, %v17205_v22  ;;  %v10337_v17 = vpop.f32.mrb[49].mxu0 }
 0x70f   : > { %v10338_v10 = vadd.f32 %v17205_v22, %v10337_v17  ;;  %v12693_v55 = vpop.f32.mrb[50].mxu0 }
 0x710   : > { %v10418_v23 = vmax.f32 %v10346_v61, 0.0  ;;  %v10349_v62 = vadd.f32 %v12693_v55, %v17205_v22  ;;  %v10340_v34 = vpop.f32.mrb[51].mxu0 }
 0x711   : > { %v10416_v56 = vmax.f32 %v10338_v10, 0.0  ;;  %v10341_v11 = vadd.f32 %v17205_v22, %v10340_v34 }
 0x712   : > { %10450 = vst.msk [vmem:[%s17212_s24 + $0x90] sm:$0xff] %vm806_vm4, %v10418_v23  ;;  %v10419_v0 = vmax.f32 %v10349_v62, 0.0 }
 0x713   : > { %10448 = vst.msk [vmem:[%s17212_s24 + $0x80] sm:$0xff] %vm806_vm4, %v10416_v56  ;;  %v10417_v30 = vmax.f32 %v10341_v11, 0.0 }
 0x714   : > { %10451 = vst.msk [vmem:[%s17212_s24 + $0x98] sm:$0xff] %vm806_vm4, %v10419_v0 }
 0x715   : > { %10449 = vst.msk [vmem:[%s17212_s24 + $0x88] sm:$0xff] %vm806_vm4, %v10417_v30  ;;  %v12696_v63 = vpop.f32.mrb[52].mxu0 }
 0x716   : > { %v10362_v7 = vadd.f32 %v12696_v63, %v17205_v22  ;;  %v10353_v45 = vpop.f32.mrb[53].mxu0 }
 0x717   : > { %v10354_v51 = vadd.f32 %v17205_v22, %v10353_v45  ;;  %v12697_v19 = vpop.f32.mrb[54].mxu0 }
 0x718   : > { %v10422_v42 = vmax.f32 %v10362_v7, 0.0  ;;  %v10365_v15 = vadd.f32 %v12697_v19, %v17205_v22  ;;  %v10356_v32 = vpop.f32.mrb[55].mxu0 }
 0x719   : > { %v10420_v6 = vmax.f32 %v10354_v51, 0.0  ;;  %v10357_v48 = vadd.f32 %v17205_v22, %v10356_v32 }
 0x71a   : > { %10454 = vst.msk [vmem:[%s17212_s24 + $0xb0] sm:$0xff] %vm806_vm4, %v10422_v42  ;;  %v10423_v52 = vmax.f32 %v10365_v15, 0.0 }
 0x71b   : > { %10452 = vst.msk [vmem:[%s17212_s24 + $0xa0] sm:$0xff] %vm806_vm4, %v10420_v6  ;;  %v10421_v36 = vmax.f32 %v10357_v48, 0.0 }
 0x71c   : > { %10455 = vst.msk [vmem:[%s17212_s24 + $0xb8] sm:$0xff] %vm806_vm4, %v10423_v52 }
 0x71d   : > { %10453 = vst.msk [vmem:[%s17212_s24 + $0xa8] sm:$0xff] %vm806_vm4, %v10421_v36  ;;  %v12700_v58 = vpop.f32.mrb[56].mxu0 }
 0x71e   : > { %v10378_v18 = vadd.f32 %v12700_v58, %v17205_v22  ;;  %v10369_v47 = vpop.f32.mrb[57].mxu0 }
 0x71f   : > { %v10370_v13 = vadd.f32 %v17205_v22, %v10369_v47  ;;  %v12701_v44 = vpop.f32.mrb[58].mxu0 }
 0x720   : > { %v10426_v50 = vmax.f32 %v10378_v18, 0.0  ;;  %v10381_v37 = vadd.f32 %v12701_v44, %v17205_v22  ;;  %v10372_v53 = vpop.f32.mrb[59].mxu0 }
 0x721   : > { %v10424_v28 = vmax.f32 %v10370_v13, 0.0  ;;  %v10373_v60 = vadd.f32 %v17205_v22, %v10372_v53 }
 0x722   : > { %10458 = vst.msk [vmem:[%s17212_s24 + $0xd0] sm:$0xff] %vm806_vm4, %v10426_v50  ;;  %v10427_v41 = vmax.f32 %v10381_v37, 0.0 }
 0x723   : > { %10456 = vst.msk [vmem:[%s17212_s24 + $0xc0] sm:$0xff] %vm806_vm4, %v10424_v28  ;;  %v10425_v29 = vmax.f32 %v10373_v60, 0.0 }
 0x724   : > { %10459 = vst.msk [vmem:[%s17212_s24 + $0xd8] sm:$0xff] %vm806_vm4, %v10427_v41 }
 0x725   : > { %10457 = vst.msk [vmem:[%s17212_s24 + $0xc8] sm:$0xff] %vm806_vm4, %v10425_v29  ;;  %v12704_v27 = vpop.f32.mrb[60].mxu0 }
 0x726   : > { %v10394_v21 = vadd.f32 %v12704_v27, %v17205_v22  ;;  %v10385_v54 = vpop.f32.mrb[61].mxu0 }
 0x727   : > { %v10386_v4 = vadd.f32 %v17205_v22, %v10385_v54  ;;  %v12705_v12 = vpop.f32.mrb[62].mxu0 }
 0x728   : > { %v10430_v1 = vmax.f32 %v10394_v21, 0.0  ;;  %v10397_v59 = vadd.f32 %v12705_v12, %v17205_v22  ;;  %v10388_v33 = vpop.f32.mrb[63].mxu0 }
 0x729   : > { %v10428_v20 = vmax.f32 %v10386_v4, 0.0  ;;  %v10389_v43 = vadd.f32 %v17205_v22, %v10388_v33 }
 0x72a   : > { %10462 = vst.msk [vmem:[%s17212_s24 + $0xf0] sm:$0xff] %vm806_vm4, %v10430_v1  ;;  %v10431_v39 = vmax.f32 %v10397_v59, 0.0 }
 0x72b   : > { %10460 = vst.msk [vmem:[%s17212_s24 + $0xe0] sm:$0xff] %vm806_vm4, %v10428_v20  ;;  %v10429_v3 = vmax.f32 %v10389_v43, 0.0 }
 0x72c   : > { %10463 = vst.msk [vmem:[%s17212_s24 + $0xf8] sm:$0xff] %vm806_vm4, %v10431_v39 }
 0x72d   : > { %10461 = vst.msk [vmem:[%s17212_s24 + $0xe8] sm:$0xff] %vm806_vm4, %v10429_v3 }
 0x72e PF: > { %s19_s27 = sadd.s32 1, %s13389_s27  }
 0x72f   : > { %p16_p4 = scmp.ge.s32.totalorder %s19_s27, 4  }
 0x731   :  { %18 = sbr.rel (!%p16_p4) target bundleno = 1 (0x1), region = 110 }

</bundles_post_ra>
